<compile_context>
chip_gen: v7x
topology: tpu7x:2x2x1
jax: 0.10.0
libtpu: 0.0.40
codegen_flags: <defaults>
</compile_context>

<pallas_src>
import functools

import jax
import jax.numpy as jnp
from jax.experimental import pallas as pl
from jax.experimental.pallas import tpu as pltpu

_BN_EPS = 1e-5
_MIB = 1024 * 1024


def _round_up(x, m):
    return ((x + m - 1) // m) * m


@functools.lru_cache(maxsize=None)
def _vmem_budget_bytes():
    """~75% of physical VMEM (queried when possible), clamped to [32, 96] MiB."""
    cap = 64 * _MIB
    try:
        info = pltpu.get_tpu_info()
        cap = int(getattr(info, "vmem_capacity_bytes", cap))
    except Exception:
        pass
    return max(32 * _MIB, min(int(cap * 0.75), 96 * _MIB))


# ---------------------------------------------------------------------------
# Kernel: single-K matmul (bf16 x bf16 -> f32) with fused epilogue + BN stats
# ---------------------------------------------------------------------------

def _matmul_fused(p, w, *, out_dtype=jnp.bfloat16, clamp01=False):
    """p: (B, M, K) bf16, w: (B, K, Nout) bf16 (Nout a multiple of 128).

    Returns:
      out   : (B, M, Nout) out_dtype  -- layer activation (lane-dense stores)
      stats : (B, MT, 8, Nout) f32    -- per-(batch, M-tile) BN partials for
              the *next* layer: row 0 = sum over the tile rows, row 1 = sum of
              squares (computed in f32 before the downcast), rows 2..7 = 0.

    Single K step (K always fits VMEM for this net) so there is no accumulator
    scratch or init/finalize branching.  Grid = (B, M tiles), both 'parallel'
    (megacore / 2-TC sharding on v7x).  Optional fused Hardtanh(0, 1).
    """
    b, m, k = p.shape
    nout = w.shape[2]
    out_bytes = jnp.dtype(out_dtype).itemsize

    mp = _round_up(m, 8)
    if mp != m:
        p = jnp.pad(p, ((0, 0), (0, mp - m), (0, 0)))

    budget = _vmem_budget_bytes()

    def footprint(tm):
        return (2 * tm * k * 2              # double-buffered patch block (bf16)
                + 2 * k * nout * 2          # double-buffered weight block (bf16)
                + 2 * tm * nout * out_bytes  # double-buffered output block
                + 2 * 8 * nout * 4)         # double-buffered stats block

    tm = 8
    for cand in (2048, 1024, 512, 256, 128, 64, 32, 16, 8):
        if mp % cand == 0 and footprint(cand) <= budget - 8 * _MIB:
            tm = cand
            break
    # keep >= 2 blocks across the parallel grid axes when possible (v7x: 2 TCs)
    while b * (mp // tm) < 2 and tm > 8:
        tm //= 2
    mt = mp // tm

    def kernel(p_ref, w_ref, o_ref, stat_ref):
        y = jnp.dot(p_ref[...], w_ref[...], preferred_element_type=jnp.float32)
        if clamp01:
            y = jnp.clip(y, 0.0, 1.0)
        ssum = jnp.sum(y, axis=0, keepdims=True)        # (1, nout) f32
        ssq = jnp.sum(y * y, axis=0, keepdims=True)     # (1, nout) f32
        row = jax.lax.broadcasted_iota(jnp.int32, (8, nout), 0)
        stat_ref[...] = jnp.where(row == 0, ssum,
                                  jnp.where(row == 1, ssq, 0.0))
        o_ref[...] = y.astype(o_ref.dtype)

    flops = 2 * b * mp * k * nout
    bytes_accessed = (p.size * 2 + w.size * 2 + b * mp * nout * out_bytes
                      + b * mt * 8 * nout * 4)

    out, stats = pl.pallas_call(
        kernel,
        out_shape=(jax.ShapeDtypeStruct((b, mp, nout), out_dtype),
                   jax.ShapeDtypeStruct((b, mt, 8, nout), jnp.float32)),
        grid_spec=pltpu.PrefetchScalarGridSpec(
            num_scalar_prefetch=0,
            grid=(b, mt),
            in_specs=[
                pl.BlockSpec((None, tm, k), lambda bb, i: (bb, i, 0)),
                pl.BlockSpec((None, k, nout), lambda bb, i: (bb, 0, 0)),
            ],
            out_specs=[
                pl.BlockSpec((None, tm, nout), lambda bb, i: (bb, i, 0)),
                pl.BlockSpec((None, None, 8, nout),
                             lambda bb, i: (bb, i, 0, 0)),
            ],
        ),
        compiler_params=pltpu.CompilerParams(
            dimension_semantics=("parallel", "parallel"),
            vmem_limit_bytes=budget,
        ),
        cost_estimate=pl.CostEstimate(flops=flops, transcendentals=0,
                                      bytes_accessed=bytes_accessed),
    )(p, w)
    if mp != m:
        out = out[:, :m, :]
    return out, stats


# ---------------------------------------------------------------------------
# BatchNorm(train)+ReLU apply, stats finishing, patch builders (layout glue)
# ---------------------------------------------------------------------------

def _bn_relu_apply(act, cin, ssum, ssq, count, gamma, beta):
    """Training-mode BN (biased batch stats from fused partial sums) + ReLU,
    returned as bf16.  `act` is (M, Cstore) with real channels in [:cin]."""
    mean = ssum / count
    var = jnp.maximum(ssq / count - mean * mean, 0.0)
    sc = gamma * jax.lax.rsqrt(var + _BN_EPS)
    sh = beta - mean * sc
    a = jnp.maximum(act[:, :cin].astype(jnp.float32) * sc + sh, 0.0)
    return a.astype(jnp.bfloat16)


def _finish_stats(stats, cout, group=1):
    """(B, MT, 8, Nout) partials -> per-channel (sum, sumsq), each (cout,).
    `group` > 1 when the lane axis packs (group, Cpad) (first block: 16=ky*kx)."""
    s = stats[:, :, 0, :].sum(axis=(0, 1))
    q = stats[:, :, 1, :].sum(axis=(0, 1))
    if group > 1:
        cpad = s.shape[0] // group
        s = s.reshape(group, cpad).sum(axis=0)
        q = q.reshape(group, cpad).sum(axis=0)
    return s[:cout], q[:cout]


def _im2col_3x3(a):
    """a: (N, H, W, C) -> (N*H*W, 9*C) 'same' 3x3 patches (tap-major)."""
    n, h, w, c = a.shape
    ap = jnp.pad(a, ((0, 0), (1, 1), (1, 1), (0, 0)))
    cols = [ap[:, dy:dy + h, dx:dx + w, :] for dy in range(3) for dx in range(3)]
    return jnp.stack(cols, axis=3).reshape(n * h * w, 9 * c)


def _phase_patches_2x2(a):
    """Sub-pixel decomposition of ConvT(4, s=2, p=1): 4 phase patch matrices,
    each the 2x2 patches of the 1-padded input. -> (4, N*H*W, 4*C)."""
    n, h, w, c = a.shape
    ap = jnp.pad(a, ((0, 0), (1, 1), (1, 1), (0, 0)))
    mats = []
    for ry in range(2):
        for rx in range(2):
            cols = [ap[:, ry + dy:ry + dy + h, rx + dx:rx + dx + w, :]
                    for dy in range(2) for dx in range(2)]
            mats.append(jnp.stack(cols, axis=3).reshape(n * h * w, 4 * c))
    return jnp.stack(mats, 0)


# ---------------------------------------------------------------------------
# Layer wrappers
# ---------------------------------------------------------------------------

def _first_block(x, prm):
    """BN(nz) -> ReLU -> ConvT(nz, Cout, 4, s=1, p=0) on a 1x1 input: a single
    (N, nz) @ (nz, 16*Cpad) matmul whose lane axis packs (ky, kx, c_out), so
    the result is already the channel-last (M=N*16, Cpad) activation."""
    n, nz = x.shape[0], x.shape[1]
    xf = x.reshape(n, nz).astype(jnp.float32)
    s_in = jnp.sum(xf, axis=0)
    q_in = jnp.sum(xf * xf, axis=0)
    a = _bn_relu_apply(xf, nz, s_in, q_in, n, prm["gamma"], prm["beta"])
    out, stats = _matmul_fused(a[None], prm["wm"][None])
    cout, cpad = prm["cout"], prm["cpad"]
    act = out[0].reshape(n * 16, cpad)
    s, q = _finish_stats(stats, cout, group=16)
    return act, s, q, n * 16, cout, 4, 4


def _block_3x3(act, cin, s_in, q_in, cnt, n, h, w, prm, *, clamp01=False):
    """BN -> ReLU -> ConvT(3x3, s=1, p=1) [-> Hardtanh(0,1)].  The dense-block
    2**(n_convs-2) output scale is pre-folded into prm['wm'] (exact)."""
    a = _bn_relu_apply(act, cin, s_in, q_in, cnt,
                       prm["gamma"], prm["beta"]).reshape(n, h, w, cin)
    patches = _im2col_3x3(a)                              # (M, 9*cin) bf16
    out, stats = _matmul_fused(patches[None], prm["wm"][None], clamp01=clamp01)
    s, q = _finish_stats(stats, prm["cout"])
    return out[0], s, q, n * h * w, prm["cout"]


def _transition_block(act, cin, s_in, q_in, cnt, n, h, w, prm):
    """BN -> ReLU -> ConvT(4x4, s=2, p=1) via 4-phase sub-pixel decomposition."""
    a = _bn_relu_apply(act, cin, s_in, q_in, cnt,
                       prm["gamma"], prm["beta"]).reshape(n, h, w, cin)
    patches = _phase_patches_2x2(a)                       # (4, M, 4*cin) bf16
    out, stats = _matmul_fused(patches, prm["wm"])        # (4, M, cpad) bf16
    cout, cpad = prm["cout"], prm["cpad"]
    # interleave phases: y[n, 2q+ry, 2p+rx, :] = out[2*ry+rx, (n, q, p), :]
    # (bf16 now -> half the bytes of the old f32 pass; fuses with the next
    #  layer's patch build under jit)
    o = out.reshape(2, 2, n, h, w, cpad).transpose(2, 3, 0, 4, 1, 5)
    o = o.reshape(n * 2 * h * 2 * w, cpad)
    s, q = _finish_stats(stats, cout)
    return o, s, q, n * 2 * h * 2 * w, cout, 2 * h, 2 * w


# ---------------------------------------------------------------------------
# Full decoder forward
# ---------------------------------------------------------------------------

def wasp_dense_decoder_forward(x, prep):
    """x: (N, nz, 1, 1) NCHW -> (N, nc, 64, 64) NCHW; forward semantics of
    waspDenseDecoder with training-mode BatchNorm batch statistics."""
    n = x.shape[0]
    act, s, q, cnt, cin, h, w = _first_block(x, prep["first"])
    for blk in prep["blocks"]:
        if blk["kind"] == "dense":
            act, s, q, cnt, cin = _block_3x3(act, cin, s, q, cnt, n, h, w, blk)
        else:
            act, s, q, cnt, cin, h, w = _transition_block(
                act, cin, s, q, cnt, n, h, w, blk)
    y, _, _, _, cout = _block_3x3(act, cin, s, q, cnt, n, h, w, prep["final"],
                                  clamp01=True)
    # module boundary only: drop padded channels, back to NCHW, f32.
    y = y[:, :cout].reshape(n, h, w, cout).transpose(0, 3, 1, 2)
    return y.astype(jnp.float32)


# ---------------------------------------------------------------------------
# Parameter construction (raw, PyTorch layout) + one-time matmul-ready prep
# ---------------------------------------------------------------------------

def init_raw_params(key, nz, nc, ngf):
    """Deterministic synthetic parameters in PyTorch layout (ConvTranspose2d
    weight is (C_in, C_out, kH, kW)).  Only parameters that influence the
    forward pass are created (DenseBlockDecoder.forward only applies layers[0];
    the i>0 entries are running sums -> a 2**(n_convs-2) scale)."""

    def conv_w(k_, cin, cout, ksz):
        return jax.random.normal(k_, (cin, cout, ksz, ksz), jnp.float32) * 0.05

    def bn_p(k_, c):
        kg, kb = jax.random.split(k_)
        return (1.0 + 0.1 * jax.random.normal(kg, (c,), jnp.float32),
                0.05 * jax.random.normal(kb, (c,), jnp.float32))

    keys = iter(jax.random.split(key, 32))

    g0, b0 = bn_p(next(keys), nz)
    first = dict(gamma=g0, beta=b0, w=conv_w(next(keys), nz, ngf * 8, 4))

    arch = [("dense", ngf * 8, ngf * 8, 16), ("trans", ngf * 8, ngf * 4, None),
            ("dense", ngf * 4, ngf * 4, 24), ("trans", ngf * 4, ngf * 2, None),
            ("dense", ngf * 2, ngf * 2, 12), ("trans", ngf * 2, ngf,     None),
            ("dense", ngf,     ngf,     6),  ("trans", ngf,     ngf,     None)]

    blocks = []
    for kind, cin, cout, n_convs in arch:
        g, b = bn_p(next(keys), cin)
        ksz = 3 if kind == "dense" else 4
        blocks.append(dict(kind=kind, gamma=g, beta=b, n_convs=n_convs,
                           w=conv_w(next(keys), cin, cout, ksz)))

    gf, bf = bn_p(next(keys), ngf)
    final = dict(gamma=gf, beta=bf, w=conv_w(next(keys), ngf, nc, 3))
    return dict(first=first, blocks=blocks, final=final)


def _prep_convt3x3(w, scale=1.0):
    """ConvT(Cin, Cout, 3, s=1, p=1) weight -> (9*Cin, Cpad) bf16 matrix of the
    equivalent stride-1 conv (spatially flipped), Cout zero-padded to 128k.
    The dense-block scale (an exact power of two) is folded in."""
    cin, cout = w.shape[0], w.shape[1]
    cpad = _round_up(cout, 128)
    wm = jnp.flip(w, (2, 3)).transpose(2, 3, 0, 1).reshape(9 * cin, cout)
    wm = jnp.pad(wm * scale, ((0, 0), (0, cpad - cout)))
    return wm.astype(jnp.bfloat16), cout, cpad


def _prep_convt4x4_s2(w):
    """ConvT(Cin, Cout, 4, s=2, p=1) -> per-phase (4, 4*Cin, Cpad) bf16 matrices:
    phase (ry, rx) taps kernel rows (3-ry, 1-ry) x cols (3-rx, 1-rx)."""
    cin, cout = w.shape[0], w.shape[1]
    cpad = _round_up(cout, 128)
    mats = []
    for ry in range(2):
        for rx in range(2):
            sub = w[:, :, (3 - ry, 1 - ry), :][:, :, :, (3 - rx, 1 - rx)]
            mats.append(sub.transpose(2, 3, 0, 1).reshape(4 * cin, cout))
    wm = jnp.pad(jnp.stack(mats, 0), ((0, 0), (0, 0), (0, cpad - cout)))
    return wm.astype(jnp.bfloat16), cout, cpad


def _prep_first(w):
    """ConvT(nz, Cout, 4, s=1, p=0) on a 1x1 input -> (nz, 16*Cpad) bf16 matrix
    with the lane axis packed as (ky, kx, c_out)."""
    nz, cout = w.shape[0], w.shape[1]
    cpad = _round_up(cout, 128)
    wm = jnp.pad(w, ((0, 0), (0, cpad - cout), (0, 0), (0, 0)))
    wm = wm.transpose(0, 2, 3, 1).reshape(nz, 16 * cpad)
    return wm.astype(jnp.bfloat16), cout, cpad


def prepare_params(raw):
    """One-time parameter prep: build all flipped / transposed / padded bf16
    matmul weight matrices (with the dense-block scale folded in) outside the
    per-call forward, so no per-forward XLA weight reshuffling remains."""
    fw, fc, fp = _prep_first(raw["first"]["w"])
    first = dict(gamma=raw["first"]["gamma"], beta=raw["first"]["beta"],
                 wm=fw, cout=fc, cpad=fp)
    blocks = []
    for blk in raw["blocks"]:
        if blk["kind"] == "dense":
            scale = float(2.0 ** (blk["n_convs"] - 2))
            wm, cout, cpad = _prep_convt3x3(blk["w"], scale)
        else:
            wm, cout, cpad = _prep_convt4x4_s2(blk["w"])
        blocks.append(dict(kind=blk["kind"], gamma=blk["gamma"],
                           beta=blk["beta"], wm=wm, cout=cout, cpad=cpad))
    lw, lc, lp = _prep_convt3x3(raw["final"]["w"])
    final = dict(gamma=raw["final"]["gamma"], beta=raw["final"]["beta"],
                 wm=lw, cout=lc, cpad=lp)
    return dict(first=first, blocks=blocks, final=final)


if __name__ == "__main__":
    # Small config consistent with the module (nz latent as a 1x1 map).
    N, NZ, NC, NGF = 2, 32, 1, 8

    key = jax.random.PRNGKey(0)
    key, kx = jax.random.split(key)
    x = jax.random.normal(kx, (N, NZ, 1, 1), jnp.float32)  # NCHW, like PyTorch

    raw = init_raw_params(key, NZ, NC, NGF)
    prep = prepare_params(raw)   # one-time weight-matrix prep (review item)

    fwd = jax.jit(lambda inp: wasp_dense_decoder_forward(inp, prep))
    out = jax.block_until_ready(fwd(x))

    expected = (N, NC, 64, 64)          # 1 -> 4 -> 8 -> 16 -> 32 -> 64 spatial
    assert out.shape == expected, (out.shape, expected)
    assert bool(jnp.all(jnp.isfinite(out)))
    assert bool(jnp.all((out >= 0.0) & (out <= 1.0)))  # Hardtanh(0, 1) range

    print("KERNEL_OK")
</pallas_src>

<mosaic_0001>
module attributes {stable_mosaic.version = 11 : i64} {
  func.func @kernel(%arg0: i32, %arg1: i32, %arg2: memref<1x8x32xbf16, #tpu.memory_space<vmem>>, %arg3: memref<1x32x2048xbf16, #tpu.memory_space<vmem>>, %arg4: memref<1x8x2048xbf16, #tpu.memory_space<vmem>>, %arg5: memref<1x1x8x2048xf32, #tpu.memory_space<vmem>>) attributes {dimension_semantics = [#tpu.dimension_semantics<parallel>, #tpu.dimension_semantics<parallel>], iteration_bounds = array<i64: 1, 1>, scalar_prefetch = 0 : i64, scratch_operands = 0 : i64, tpu.core_type = #tpu.core_type<tc>, window_params = [{transform_indices = @transform_0, window_bounds = array<i64: 1, 8, 32>}, {transform_indices = @transform_1, window_bounds = array<i64: 1, 32, 2048>}, {transform_indices = @transform_2, window_bounds = array<i64: 1, 8, 2048>}, {transform_indices = @transform_3, window_bounds = array<i64: 1, 1, 8, 2048>}]} {
    %c0 = arith.constant 0 : index
    %c0_0 = arith.constant 0 : index
    %c0_1 = arith.constant 0 : index
    %0 = vector.load %arg2[%c0, %c0_0, %c0_1] : memref<1x8x32xbf16, #tpu.memory_space<vmem>>, vector<1x8x32xbf16>
    %1 = vector.shape_cast %0 : vector<1x8x32xbf16> to vector<8x32xbf16>
    %c0_2 = arith.constant 0 : index
    %c0_3 = arith.constant 0 : index
    %c0_4 = arith.constant 0 : index
    %2 = vector.load %arg3[%c0_2, %c0_3, %c0_4] : memref<1x32x2048xbf16, #tpu.memory_space<vmem>>, vector<1x32x2048xbf16>
    %3 = vector.shape_cast %2 : vector<1x32x2048xbf16> to vector<32x2048xbf16>
    %cst = arith.constant dense<0.000000e+00> : vector<8x2048xf32>
    %4 = tpu.matmul %1, %3, %cst {dimension_numbers = #tpu.dot_dimension_numbers<[1], [0], [0], [1], [0, 0, 1, 1], [], []>} : vector<8x32xbf16>, vector<32x2048xbf16>, vector<8x2048xf32> -> vector<8x2048xf32>
    %cst_5 = arith.constant dense<0.000000e+00> : vector<2048xf32>
    %5 = vector.multi_reduction <add>, %4, %cst_5 [0] : vector<8x2048xf32> to vector<2048xf32>
    %6 = vector.shape_cast %5 : vector<2048xf32> to vector<1x2048xf32>
    %7 = arith.mulf %4, %4 : vector<8x2048xf32>
    %cst_6 = arith.constant dense<0.000000e+00> : vector<2048xf32>
    %8 = vector.multi_reduction <add>, %7, %cst_6 [0] : vector<8x2048xf32> to vector<2048xf32>
    %9 = vector.shape_cast %8 : vector<2048xf32> to vector<1x2048xf32>
    %10 = tpu.iota {dimensions = array<i32: 0>} : vector<8x2048xi32>
    %c0_i32 = arith.constant 0 : i32
    %11 = vector.broadcast %c0_i32 : i32 to vector<8x2048xi32>
    %12 = arith.cmpi eq, %10, %11 : vector<8x2048xi32>
    %c1_i32 = arith.constant 1 : i32
    %13 = vector.broadcast %c1_i32 : i32 to vector<8x2048xi32>
    %14 = arith.cmpi eq, %10, %13 : vector<8x2048xi32>
    %cst_7 = arith.constant 0.000000e+00 : f32
    %15 = vector.shape_cast %9 : vector<1x2048xf32> to vector<1x2048xf32>
    %16 = vector.broadcast %15 : vector<1x2048xf32> to vector<8x2048xf32>
    %17 = vector.broadcast %cst_7 : f32 to vector<8x2048xf32>
    %18 = arith.select %14, %16, %17 : vector<8x2048xi1>, vector<8x2048xf32>
    %19 = vector.shape_cast %6 : vector<1x2048xf32> to vector<1x2048xf32>
    %20 = vector.broadcast %19 : vector<1x2048xf32> to vector<8x2048xf32>
    %21 = arith.select %12, %20, %18 : vector<8x2048xi1>, vector<8x2048xf32>
    %c0_8 = arith.constant 0 : index
    %c0_9 = arith.constant 0 : index
    %c0_10 = arith.constant 0 : index
    %c0_11 = arith.constant 0 : index
    %22 = vector.load %arg5[%c0_8, %c0_9, %c0_10, %c0_11] : memref<1x1x8x2048xf32, #tpu.memory_space<vmem>>, vector<1x1x8x2048xf32>
    %23 = vector.shape_cast %22 : vector<1x1x8x2048xf32> to vector<8x2048xf32>
    %24 = vector.shape_cast %21 : vector<8x2048xf32> to vector<1x1x8x2048xf32>
    tpu.vector_store %arg5[%c0_8, %c0_9, %c0_10, %c0_11], %24 {strides = array<i32>} : memref<1x1x8x2048xf32, #tpu.memory_space<vmem>>, vector<1x1x8x2048xf32>,
    %25 = arith.truncf %4 : vector<8x2048xf32> to vector<8x2048xbf16>
    %c0_12 = arith.constant 0 : index
    %c0_13 = arith.constant 0 : index
    %c0_14 = arith.constant 0 : index
    %26 = vector.load %arg4[%c0_12, %c0_13, %c0_14] : memref<1x8x2048xbf16, #tpu.memory_space<vmem>>, vector<1x8x2048xbf16>
    %27 = vector.shape_cast %26 : vector<1x8x2048xbf16> to vector<8x2048xbf16>
    %28 = vector.shape_cast %25 : vector<8x2048xbf16> to vector<1x8x2048xbf16>
    tpu.vector_store %arg4[%c0_12, %c0_13, %c0_14], %28 {strides = array<i32>} : memref<1x8x2048xbf16, #tpu.memory_space<vmem>>, vector<1x8x2048xbf16>,
    return
  }
  func.func @transform_0(%arg0: i32, %arg1: i32) -> (i32, i32, i32) {
    %c0_i32 = arith.constant 0 : i32
    %c0_i32_0 = arith.constant 0 : i32
    return %arg0, %arg1, %c0_i32 : i32, i32, i32
  }
  func.func @transform_1(%arg0: i32, %arg1: i32) -> (i32, i32, i32) {
    %c0_i32 = arith.constant 0 : i32
    %c0_i32_0 = arith.constant 0 : i32
    %c0_i32_1 = arith.constant 0 : i32
    return %arg0, %c0_i32, %c0_i32_0 : i32, i32, i32
  }
  func.func @transform_2(%arg0: i32, %arg1: i32) -> (i32, i32, i32) {
    %c0_i32 = arith.constant 0 : i32
    %c0_i32_0 = arith.constant 0 : i32
    return %arg0, %arg1, %c0_i32 : i32, i32, i32
  }
  func.func @transform_3(%arg0: i32, %arg1: i32) -> (i32, i32, i32, i32) {
    %c0_i32 = arith.constant 0 : i32
    %c0_i32_0 = arith.constant 0 : i32
    %c0_i32_1 = arith.constant 0 : i32
    return %arg0, %arg1, %c0_i32, %c0_i32_0 : i32, i32, i32, i32
  }
}

module attributes {stable_mosaic.version = 11 : i64} {
  func.func @kernel(%arg0: i32, %arg1: i32, %arg2: memref<1x16x576xbf16, #tpu.memory_space<vmem>>, %arg3: memref<1x576x128xbf16, #tpu.memory_space<vmem>>, %arg4: memref<1x16x128xbf16, #tpu.memory_space<vmem>>, %arg5: memref<1x1x8x128xf32, #tpu.memory_space<vmem>>) attributes {dimension_semantics = [#tpu.dimension_semantics<parallel>, #tpu.dimension_semantics<parallel>], iteration_bounds = array<i64: 1, 2>, scalar_prefetch = 0 : i64, scratch_operands = 0 : i64, tpu.core_type = #tpu.core_type<tc>, window_params = [{transform_indices = @transform_0, window_bounds = array<i64: 1, 16, 576>}, {transform_indices = @transform_1, window_bounds = array<i64: 1, 576, 128>}, {transform_indices = @transform_2, window_bounds = array<i64: 1, 16, 128>}, {transform_indices = @transform_3, window_bounds = array<i64: 1, 1, 8, 128>}]} {
    %c0 = arith.constant 0 : index
    %c0_0 = arith.constant 0 : index
    %c0_1 = arith.constant 0 : index
    %0 = vector.load %arg2[%c0, %c0_0, %c0_1] : memref<1x16x576xbf16, #tpu.memory_space<vmem>>, vector<1x16x576xbf16>
    %1 = vector.shape_cast %0 : vector<1x16x576xbf16> to vector<16x576xbf16>
    %c0_2 = arith.constant 0 : index
    %c0_3 = arith.constant 0 : index
    %c0_4 = arith.constant 0 : index
    %2 = vector.load %arg3[%c0_2, %c0_3, %c0_4] : memref<1x576x128xbf16, #tpu.memory_space<vmem>>, vector<1x576x128xbf16>
    %3 = vector.shape_cast %2 : vector<1x576x128xbf16> to vector<576x128xbf16>
    %cst = arith.constant dense<0.000000e+00> : vector<16x128xf32>
    %4 = tpu.matmul %1, %3, %cst {dimension_numbers = #tpu.dot_dimension_numbers<[1], [0], [0], [1], [0, 0, 1, 1], [], []>} : vector<16x576xbf16>, vector<576x128xbf16>, vector<16x128xf32> -> vector<16x128xf32>
    %cst_5 = arith.constant dense<0.000000e+00> : vector<128xf32>
    %5 = vector.multi_reduction <add>, %4, %cst_5 [0] : vector<16x128xf32> to vector<128xf32>
    %6 = vector.shape_cast %5 : vector<128xf32> to vector<1x128xf32>
    %7 = arith.mulf %4, %4 : vector<16x128xf32>
    %cst_6 = arith.constant dense<0.000000e+00> : vector<128xf32>
    %8 = vector.multi_reduction <add>, %7, %cst_6 [0] : vector<16x128xf32> to vector<128xf32>
    %9 = vector.shape_cast %8 : vector<128xf32> to vector<1x128xf32>
    %10 = tpu.iota {dimensions = array<i32: 0>} : vector<8x128xi32>
    %c0_i32 = arith.constant 0 : i32
    %11 = vector.broadcast %c0_i32 : i32 to vector<8x128xi32>
    %12 = arith.cmpi eq, %10, %11 : vector<8x128xi32>
    %c1_i32 = arith.constant 1 : i32
    %13 = vector.broadcast %c1_i32 : i32 to vector<8x128xi32>
    %14 = arith.cmpi eq, %10, %13 : vector<8x128xi32>
    %cst_7 = arith.constant 0.000000e+00 : f32
    %15 = vector.shape_cast %9 : vector<1x128xf32> to vector<1x128xf32>
    %16 = vector.broadcast %15 : vector<1x128xf32> to vector<8x128xf32>
    %17 = vector.broadcast %cst_7 : f32 to vector<8x128xf32>
    %18 = arith.select %14, %16, %17 : vector<8x128xi1>, vector<8x128xf32>
    %19 = vector.shape_cast %6 : vector<1x128xf32> to vector<1x128xf32>
    %20 = vector.broadcast %19 : vector<1x128xf32> to vector<8x128xf32>
    %21 = arith.select %12, %20, %18 : vector<8x128xi1>, vector<8x128xf32>
    %c0_8 = arith.constant 0 : index
    %c0_9 = arith.constant 0 : index
    %c0_10 = arith.constant 0 : index
    %c0_11 = arith.constant 0 : index
    %22 = vector.load %arg5[%c0_8, %c0_9, %c0_10, %c0_11] : memref<1x1x8x128xf32, #tpu.memory_space<vmem>>, vector<1x1x8x128xf32>
    %23 = vector.shape_cast %22 : vector<1x1x8x128xf32> to vector<8x128xf32>
    %24 = vector.shape_cast %21 : vector<8x128xf32> to vector<1x1x8x128xf32>
    tpu.vector_store %arg5[%c0_8, %c0_9, %c0_10, %c0_11], %24 {strides = array<i32>} : memref<1x1x8x128xf32, #tpu.memory_space<vmem>>, vector<1x1x8x128xf32>,
    %25 = arith.truncf %4 : vector<16x128xf32> to vector<16x128xbf16>
    %c0_12 = arith.constant 0 : index
    %c0_13 = arith.constant 0 : index
    %c0_14 = arith.constant 0 : index
    %26 = vector.load %arg4[%c0_12, %c0_13, %c0_14] : memref<1x16x128xbf16, #tpu.memory_space<vmem>>, vector<1x16x128xbf16>
    %27 = vector.shape_cast %26 : vector<1x16x128xbf16> to vector<16x128xbf16>
    %28 = vector.shape_cast %25 : vector<16x128xbf16> to vector<1x16x128xbf16>
    tpu.vector_store %arg4[%c0_12, %c0_13, %c0_14], %28 {strides = array<i32>} : memref<1x16x128xbf16, #tpu.memory_space<vmem>>, vector<1x16x128xbf16>,
    return
  }
  func.func @transform_0(%arg0: i32, %arg1: i32) -> (i32, i32, i32) {
    %c0_i32 = arith.constant 0 : i32
    %c0_i32_0 = arith.constant 0 : i32
    return %arg0, %arg1, %c0_i32 : i32, i32, i32
  }
  func.func @transform_1(%arg0: i32, %arg1: i32) -> (i32, i32, i32) {
    %c0_i32 = arith.constant 0 : i32
    %c0_i32_0 = arith.constant 0 : i32
    %c0_i32_1 = arith.constant 0 : i32
    return %arg0, %c0_i32, %c0_i32_0 : i32, i32, i32
  }
  func.func @transform_2(%arg0: i32, %arg1: i32) -> (i32, i32, i32) {
    %c0_i32 = arith.constant 0 : i32
    %c0_i32_0 = arith.constant 0 : i32
    return %arg0, %arg1, %c0_i32 : i32, i32, i32
  }
  func.func @transform_3(%arg0: i32, %arg1: i32) -> (i32, i32, i32, i32) {
    %c0_i32 = arith.constant 0 : i32
    %c0_i32_0 = arith.constant 0 : i32
    %c0_i32_1 = arith.constant 0 : i32
    return %arg0, %arg1, %c0_i32, %c0_i32_0 : i32, i32, i32, i32
  }
}

module attributes {stable_mosaic.version = 11 : i64} {
  func.func @kernel(%arg0: i32, %arg1: i32, %arg2: memref<1x32x256xbf16, #tpu.memory_space<vmem>>, %arg3: memref<1x256x128xbf16, #tpu.memory_space<vmem>>, %arg4: memref<1x32x128xbf16, #tpu.memory_space<vmem>>, %arg5: memref<1x1x8x128xf32, #tpu.memory_space<vmem>>) attributes {dimension_semantics = [#tpu.dimension_semantics<parallel>, #tpu.dimension_semantics<parallel>], iteration_bounds = array<i64: 4, 1>, scalar_prefetch = 0 : i64, scratch_operands = 0 : i64, tpu.core_type = #tpu.core_type<tc>, window_params = [{transform_indices = @transform_0, window_bounds = array<i64: 1, 32, 256>}, {transform_indices = @transform_1, window_bounds = array<i64: 1, 256, 128>}, {transform_indices = @transform_2, window_bounds = array<i64: 1, 32, 128>}, {transform_indices = @transform_3, window_bounds = array<i64: 1, 1, 8, 128>}]} {
    %c0 = arith.constant 0 : index
    %c0_0 = arith.constant 0 : index
    %c0_1 = arith.constant 0 : index
    %0 = vector.load %arg2[%c0, %c0_0, %c0_1] : memref<1x32x256xbf16, #tpu.memory_space<vmem>>, vector<1x32x256xbf16>
    %1 = vector.shape_cast %0 : vector<1x32x256xbf16> to vector<32x256xbf16>
    %c0_2 = arith.constant 0 : index
    %c0_3 = arith.constant 0 : index
    %c0_4 = arith.constant 0 : index
    %2 = vector.load %arg3[%c0_2, %c0_3, %c0_4] : memref<1x256x128xbf16, #tpu.memory_space<vmem>>, vector<1x256x128xbf16>
    %3 = vector.shape_cast %2 : vector<1x256x128xbf16> to vector<256x128xbf16>
    %cst = arith.constant dense<0.000000e+00> : vector<32x128xf32>
    %4 = tpu.matmul %1, %3, %cst {dimension_numbers = #tpu.dot_dimension_numbers<[1], [0], [0], [1], [0, 0, 1, 1], [], []>} : vector<32x256xbf16>, vector<256x128xbf16>, vector<32x128xf32> -> vector<32x128xf32>
    %cst_5 = arith.constant dense<0.000000e+00> : vector<128xf32>
    %5 = vector.multi_reduction <add>, %4, %cst_5 [0] : vector<32x128xf32> to vector<128xf32>
    %6 = vector.shape_cast %5 : vector<128xf32> to vector<1x128xf32>
    %7 = arith.mulf %4, %4 : vector<32x128xf32>
    %cst_6 = arith.constant dense<0.000000e+00> : vector<128xf32>
    %8 = vector.multi_reduction <add>, %7, %cst_6 [0] : vector<32x128xf32> to vector<128xf32>
    %9 = vector.shape_cast %8 : vector<128xf32> to vector<1x128xf32>
    %10 = tpu.iota {dimensions = array<i32: 0>} : vector<8x128xi32>
    %c0_i32 = arith.constant 0 : i32
    %11 = vector.broadcast %c0_i32 : i32 to vector<8x128xi32>
    %12 = arith.cmpi eq, %10, %11 : vector<8x128xi32>
    %c1_i32 = arith.constant 1 : i32
    %13 = vector.broadcast %c1_i32 : i32 to vector<8x128xi32>
    %14 = arith.cmpi eq, %10, %13 : vector<8x128xi32>
    %cst_7 = arith.constant 0.000000e+00 : f32
    %15 = vector.shape_cast %9 : vector<1x128xf32> to vector<1x128xf32>
    %16 = vector.broadcast %15 : vector<1x128xf32> to vector<8x128xf32>
    %17 = vector.broadcast %cst_7 : f32 to vector<8x128xf32>
    %18 = arith.select %14, %16, %17 : vector<8x128xi1>, vector<8x128xf32>
    %19 = vector.shape_cast %6 : vector<1x128xf32> to vector<1x128xf32>
    %20 = vector.broadcast %19 : vector<1x128xf32> to vector<8x128xf32>
    %21 = arith.select %12, %20, %18 : vector<8x128xi1>, vector<8x128xf32>
    %c0_8 = arith.constant 0 : index
    %c0_9 = arith.constant 0 : index
    %c0_10 = arith.constant 0 : index
    %c0_11 = arith.constant 0 : index
    %22 = vector.load %arg5[%c0_8, %c0_9, %c0_10, %c0_11] : memref<1x1x8x128xf32, #tpu.memory_space<vmem>>, vector<1x1x8x128xf32>
    %23 = vector.shape_cast %22 : vector<1x1x8x128xf32> to vector<8x128xf32>
    %24 = vector.shape_cast %21 : vector<8x128xf32> to vector<1x1x8x128xf32>
    tpu.vector_store %arg5[%c0_8, %c0_9, %c0_10, %c0_11], %24 {strides = array<i32>} : memref<1x1x8x128xf32, #tpu.memory_space<vmem>>, vector<1x1x8x128xf32>,
    %25 = arith.truncf %4 : vector<32x128xf32> to vector<32x128xbf16>
    %c0_12 = arith.constant 0 : index
    %c0_13 = arith.constant 0 : index
    %c0_14 = arith.constant 0 : index
    %26 = vector.load %arg4[%c0_12, %c0_13, %c0_14] : memref<1x32x128xbf16, #tpu.memory_space<vmem>>, vector<1x32x128xbf16>
    %27 = vector.shape_cast %26 : vector<1x32x128xbf16> to vector<32x128xbf16>
    %28 = vector.shape_cast %25 : vector<32x128xbf16> to vector<1x32x128xbf16>
    tpu.vector_store %arg4[%c0_12, %c0_13, %c0_14], %28 {strides = array<i32>} : memref<1x32x128xbf16, #tpu.memory_space<vmem>>, vector<1x32x128xbf16>,
    return
  }
  func.func @transform_0(%arg0: i32, %arg1: i32) -> (i32, i32, i32) {
    %c0_i32 = arith.constant 0 : i32
    %c0_i32_0 = arith.constant 0 : i32
    return %arg0, %arg1, %c0_i32 : i32, i32, i32
  }
  func.func @transform_1(%arg0: i32, %arg1: i32) -> (i32, i32, i32) {
    %c0_i32 = arith.constant 0 : i32
    %c0_i32_0 = arith.constant 0 : i32
    %c0_i32_1 = arith.constant 0 : i32
    return %arg0, %c0_i32, %c0_i32_0 : i32, i32, i32
  }
  func.func @transform_2(%arg0: i32, %arg1: i32) -> (i32, i32, i32) {
    %c0_i32 = arith.constant 0 : i32
    %c0_i32_0 = arith.constant 0 : i32
    return %arg0, %arg1, %c0_i32 : i32, i32, i32
  }
  func.func @transform_3(%arg0: i32, %arg1: i32) -> (i32, i32, i32, i32) {
    %c0_i32 = arith.constant 0 : i32
    %c0_i32_0 = arith.constant 0 : i32
    %c0_i32_1 = arith.constant 0 : i32
    return %arg0, %arg1, %c0_i32, %c0_i32_0 : i32, i32, i32, i32
  }
}

module attributes {stable_mosaic.version = 11 : i64} {
  func.func @kernel(%arg0: i32, %arg1: i32, %arg2: memref<1x64x288xbf16, #tpu.memory_space<vmem>>, %arg3: memref<1x288x128xbf16, #tpu.memory_space<vmem>>, %arg4: memref<1x64x128xbf16, #tpu.memory_space<vmem>>, %arg5: memref<1x1x8x128xf32, #tpu.memory_space<vmem>>) attributes {dimension_semantics = [#tpu.dimension_semantics<parallel>, #tpu.dimension_semantics<parallel>], iteration_bounds = array<i64: 1, 2>, scalar_prefetch = 0 : i64, scratch_operands = 0 : i64, tpu.core_type = #tpu.core_type<tc>, window_params = [{transform_indices = @transform_0, window_bounds = array<i64: 1, 64, 288>}, {transform_indices = @transform_1, window_bounds = array<i64: 1, 288, 128>}, {transform_indices = @transform_2, window_bounds = array<i64: 1, 64, 128>}, {transform_indices = @transform_3, window_bounds = array<i64: 1, 1, 8, 128>}]} {
    %c0 = arith.constant 0 : index
    %c0_0 = arith.constant 0 : index
    %c0_1 = arith.constant 0 : index
    %0 = vector.load %arg2[%c0, %c0_0, %c0_1] : memref<1x64x288xbf16, #tpu.memory_space<vmem>>, vector<1x64x288xbf16>
    %1 = vector.shape_cast %0 : vector<1x64x288xbf16> to vector<64x288xbf16>
    %c0_2 = arith.constant 0 : index
    %c0_3 = arith.constant 0 : index
    %c0_4 = arith.constant 0 : index
    %2 = vector.load %arg3[%c0_2, %c0_3, %c0_4] : memref<1x288x128xbf16, #tpu.memory_space<vmem>>, vector<1x288x128xbf16>
    %3 = vector.shape_cast %2 : vector<1x288x128xbf16> to vector<288x128xbf16>
    %cst = arith.constant dense<0.000000e+00> : vector<64x128xf32>
    %4 = tpu.matmul %1, %3, %cst {dimension_numbers = #tpu.dot_dimension_numbers<[1], [0], [0], [1], [0, 0, 1, 1], [], []>} : vector<64x288xbf16>, vector<288x128xbf16>, vector<64x128xf32> -> vector<64x128xf32>
    %cst_5 = arith.constant dense<0.000000e+00> : vector<128xf32>
    %5 = vector.multi_reduction <add>, %4, %cst_5 [0] : vector<64x128xf32> to vector<128xf32>
    %6 = vector.shape_cast %5 : vector<128xf32> to vector<1x128xf32>
    %7 = arith.mulf %4, %4 : vector<64x128xf32>
    %cst_6 = arith.constant dense<0.000000e+00> : vector<128xf32>
    %8 = vector.multi_reduction <add>, %7, %cst_6 [0] : vector<64x128xf32> to vector<128xf32>
    %9 = vector.shape_cast %8 : vector<128xf32> to vector<1x128xf32>
    %10 = tpu.iota {dimensions = array<i32: 0>} : vector<8x128xi32>
    %c0_i32 = arith.constant 0 : i32
    %11 = vector.broadcast %c0_i32 : i32 to vector<8x128xi32>
    %12 = arith.cmpi eq, %10, %11 : vector<8x128xi32>
    %c1_i32 = arith.constant 1 : i32
    %13 = vector.broadcast %c1_i32 : i32 to vector<8x128xi32>
    %14 = arith.cmpi eq, %10, %13 : vector<8x128xi32>
    %cst_7 = arith.constant 0.000000e+00 : f32
    %15 = vector.shape_cast %9 : vector<1x128xf32> to vector<1x128xf32>
    %16 = vector.broadcast %15 : vector<1x128xf32> to vector<8x128xf32>
    %17 = vector.broadcast %cst_7 : f32 to vector<8x128xf32>
    %18 = arith.select %14, %16, %17 : vector<8x128xi1>, vector<8x128xf32>
    %19 = vector.shape_cast %6 : vector<1x128xf32> to vector<1x128xf32>
    %20 = vector.broadcast %19 : vector<1x128xf32> to vector<8x128xf32>
    %21 = arith.select %12, %20, %18 : vector<8x128xi1>, vector<8x128xf32>
    %c0_8 = arith.constant 0 : index
    %c0_9 = arith.constant 0 : index
    %c0_10 = arith.constant 0 : index
    %c0_11 = arith.constant 0 : index
    %22 = vector.load %arg5[%c0_8, %c0_9, %c0_10, %c0_11] : memref<1x1x8x128xf32, #tpu.memory_space<vmem>>, vector<1x1x8x128xf32>
    %23 = vector.shape_cast %22 : vector<1x1x8x128xf32> to vector<8x128xf32>
    %24 = vector.shape_cast %21 : vector<8x128xf32> to vector<1x1x8x128xf32>
    tpu.vector_store %arg5[%c0_8, %c0_9, %c0_10, %c0_11], %24 {strides = array<i32>} : memref<1x1x8x128xf32, #tpu.memory_space<vmem>>, vector<1x1x8x128xf32>,
    %25 = arith.truncf %4 : vector<64x128xf32> to vector<64x128xbf16>
    %c0_12 = arith.constant 0 : index
    %c0_13 = arith.constant 0 : index
    %c0_14 = arith.constant 0 : index
    %26 = vector.load %arg4[%c0_12, %c0_13, %c0_14] : memref<1x64x128xbf16, #tpu.memory_space<vmem>>, vector<1x64x128xbf16>
    %27 = vector.shape_cast %26 : vector<1x64x128xbf16> to vector<64x128xbf16>
    %28 = vector.shape_cast %25 : vector<64x128xbf16> to vector<1x64x128xbf16>
    tpu.vector_store %arg4[%c0_12, %c0_13, %c0_14], %28 {strides = array<i32>} : memref<1x64x128xbf16, #tpu.memory_space<vmem>>, vector<1x64x128xbf16>,
    return
  }
  func.func @transform_0(%arg0: i32, %arg1: i32) -> (i32, i32, i32) {
    %c0_i32 = arith.constant 0 : i32
    %c0_i32_0 = arith.constant 0 : i32
    return %arg0, %arg1, %c0_i32 : i32, i32, i32
  }
  func.func @transform_1(%arg0: i32, %arg1: i32) -> (i32, i32, i32) {
    %c0_i32 = arith.constant 0 : i32
    %c0_i32_0 = arith.constant 0 : i32
    %c0_i32_1 = arith.constant 0 : i32
    return %arg0, %c0_i32, %c0_i32_0 : i32, i32, i32
  }
  func.func @transform_2(%arg0: i32, %arg1: i32) -> (i32, i32, i32) {
    %c0_i32 = arith.constant 0 : i32
    %c0_i32_0 = arith.constant 0 : i32
    return %arg0, %arg1, %c0_i32 : i32, i32, i32
  }
  func.func @transform_3(%arg0: i32, %arg1: i32) -> (i32, i32, i32, i32) {
    %c0_i32 = arith.constant 0 : i32
    %c0_i32_0 = arith.constant 0 : i32
    %c0_i32_1 = arith.constant 0 : i32
    return %arg0, %arg1, %c0_i32, %c0_i32_0 : i32, i32, i32, i32
  }
}

module attributes {stable_mosaic.version = 11 : i64} {
  func.func @kernel(%arg0: i32, %arg1: i32, %arg2: memref<1x128x128xbf16, #tpu.memory_space<vmem>>, %arg3: memref<1x128x128xbf16, #tpu.memory_space<vmem>>, %arg4: memref<1x128x128xbf16, #tpu.memory_space<vmem>>, %arg5: memref<1x1x8x128xf32, #tpu.memory_space<vmem>>) attributes {dimension_semantics = [#tpu.dimension_semantics<parallel>, #tpu.dimension_semantics<parallel>], iteration_bounds = array<i64: 4, 1>, scalar_prefetch = 0 : i64, scratch_operands = 0 : i64, tpu.core_type = #tpu.core_type<tc>, window_params = [{transform_indices = @transform_0, window_bounds = array<i64: 1, 128, 128>}, {transform_indices = @transform_1, window_bounds = array<i64: 1, 128, 128>}, {transform_indices = @transform_2, window_bounds = array<i64: 1, 128, 128>}, {transform_indices = @transform_3, window_bounds = array<i64: 1, 1, 8, 128>}]} {
    %c0 = arith.constant 0 : index
    %c0_0 = arith.constant 0 : index
    %c0_1 = arith.constant 0 : index
    %0 = vector.load %arg2[%c0, %c0_0, %c0_1] : memref<1x128x128xbf16, #tpu.memory_space<vmem>>, vector<1x128x128xbf16>
    %1 = vector.shape_cast %0 : vector<1x128x128xbf16> to vector<128x128xbf16>
    %c0_2 = arith.constant 0 : index
    %c0_3 = arith.constant 0 : index
    %c0_4 = arith.constant 0 : index
    %2 = vector.load %arg3[%c0_2, %c0_3, %c0_4] : memref<1x128x128xbf16, #tpu.memory_space<vmem>>, vector<1x128x128xbf16>
    %3 = vector.shape_cast %2 : vector<1x128x128xbf16> to vector<128x128xbf16>
    %cst = arith.constant dense<0.000000e+00> : vector<128x128xf32>
    %4 = tpu.matmul %1, %3, %cst {dimension_numbers = #tpu.dot_dimension_numbers<[1], [0], [0], [1], [0, 0, 1, 1], [], []>} : vector<128x128xbf16>, vector<128x128xbf16>, vector<128x128xf32> -> vector<128x128xf32>
    %cst_5 = arith.constant dense<0.000000e+00> : vector<128xf32>
    %5 = vector.multi_reduction <add>, %4, %cst_5 [0] : vector<128x128xf32> to vector<128xf32>
    %6 = vector.shape_cast %5 : vector<128xf32> to vector<1x128xf32>
    %7 = arith.mulf %4, %4 : vector<128x128xf32>
    %cst_6 = arith.constant dense<0.000000e+00> : vector<128xf32>
    %8 = vector.multi_reduction <add>, %7, %cst_6 [0] : vector<128x128xf32> to vector<128xf32>
    %9 = vector.shape_cast %8 : vector<128xf32> to vector<1x128xf32>
    %10 = tpu.iota {dimensions = array<i32: 0>} : vector<8x128xi32>
    %c0_i32 = arith.constant 0 : i32
    %11 = vector.broadcast %c0_i32 : i32 to vector<8x128xi32>
    %12 = arith.cmpi eq, %10, %11 : vector<8x128xi32>
    %c1_i32 = arith.constant 1 : i32
    %13 = vector.broadcast %c1_i32 : i32 to vector<8x128xi32>
    %14 = arith.cmpi eq, %10, %13 : vector<8x128xi32>
    %cst_7 = arith.constant 0.000000e+00 : f32
    %15 = vector.shape_cast %9 : vector<1x128xf32> to vector<1x128xf32>
    %16 = vector.broadcast %15 : vector<1x128xf32> to vector<8x128xf32>
    %17 = vector.broadcast %cst_7 : f32 to vector<8x128xf32>
    %18 = arith.select %14, %16, %17 : vector<8x128xi1>, vector<8x128xf32>
    %19 = vector.shape_cast %6 : vector<1x128xf32> to vector<1x128xf32>
    %20 = vector.broadcast %19 : vector<1x128xf32> to vector<8x128xf32>
    %21 = arith.select %12, %20, %18 : vector<8x128xi1>, vector<8x128xf32>
    %c0_8 = arith.constant 0 : index
    %c0_9 = arith.constant 0 : index
    %c0_10 = arith.constant 0 : index
    %c0_11 = arith.constant 0 : index
    %22 = vector.load %arg5[%c0_8, %c0_9, %c0_10, %c0_11] : memref<1x1x8x128xf32, #tpu.memory_space<vmem>>, vector<1x1x8x128xf32>
    %23 = vector.shape_cast %22 : vector<1x1x8x128xf32> to vector<8x128xf32>
    %24 = vector.shape_cast %21 : vector<8x128xf32> to vector<1x1x8x128xf32>
    tpu.vector_store %arg5[%c0_8, %c0_9, %c0_10, %c0_11], %24 {strides = array<i32>} : memref<1x1x8x128xf32, #tpu.memory_space<vmem>>, vector<1x1x8x128xf32>,
    %25 = arith.truncf %4 : vector<128x128xf32> to vector<128x128xbf16>
    %c0_12 = arith.constant 0 : index
    %c0_13 = arith.constant 0 : index
    %c0_14 = arith.constant 0 : index
    %26 = vector.load %arg4[%c0_12, %c0_13, %c0_14] : memref<1x128x128xbf16, #tpu.memory_space<vmem>>, vector<1x128x128xbf16>
    %27 = vector.shape_cast %26 : vector<1x128x128xbf16> to vector<128x128xbf16>
    %28 = vector.shape_cast %25 : vector<128x128xbf16> to vector<1x128x128xbf16>
    tpu.vector_store %arg4[%c0_12, %c0_13, %c0_14], %28 {strides = array<i32>} : memref<1x128x128xbf16, #tpu.memory_space<vmem>>, vector<1x128x128xbf16>,
    return
  }
  func.func @transform_0(%arg0: i32, %arg1: i32) -> (i32, i32, i32) {
    %c0_i32 = arith.constant 0 : i32
    %c0_i32_0 = arith.constant 0 : i32
    return %arg0, %arg1, %c0_i32 : i32, i32, i32
  }
  func.func @transform_1(%arg0: i32, %arg1: i32) -> (i32, i32, i32) {
    %c0_i32 = arith.constant 0 : i32
    %c0_i32_0 = arith.constant 0 : i32
    %c0_i32_1 = arith.constant 0 : i32
    return %arg0, %c0_i32, %c0_i32_0 : i32, i32, i32
  }
  func.func @transform_2(%arg0: i32, %arg1: i32) -> (i32, i32, i32) {
    %c0_i32 = arith.constant 0 : i32
    %c0_i32_0 = arith.constant 0 : i32
    return %arg0, %arg1, %c0_i32 : i32, i32, i32
  }
  func.func @transform_3(%arg0: i32, %arg1: i32) -> (i32, i32, i32, i32) {
    %c0_i32 = arith.constant 0 : i32
    %c0_i32_0 = arith.constant 0 : i32
    %c0_i32_1 = arith.constant 0 : i32
    return %arg0, %arg1, %c0_i32, %c0_i32_0 : i32, i32, i32, i32
  }
}

module attributes {stable_mosaic.version = 11 : i64} {
  func.func @kernel(%arg0: i32, %arg1: i32, %arg2: memref<1x256x144xbf16, #tpu.memory_space<vmem>>, %arg3: memref<1x144x128xbf16, #tpu.memory_space<vmem>>, %arg4: memref<1x256x128xbf16, #tpu.memory_space<vmem>>, %arg5: memref<1x1x8x128xf32, #tpu.memory_space<vmem>>) attributes {dimension_semantics = [#tpu.dimension_semantics<parallel>, #tpu.dimension_semantics<parallel>], iteration_bounds = array<i64: 1, 2>, scalar_prefetch = 0 : i64, scratch_operands = 0 : i64, tpu.core_type = #tpu.core_type<tc>, window_params = [{transform_indices = @transform_0, window_bounds = array<i64: 1, 256, 144>}, {transform_indices = @transform_1, window_bounds = array<i64: 1, 144, 128>}, {transform_indices = @transform_2, window_bounds = array<i64: 1, 256, 128>}, {transform_indices = @transform_3, window_bounds = array<i64: 1, 1, 8, 128>}]} {
    %c0 = arith.constant 0 : index
    %c0_0 = arith.constant 0 : index
    %c0_1 = arith.constant 0 : index
    %0 = vector.load %arg2[%c0, %c0_0, %c0_1] : memref<1x256x144xbf16, #tpu.memory_space<vmem>>, vector<1x256x144xbf16>
    %1 = vector.shape_cast %0 : vector<1x256x144xbf16> to vector<256x144xbf16>
    %c0_2 = arith.constant 0 : index
    %c0_3 = arith.constant 0 : index
    %c0_4 = arith.constant 0 : index
    %2 = vector.load %arg3[%c0_2, %c0_3, %c0_4] : memref<1x144x128xbf16, #tpu.memory_space<vmem>>, vector<1x144x128xbf16>
    %3 = vector.shape_cast %2 : vector<1x144x128xbf16> to vector<144x128xbf16>
    %cst = arith.constant dense<0.000000e+00> : vector<256x128xf32>
    %4 = tpu.matmul %1, %3, %cst {dimension_numbers = #tpu.dot_dimension_numbers<[1], [0], [0], [1], [0, 0, 1, 1], [], []>} : vector<256x144xbf16>, vector<144x128xbf16>, vector<256x128xf32> -> vector<256x128xf32>
    %cst_5 = arith.constant dense<0.000000e+00> : vector<128xf32>
    %5 = vector.multi_reduction <add>, %4, %cst_5 [0] : vector<256x128xf32> to vector<128xf32>
    %6 = vector.shape_cast %5 : vector<128xf32> to vector<1x128xf32>
    %7 = arith.mulf %4, %4 : vector<256x128xf32>
    %cst_6 = arith.constant dense<0.000000e+00> : vector<128xf32>
    %8 = vector.multi_reduction <add>, %7, %cst_6 [0] : vector<256x128xf32> to vector<128xf32>
    %9 = vector.shape_cast %8 : vector<128xf32> to vector<1x128xf32>
    %10 = tpu.iota {dimensions = array<i32: 0>} : vector<8x128xi32>
    %c0_i32 = arith.constant 0 : i32
    %11 = vector.broadcast %c0_i32 : i32 to vector<8x128xi32>
    %12 = arith.cmpi eq, %10, %11 : vector<8x128xi32>
    %c1_i32 = arith.constant 1 : i32
    %13 = vector.broadcast %c1_i32 : i32 to vector<8x128xi32>
    %14 = arith.cmpi eq, %10, %13 : vector<8x128xi32>
    %cst_7 = arith.constant 0.000000e+00 : f32
    %15 = vector.shape_cast %9 : vector<1x128xf32> to vector<1x128xf32>
    %16 = vector.broadcast %15 : vector<1x128xf32> to vector<8x128xf32>
    %17 = vector.broadcast %cst_7 : f32 to vector<8x128xf32>
    %18 = arith.select %14, %16, %17 : vector<8x128xi1>, vector<8x128xf32>
    %19 = vector.shape_cast %6 : vector<1x128xf32> to vector<1x128xf32>
    %20 = vector.broadcast %19 : vector<1x128xf32> to vector<8x128xf32>
    %21 = arith.select %12, %20, %18 : vector<8x128xi1>, vector<8x128xf32>
    %c0_8 = arith.constant 0 : index
    %c0_9 = arith.constant 0 : index
    %c0_10 = arith.constant 0 : index
    %c0_11 = arith.constant 0 : index
    %22 = vector.load %arg5[%c0_8, %c0_9, %c0_10, %c0_11] : memref<1x1x8x128xf32, #tpu.memory_space<vmem>>, vector<1x1x8x128xf32>
    %23 = vector.shape_cast %22 : vector<1x1x8x128xf32> to vector<8x128xf32>
    %24 = vector.shape_cast %21 : vector<8x128xf32> to vector<1x1x8x128xf32>
    tpu.vector_store %arg5[%c0_8, %c0_9, %c0_10, %c0_11], %24 {strides = array<i32>} : memref<1x1x8x128xf32, #tpu.memory_space<vmem>>, vector<1x1x8x128xf32>,
    %25 = arith.truncf %4 : vector<256x128xf32> to vector<256x128xbf16>
    %c0_12 = arith.constant 0 : index
    %c0_13 = arith.constant 0 : index
    %c0_14 = arith.constant 0 : index
    %26 = vector.load %arg4[%c0_12, %c0_13, %c0_14] : memref<1x256x128xbf16, #tpu.memory_space<vmem>>, vector<1x256x128xbf16>
    %27 = vector.shape_cast %26 : vector<1x256x128xbf16> to vector<256x128xbf16>
    %28 = vector.shape_cast %25 : vector<256x128xbf16> to vector<1x256x128xbf16>
    tpu.vector_store %arg4[%c0_12, %c0_13, %c0_14], %28 {strides = array<i32>} : memref<1x256x128xbf16, #tpu.memory_space<vmem>>, vector<1x256x128xbf16>,
    return
  }
  func.func @transform_0(%arg0: i32, %arg1: i32) -> (i32, i32, i32) {
    %c0_i32 = arith.constant 0 : i32
    %c0_i32_0 = arith.constant 0 : i32
    return %arg0, %arg1, %c0_i32 : i32, i32, i32
  }
  func.func @transform_1(%arg0: i32, %arg1: i32) -> (i32, i32, i32) {
    %c0_i32 = arith.constant 0 : i32
    %c0_i32_0 = arith.constant 0 : i32
    %c0_i32_1 = arith.constant 0 : i32
    return %arg0, %c0_i32, %c0_i32_0 : i32, i32, i32
  }
  func.func @transform_2(%arg0: i32, %arg1: i32) -> (i32, i32, i32) {
    %c0_i32 = arith.constant 0 : i32
    %c0_i32_0 = arith.constant 0 : i32
    return %arg0, %arg1, %c0_i32 : i32, i32, i32
  }
  func.func @transform_3(%arg0: i32, %arg1: i32) -> (i32, i32, i32, i32) {
    %c0_i32 = arith.constant 0 : i32
    %c0_i32_0 = arith.constant 0 : i32
    %c0_i32_1 = arith.constant 0 : i32
    return %arg0, %arg1, %c0_i32, %c0_i32_0 : i32, i32, i32, i32
  }
}

module attributes {stable_mosaic.version = 11 : i64} {
  func.func @kernel(%arg0: i32, %arg1: i32, %arg2: memref<1x512x64xbf16, #tpu.memory_space<vmem>>, %arg3: memref<1x64x128xbf16, #tpu.memory_space<vmem>>, %arg4: memref<1x512x128xbf16, #tpu.memory_space<vmem>>, %arg5: memref<1x1x8x128xf32, #tpu.memory_space<vmem>>) attributes {dimension_semantics = [#tpu.dimension_semantics<parallel>, #tpu.dimension_semantics<parallel>], iteration_bounds = array<i64: 4, 1>, scalar_prefetch = 0 : i64, scratch_operands = 0 : i64, tpu.core_type = #tpu.core_type<tc>, window_params = [{transform_indices = @transform_0, window_bounds = array<i64: 1, 512, 64>}, {transform_indices = @transform_1, window_bounds = array<i64: 1, 64, 128>}, {transform_indices = @transform_2, window_bounds = array<i64: 1, 512, 128>}, {transform_indices = @transform_3, window_bounds = array<i64: 1, 1, 8, 128>}]} {
    %c0 = arith.constant 0 : index
    %c0_0 = arith.constant 0 : index
    %c0_1 = arith.constant 0 : index
    %0 = vector.load %arg2[%c0, %c0_0, %c0_1] : memref<1x512x64xbf16, #tpu.memory_space<vmem>>, vector<1x512x64xbf16>
    %1 = vector.shape_cast %0 : vector<1x512x64xbf16> to vector<512x64xbf16>
    %c0_2 = arith.constant 0 : index
    %c0_3 = arith.constant 0 : index
    %c0_4 = arith.constant 0 : index
    %2 = vector.load %arg3[%c0_2, %c0_3, %c0_4] : memref<1x64x128xbf16, #tpu.memory_space<vmem>>, vector<1x64x128xbf16>
    %3 = vector.shape_cast %2 : vector<1x64x128xbf16> to vector<64x128xbf16>
    %cst = arith.constant dense<0.000000e+00> : vector<512x128xf32>
    %4 = tpu.matmul %1, %3, %cst {dimension_numbers = #tpu.dot_dimension_numbers<[1], [0], [0], [1], [0, 0, 1, 1], [], []>} : vector<512x64xbf16>, vector<64x128xbf16>, vector<512x128xf32> -> vector<512x128xf32>
    %cst_5 = arith.constant dense<0.000000e+00> : vector<128xf32>
    %5 = vector.multi_reduction <add>, %4, %cst_5 [0] : vector<512x128xf32> to vector<128xf32>
    %6 = vector.shape_cast %5 : vector<128xf32> to vector<1x128xf32>
    %7 = arith.mulf %4, %4 : vector<512x128xf32>
    %cst_6 = arith.constant dense<0.000000e+00> : vector<128xf32>
    %8 = vector.multi_reduction <add>, %7, %cst_6 [0] : vector<512x128xf32> to vector<128xf32>
    %9 = vector.shape_cast %8 : vector<128xf32> to vector<1x128xf32>
    %10 = tpu.iota {dimensions = array<i32: 0>} : vector<8x128xi32>
    %c0_i32 = arith.constant 0 : i32
    %11 = vector.broadcast %c0_i32 : i32 to vector<8x128xi32>
    %12 = arith.cmpi eq, %10, %11 : vector<8x128xi32>
    %c1_i32 = arith.constant 1 : i32
    %13 = vector.broadcast %c1_i32 : i32 to vector<8x128xi32>
    %14 = arith.cmpi eq, %10, %13 : vector<8x128xi32>
    %cst_7 = arith.constant 0.000000e+00 : f32
    %15 = vector.shape_cast %9 : vector<1x128xf32> to vector<1x128xf32>
    %16 = vector.broadcast %15 : vector<1x128xf32> to vector<8x128xf32>
    %17 = vector.broadcast %cst_7 : f32 to vector<8x128xf32>
    %18 = arith.select %14, %16, %17 : vector<8x128xi1>, vector<8x128xf32>
    %19 = vector.shape_cast %6 : vector<1x128xf32> to vector<1x128xf32>
    %20 = vector.broadcast %19 : vector<1x128xf32> to vector<8x128xf32>
    %21 = arith.select %12, %20, %18 : vector<8x128xi1>, vector<8x128xf32>
    %c0_8 = arith.constant 0 : index
    %c0_9 = arith.constant 0 : index
    %c0_10 = arith.constant 0 : index
    %c0_11 = arith.constant 0 : index
    %22 = vector.load %arg5[%c0_8, %c0_9, %c0_10, %c0_11] : memref<1x1x8x128xf32, #tpu.memory_space<vmem>>, vector<1x1x8x128xf32>
    %23 = vector.shape_cast %22 : vector<1x1x8x128xf32> to vector<8x128xf32>
    %24 = vector.shape_cast %21 : vector<8x128xf32> to vector<1x1x8x128xf32>
    tpu.vector_store %arg5[%c0_8, %c0_9, %c0_10, %c0_11], %24 {strides = array<i32>} : memref<1x1x8x128xf32, #tpu.memory_space<vmem>>, vector<1x1x8x128xf32>,
    %25 = arith.truncf %4 : vector<512x128xf32> to vector<512x128xbf16>
    %c0_12 = arith.constant 0 : index
    %c0_13 = arith.constant 0 : index
    %c0_14 = arith.constant 0 : index
    %26 = vector.load %arg4[%c0_12, %c0_13, %c0_14] : memref<1x512x128xbf16, #tpu.memory_space<vmem>>, vector<1x512x128xbf16>
    %27 = vector.shape_cast %26 : vector<1x512x128xbf16> to vector<512x128xbf16>
    %28 = vector.shape_cast %25 : vector<512x128xbf16> to vector<1x512x128xbf16>
    tpu.vector_store %arg4[%c0_12, %c0_13, %c0_14], %28 {strides = array<i32>} : memref<1x512x128xbf16, #tpu.memory_space<vmem>>, vector<1x512x128xbf16>,
    return
  }
  func.func @transform_0(%arg0: i32, %arg1: i32) -> (i32, i32, i32) {
    %c0_i32 = arith.constant 0 : i32
    %c0_i32_0 = arith.constant 0 : i32
    return %arg0, %arg1, %c0_i32 : i32, i32, i32
  }
  func.func @transform_1(%arg0: i32, %arg1: i32) -> (i32, i32, i32) {
    %c0_i32 = arith.constant 0 : i32
    %c0_i32_0 = arith.constant 0 : i32
    %c0_i32_1 = arith.constant 0 : i32
    return %arg0, %c0_i32, %c0_i32_0 : i32, i32, i32
  }
  func.func @transform_2(%arg0: i32, %arg1: i32) -> (i32, i32, i32) {
    %c0_i32 = arith.constant 0 : i32
    %c0_i32_0 = arith.constant 0 : i32
    return %arg0, %arg1, %c0_i32 : i32, i32, i32
  }
  func.func @transform_3(%arg0: i32, %arg1: i32) -> (i32, i32, i32, i32) {
    %c0_i32 = arith.constant 0 : i32
    %c0_i32_0 = arith.constant 0 : i32
    %c0_i32_1 = arith.constant 0 : i32
    return %arg0, %arg1, %c0_i32, %c0_i32_0 : i32, i32, i32, i32
  }
}

module attributes {stable_mosaic.version = 11 : i64} {
  func.func @kernel(%arg0: i32, %arg1: i32, %arg2: memref<1x1024x72xbf16, #tpu.memory_space<vmem>>, %arg3: memref<1x72x128xbf16, #tpu.memory_space<vmem>>, %arg4: memref<1x1024x128xbf16, #tpu.memory_space<vmem>>, %arg5: memref<1x1x8x128xf32, #tpu.memory_space<vmem>>) attributes {dimension_semantics = [#tpu.dimension_semantics<parallel>, #tpu.dimension_semantics<parallel>], iteration_bounds = array<i64: 1, 2>, scalar_prefetch = 0 : i64, scratch_operands = 0 : i64, tpu.core_type = #tpu.core_type<tc>, window_params = [{transform_indices = @transform_0, window_bounds = array<i64: 1, 1024, 72>}, {transform_indices = @transform_1, window_bounds = array<i64: 1, 72, 128>}, {transform_indices = @transform_2, window_bounds = array<i64: 1, 1024, 128>}, {transform_indices = @transform_3, window_bounds = array<i64: 1, 1, 8, 128>}]} {
    %c0 = arith.constant 0 : index
    %c0_0 = arith.constant 0 : index
    %c0_1 = arith.constant 0 : index
    %0 = vector.load %arg2[%c0, %c0_0, %c0_1] : memref<1x1024x72xbf16, #tpu.memory_space<vmem>>, vector<1x1024x72xbf16>
    %1 = vector.shape_cast %0 : vector<1x1024x72xbf16> to vector<1024x72xbf16>
    %c0_2 = arith.constant 0 : index
    %c0_3 = arith.constant 0 : index
    %c0_4 = arith.constant 0 : index
    %2 = vector.load %arg3[%c0_2, %c0_3, %c0_4] : memref<1x72x128xbf16, #tpu.memory_space<vmem>>, vector<1x72x128xbf16>
    %3 = vector.shape_cast %2 : vector<1x72x128xbf16> to vector<72x128xbf16>
    %cst = arith.constant dense<0.000000e+00> : vector<1024x128xf32>
    %4 = tpu.matmul %1, %3, %cst {dimension_numbers = #tpu.dot_dimension_numbers<[1], [0], [0], [1], [0, 0, 1, 1], [], []>} : vector<1024x72xbf16>, vector<72x128xbf16>, vector<1024x128xf32> -> vector<1024x128xf32>
    %cst_5 = arith.constant dense<0.000000e+00> : vector<128xf32>
    %5 = vector.multi_reduction <add>, %4, %cst_5 [0] : vector<1024x128xf32> to vector<128xf32>
    %6 = vector.shape_cast %5 : vector<128xf32> to vector<1x128xf32>
    %7 = arith.mulf %4, %4 : vector<1024x128xf32>
    %cst_6 = arith.constant dense<0.000000e+00> : vector<128xf32>
    %8 = vector.multi_reduction <add>, %7, %cst_6 [0] : vector<1024x128xf32> to vector<128xf32>
    %9 = vector.shape_cast %8 : vector<128xf32> to vector<1x128xf32>
    %10 = tpu.iota {dimensions = array<i32: 0>} : vector<8x128xi32>
    %c0_i32 = arith.constant 0 : i32
    %11 = vector.broadcast %c0_i32 : i32 to vector<8x128xi32>
    %12 = arith.cmpi eq, %10, %11 : vector<8x128xi32>
    %c1_i32 = arith.constant 1 : i32
    %13 = vector.broadcast %c1_i32 : i32 to vector<8x128xi32>
    %14 = arith.cmpi eq, %10, %13 : vector<8x128xi32>
    %cst_7 = arith.constant 0.000000e+00 : f32
    %15 = vector.shape_cast %9 : vector<1x128xf32> to vector<1x128xf32>
    %16 = vector.broadcast %15 : vector<1x128xf32> to vector<8x128xf32>
    %17 = vector.broadcast %cst_7 : f32 to vector<8x128xf32>
    %18 = arith.select %14, %16, %17 : vector<8x128xi1>, vector<8x128xf32>
    %19 = vector.shape_cast %6 : vector<1x128xf32> to vector<1x128xf32>
    %20 = vector.broadcast %19 : vector<1x128xf32> to vector<8x128xf32>
    %21 = arith.select %12, %20, %18 : vector<8x128xi1>, vector<8x128xf32>
    %c0_8 = arith.constant 0 : index
    %c0_9 = arith.constant 0 : index
    %c0_10 = arith.constant 0 : index
    %c0_11 = arith.constant 0 : index
    %22 = vector.load %arg5[%c0_8, %c0_9, %c0_10, %c0_11] : memref<1x1x8x128xf32, #tpu.memory_space<vmem>>, vector<1x1x8x128xf32>
    %23 = vector.shape_cast %22 : vector<1x1x8x128xf32> to vector<8x128xf32>
    %24 = vector.shape_cast %21 : vector<8x128xf32> to vector<1x1x8x128xf32>
    tpu.vector_store %arg5[%c0_8, %c0_9, %c0_10, %c0_11], %24 {strides = array<i32>} : memref<1x1x8x128xf32, #tpu.memory_space<vmem>>, vector<1x1x8x128xf32>,
    %25 = arith.truncf %4 : vector<1024x128xf32> to vector<1024x128xbf16>
    %c0_12 = arith.constant 0 : index
    %c0_13 = arith.constant 0 : index
    %c0_14 = arith.constant 0 : index
    %26 = vector.load %arg4[%c0_12, %c0_13, %c0_14] : memref<1x1024x128xbf16, #tpu.memory_space<vmem>>, vector<1x1024x128xbf16>
    %27 = vector.shape_cast %26 : vector<1x1024x128xbf16> to vector<1024x128xbf16>
    %28 = vector.shape_cast %25 : vector<1024x128xbf16> to vector<1x1024x128xbf16>
    tpu.vector_store %arg4[%c0_12, %c0_13, %c0_14], %28 {strides = array<i32>} : memref<1x1024x128xbf16, #tpu.memory_space<vmem>>, vector<1x1024x128xbf16>,
    return
  }
  func.func @transform_0(%arg0: i32, %arg1: i32) -> (i32, i32, i32) {
    %c0_i32 = arith.constant 0 : i32
    %c0_i32_0 = arith.constant 0 : i32
    return %arg0, %arg1, %c0_i32 : i32, i32, i32
  }
  func.func @transform_1(%arg0: i32, %arg1: i32) -> (i32, i32, i32) {
    %c0_i32 = arith.constant 0 : i32
    %c0_i32_0 = arith.constant 0 : i32
    %c0_i32_1 = arith.constant 0 : i32
    return %arg0, %c0_i32, %c0_i32_0 : i32, i32, i32
  }
  func.func @transform_2(%arg0: i32, %arg1: i32) -> (i32, i32, i32) {
    %c0_i32 = arith.constant 0 : i32
    %c0_i32_0 = arith.constant 0 : i32
    return %arg0, %arg1, %c0_i32 : i32, i32, i32
  }
  func.func @transform_3(%arg0: i32, %arg1: i32) -> (i32, i32, i32, i32) {
    %c0_i32 = arith.constant 0 : i32
    %c0_i32_0 = arith.constant 0 : i32
    %c0_i32_1 = arith.constant 0 : i32
    return %arg0, %arg1, %c0_i32, %c0_i32_0 : i32, i32, i32, i32
  }
}

module attributes {stable_mosaic.version = 11 : i64} {
  func.func @kernel(%arg0: i32, %arg1: i32, %arg2: memref<1x2048x32xbf16, #tpu.memory_space<vmem>>, %arg3: memref<1x32x128xbf16, #tpu.memory_space<vmem>>, %arg4: memref<1x2048x128xbf16, #tpu.memory_space<vmem>>, %arg5: memref<1x1x8x128xf32, #tpu.memory_space<vmem>>) attributes {dimension_semantics = [#tpu.dimension_semantics<parallel>, #tpu.dimension_semantics<parallel>], iteration_bounds = array<i64: 4, 1>, scalar_prefetch = 0 : i64, scratch_operands = 0 : i64, tpu.core_type = #tpu.core_type<tc>, window_params = [{transform_indices = @transform_0, window_bounds = array<i64: 1, 2048, 32>}, {transform_indices = @transform_1, window_bounds = array<i64: 1, 32, 128>}, {transform_indices = @transform_2, window_bounds = array<i64: 1, 2048, 128>}, {transform_indices = @transform_3, window_bounds = array<i64: 1, 1, 8, 128>}]} {
    %c0 = arith.constant 0 : index
    %c0_0 = arith.constant 0 : index
    %c0_1 = arith.constant 0 : index
    %0 = vector.load %arg2[%c0, %c0_0, %c0_1] : memref<1x2048x32xbf16, #tpu.memory_space<vmem>>, vector<1x2048x32xbf16>
    %1 = vector.shape_cast %0 : vector<1x2048x32xbf16> to vector<2048x32xbf16>
    %c0_2 = arith.constant 0 : index
    %c0_3 = arith.constant 0 : index
    %c0_4 = arith.constant 0 : index
    %2 = vector.load %arg3[%c0_2, %c0_3, %c0_4] : memref<1x32x128xbf16, #tpu.memory_space<vmem>>, vector<1x32x128xbf16>
    %3 = vector.shape_cast %2 : vector<1x32x128xbf16> to vector<32x128xbf16>
    %cst = arith.constant dense<0.000000e+00> : vector<2048x128xf32>
    %4 = tpu.matmul %1, %3, %cst {dimension_numbers = #tpu.dot_dimension_numbers<[1], [0], [0], [1], [0, 0, 1, 1], [], []>} : vector<2048x32xbf16>, vector<32x128xbf16>, vector<2048x128xf32> -> vector<2048x128xf32>
    %cst_5 = arith.constant dense<0.000000e+00> : vector<128xf32>
    %5 = vector.multi_reduction <add>, %4, %cst_5 [0] : vector<2048x128xf32> to vector<128xf32>
    %6 = vector.shape_cast %5 : vector<128xf32> to vector<1x128xf32>
    %7 = arith.mulf %4, %4 : vector<2048x128xf32>
    %cst_6 = arith.constant dense<0.000000e+00> : vector<128xf32>
    %8 = vector.multi_reduction <add>, %7, %cst_6 [0] : vector<2048x128xf32> to vector<128xf32>
    %9 = vector.shape_cast %8 : vector<128xf32> to vector<1x128xf32>
    %10 = tpu.iota {dimensions = array<i32: 0>} : vector<8x128xi32>
    %c0_i32 = arith.constant 0 : i32
    %11 = vector.broadcast %c0_i32 : i32 to vector<8x128xi32>
    %12 = arith.cmpi eq, %10, %11 : vector<8x128xi32>
    %c1_i32 = arith.constant 1 : i32
    %13 = vector.broadcast %c1_i32 : i32 to vector<8x128xi32>
    %14 = arith.cmpi eq, %10, %13 : vector<8x128xi32>
    %cst_7 = arith.constant 0.000000e+00 : f32
    %15 = vector.shape_cast %9 : vector<1x128xf32> to vector<1x128xf32>
    %16 = vector.broadcast %15 : vector<1x128xf32> to vector<8x128xf32>
    %17 = vector.broadcast %cst_7 : f32 to vector<8x128xf32>
    %18 = arith.select %14, %16, %17 : vector<8x128xi1>, vector<8x128xf32>
    %19 = vector.shape_cast %6 : vector<1x128xf32> to vector<1x128xf32>
    %20 = vector.broadcast %19 : vector<1x128xf32> to vector<8x128xf32>
    %21 = arith.select %12, %20, %18 : vector<8x128xi1>, vector<8x128xf32>
    %c0_8 = arith.constant 0 : index
    %c0_9 = arith.constant 0 : index
    %c0_10 = arith.constant 0 : index
    %c0_11 = arith.constant 0 : index
    %22 = vector.load %arg5[%c0_8, %c0_9, %c0_10, %c0_11] : memref<1x1x8x128xf32, #tpu.memory_space<vmem>>, vector<1x1x8x128xf32>
    %23 = vector.shape_cast %22 : vector<1x1x8x128xf32> to vector<8x128xf32>
    %24 = vector.shape_cast %21 : vector<8x128xf32> to vector<1x1x8x128xf32>
    tpu.vector_store %arg5[%c0_8, %c0_9, %c0_10, %c0_11], %24 {strides = array<i32>} : memref<1x1x8x128xf32, #tpu.memory_space<vmem>>, vector<1x1x8x128xf32>,
    %25 = arith.truncf %4 : vector<2048x128xf32> to vector<2048x128xbf16>
    %c0_12 = arith.constant 0 : index
    %c0_13 = arith.constant 0 : index
    %c0_14 = arith.constant 0 : index
    %26 = vector.load %arg4[%c0_12, %c0_13, %c0_14] : memref<1x2048x128xbf16, #tpu.memory_space<vmem>>, vector<1x2048x128xbf16>
    %27 = vector.shape_cast %26 : vector<1x2048x128xbf16> to vector<2048x128xbf16>
    %28 = vector.shape_cast %25 : vector<2048x128xbf16> to vector<1x2048x128xbf16>
    tpu.vector_store %arg4[%c0_12, %c0_13, %c0_14], %28 {strides = array<i32>} : memref<1x2048x128xbf16, #tpu.memory_space<vmem>>, vector<1x2048x128xbf16>,
    return
  }
  func.func @transform_0(%arg0: i32, %arg1: i32) -> (i32, i32, i32) {
    %c0_i32 = arith.constant 0 : i32
    %c0_i32_0 = arith.constant 0 : i32
    return %arg0, %arg1, %c0_i32 : i32, i32, i32
  }
  func.func @transform_1(%arg0: i32, %arg1: i32) -> (i32, i32, i32) {
    %c0_i32 = arith.constant 0 : i32
    %c0_i32_0 = arith.constant 0 : i32
    %c0_i32_1 = arith.constant 0 : i32
    return %arg0, %c0_i32, %c0_i32_0 : i32, i32, i32
  }
  func.func @transform_2(%arg0: i32, %arg1: i32) -> (i32, i32, i32) {
    %c0_i32 = arith.constant 0 : i32
    %c0_i32_0 = arith.constant 0 : i32
    return %arg0, %arg1, %c0_i32 : i32, i32, i32
  }
  func.func @transform_3(%arg0: i32, %arg1: i32) -> (i32, i32, i32, i32) {
    %c0_i32 = arith.constant 0 : i32
    %c0_i32_0 = arith.constant 0 : i32
    %c0_i32_1 = arith.constant 0 : i32
    return %arg0, %arg1, %c0_i32, %c0_i32_0 : i32, i32, i32, i32
  }
}

module attributes {stable_mosaic.version = 11 : i64} {
  func.func @kernel(%arg0: i32, %arg1: i32, %arg2: memref<1x2048x72xbf16, #tpu.memory_space<vmem>>, %arg3: memref<1x72x128xbf16, #tpu.memory_space<vmem>>, %arg4: memref<1x2048x128xbf16, #tpu.memory_space<vmem>>, %arg5: memref<1x1x8x128xf32, #tpu.memory_space<vmem>>) attributes {dimension_semantics = [#tpu.dimension_semantics<parallel>, #tpu.dimension_semantics<parallel>], iteration_bounds = array<i64: 1, 4>, scalar_prefetch = 0 : i64, scratch_operands = 0 : i64, tpu.core_type = #tpu.core_type<tc>, window_params = [{transform_indices = @transform_0, window_bounds = array<i64: 1, 2048, 72>}, {transform_indices = @transform_1, window_bounds = array<i64: 1, 72, 128>}, {transform_indices = @transform_2, window_bounds = array<i64: 1, 2048, 128>}, {transform_indices = @transform_3, window_bounds = array<i64: 1, 1, 8, 128>}]} {
    %c0 = arith.constant 0 : index
    %c0_0 = arith.constant 0 : index
    %c0_1 = arith.constant 0 : index
    %0 = vector.load %arg2[%c0, %c0_0, %c0_1] : memref<1x2048x72xbf16, #tpu.memory_space<vmem>>, vector<1x2048x72xbf16>
    %1 = vector.shape_cast %0 : vector<1x2048x72xbf16> to vector<2048x72xbf16>
    %c0_2 = arith.constant 0 : index
    %c0_3 = arith.constant 0 : index
    %c0_4 = arith.constant 0 : index
    %2 = vector.load %arg3[%c0_2, %c0_3, %c0_4] : memref<1x72x128xbf16, #tpu.memory_space<vmem>>, vector<1x72x128xbf16>
    %3 = vector.shape_cast %2 : vector<1x72x128xbf16> to vector<72x128xbf16>
    %cst = arith.constant dense<0.000000e+00> : vector<2048x128xf32>
    %4 = tpu.matmul %1, %3, %cst {dimension_numbers = #tpu.dot_dimension_numbers<[1], [0], [0], [1], [0, 0, 1, 1], [], []>} : vector<2048x72xbf16>, vector<72x128xbf16>, vector<2048x128xf32> -> vector<2048x128xf32>
    %cst_5 = arith.constant 0.000000e+00 : f32
    %cst_6 = arith.constant 1.000000e+00 : f32
    %5 = vector.broadcast %cst_5 : f32 to vector<2048x128xf32>
    %6 = arith.maximumf %5, %4 : vector<2048x128xf32>
    %7 = vector.broadcast %cst_6 : f32 to vector<2048x128xf32>
    %8 = arith.minimumf %7, %6 : vector<2048x128xf32>
    %cst_7 = arith.constant dense<0.000000e+00> : vector<128xf32>
    %9 = vector.multi_reduction <add>, %8, %cst_7 [0] : vector<2048x128xf32> to vector<128xf32>
    %10 = vector.shape_cast %9 : vector<128xf32> to vector<1x128xf32>
    %11 = arith.mulf %8, %8 : vector<2048x128xf32>
    %cst_8 = arith.constant dense<0.000000e+00> : vector<128xf32>
    %12 = vector.multi_reduction <add>, %11, %cst_8 [0] : vector<2048x128xf32> to vector<128xf32>
    %13 = vector.shape_cast %12 : vector<128xf32> to vector<1x128xf32>
    %14 = tpu.iota {dimensions = array<i32: 0>} : vector<8x128xi32>
    %c0_i32 = arith.constant 0 : i32
    %15 = vector.broadcast %c0_i32 : i32 to vector<8x128xi32>
    %16 = arith.cmpi eq, %14, %15 : vector<8x128xi32>
    %c1_i32 = arith.constant 1 : i32
    %17 = vector.broadcast %c1_i32 : i32 to vector<8x128xi32>
    %18 = arith.cmpi eq, %14, %17 : vector<8x128xi32>
    %cst_9 = arith.constant 0.000000e+00 : f32
    %19 = vector.shape_cast %13 : vector<1x128xf32> to vector<1x128xf32>
    %20 = vector.broadcast %19 : vector<1x128xf32> to vector<8x128xf32>
    %21 = vector.broadcast %cst_9 : f32 to vector<8x128xf32>
    %22 = arith.select %18, %20, %21 : vector<8x128xi1>, vector<8x128xf32>
    %23 = vector.shape_cast %10 : vector<1x128xf32> to vector<1x128xf32>
    %24 = vector.broadcast %23 : vector<1x128xf32> to vector<8x128xf32>
    %25 = arith.select %16, %24, %22 : vector<8x128xi1>, vector<8x128xf32>
    %c0_10 = arith.constant 0 : index
    %c0_11 = arith.constant 0 : index
    %c0_12 = arith.constant 0 : index
    %c0_13 = arith.constant 0 : index
    %26 = vector.load %arg5[%c0_10, %c0_11, %c0_12, %c0_13] : memref<1x1x8x128xf32, #tpu.memory_space<vmem>>, vector<1x1x8x128xf32>
    %27 = vector.shape_cast %26 : vector<1x1x8x128xf32> to vector<8x128xf32>
    %28 = vector.shape_cast %25 : vector<8x128xf32> to vector<1x1x8x128xf32>
    tpu.vector_store %arg5[%c0_10, %c0_11, %c0_12, %c0_13], %28 {strides = array<i32>} : memref<1x1x8x128xf32, #tpu.memory_space<vmem>>, vector<1x1x8x128xf32>,
    %29 = arith.truncf %8 : vector<2048x128xf32> to vector<2048x128xbf16>
    %c0_14 = arith.constant 0 : index
    %c0_15 = arith.constant 0 : index
    %c0_16 = arith.constant 0 : index
    %30 = vector.load %arg4[%c0_14, %c0_15, %c0_16] : memref<1x2048x128xbf16, #tpu.memory_space<vmem>>, vector<1x2048x128xbf16>
    %31 = vector.shape_cast %30 : vector<1x2048x128xbf16> to vector<2048x128xbf16>
    %32 = vector.shape_cast %29 : vector<2048x128xbf16> to vector<1x2048x128xbf16>
    tpu.vector_store %arg4[%c0_14, %c0_15, %c0_16], %32 {strides = array<i32>} : memref<1x2048x128xbf16, #tpu.memory_space<vmem>>, vector<1x2048x128xbf16>,
    return
  }
  func.func @transform_0(%arg0: i32, %arg1: i32) -> (i32, i32, i32) {
    %c0_i32 = arith.constant 0 : i32
    %c0_i32_0 = arith.constant 0 : i32
    return %arg0, %arg1, %c0_i32 : i32, i32, i32
  }
  func.func @transform_1(%arg0: i32, %arg1: i32) -> (i32, i32, i32) {
    %c0_i32 = arith.constant 0 : i32
    %c0_i32_0 = arith.constant 0 : i32
    %c0_i32_1 = arith.constant 0 : i32
    return %arg0, %c0_i32, %c0_i32_0 : i32, i32, i32
  }
  func.func @transform_2(%arg0: i32, %arg1: i32) -> (i32, i32, i32) {
    %c0_i32 = arith.constant 0 : i32
    %c0_i32_0 = arith.constant 0 : i32
    return %arg0, %arg1, %c0_i32 : i32, i32, i32
  }
  func.func @transform_3(%arg0: i32, %arg1: i32) -> (i32, i32, i32, i32) {
    %c0_i32 = arith.constant 0 : i32
    %c0_i32_0 = arith.constant 0 : i32
    %c0_i32_1 = arith.constant 0 : i32
    return %arg0, %arg1, %c0_i32, %c0_i32_0 : i32, i32, i32, i32
  }
}

</mosaic_0001>

<bundles_post_ra>
// kernel: squeeze.24
= control target key start
LH: loop header
LB: loop body
LE: loop exit
PB: predicated region body
PF: predicated region fallthrough
CT: control target
= control target key end

     0   :  { %s456_s0 = inlined_call_operand.vmem [shape: bf16[1,2,2048], index: 0, kind: input, shape index: {}]   ;;  %s457_s1 = inlined_call_operand.vmem [shape: bf16[32,128], index: 1, kind: output, shape index: {}]  }
   0x1   :  { %v363_v0 = vld [vmem:[%s456_s0 + $0xf] sm:$0x1]  ;;  %v364_v1 = vld [vmem:[%s456_s0 + $0xe] sm:$0x1]  ;;  %v365_v2 = vld [vmem:[%s456_s0 + $0xd] sm:$0x1] }
   0x2   :  { %v17_v3 = vunpack.c.l.bf16 %v363_v0  ;;  %v33_v4 = vunpack.c.l.bf16 %v364_v1  ;;  %v49_v5 = vunpack.c.l.bf16 %v365_v2  ;;  %v366_v6 = vld [vmem:[%s456_s0 + $0xc] sm:$0x1]  ;;  %v367_v7 = vld [vmem:[%s456_s0 + $0xb] sm:$0x1]  ;;  %v368_v8 = vld [vmem:[%s456_s0 + $0xa] sm:$0x1] }
   0x3   :  { %v65_v9 = vunpack.c.l.bf16 %v366_v6  ;;  %v81_v10 = vunpack.c.l.bf16 %v367_v7  ;;  %v97_v11 = vunpack.c.l.bf16 %v368_v8  ;;  %v369_v12 = vld [vmem:[%s456_s0 + $0x9] sm:$0x1]  ;;  %v370_v13 = vld [vmem:[%s456_s0 + $0x8] sm:$0x1]  ;;  %v371_v14 = vld [vmem:[%s456_s0 + $0x7] sm:$0x1] }
   0x4   :  { %20 = vst [vmem:[#allocation1 + $0x78] sm:$0x3] %v17_v3  ;;  %36 = vst [vmem:[#allocation1 + $0x70] sm:$0x3] %v33_v4  ;;  %v113_v15 = vunpack.c.l.bf16 %v369_v12  ;;  %v129_v16 = vunpack.c.l.bf16 %v370_v13  ;;  %v145_v17 = vunpack.c.l.bf16 %v371_v14  ;;  %v372_v18 = vld [vmem:[%s456_s0 + $0x6] sm:$0x1] }
   0x5   :  { %52 = vst [vmem:[#allocation1 + $0x68] sm:$0x3] %v49_v5  ;;  %v373_v19 = vld [vmem:[%s456_s0 + $0x5] sm:$0x1]  ;;  %v374_v20 = vld [vmem:[%s456_s0 + $0x4] sm:$0x1]  ;;  %v161_v21 = vunpack.c.l.bf16 %v372_v18 }
   0x6   :  { %68 = vst [vmem:[#allocation1 + $0x60] sm:$0x3] %v65_v9  ;;  %84 = vst [vmem:[#allocation1 + $0x58] sm:$0x3] %v81_v10  ;;  %v177_v22 = vunpack.c.l.bf16 %v373_v19  ;;  %v193_v23 = vunpack.c.l.bf16 %v374_v20  ;;  %v375_v24 = vld [vmem:[%s456_s0 + $0x3] sm:$0x1] }
   0x7   :  { %100 = vst [vmem:[#allocation1 + $0x50] sm:$0x3] %v97_v11  ;;  %v376_v25 = vld [vmem:[%s456_s0 + $0x2] sm:$0x1]  ;;  %v377_v26 = vld [vmem:[%s456_s0 + $0x1] sm:$0x1]  ;;  %v209_v27 = vunpack.c.l.bf16 %v375_v24 }
   0x8   :  { %116 = vst [vmem:[#allocation1 + $0x48] sm:$0x3] %v113_v15  ;;  %132 = vst [vmem:[#allocation1 + $0x40] sm:$0x3] %v129_v16  ;;  %v225_v28 = vunpack.c.l.bf16 %v376_v25  ;;  %v240_v29 = vunpack.c.l.bf16 %v377_v26  ;;  %v253_v30 = vld [vmem:[%s456_s0] sm:$0x1] }
   0x9   :  { %148 = vst [vmem:[#allocation1 + $0x38] sm:$0x3] %v145_v17  ;;  %164 = vst [vmem:[#allocation1 + $0x30] sm:$0x3] %v161_v21  ;;  %v254_v31 = vunpack.c.l.bf16 %v253_v30 }
   0xa   :  { %180 = vst [vmem:[#allocation1 + $0x28] sm:$0x3] %v177_v22  ;;  %196 = vst [vmem:[#allocation1 + $0x20] sm:$0x3] %v193_v23 }
   0xb   :  { %212 = vst [vmem:[#allocation1 + $0x18] sm:$0x3] %v209_v27  ;;  %228 = vst [vmem:[#allocation1 + $0x10] sm:$0x3] %v225_v28  ;;  %v312_v33 = vld [vmem:[#allocation1 + $0x70] sm:$0x3]  }
   0xc   :  { %243 = vst [vmem:[#allocation1 + $0x8] sm:$0x3] %v240_v29  ;;  %256 = vst [vmem:[#allocation1] sm:$0x3] %v254_v31  ;;  %v308_v32 = vld [vmem:[#allocation1 + $0x68] sm:$0x3]  }
   0xd   :  { %v316_v34 = vld [vmem:[#allocation1 + $0x78] sm:$0x3]   ;;  %v304_v37 = vld [vmem:[#allocation1 + $0x60] sm:$0x3]  }
   0xe   :  { %v296_v35 = vld [vmem:[#allocation1 + $0x50] sm:$0x3]   ;;  %v300_v36 = vld [vmem:[#allocation1 + $0x58] sm:$0x3]  }
   0xf   :  { %310 = vst [vmem:[#allocation0 + $0xd] ss:$16 sm:$0x3] %v308_v32   ;;  %314 = vst [vmem:[#allocation0 + $0xe] ss:$16 sm:$0x3] %v312_v33  }
  0x10   :  { %318 = vst [vmem:[#allocation0 + $0xf] ss:$16 sm:$0x3] %v316_v34   ;;  %v284_v38 = vld [vmem:[#allocation1 + $0x38] sm:$0x3]  }
  0x11   :  { %v288_v39 = vld [vmem:[#allocation1 + $0x40] sm:$0x3]   ;;  %v292_v40 = vld [vmem:[#allocation1 + $0x48] sm:$0x3]   ;;  %v280_v43 = vld [vmem:[#allocation1 + $0x30] sm:$0x3]  }
  0x12   :  { %298 = vst [vmem:[#allocation0 + $0xa] ss:$16 sm:$0x3] %v296_v35   ;;  %302 = vst [vmem:[#allocation0 + $0xb] ss:$16 sm:$0x3] %v300_v36  }
  0x13   :  { %306 = vst [vmem:[#allocation0 + $0xc] ss:$16 sm:$0x3] %v304_v37   ;;  %v272_v41 = vld [vmem:[#allocation1 + $0x20] sm:$0x3]  }
  0x14   :  { %v276_v42 = vld [vmem:[#allocation1 + $0x28] sm:$0x3]   ;;  %286 = vst [vmem:[#allocation0 + $0x7] ss:$16 sm:$0x3] %v284_v38  }
  0x15   :  { %290 = vst [vmem:[#allocation0 + $0x8] ss:$16 sm:$0x3] %v288_v39   ;;  %294 = vst [vmem:[#allocation0 + $0x9] ss:$16 sm:$0x3] %v292_v40  }
  0x16   :  { %v260_v44 = vld [vmem:[#allocation1 + $0x8] sm:$0x3]   ;;  %v264_v45 = vld [vmem:[#allocation1 + $0x10] sm:$0x3]   ;;  %v268_v46 = vld [vmem:[#allocation1 + $0x18] sm:$0x3]  }
  0x17   :  { %274 = vst [vmem:[#allocation0 + $0x4] ss:$16 sm:$0x3] %v272_v41   ;;  %278 = vst [vmem:[#allocation0 + $0x5] ss:$16 sm:$0x3] %v276_v42  }
  0x18   :  { %282 = vst [vmem:[#allocation0 + $0x6] ss:$16 sm:$0x3] %v280_v43   ;;  %v257_v47 = vld [vmem:[#allocation1] sm:$0x3]  }
  0x19   :  { %262 = vst [vmem:[#allocation0 + $0x1] ss:$16 sm:$0x3] %v260_v44   ;;  %266 = vst [vmem:[#allocation0 + $0x2] ss:$16 sm:$0x3] %v264_v45  }
  0x1a   :  { %270 = vst [vmem:[#allocation0 + $0x3] ss:$16 sm:$0x3] %v268_v46   ;;  %258 = vst [vmem:[#allocation0] ss:$16 sm:$0x3] %v257_v47  }
  0x1c   :  { %v328_v48 = vld [vmem:[#allocation0 + $0x8] sm:$0xff]  ;;  %v341_v49 = vld [vmem:[#allocation0 + $0x18] sm:$0xff] }
  0x21   :  { %v323_v50 = vld [vmem:[#allocation0] sm:$0xff]  ;;  %v334_v51 = vld [vmem:[#allocation0 + $0x10] sm:$0xff] }
  0x22   :  { %v384_v52 = vpack.c.bf16 %v328_v48, %v323_v50  ;;  %v389_v53 = vpack.c.bf16 %v341_v49, %v334_v51 }
  0x24   :  { %385 = vst [vmem:[%s457_s1] sm:$0xff] %v384_v52   ;;  %391 = vst [vmem:[%s457_s1 + $0x8] sm:$0xff] %v389_v53  }

// kernel: _lambda_.10
= control target key start
LH: loop header
LB: loop body
LE: loop exit
PB: predicated region body
PF: predicated region fallthrough
CT: control target
= control target key end

     0   :  { %v936_v3 = vmov 0   ;;  %vm207_vm0 = vcmask 261120   ;;  %s1320_s1 = inlined_call_operand.vmem [shape: bf16[1,32,2048], index: 1, kind: input, shape index: {}]   ;;  %s1321_s0 = inlined_call_operand.vmem [shape: bf16[1,8,32], index: 0, kind: input, shape index: {}]   ;;  %s1322_s2 = inlined_call_operand.vmem [shape: bf16[1,8,2048], index: 2, kind: output, shape index: {0}]   ;;  %s1323_s3 = inlined_call_operand.vmem [shape: f32[1,1,8,2048], index: 3, kind: output, shape index: {1}]  }
   0x1   :  { %v15_v0 = vld [vmem:[%s1320_s1] sm:$0xff]  ;;  %v16_v2 = vld [vmem:[%s1320_s1 + $0x8] sm:$0xff]  ;;  %243 = vmatprep.mubr.bf16.mxu0 %v936_v3  ;;  %284 = vmatprep.mubr.bf16.mxu1 %v936_v3  ;;  %v17_v15 = vld [vmem:[%s1320_s1 + $0x10] sm:$0xff] }
   0x2   :  { %v23_v1 = vld [vmem:[%s1320_s1 + $0x40] sm:$0xff]  ;;  %v24_v5 = vld [vmem:[%s1320_s1 + $0x48] sm:$0xff]  ;;  %v25_v16 = vld [vmem:[%s1320_s1 + $0x50] sm:$0xff] }
   0x3   :  { %v880_v4 = vcombine.high %v15_v0, %v23_v1  ;;  %v879_v6 = vcombine.low %v15_v0, %v23_v1  ;;  %v31_v7 = vld [vmem:[%s1320_s1 + $0x80] sm:$0xff]  ;;  %v882_v9 = vcombine.high %v16_v2, %v24_v5  ;;  %v881_v10 = vcombine.low %v16_v2, %v24_v5  ;;  %v32_v12 = vld [vmem:[%s1320_s1 + $0x88] sm:$0xff]  ;;  %v18_v17 = vld [vmem:[%s1320_s1 + $0x18] sm:$0xff] }
   0x4   :  { %v39_v8 = vld [vmem:[%s1320_s1 + $0xc0] sm:$0xff]  ;;  %v40_v13 = vld [vmem:[%s1320_s1 + $0xc8] sm:$0xff]  ;;  %v26_v19 = vld [vmem:[%s1320_s1 + $0x58] sm:$0xff]  ;;  %v884_v21 = vcombine.high %v17_v15, %v25_v16  ;;  %v883_v28 = vcombine.low %v17_v15, %v25_v16  ;;  %v747_v2 = vlaneseq }
   0x5   :  { %v896_v11 = vcombine.high %v31_v7, %v39_v8  ;;  %211 = vmatprep.subr.bf16.mxu0 %v880_v4  ;;  %v898_v14 = vcombine.high %v32_v12, %v40_v13  ;;  %252 = vmatprep.subr.bf16.mxu1 %v882_v9  ;;  %v895_v18 = vcombine.low %v31_v7, %v39_v8  ;;  %v33_v23 = vld [vmem:[%s1320_s1 + $0x90] sm:$0xff]  ;;  %v34_v25 = vld [vmem:[%s1320_s1 + $0x98] sm:$0xff]  ;;  %v1010_v27 = vld [vmem:[%s1321_s0] sm:$0xf] }
   0x6   :  { %212 = vmatpush1.bf16.msra.mxu0 %v879_v6  ;;  %253 = vmatpush1.bf16.msra.mxu1 %v881_v10  ;;  %v897_v20 = vcombine.low %v32_v12, %v40_v13  ;;  %v886_v22 = vcombine.high %v18_v17, %v26_v19  ;;  %v41_v24 = vld [vmem:[%s1320_s1 + $0xd0] sm:$0xff]  ;;  %v42_v26 = vld [vmem:[%s1320_s1 + $0xd8] sm:$0xff]  ;;  %v885_v29 = vcombine.low %v18_v17, %v26_v19  ;;  %v19_v32 = vld [vmem:[%s1320_s1 + $0x20] sm:$0xff]  ;;  %v1082_v5 = vshrl.u32 %v747_v2, 7 }
   0x7   :  { %213 = vmatprep.subr.bf16.mxu0 %v896_v11  ;;  %254 = vmatprep.subr.bf16.mxu1 %v898_v14  ;;  %v900_v30 = vcombine.high %v33_v23, %v41_v24  ;;  %v902_v31 = vcombine.high %v34_v25, %v42_v26  ;;  %v27_v33 = vld [vmem:[%s1320_s1 + $0x60] sm:$0xff]  ;;  %v20_v34 = vld [vmem:[%s1320_s1 + $0x28] sm:$0xff]  ;;  %v899_v36 = vcombine.low %v33_v23, %v41_v24  ;;  %v21_v48 = vld [vmem:[%s1320_s1 + $0x30] sm:$0xff] }
   0x8   :  { %v28_v35 = vld [vmem:[%s1320_s1 + $0x68] sm:$0xff]  ;;  %v901_v37 = vcombine.low %v34_v25, %v42_v26  ;;  %v888_v38 = vcombine.high %v19_v32, %v27_v33  ;;  %v35_v40 = vld [vmem:[%s1320_s1 + $0xa0] sm:$0xff]  ;;  %v887_v44 = vcombine.low %v19_v32, %v27_v33  ;;  %v29_v49 = vld [vmem:[%s1320_s1 + $0x70] sm:$0xff]  ;;  %vm750_vm1 = vcmp.eq.s32.totalorder %v1082_v5, 1 }
   0x9   :  { %v890_v39 = vcombine.high %v20_v34, %v28_v35  ;;  %v43_v41 = vld [vmem:[%s1320_s1 + $0xe0] sm:$0xff]  ;;  %v36_v42 = vld [vmem:[%s1320_s1 + $0xa8] sm:$0xff]  ;;  %v889_v45 = vcombine.low %v20_v34, %v28_v35  ;;  %v22_v50 = vld [vmem:[%s1320_s1 + $0x38] sm:$0xff]  ;;  %v892_v54 = vcombine.high %v21_v48, %v29_v49  ;;  %v891_v60 = vcombine.low %v21_v48, %v29_v49 }
   0xa   :  { %214 = vmatpush1.bf16.msra.mxu0 %v895_v18  ;;  %255 = vmatpush1.bf16.msra.mxu1 %v897_v20  ;;  %v44_v43 = vld [vmem:[%s1320_s1 + $0xe8] sm:$0xff]  ;;  %v904_v46 = vcombine.high %v35_v40, %v43_v41  ;;  %v30_v51 = vld [vmem:[%s1320_s1 + $0x78] sm:$0xff]  ;;  %v903_v52 = vcombine.low %v35_v40, %v43_v41  ;;  %v37_v56 = vld [vmem:[%s1320_s1 + $0xb0] sm:$0xff]  ;;  %vm749_vm2 = vcmp.eq.s32.totalorder %v1082_v5, 0 }
   0xb   :  { %293 = vmatprep.subr.bf16.mxu0 %v884_v21  ;;  %334 = vmatprep.subr.bf16.mxu1 %v886_v22  ;;  %v906_v47 = vcombine.high %v36_v42, %v44_v43  ;;  %v905_v53 = vcombine.low %v36_v42, %v44_v43  ;;  %v894_v55 = vcombine.high %v22_v50, %v30_v51  ;;  %v45_v57 = vld [vmem:[%s1320_s1 + $0xf0] sm:$0xff]  ;;  %v38_v58 = vld [vmem:[%s1320_s1 + $0xb8] sm:$0xff] }
   0xc   :  { %v46_v59 = vld [vmem:[%s1320_s1 + $0xf8] sm:$0xff]  ;;  %v893_v61 = vcombine.low %v22_v50, %v30_v51  ;;  %v908_v62 = vcombine.high %v37_v56, %v45_v57  ;;  %v907_v0 = vcombine.low %v37_v56, %v45_v57 }
   0xd   :  { %911 = vmatmul.mubr.msk.bf16.vlgmr.msra.gmra.mrb[0].mxu0 %vm207_vm0, %v1010_v27  ;;  %912 = vmatmul.mubr.msk.bf16.vlgmr.msra.gmra.mrb[0].mxu1 %vm207_vm0, %v1010_v27  ;;  %v910_v63 = vcombine.high %v38_v58, %v46_v59  ;;  %v909_v1 = vcombine.low %v38_v58, %v46_v59 }
   0xe   :  { %294 = vmatpush1.bf16.msra.mxu0 %v883_v28  ;;  %335 = vmatpush1.bf16.msra.mxu1 %v885_v29 }
   0xf   :  { %295 = vmatprep.subr.bf16.mxu0 %v900_v30  ;;  %336 = vmatprep.subr.bf16.mxu1 %v902_v31 }
  0x10   :  { %325 = vmatprep.mubr.bf16.mxu0 %v936_v3  ;;  %366 = vmatprep.mubr.bf16.mxu1 %v936_v3 }
  0x12   :  { %296 = vmatpush1.bf16.msra.mxu0 %v899_v36  ;;  %337 = vmatpush1.bf16.msra.mxu1 %v901_v37 }
  0x13   :  { %375 = vmatprep.subr.bf16.mxu0 %v888_v38  ;;  %416 = vmatprep.subr.bf16.mxu1 %v890_v39 }
  0x15   :  { %913 = vmatmul.mubr.msk.bf16.vlgmr.msra.gmra.mrb[4].mxu0 %vm207_vm0, %v1010_v27  ;;  %914 = vmatmul.mubr.msk.bf16.vlgmr.msra.gmra.mrb[4].mxu1 %vm207_vm0, %v1010_v27 }
  0x16   :  { %376 = vmatpush1.bf16.msra.mxu0 %v887_v44  ;;  %417 = vmatpush1.bf16.msra.mxu1 %v889_v45 }
  0x17   :  { %377 = vmatprep.subr.bf16.mxu0 %v904_v46  ;;  %418 = vmatprep.subr.bf16.mxu1 %v906_v47 }
  0x18   :  { %407 = vmatprep.mubr.bf16.mxu0 %v936_v3  ;;  %448 = vmatprep.mubr.bf16.mxu1 %v936_v3 }
  0x1a   :  { %378 = vmatpush1.bf16.msra.mxu0 %v903_v52  ;;  %419 = vmatpush1.bf16.msra.mxu1 %v905_v53 }
  0x1b   :  { %457 = vmatprep.subr.bf16.mxu0 %v892_v54  ;;  %498 = vmatprep.subr.bf16.mxu1 %v894_v55 }
  0x1d   :  { %915 = vmatmul.mubr.msk.bf16.vlgmr.msra.gmra.mrb[8].mxu0 %vm207_vm0, %v1010_v27  ;;  %916 = vmatmul.mubr.msk.bf16.vlgmr.msra.gmra.mrb[8].mxu1 %vm207_vm0, %v1010_v27 }
  0x1e   :  { %458 = vmatpush1.bf16.msra.mxu0 %v891_v60  ;;  %499 = vmatpush1.bf16.msra.mxu1 %v893_v61 }
  0x1f   :  { %459 = vmatprep.subr.bf16.mxu0 %v908_v62  ;;  %500 = vmatprep.subr.bf16.mxu1 %v910_v63 }
  0x20   :  { %489 = vmatprep.mubr.bf16.mxu0 %v936_v3  ;;  %530 = vmatprep.mubr.bf16.mxu1 %v936_v3 }
  0x22   :  { %460 = vmatpush1.bf16.msra.mxu0 %v907_v0  ;;  %501 = vmatpush1.bf16.msra.mxu1 %v909_v1 }
  0x25   :  { %917 = vmatmul.mubr.msk.bf16.vlgmr.msra.gmra.mrb[12].mxu0 %vm207_vm0, %v1010_v27  ;;  %918 = vmatmul.mubr.msk.bf16.vlgmr.msra.gmra.mrb[12].mxu1 %vm207_vm0, %v1010_v27 }
  0xe0   :  { %v245_v4 = vpop.f32.mrb[0].mxu0  ;;  %v1084_v8 = vpop.f32.mrb[0].mxu1 }
  0xe1   :  { %v539_v6 = vrot.slane %v245_v4, 4  ;;  %v635_v7 = vmul.f32 %v245_v4, %v245_v4  ;;  %v247_v9 = vpop.f32.mrb[1].mxu0  ;;  %v551_v10 = vrot.slane %v1084_v8, 4  ;;  %v637_v3 = vmul.f32 %v1084_v8, %v1084_v8  ;;  %v1089_v13 = vpop.f32.mrb[1].mxu1 }
  0xe2   :  { %v545_v11 = vrot.slane %v247_v9, 4  ;;  %v636_v12 = vmul.f32 %v247_v9, %v247_v9  ;;  %v249_v14 = vpop.f32.mrb[2].mxu0  ;;  %v927_v17 = vpack.c.bf16 %v247_v9, %v245_v4  ;;  %v557_v18 = vrot.slane %v1089_v13, 4  ;;  %v290_v19 = vpop.f32.mrb[2].mxu1 }
  0xe3   :  { %v540_v15 = vadd.f32 %v539_v6, %v245_v4  ;;  %v651_v16 = vrot.slane %v635_v7, 4  ;;  %v250_v20 = vpop.f32.mrb[3].mxu0  ;;  %v552_v21 = vadd.f32 %v551_v10, %v1084_v8  ;;  %v663_v22 = vrot.slane %v637_v3, 4  ;;  %v291_v25 = vpop.f32.mrb[3].mxu1 }
  0xe4   :  { %v546_v23 = vadd.f32 %v545_v11, %v247_v9  ;;  %v657_v24 = vrot.slane %v636_v12, 4  ;;  %863 = vst [vmem:[%s1322_s2] sm:$0xff] %v927_v17  ;;  %v558_v28 = vadd.f32 %v557_v18, %v1089_v13  ;;  %v638_v29 = vmul.f32 %v1089_v13, %v1089_v13 }
  0xe5   :  { %v541_v26 = vrot.slane %v540_v15, 2  ;;  %v652_v27 = vadd.f32 %v651_v16, %v635_v7  ;;  %v553_v30 = vrot.slane %v552_v21, 2  ;;  %v664_v31 = vadd.f32 %v663_v22, %v637_v3 }
  0xe6   :  { %v547_v32 = vrot.slane %v546_v23, 2  ;;  %v658_v33 = vadd.f32 %v657_v24, %v636_v12  ;;  %v559_v36 = vrot.slane %v558_v28, 2  ;;  %v669_v37 = vrot.slane %v638_v29, 4 }
  0xe7   :  { %v542_v34 = vadd.f32 %v541_v26, %v540_v15  ;;  %v653_v35 = vrot.slane %v652_v27, 2  ;;  %v554_v38 = vadd.f32 %v553_v30, %v552_v21  ;;  %v665_v39 = vrot.slane %v664_v31, 2 }
  0xe8   :  { %v548_v40 = vadd.f32 %v547_v32, %v546_v23  ;;  %v659_v41 = vrot.slane %v658_v33, 2  ;;  %v1101_v42 = vpop.f32.mrb[4].mxu0  ;;  %v560_v45 = vadd.f32 %v559_v36, %v558_v28  ;;  %v670_v46 = vadd.f32 %v669_v37, %v638_v29  ;;  %v1103_v47 = vpop.f32.mrb[4].mxu1 }
  0xe9   :  { %v543_v43 = vrot.slane %v542_v34, 1  ;;  %v654_v44 = vadd.f32 %v653_v35, %v652_v27  ;;  %v1105_v48 = vpop.f32.mrb[5].mxu0  ;;  %v555_v49 = vrot.slane %v554_v38, 1  ;;  %v666_v50 = vadd.f32 %v665_v39, %v664_v31  ;;  %v1107_v53 = vpop.f32.mrb[5].mxu1 }
  0xea   :  { %v549_v51 = vrot.slane %v548_v40, 1  ;;  %v660_v52 = vadd.f32 %v659_v41, %v658_v33  ;;  %v331_v54 = vpop.f32.mrb[6].mxu0  ;;  %v561_v57 = vrot.slane %v560_v45, 1  ;;  %v671_v58 = vrot.slane %v670_v46, 2  ;;  %v372_v59 = vpop.f32.mrb[6].mxu1 }
  0xeb   :  { %v544_v55 = vadd.f32 %v543_v43, %v542_v34  ;;  %v655_v56 = vrot.slane %v654_v44, 1  ;;  %v332_v60 = vpop.f32.mrb[7].mxu0  ;;  %v556_v61 = vadd.f32 %v555_v49, %v554_v38  ;;  %v667_v62 = vrot.slane %v666_v50, 1  ;;  %v373_v1 = vpop.f32.mrb[7].mxu1 }
  0xec   :  { %v550_v63 = vadd.f32 %v549_v51, %v548_v40  ;;  %v661_v0 = vrot.slane %v660_v52, 1  ;;  %v562_v4 = vadd.f32 %v561_v57, %v560_v45  ;;  %v672_v6 = vadd.f32 %v671_v58, %v670_v46 }
  0xed   :  { %v656_v2 = vadd.f32 %v655_v56, %v654_v44  ;;  %v928_v7 = vpack.c.bf16 %v1089_v13, %v1084_v8  ;;  %v668_v9 = vadd.f32 %v667_v62, %v666_v50  ;;  %v563_v3 = vrot.slane %v1101_v42, 4 }
  0xee   :  { %v662_v10 = vadd.f32 %v661_v0, %v660_v52  ;;  %v639_v11 = vmul.f32 %v1101_v42, %v1101_v42  ;;  %v673_v14 = vrot.slane %v672_v6, 1  ;;  %v575_v15 = vrot.slane %v1103_v47, 4 }
  0xef   :  { %v751_v12 = vsel %vm750_vm1, %v656_v2, 0.0  ;;  %864 = vst [vmem:[%s1322_s2 + $0x8] sm:$0xff] %v928_v7  ;;  %v641_v8 = vmul.f32 %v1103_v47, %v1103_v47  ;;  %v753_v16 = vsel %vm750_vm1, %v668_v9, 0.0  ;;  %v564_v18 = vadd.f32 %v563_v3, %v1101_v42 }
  0xf0   :  { %v767_v13 = vsel %vm749_vm2, %v544_v55, %v751_v12  ;;  %v752_v17 = vsel %vm750_vm1, %v662_v10, 0.0  ;;  %v1129_v19 = vpop.f32.mrb[8].mxu0  ;;  %v769_v20 = vsel %vm749_vm2, %v556_v61, %v753_v16  ;;  %v674_v22 = vadd.f32 %v673_v14, %v672_v6  ;;  %v1138_v24 = vpop.f32.mrb[8].mxu1 }
  0xf1   :  { %783 = vst [vmem:[%s1323_s3] sm:$0xff] %v767_v13  ;;  %v768_v21 = vsel %vm749_vm2, %v550_v63, %v752_v17  ;;  %v675_v23 = vrot.slane %v639_v11, 4  ;;  %v1140_v25 = vpop.f32.mrb[9].mxu0  ;;  %785 = vst [vmem:[%s1323_s3 + $0x10] sm:$0xff] %v769_v20  ;;  %v565_v26 = vrot.slane %v564_v18, 2  ;;  %v576_v27 = vadd.f32 %v575_v15, %v1103_v47  ;;  %v1150_v30 = vpop.f32.mrb[9].mxu1 }
  0xf2   :  { %784 = vst [vmem:[%s1323_s3 + $0x8] sm:$0xff] %v768_v21  ;;  %v687_v28 = vrot.slane %v641_v8, 4  ;;  %v569_v29 = vrot.slane %v1105_v48, 4  ;;  %v413_v31 = vpop.f32.mrb[10].mxu0  ;;  %v754_v32 = vsel %vm750_vm1, %v674_v22, 0.0  ;;  %v640_v34 = vmul.f32 %v1105_v48, %v1105_v48  ;;  %v454_v36 = vpop.f32.mrb[10].mxu1 }
  0xf3   :  { %v676_v33 = vadd.f32 %v675_v23, %v639_v11  ;;  %v929_v35 = vpack.c.bf16 %v1105_v48, %v1101_v42  ;;  %v414_v37 = vpop.f32.mrb[11].mxu0  ;;  %v770_v38 = vsel %vm749_vm2, %v562_v4, %v754_v32  ;;  %v566_v39 = vadd.f32 %v565_v26, %v564_v18  ;;  %v455_v43 = vpop.f32.mrb[11].mxu1 }
  0xf4   :  { %v577_v40 = vrot.slane %v576_v27, 2  ;;  %v688_v41 = vadd.f32 %v687_v28, %v641_v8  ;;  %786 = vst [vmem:[%s1323_s3 + $0x18] sm:$0xff] %v770_v38  ;;  %v570_v45 = vadd.f32 %v569_v29, %v1105_v48  ;;  %v681_v46 = vrot.slane %v640_v34, 4 }
  0xf5   :  { %v677_v44 = vrot.slane %v676_v33, 2  ;;  %865 = vst [vmem:[%s1322_s2 + $0x10] sm:$0xff] %v929_v35  ;;  %v581_v42 = vrot.slane %v1107_v53, 4  ;;  %v567_v49 = vrot.slane %v566_v39, 1  ;;  %v642_v52 = vmul.f32 %v1107_v53, %v1107_v53 }
  0xf6   :  { %v578_v50 = vadd.f32 %v577_v40, %v576_v27  ;;  %v689_v51 = vrot.slane %v688_v41, 2  ;;  %v571_v55 = vrot.slane %v570_v45, 2  ;;  %v682_v56 = vadd.f32 %v681_v46, %v640_v34 }
  0xf7   :  { %v678_v54 = vadd.f32 %v677_v44, %v676_v33  ;;  %v582_v57 = vadd.f32 %v581_v42, %v1107_v53  ;;  %v568_v58 = vadd.f32 %v567_v49, %v566_v39  ;;  %v693_v60 = vrot.slane %v642_v52, 4 }
  0xf8   :  { %v579_v48 = vrot.slane %v578_v50, 1  ;;  %v690_v59 = vadd.f32 %v689_v51, %v688_v41  ;;  %v1171_v61 = vpop.f32.mrb[12].mxu0  ;;  %v572_v63 = vadd.f32 %v571_v55, %v570_v45  ;;  %v683_v0 = vrot.slane %v682_v56, 2  ;;  %v1173_v2 = vpop.f32.mrb[12].mxu1 }
  0xf9   :  { %v679_v62 = vrot.slane %v678_v54, 1  ;;  %v583_v1 = vrot.slane %v582_v57, 2  ;;  %v1175_v4 = vpop.f32.mrb[13].mxu0  ;;  %v694_v9 = vadd.f32 %v693_v60, %v642_v52  ;;  %v930_v10 = vpack.c.bf16 %v1107_v53, %v1103_v47  ;;  %v1179_v3 = vpop.f32.mrb[13].mxu1 }
  0xfa   :  { %v580_v6 = vadd.f32 %v579_v48, %v578_v50  ;;  %v691_v7 = vrot.slane %v690_v59, 1  ;;  %v495_v11 = vpop.f32.mrb[14].mxu0  ;;  %v573_v14 = vrot.slane %v572_v63, 1  ;;  %v684_v15 = vadd.f32 %v683_v0, %v682_v56  ;;  %v536_v13 = vpop.f32.mrb[14].mxu1 }
  0xfb   :  { %v680_v12 = vadd.f32 %v679_v62, %v678_v54  ;;  %v584_v8 = vadd.f32 %v583_v1, %v582_v57  ;;  %v496_v16 = vpop.f32.mrb[15].mxu0  ;;  %v695_v18 = vrot.slane %v694_v9, 2  ;;  %866 = vst [vmem:[%s1322_s2 + $0x18] sm:$0xff] %v930_v10  ;;  %v587_v20 = vrot.slane %v1129_v19, 4  ;;  %v537_v53 = vpop.f32.mrb[15].mxu1 }
  0xfc   :  { %v692_v17 = vadd.f32 %v691_v7, %v690_v59  ;;  %v643_v47 = vmul.f32 %v1129_v19, %v1129_v19  ;;  %v574_v22 = vadd.f32 %v573_v14, %v572_v63  ;;  %v685_v23 = vrot.slane %v684_v15, 1 }
  0xfd   :  { %v755_v21 = vsel %vm750_vm1, %v680_v12, 0.0  ;;  %v585_v26 = vrot.slane %v584_v8, 1  ;;  %v696_v29 = vadd.f32 %v695_v18, %v694_v9  ;;  %v588_v31 = vadd.f32 %v587_v20, %v1129_v19 }
  0xfe   :  { %v771_v27 = vsel %vm749_vm2, %v568_v58, %v755_v21  ;;  %v757_v28 = vsel %vm750_vm1, %v692_v17, 0.0  ;;  %v686_v33 = vadd.f32 %v685_v23, %v684_v15  ;;  %v699_v35 = vrot.slane %v643_v47, 4 }
  0xff   :  { %787 = vst [vmem:[%s1323_s3 + $0x20] sm:$0xff] %v771_v27  ;;  %v773_v32 = vsel %vm749_vm2, %v580_v6, %v757_v28  ;;  %v586_v34 = vadd.f32 %v585_v26, %v584_v8  ;;  %v697_v36 = vrot.slane %v696_v29, 1  ;;  %v589_v37 = vrot.slane %v588_v31, 2 }
 0x100   :  { %789 = vst [vmem:[%s1323_s3 + $0x30] sm:$0xff] %v773_v32  ;;  %v599_v38 = vrot.slane %v1138_v24, 4  ;;  %v645_v39 = vmul.f32 %v1138_v24, %v1138_v24  ;;  %v756_v40 = vsel %vm750_vm1, %v686_v33, 0.0  ;;  %v700_v41 = vadd.f32 %v699_v35, %v643_v47 }
 0x101   :  { %v593_v43 = vrot.slane %v1140_v25, 4  ;;  %v644_v44 = vmul.f32 %v1140_v25, %v1140_v25  ;;  %v772_v45 = vsel %vm749_vm2, %v574_v22, %v756_v40  ;;  %v698_v46 = vadd.f32 %v697_v36, %v696_v29 }
 0x102   :  { %v590_v42 = vadd.f32 %v589_v37, %v588_v31  ;;  %v600_v49 = vadd.f32 %v599_v38, %v1138_v24  ;;  %788 = vst [vmem:[%s1323_s3 + $0x28] sm:$0xff] %v772_v45  ;;  %v701_v50 = vrot.slane %v700_v41, 2  ;;  %v711_v51 = vrot.slane %v645_v39, 4 }
 0x103   :  { %v594_v52 = vadd.f32 %v593_v43, %v1140_v25  ;;  %v705_v54 = vrot.slane %v644_v44, 4  ;;  %v758_v55 = vsel %vm750_vm1, %v698_v46, 0.0  ;;  %v931_v58 = vpack.c.bf16 %v1140_v25, %v1129_v19 }
 0x104   :  { %v591_v56 = vrot.slane %v590_v42, 1  ;;  %v601_v57 = vrot.slane %v600_v49, 2  ;;  %v774_v48 = vsel %vm749_vm2, %v586_v34, %v758_v55  ;;  %v702_v59 = vadd.f32 %v701_v50, %v700_v41 }
 0x105   :  { %v712_v60 = vadd.f32 %v711_v51, %v645_v39  ;;  %v595_v62 = vrot.slane %v594_v52, 2  ;;  %790 = vst [vmem:[%s1323_s3 + $0x38] sm:$0xff] %v774_v48  ;;  %v706_v1 = vadd.f32 %v705_v54, %v644_v44  ;;  %867 = vst [vmem:[%s1322_s2 + $0x20] sm:$0xff] %v931_v58  ;;  %v605_v6 = vrot.slane %v1150_v30, 4 }
 0x106   :  { %v592_v63 = vadd.f32 %v591_v56, %v590_v42  ;;  %v602_v0 = vadd.f32 %v601_v57, %v600_v49  ;;  %v703_v19 = vrot.slane %v702_v59, 1  ;;  %v646_v9 = vmul.f32 %v1150_v30, %v1150_v30 }
 0x107   :  { %v713_v25 = vrot.slane %v712_v60, 2  ;;  %v596_v7 = vadd.f32 %v595_v62, %v594_v52  ;;  %v707_v11 = vrot.slane %v706_v1, 2  ;;  %v606_v12 = vadd.f32 %v605_v6, %v1150_v30 }
 0x108   :  { %v603_v10 = vrot.slane %v602_v0, 1  ;;  %v932_v14 = vpack.c.bf16 %v1150_v30, %v1138_v24  ;;  %v704_v15 = vadd.f32 %v703_v19, %v702_v59  ;;  %v717_v16 = vrot.slane %v646_v9, 4 }
 0x109   :  { %v714_v8 = vadd.f32 %v713_v25, %v712_v60  ;;  %v597_v13 = vrot.slane %v596_v7, 1  ;;  %v708_v18 = vadd.f32 %v707_v11, %v706_v1  ;;  %v607_v20 = vrot.slane %v606_v12, 2 }
 0x10a   :  { %v604_v17 = vadd.f32 %v603_v10, %v602_v0  ;;  %868 = vst [vmem:[%s1322_s2 + $0x28] sm:$0xff] %v932_v14  ;;  %v611_v47 = vrot.slane %v1171_v61, 4  ;;  %v759_v53 = vsel %vm750_vm1, %v704_v15, 0.0  ;;  %v718_v23 = vadd.f32 %v717_v16, %v646_v9 }
 0x10b   :  { %v715_v21 = vrot.slane %v714_v8, 1  ;;  %v598_v22 = vadd.f32 %v597_v13, %v596_v7  ;;  %v775_v24 = vsel %vm749_vm2, %v592_v63, %v759_v53  ;;  %v709_v30 = vrot.slane %v708_v18, 1 }
 0x10c   :  { %v608_v26 = vadd.f32 %v607_v20, %v606_v12  ;;  %v612_v27 = vadd.f32 %v611_v47, %v1171_v61  ;;  %791 = vst [vmem:[%s1323_s3 + $0x40] sm:$0xff] %v775_v24  ;;  %v719_v29 = vrot.slane %v718_v23, 2  ;;  %v647_v31 = vmul.f32 %v1171_v61, %v1171_v61 }
 0x10d   :  { %v716_v28 = vadd.f32 %v715_v21, %v714_v8  ;;  %v623_v32 = vrot.slane %v1173_v2, 4  ;;  %v710_v33 = vadd.f32 %v709_v30, %v708_v18  ;;  %v649_v36 = vmul.f32 %v1173_v2, %v1173_v2 }
 0x10e   :  { %v609_v34 = vrot.slane %v608_v26, 1  ;;  %v613_v35 = vrot.slane %v612_v27, 2  ;;  %v720_v38 = vadd.f32 %v719_v29, %v718_v23  ;;  %v723_v39 = vrot.slane %v647_v31, 4 }
 0x10f   :  { %v761_v37 = vsel %vm750_vm1, %v716_v28, 0.0  ;;  %v624_v40 = vadd.f32 %v623_v32, %v1173_v2  ;;  %v760_v43 = vsel %vm750_vm1, %v710_v33, 0.0  ;;  %v735_v50 = vrot.slane %v649_v36, 4 }
 0x110   :  { %v777_v41 = vsel %vm749_vm2, %v604_v17, %v761_v37  ;;  %v614_v44 = vadd.f32 %v613_v35, %v612_v27  ;;  %v776_v45 = vsel %vm749_vm2, %v598_v22, %v760_v43  ;;  %v721_v46 = vrot.slane %v720_v38, 1 }
 0x111   :  { %793 = vst [vmem:[%s1323_s3 + $0x50] sm:$0xff] %v777_v41  ;;  %v724_v42 = vadd.f32 %v723_v39, %v647_v31  ;;  %v625_v49 = vrot.slane %v624_v40, 2  ;;  %792 = vst [vmem:[%s1323_s3 + $0x48] sm:$0xff] %v776_v45  ;;  %v617_v51 = vrot.slane %v1175_v4, 4  ;;  %v648_v52 = vmul.f32 %v1175_v4, %v1175_v4 }
 0x112   :  { %v610_v54 = vadd.f32 %v609_v34, %v608_v26  ;;  %v722_v55 = vadd.f32 %v721_v46, %v720_v38  ;;  %v933_v57 = vpack.c.bf16 %v1175_v4, %v1171_v61  ;;  %v615_v58 = vrot.slane %v614_v44, 1 }
 0x113   :  { %v725_v56 = vrot.slane %v724_v42, 2  ;;  %v736_v48 = vadd.f32 %v735_v50, %v649_v36  ;;  %v618_v59 = vadd.f32 %v617_v51, %v1175_v4  ;;  %v729_v60 = vrot.slane %v648_v52, 4 }
 0x114   :  { %v762_v62 = vsel %vm750_vm1, %v722_v55, 0.0  ;;  %v626_v0 = vadd.f32 %v625_v49, %v624_v40  ;;  %869 = vst [vmem:[%s1322_s2 + $0x30] sm:$0xff] %v933_v57  ;;  %v629_v1 = vrot.slane %v1179_v3, 4  ;;  %v650_v9 = vmul.f32 %v1179_v3, %v1179_v3 }
 0x115   :  { %v726_v63 = vadd.f32 %v725_v56, %v724_v42  ;;  %v778_v6 = vsel %vm749_vm2, %v610_v54, %v762_v62  ;;  %v737_v61 = vrot.slane %v736_v48, 2  ;;  %v619_v19 = vrot.slane %v618_v59, 2 }
 0x116   :  { %v730_v25 = vadd.f32 %v729_v60, %v648_v52  ;;  %794 = vst [vmem:[%s1323_s3 + $0x58] sm:$0xff] %v778_v6  ;;  %v630_v7 = vadd.f32 %v629_v1, %v1179_v3  ;;  %v934_v14 = vpack.c.bf16 %v1179_v3, %v1173_v2  ;;  %v627_v8 = vrot.slane %v626_v0, 1 }
 0x117   :  { %v727_v4 = vrot.slane %v726_v63, 1  ;;  %v738_v10 = vadd.f32 %v737_v61, %v736_v48  ;;  %v620_v11 = vadd.f32 %v619_v19, %v618_v59  ;;  %v741_v16 = vrot.slane %v650_v9, 4 }
 0x118   :  { %v731_v12 = vrot.slane %v730_v25, 2  ;;  %v631_v13 = vrot.slane %v630_v7, 2  ;;  %v616_v17 = vadd.f32 %v615_v58, %v614_v44  ;;  %870 = vst [vmem:[%s1322_s2 + $0x38] sm:$0xff] %v934_v14  ;;  %v628_v24 = vadd.f32 %v627_v8, %v626_v0 }
 0x119   :  { %v728_v15 = vadd.f32 %v727_v4, %v726_v63  ;;  %v739_v18 = vrot.slane %v738_v10, 1  ;;  %v621_v53 = vrot.slane %v620_v11, 1  ;;  %v742_v21 = vadd.f32 %v741_v16, %v650_v9 }
 0x11a   :  { %v732_v20 = vadd.f32 %v731_v12, %v730_v25  ;;  %v632_v23 = vadd.f32 %v631_v13, %v630_v7 }
 0x11b   :  { %v763_v47 = vsel %vm750_vm1, %v728_v15, 0.0  ;;  %v740_v2 = vadd.f32 %v739_v18, %v738_v10  ;;  %v743_v30 = vrot.slane %v742_v21, 2  ;;  %v622_v29 = vadd.f32 %v621_v53, %v620_v11 }
 0x11c   :  { %v779_v22 = vsel %vm749_vm2, %v616_v17, %v763_v47  ;;  %v733_v3 = vrot.slane %v732_v20, 1  ;;  %v633_v33 = vrot.slane %v632_v23, 1 }
 0x11d   :  { %795 = vst [vmem:[%s1323_s3 + $0x60] sm:$0xff] %v779_v22  ;;  %v765_v26 = vsel %vm750_vm1, %v740_v2, 0.0  ;;  %v744_v31 = vadd.f32 %v743_v30, %v742_v21 }
 0x11e   :  { %v734_v27 = vadd.f32 %v733_v3, %v732_v20  ;;  %v781_v28 = vsel %vm749_vm2, %v628_v24, %v765_v26  ;;  %v634_v37 = vadd.f32 %v633_v33, %v632_v23 }
 0x11f   :  { %797 = vst [vmem:[%s1323_s3 + $0x70] sm:$0xff] %v781_v28  ;;  %v745_v35 = vrot.slane %v744_v31, 1 }
 0x120   :  { %v764_v32 = vsel %vm750_vm1, %v734_v27, 0.0 }
 0x121   :  { %v780_v34 = vsel %vm749_vm2, %v622_v29, %v764_v32  ;;  %v746_v36 = vadd.f32 %v745_v35, %v744_v31 }
 0x122   :  { %796 = vst [vmem:[%s1323_s3 + $0x68] sm:$0xff] %v780_v34 }
 0x123   :  { %v766_v38 = vsel %vm750_vm1, %v746_v36, 0.0 }
 0x124   :  { %v782_v39 = vsel %vm749_vm2, %v634_v37, %v766_v38 }
 0x125   :  { %798 = vst [vmem:[%s1323_s3 + $0x78] sm:$0xff] %v782_v39 }

// kernel: _lambda_.11
= control target key start
LH: loop header
LB: loop body
LE: loop exit
PB: predicated region body
PF: predicated region fallthrough
CT: control target
= control target key end

     0   :  { %s1127_s12 = smov 0   ;;  %s1129_s13 = smov 0   ;;  %s1280_s0 = inlined_call_operand.vmem [shape: bf16[1,32,576], index: 0, kind: input, shape index: {}]   ;;  %s1281_s1 = inlined_call_operand.vmem [shape: bf16[1,576,128], index: 1, kind: input, shape index: {}]   ;;  %s1282_s2 = inlined_call_operand.vmem [shape: bf16[1,32,128], index: 2, kind: output, shape index: {0}]   ;;  %s1283_s3 = inlined_call_operand.vmem [shape: f32[1,2,8,128], index: 3, kind: output, shape index: {1}]  }
   0x1   :  { %s1131_s14 = smov 0  }
   0x2 LB: > { %s23_s15 = sadd.s32 1, %s1099_s13  ;;  %p891_p0 = scmp.ge.s32.totalorder %s1103_s14, 1  ;;  %s1103_s14 = sphi %s1131_s14, %s14_s14   ;;  %s1099_s13 = sphi %s1129_s13, %s1285_s13   ;;  %s1095_s12 = sphi %s1127_s12, %s1284_s12  }
   0x3   : > { %p24_p1 = scmp.ge.s32.totalorder %s23_s15, 2  ;;  %p174_p2 = scmp.lt.s32.totalorder %s1103_s14, 3 }
   0x5   : > { %s1287_s15 = smov (%p24_p1, %s23_s15), 0  ;;  %p175_p3 = pnand %p891_p0, %p174_p2 }
   0x6   : > { %v1038_v0 = vld [vmem:[%s1281_s1 + $0x40] sm:$0xff] (!%p175_p3)   ;;  %v1042_v4 = vld [vmem:[%s1281_s1 + $0x48] sm:$0xff] (!%p175_p3)   ;;  %v1046_v8 = vld [vmem:[%s1281_s1 + $0x50] sm:$0xff] (!%p175_p3)   ;;  %s892_s23 = sshll.u32 (!%p175_p3), %s1095_s12, 1  ;;  %v1105_v34 = vmov (!%p175_p3), 0.0   ;;  %vm1106_vm0 = vmmov (!%p175_p3), 0  }
   0x7   : > { %178 = sbr.rel (%p175_p3) target bundleno = 291 (0x123), region = 28  ;;  %v1039_v1 = vld [vmem:[%s1281_s1 + $0xc0] sm:$0xff] (!%p175_p3)   ;;  %950 = vmatprep.subr.bf16.mxu0 (!%p175_p3), %v1038_v0  ;;  %v1043_v5 = vld [vmem:[%s1281_s1 + $0xc8] sm:$0xff] (!%p175_p3)   ;;  %v1047_v9 = vld [vmem:[%s1281_s1 + $0xd0] sm:$0xff] (!%p175_p3)   ;;  %p223_p4 = scmp.lt.s32.totalorder (!%p175_p3), %s892_s23, 3  ;;  %vm574_vm1 = vcmask (!%p175_p3), 523264  }
   0x8   : > { %v1040_v2 = vld [vmem:[%s1281_s1] sm:$0xff] (!%p175_p3)   ;;  %972 = vmatprep.subr.bf16.mxu1 (!%p175_p3), %v1039_v1  ;;  %v1044_v6 = vld [vmem:[%s1281_s1 + $0x8] sm:$0xff] (!%p175_p3)   ;;  %v1048_v10 = vld [vmem:[%s1281_s1 + $0x10] sm:$0xff] (!%p175_p3)   ;;  %p248_p5 = scmp.lt.s32.totalorder (!%p175_p3), %s1095_s12, 1 }
   0x9   : > { %v1041_v3 = vld [vmem:[%s1281_s1 + $0x80] sm:$0xff] (!%p175_p3)   ;;  %951 = vmatpush3.bf16.msra.mxu0 (!%p175_p3), %v1040_v2  ;;  %v1045_v7 = vld [vmem:[%s1281_s1 + $0x88] sm:$0xff] (!%p175_p3)   ;;  %v1049_v11 = vld [vmem:[%s1281_s1 + $0x90] sm:$0xff] (!%p175_p3)  }
   0xa   : > { %973 = vmatpush3.bf16.msra.mxu1 (!%p175_p3), %v1041_v3  ;;  %952 = vmatprep.subr.bf16.mxu0 (!%p175_p3), %v1042_v4  ;;  %v1050_v12 = vld [vmem:[%s1281_s1 + $0x58] sm:$0xff] (!%p175_p3)   ;;  %v1054_v16 = vld [vmem:[%s1281_s1 + $0x60] sm:$0xff] (!%p175_p3)   ;;  %v1058_v20 = vld [vmem:[%s1281_s1 + $0x68] sm:$0xff] (!%p175_p3)  }
   0xb   : > { %974 = vmatprep.subr.bf16.mxu1 (!%p175_p3), %v1043_v5  ;;  %v1051_v13 = vld [vmem:[%s1281_s1 + $0xd8] sm:$0xff] (!%p175_p3)   ;;  %v1055_v17 = vld [vmem:[%s1281_s1 + $0xe0] sm:$0xff] (!%p175_p3)   ;;  %v1059_v21 = vld [vmem:[%s1281_s1 + $0xe8] sm:$0xff] (!%p175_p3)  }
   0xc   : > { %v1052_v14 = vld [vmem:[%s1281_s1 + $0x18] sm:$0xff] (!%p175_p3)   ;;  %v1056_v18 = vld [vmem:[%s1281_s1 + $0x20] sm:$0xff] (!%p175_p3)   ;;  %v1060_v22 = vld [vmem:[%s1281_s1 + $0x28] sm:$0xff] (!%p175_p3)  }
   0xd   : > { %953 = vmatpush3.bf16.msra.mxu0 (!%p175_p3), %v1044_v6  ;;  %v1053_v15 = vld [vmem:[%s1281_s1 + $0x98] sm:$0xff] (!%p175_p3)   ;;  %v1057_v19 = vld [vmem:[%s1281_s1 + $0xa0] sm:$0xff] (!%p175_p3)   ;;  %v1061_v23 = vld [vmem:[%s1281_s1 + $0xa8] sm:$0xff] (!%p175_p3)   ;;  %v717_v6 = vlaneseq (!%p175_p3) }
   0xe   : > { %975 = vmatpush3.bf16.msra.mxu1 %v1045_v7  ;;  %954 = vmatprep.subr.bf16.mxu0 %v1046_v8  ;;  %s1289_s23 = smov (!%p223_p4, %s892_s23), 3  ;;  %v1062_v24 = vld [vmem:[%s1281_s1 + $0x70] sm:$0xff]   ;;  %v1066_v28 = vld [vmem:[%s1281_s1 + $0x78] sm:$0xff]   ;;  %v1076_v37 = vld [vmem:[%s1281_s1 + $0x100] sm:$0xff]   ;;  %s1291_s12 = smov (!%p248_p5, %s1095_s12), 1 }
   0xf   : > { %976 = vmatprep.subr.bf16.mxu1 %v1047_v9  ;;  %v1063_v25 = vld [vmem:[%s1281_s1 + $0xf0] sm:$0xff]   ;;  %s1011_s24 = smul.u32 20, %s1289_s23  ;;  %v1067_v29 = vld [vmem:[%s1281_s1 + $0xf8] sm:$0xff]   ;;  %v1077_v38 = vld [vmem:[%s1281_s1 + $0x108] sm:$0xff]   ;;  %s895_s26 = sshll.u32 %s1289_s23, 2 }
  0x10   : > { %v1064_v26 = vld [vmem:[%s1281_s1 + $0x30] sm:$0xff]   ;;  %v1068_v30 = vld [vmem:[%s1281_s1 + $0x38] sm:$0xff]   ;;  %s244_s29 = scalar_lea.vmem %s1282_s2, %s895_s26  ;;  %s896_s23 = sshll.u32 %s1291_s12, 3 }
  0x11   : > { %955 = vmatpush3.bf16.msra.mxu0 %v1048_v10  ;;  %v1065_v27 = vld [vmem:[%s1281_s1 + $0xb0] sm:$0xff]   ;;  %s229_s8 = scalar_lea.vmem %s1280_s0, %s1011_s24  ;;  %v1069_v31 = vld [vmem:[%s1281_s1 + $0xb8] sm:$0xff]   ;;  %s253_s5 = scalar_lea.vmem %s1283_s3, %s896_s23 }
  0x12   : > { %977 = vmatpush3.bf16.msra.mxu1 %v1049_v11  ;;  %956 = vmatprep.subr.bf16.mxu0 %v1050_v12  ;;  %v1070_v32 = vld [vmem:[%s229_s8] ss:$20 sps:$4 sm:$0xff]   ;;  %v1072_v33 = vld [vmem:[%s229_s8 + $0x4] ss:$20 sps:$4 sm:$0xff]   ;;  %v1073_v35 = vld [vmem:[%s229_s8 + $0x8] ss:$20 sps:$4 sm:$0xff]  }
  0x13   : > { %978 = vmatprep.subr.bf16.mxu1 %v1051_v13  ;;  %v1075_v36 = vld [vmem:[%s229_s8 + $0xc] ss:$20 sps:$4 sm:$0xff]   ;;  %610 = vmatprep.mubr.bf16.mxu0 %v1072_v33  ;;  %v1078_v39 = vld [vmem:[%s1281_s1 + $0x110] sm:$0xff]   ;;  %v1079_v40 = vld [vmem:[%s1281_s1 + $0x118] sm:$0xff]   ;;  %v718_v11 = vshrl.u32 %v717_v6, 7 }
  0x14   : > { %651 = vmatprep.mubr.bf16.mxu1 %v1075_v36  ;;  %v1080_v41 = vld [vmem:[%s229_s8 + $0x10] ss:$20 sps:$4 sm:$0xff]  }
  0x15   : > { %957 = vmatpush3.bf16.msra.mxu0 %v1052_v14  ;;  %vm720_vm2 = vcmp.eq.s32.totalorder %v718_v11, 1  ;;  %vm719_vm3 = vcmp.eq.s32.totalorder %v718_v11, 0 }
  0x16   : > { %979 = vmatpush3.bf16.msra.mxu1 %v1053_v15  ;;  %958 = vmatprep.subr.bf16.mxu0 %v1054_v16 }
  0x17   : > { %980 = vmatprep.subr.bf16.mxu1 %v1055_v17 }
  0x19   : > { %959 = vmatpush3.bf16.msra.mxu0 %v1056_v18 }
  0x1a   : > { %981 = vmatpush3.bf16.msra.mxu1 %v1057_v19  ;;  %960 = vmatprep.subr.bf16.mxu0 %v1058_v20 }
  0x1b   : > { %982 = vmatprep.subr.bf16.mxu1 %v1059_v21 }
  0x1d   : > { %961 = vmatpush3.bf16.msra.mxu0 %v1060_v22 }
  0x1e   : > { %983 = vmatpush3.bf16.msra.mxu1 %v1061_v23  ;;  %962 = vmatprep.subr.bf16.mxu0 %v1062_v24 }
  0x1f   : > { %984 = vmatprep.subr.bf16.mxu1 %v1063_v25 }
  0x21   : > { %963 = vmatpush3.bf16.msra.mxu0 %v1064_v26 }
  0x22   : > { %985 = vmatpush3.bf16.msra.mxu1 %v1065_v27  ;;  %964 = vmatprep.subr.bf16.mxu0 %v1066_v28 }
  0x23   : > { %986 = vmatprep.subr.bf16.mxu1 %v1067_v29 }
  0x25   : > { %965 = vmatpush3.bf16.msra.mxu0 %v1068_v30 }
  0x26   : > { %987 = vmatpush3.bf16.msra.mxu1 %v1069_v31  ;;  %999 = vmatprep.subr.bf16.mxu0 %v1105_v34 }
  0x28   : > { %611 = vmatmul.mubr.bf16.vlgmr.msra.gmra.mrb[0].mxu0 %v1070_v32 }
  0x29   : > { %652 = vmatmul.mubr.bf16.vlgmr.msra.gmra.mrb[0].mxu1 %v1073_v35  ;;  %1000 = vmatpush3.bf16.msra.mxu0 %v1076_v37 }
  0x2a   : > { %1001 = vmatprep.subr.bf16.mxu0 %v1105_v34  ;;  %1007 = vmatprep.mubr.msk.bf16.mxu0 %vm1106_vm0, %v1105_v34 }
  0x2d   : > { %1002 = vmatpush3.bf16.msra.mxu0 %v1077_v38 }
  0x2e   : > { %1003 = vmatprep.subr.bf16.mxu0 %v1105_v34 }
  0x31   : > { %1004 = vmatpush3.bf16.msra.mxu0 %v1078_v39 }
  0x32   : > { %1005 = vmatprep.subr.bf16.mxu0 %v1105_v34 }
  0x35   : > { %1006 = vmatpush3.bf16.msra.mxu0 %v1079_v40 }
  0x38   : > { %1008 = vmatmul.mubr.msk.bf16.vlgmr.msra.gmra.mrb[4].mxu0 %vm574_vm1, %v1080_v41 }
  0xfb   : > { %v966_v42 = vpop.f32.mrb[0].mxu0 }
  0xfc   : > { %v988_v43 = vpop.f32.mrb[0].mxu1  ;;  %v967_v44 = vpop.f32.mrb[1].mxu0 }
  0xfd   : > { %v968_v45 = vadd.f32 %v967_v44, %v966_v42  ;;  %v989_v46 = vpop.f32.mrb[1].mxu1  ;;  %v969_v47 = vpop.f32.mrb[2].mxu0 }
  0xfe   : > { %v990_v48 = vadd.f32 %v989_v46, %v988_v43  ;;  %v991_v49 = vpop.f32.mrb[2].mxu1  ;;  %v970_v50 = vpop.f32.mrb[3].mxu0 }
  0xff   : > { %v971_v51 = vadd.f32 %v970_v50, %v969_v47  ;;  %v992_v52 = vpop.f32.mrb[3].mxu1 }
 0x100   : > { %v993_v53 = vadd.f32 %v992_v52, %v991_v49  ;;  %v654_v54 = vadd.f32 %v990_v48, %v968_v45 }
 0x102   : > { %v657_v55 = vadd.f32 %v993_v53, %v971_v51 }
 0x10b   : > { %v694_v56 = vpop.f32.mrb[4].mxu0 }
 0x10c   : > { %v695_v57 = vadd.f32 %v694_v56, %v654_v54  ;;  %v1009_v58 = vpop.f32.mrb[5].mxu0 }
 0x10d   : > { %v697_v59 = vpop.f32.mrb[6].mxu0 }
 0x10e   : > { %v698_v60 = vadd.f32 %v697_v59, %v657_v55  ;;  %v1010_v61 = vpop.f32.mrb[7].mxu0  ;;  %v708_v62 = vmul.f32 %v695_v57, %v695_v57 }
 0x110   : > { %v701_v63 = vadd.f32 %v698_v60, %v695_v57  ;;  %v709_v0 = vmul.f32 %v698_v60, %v698_v60  ;;  %v948_v1 = vpack.c.bf16 %v698_v60, %v695_v57 }
 0x112   : > { %v702_v2 = vrot.slane %v701_v63, 4  ;;  %v710_v3 = vadd.f32 %v709_v0, %v708_v62  ;;  %949 = vst [vmem:[%s244_s29] sm:$0xff] %v948_v1  }
 0x114   : > { %v703_v4 = vadd.f32 %v702_v2, %v701_v63  ;;  %v711_v5 = vrot.slane %v710_v3, 4 }
 0x116   : > { %v704_v7 = vrot.slane %v703_v4, 2  ;;  %v712_v8 = vadd.f32 %v711_v5, %v710_v3 }
 0x118   : > { %v705_v9 = vadd.f32 %v704_v7, %v703_v4  ;;  %v713_v10 = vrot.slane %v712_v8, 2 }
 0x11a   : > { %v714_v12 = vadd.f32 %v713_v10, %v712_v8  ;;  %v706_v13 = vrot.slane %v705_v9, 1 }
 0x11c   : > { %v715_v14 = vrot.slane %v714_v12, 1  ;;  %v707_v16 = vadd.f32 %v706_v13, %v705_v9 }
 0x11e   : > { %v716_v15 = vadd.f32 %v715_v14, %v714_v12 }
 0x120   : > { %v721_v17 = vsel %vm720_vm2, %v716_v15, 0.0 }
 0x121   : > { %v722_v18 = vsel %vm719_vm3, %v707_v16, %v721_v17 }
 0x122   : > { %723 = vst [vmem:[%s253_s5] sm:$0xff] %v722_v18 }
 0x123 PF: > { %s14_s14 = sadd.s32 1, %s1103_s14   ;;  %s1284_s12 = smov %s1099_s13 }
 0x124   : > { %p11_p6 = scmp.ge.s32.totalorder %s14_s14, 4   ;;  %s1285_s13 = smov %s1287_s15 }
 0x126   :  { %13 = sbr.rel (!%p11_p6) target bundleno = 2 (0x2), region = 73 }

// kernel: _lambda_.12
= control target key start
LH: loop header
LB: loop body
LE: loop exit
PB: predicated region body
PF: predicated region fallthrough
CT: control target
= control target key end

     0   :  { %s836_s12 = smov 0   ;;  %s838_s13 = smov 0   ;;  %s899_s0 = inlined_call_operand.vmem [shape: bf16[4,32,256], index: 0, kind: input, shape index: {}]   ;;  %s900_s1 = inlined_call_operand.vmem [shape: bf16[4,256,128], index: 1, kind: input, shape index: {}]   ;;  %s901_s2 = inlined_call_operand.vmem [shape: bf16[4,32,128], index: 2, kind: output, shape index: {0}]   ;;  %s902_s3 = inlined_call_operand.vmem [shape: f32[4,1,8,128], index: 3, kind: output, shape index: {1}]  }
   0x1   :  { %s840_s14 = smov 0  }
   0x2 LB: > { %s26_s15 = sadd.s32 1, %s810_s13  ;;  %p650_p0 = scmp.ge.s32.totalorder %s814_s14, 1  ;;  %s814_s14 = sphi %s840_s14, %s14_s14   ;;  %s810_s13 = sphi %s838_s13, %s904_s13   ;;  %s806_s12 = sphi %s836_s12, %s903_s12  }
   0x3   : > { %p28_p1 = scmp.ge.s32.totalorder %s26_s15, 4  ;;  %p174_p2 = scmp.lt.s32.totalorder %s814_s14, 5 }
   0x5   : > { %s906_s15 = smov (%p28_p1, %s26_s15), 0  ;;  %p175_p3 = pnand %p650_p0, %p174_p2 }
   0x6   : > { %p220_p4 = scmp.lt.s32.totalorder (!%p175_p3), %s806_s12, 3  ;;  %v476_v47 = vlaneseq (!%p175_p3) }
   0x7   : > { %178 = sbr.rel (%p175_p3) target bundleno = 290 (0x122), region = 28 }
   0x8   : > { %v477_v52 = vshrl.u32 (!%p175_p3), %v476_v47, 7 }
   0xa   : > { %vm479_vm0 = vcmp.eq.s32.totalorder (!%p175_p3), %v477_v52, 1  ;;  %vm478_vm1 = vcmp.eq.s32.totalorder (!%p175_p3), %v477_v52, 0 }
   0xe   : > { %s908_s12 = smov (!%p220_p4, %s806_s12), 3 }
   0xf   : > { %s685_s16 = sshll.u32 %s908_s12, 7  ;;  %s684_s20 = sshll.u32 %s908_s12, 5 }
  0x10   : > { %s860_s19 = scalar_lea.vmem %s900_s1, %s685_s16  ;;  %s228_s23 = scalar_lea.vmem %s899_s0, %s684_s20 }
  0x11   : > { %v770_v0 = vld [vmem:[%s860_s19 + $0x40] sm:$0xff]   ;;  %v772_v2 = vld [vmem:[%s860_s19 + $0x48] sm:$0xff]   ;;  %v774_v4 = vld [vmem:[%s860_s19 + $0x50] sm:$0xff]   ;;  %s686_s24 = sshll.u32 %s908_s12, 4  ;;  %s657_s28 = sshll.u32 %s908_s12, 3 }
  0x12   : > { %v771_v1 = vld [vmem:[%s860_s19] sm:$0xff]   ;;  %702 = vmatprep.subr.bf16.mxu0 %v770_v0  ;;  %730 = vmatprep.subr.bf16.mxu1 %v770_v0  ;;  %v773_v3 = vld [vmem:[%s860_s19 + $0x8] sm:$0xff]   ;;  %v775_v5 = vld [vmem:[%s860_s19 + $0x10] sm:$0xff]   ;;  %s243_s27 = scalar_lea.vmem %s901_s2, %s686_s24  ;;  %s251_s4 = scalar_lea.vmem %s902_s3, %s657_s28 }
  0x13   : > { %703 = vmatpush3.bf16.msra.mxu0 %v771_v1  ;;  %738 = vmatpush3.bf16.msra.mxu1 %v771_v1  ;;  %v776_v6 = vld [vmem:[%s860_s19 + $0x58] sm:$0xff]   ;;  %v778_v8 = vld [vmem:[%s860_s19 + $0x60] sm:$0xff]   ;;  %v780_v10 = vld [vmem:[%s860_s19 + $0x68] sm:$0xff]  }
  0x14   : > { %704 = vmatprep.subr.bf16.mxu0 %v772_v2  ;;  %731 = vmatprep.subr.bf16.mxu1 %v772_v2  ;;  %v777_v7 = vld [vmem:[%s860_s19 + $0x18] sm:$0xff]   ;;  %v779_v9 = vld [vmem:[%s860_s19 + $0x20] sm:$0xff]   ;;  %v781_v13 = vld [vmem:[%s860_s19 + $0x28] sm:$0xff]  }
  0x15   : > { %v788_v11 = vld [vmem:[%s228_s23 + $0x4] ss:$8 sps:$4 sm:$0xff]   ;;  %v791_v12 = vld [vmem:[%s228_s23 + $0x14] ss:$8 sps:$4 sm:$0xff]   ;;  %v786_v18 = vld [vmem:[%s228_s23] ss:$8 sps:$4 sm:$0xff]  }
  0x16   : > { %v782_v14 = vld [vmem:[%s860_s19 + $0x70] sm:$0xff]   ;;  %437 = vmatprep.mubr.bf16.mxu0 %v788_v11  ;;  %445 = vmatprep.mubr.bf16.mxu1 %v791_v12  ;;  %v784_v16 = vld [vmem:[%s860_s19 + $0x78] sm:$0xff]  }
  0x17   : > { %705 = vmatpush3.bf16.msra.mxu0 %v773_v3  ;;  %739 = vmatpush3.bf16.msra.mxu1 %v773_v3  ;;  %v783_v15 = vld [vmem:[%s860_s19 + $0x30] sm:$0xff]   ;;  %v785_v17 = vld [vmem:[%s860_s19 + $0x38] sm:$0xff]  }
  0x18   : > { %706 = vmatprep.subr.bf16.mxu0 %v774_v4  ;;  %732 = vmatprep.subr.bf16.mxu1 %v774_v4  ;;  %v789_v19 = vld [vmem:[%s228_s23 + $0x10] ss:$8 sps:$4 sm:$0xff]  }
  0x1b   : > { %707 = vmatpush3.bf16.msra.mxu0 %v775_v5  ;;  %740 = vmatpush3.bf16.msra.mxu1 %v775_v5 }
  0x1c   : > { %708 = vmatprep.subr.bf16.mxu0 %v776_v6  ;;  %733 = vmatprep.subr.bf16.mxu1 %v776_v6 }
  0x1f   : > { %709 = vmatpush3.bf16.msra.mxu0 %v777_v7  ;;  %741 = vmatpush3.bf16.msra.mxu1 %v777_v7 }
  0x20   : > { %710 = vmatprep.subr.bf16.mxu0 %v778_v8  ;;  %734 = vmatprep.subr.bf16.mxu1 %v778_v8 }
  0x23   : > { %711 = vmatpush3.bf16.msra.mxu0 %v779_v9  ;;  %742 = vmatpush3.bf16.msra.mxu1 %v779_v9 }
  0x24   : > { %712 = vmatprep.subr.bf16.mxu0 %v780_v10  ;;  %735 = vmatprep.subr.bf16.mxu1 %v780_v10 }
  0x27   : > { %713 = vmatpush3.bf16.msra.mxu0 %v781_v13  ;;  %743 = vmatpush3.bf16.msra.mxu1 %v781_v13 }
  0x28   : > { %714 = vmatprep.subr.bf16.mxu0 %v782_v14  ;;  %736 = vmatprep.subr.bf16.mxu1 %v782_v14 }
  0x2b   : > { %715 = vmatpush3.bf16.msra.mxu0 %v783_v15  ;;  %744 = vmatpush3.bf16.msra.mxu1 %v783_v15 }
  0x2c   : > { %716 = vmatprep.subr.bf16.mxu0 %v784_v16  ;;  %737 = vmatprep.subr.bf16.mxu1 %v784_v16 }
  0x2f   : > { %717 = vmatpush3.bf16.msra.mxu0 %v785_v17  ;;  %745 = vmatpush3.bf16.msra.mxu1 %v785_v17 }
  0x32   : > { %438 = vmatmul.mubr.bf16.vlgmr.msra.gmra.mrb[0].mxu0 %v786_v18  ;;  %446 = vmatmul.mubr.bf16.vlgmr.msra.gmra.mrb[0].mxu1 %v789_v19 }
 0x105   : > { %v718_v20 = vpop.f32.mrb[0].mxu0  ;;  %v724_v21 = vpop.f32.mrb[0].mxu1 }
 0x106   : > { %v719_v22 = vpop.f32.mrb[1].mxu0  ;;  %v725_v23 = vpop.f32.mrb[1].mxu1 }
 0x107   : > { %v720_v24 = vadd.f32 %v719_v22, %v718_v20  ;;  %v721_v25 = vpop.f32.mrb[2].mxu0  ;;  %v726_v26 = vadd.f32 %v725_v23, %v724_v21  ;;  %v727_v27 = vpop.f32.mrb[2].mxu1 }
 0x108   : > { %v722_v28 = vpop.f32.mrb[3].mxu0  ;;  %v728_v29 = vpop.f32.mrb[3].mxu1 }
 0x109   : > { %v723_v30 = vadd.f32 %v722_v28, %v721_v25  ;;  %v729_v31 = vadd.f32 %v728_v29, %v727_v27  ;;  %v463_v32 = vmul.f32 %v720_v24, %v720_v24  ;;  %v465_v33 = vmul.f32 %v726_v26, %v726_v26 }
 0x10b   : > { %v454_v34 = vadd.f32 %v723_v30, %v720_v24  ;;  %v464_v35 = vmul.f32 %v723_v30, %v723_v30  ;;  %v694_v36 = vpack.c.bf16 %v723_v30, %v720_v24  ;;  %v699_v37 = vpack.c.bf16 %v729_v31, %v726_v26 }
 0x10c   : > { %v466_v41 = vmul.f32 %v729_v31, %v729_v31 }
 0x10d   : > { %v467_v38 = vadd.f32 %v464_v35, %v463_v32  ;;  %695 = vst [vmem:[%s243_s27] sm:$0xff] %v694_v36   ;;  %v455_v39 = vadd.f32 %v726_v26, %v454_v34  ;;  %701 = vst [vmem:[%s243_s27 + $0x8] sm:$0xff] %v699_v37  }
 0x10f   : > { %v456_v40 = vadd.f32 %v729_v31, %v455_v39  ;;  %v468_v42 = vadd.f32 %v467_v38, %v465_v33 }
 0x111   : > { %v457_v43 = vrot.slane %v456_v40, 4  ;;  %v469_v44 = vadd.f32 %v468_v42, %v466_v41 }
 0x113   : > { %v458_v45 = vadd.f32 %v457_v43, %v456_v40  ;;  %v470_v46 = vrot.slane %v469_v44, 4 }
 0x115   : > { %v459_v48 = vrot.slane %v458_v45, 2  ;;  %v471_v49 = vadd.f32 %v470_v46, %v469_v44 }
 0x117   : > { %v460_v50 = vadd.f32 %v459_v48, %v458_v45  ;;  %v472_v51 = vrot.slane %v471_v49, 2 }
 0x119   : > { %v473_v53 = vadd.f32 %v472_v51, %v471_v49  ;;  %v461_v54 = vrot.slane %v460_v50, 1 }
 0x11b   : > { %v474_v55 = vrot.slane %v473_v53, 1  ;;  %v462_v57 = vadd.f32 %v461_v54, %v460_v50 }
 0x11d   : > { %v475_v56 = vadd.f32 %v474_v55, %v473_v53 }
 0x11f   : > { %v480_v58 = vsel %vm479_vm0, %v475_v56, 0.0 }
 0x120   : > { %v481_v59 = vsel %vm478_vm1, %v462_v57, %v480_v58 }
 0x121   : > { %482 = vst [vmem:[%s251_s4] sm:$0xff] %v481_v59 }
 0x122 PF: > { %s14_s14 = sadd.s32 1, %s814_s14   ;;  %s903_s12 = smov %s810_s13 }
 0x123   : > { %p11_p5 = scmp.ge.s32.totalorder %s14_s14, 6   ;;  %s904_s13 = smov %s906_s15 }
 0x125   :  { %13 = sbr.rel (!%p11_p5) target bundleno = 2 (0x2), region = 73 }

// kernel: _lambda_.13
= control target key start
LH: loop header
LB: loop body
LE: loop exit
PB: predicated region body
PF: predicated region fallthrough
CT: control target
= control target key end

     0   :  { %s1114_s12 = smov 0   ;;  %s1116_s13 = smov 0   ;;  %s1237_s0 = inlined_call_operand.vmem [shape: bf16[1,128,288], index: 0, kind: input, shape index: {}]   ;;  %s1238_s1 = inlined_call_operand.vmem [shape: bf16[1,288,128], index: 1, kind: input, shape index: {}]   ;;  %s1239_s2 = inlined_call_operand.vmem [shape: bf16[1,128,128], index: 2, kind: output, shape index: {0}]   ;;  %s1240_s3 = inlined_call_operand.vmem [shape: f32[1,2,8,128], index: 3, kind: output, shape index: {1}]  }
   0x1   :  { %s1118_s14 = smov 0  }
   0x2 LB: > { %s23_s15 = sadd.s32 1, %s1088_s13  ;;  %p856_p0 = scmp.ge.s32.totalorder %s1092_s14, 1  ;;  %s1092_s14 = sphi %s1118_s14, %s14_s14   ;;  %s1088_s13 = sphi %s1116_s13, %s1242_s13   ;;  %s1084_s12 = sphi %s1114_s12, %s1241_s12  }
   0x3   : > { %p24_p1 = scmp.ge.s32.totalorder %s23_s15, 2  ;;  %p174_p2 = scmp.lt.s32.totalorder %s1092_s14, 3 }
   0x5   : > { %s1244_s15 = smov (%p24_p1, %s23_s15), 0  ;;  %p175_p3 = pnand %p856_p0, %p174_p2 }
   0x6   : > { %v1036_v0 = vld [vmem:[%s1238_s1 + $0x40] sm:$0xff] (!%p175_p3)   ;;  %s857_s18 = sshll.u32 (!%p175_p3), %s1084_s12, 3  ;;  %v1038_v2 = vld [vmem:[%s1238_s1 + $0x48] sm:$0xff] (!%p175_p3)   ;;  %v1040_v4 = vld [vmem:[%s1238_s1 + $0x50] sm:$0xff] (!%p175_p3)   ;;  %vm475_vm0 = vcmask (!%p175_p3), 261120   ;;  %p248_p5 = scmp.lt.s32.totalorder (!%p175_p3), %s1084_s12, 1 }
   0x7   : > { %178 = sbr.rel (%p175_p3) target bundleno = 297 (0x129), region = 28  ;;  %v1037_v1 = vld [vmem:[%s1238_s1] sm:$0xff] (!%p175_p3)   ;;  %937 = vmatprep.subr.bf16.mxu0 (!%p175_p3), %v1036_v0  ;;  %995 = vmatprep.subr.bf16.mxu1 (!%p175_p3), %v1036_v0  ;;  %p223_p4 = scmp.lt.s32.totalorder (!%p175_p3), %s857_s18, 15  ;;  %v1039_v3 = vld [vmem:[%s1238_s1 + $0x8] sm:$0xff] (!%p175_p3)   ;;  %v1041_v5 = vld [vmem:[%s1238_s1 + $0x10] sm:$0xff] (!%p175_p3)  }
   0x8   : > { %938 = vmatpush3.bf16.msra.mxu0 (!%p175_p3), %v1037_v1  ;;  %1003 = vmatpush3.bf16.msra.mxu1 (!%p175_p3), %v1037_v1  ;;  %v1042_v6 = vld [vmem:[%s1238_s1 + $0x58] sm:$0xff] (!%p175_p3)   ;;  %v1044_v8 = vld [vmem:[%s1238_s1 + $0x60] sm:$0xff] (!%p175_p3)   ;;  %v1046_v10 = vld [vmem:[%s1238_s1 + $0x68] sm:$0xff] (!%p175_p3)  }
   0x9   : > { %939 = vmatprep.subr.bf16.mxu0 (!%p175_p3), %v1038_v2  ;;  %996 = vmatprep.subr.bf16.mxu1 (!%p175_p3), %v1038_v2  ;;  %v1043_v7 = vld [vmem:[%s1238_s1 + $0x18] sm:$0xff] (!%p175_p3)   ;;  %v1045_v9 = vld [vmem:[%s1238_s1 + $0x20] sm:$0xff] (!%p175_p3)   ;;  %v1047_v13 = vld [vmem:[%s1238_s1 + $0x28] sm:$0xff] (!%p175_p3)  }
   0xa   : > { %v1048_v14 = vld [vmem:[%s1238_s1 + $0x70] sm:$0xff] (!%p175_p3)   ;;  %v1050_v16 = vld [vmem:[%s1238_s1 + $0x78] sm:$0xff] (!%p175_p3)   ;;  %v1058_v18 = vld [vmem:[%s1238_s1 + $0x80] sm:$0xff] (!%p175_p3)  }
   0xb   : > { %v1049_v15 = vld [vmem:[%s1238_s1 + $0x30] sm:$0xff] (!%p175_p3)   ;;  %v1051_v17 = vld [vmem:[%s1238_s1 + $0x38] sm:$0xff] (!%p175_p3)   ;;  %v1059_v22 = vld [vmem:[%s1238_s1 + $0x88] sm:$0xff] (!%p175_p3)  }
   0xc   : > { %940 = vmatpush3.bf16.msra.mxu0 (!%p175_p3), %v1039_v3  ;;  %1004 = vmatpush3.bf16.msra.mxu1 (!%p175_p3), %v1039_v3 }
   0xd   : > { %941 = vmatprep.subr.bf16.mxu0 (!%p175_p3), %v1040_v4  ;;  %997 = vmatprep.subr.bf16.mxu1 (!%p175_p3), %v1040_v4 }
   0xe   : > { %s1246_s18 = smov (!%p223_p4, %s857_s18), 15  ;;  %s1248_s12 = smov (!%p248_p5, %s1084_s12), 1 }
   0xf   : > { %s1011_s4 = smul.u32 12, %s1246_s18  ;;  %s860_s8 = sshll.u32 %s1246_s18, 2 }
  0x10   : > { %942 = vmatpush3.bf16.msra.mxu0 %v1041_v5  ;;  %1005 = vmatpush3.bf16.msra.mxu1 %v1041_v5  ;;  %s861_s18 = sshll.u32 %s1248_s12, 3 }
  0x11   : > { %943 = vmatprep.subr.bf16.mxu0 %v1042_v6  ;;  %998 = vmatprep.subr.bf16.mxu1 %v1042_v6  ;;  %s1168_s11 = scalar_lea.vmem %s1237_s0, %s1011_s4  ;;  %s253_s19 = scalar_lea.vmem %s1240_s3, %s861_s18 }
  0x12   : > { %v1054_v11 = vld [vmem:[%s1168_s11 + $0x4] ss:$12 sps:$4 sm:$0xff]   ;;  %v1057_v12 = vld [vmem:[%s1168_s11 + $0x4c] ss:$12 sps:$4 sm:$0xff]   ;;  %v1055_v20 = vld [vmem:[%s1168_s11 + $0x48] ss:$12 sps:$4 sm:$0xff]  }
  0x13   : > { %520 = vmatprep.mubr.bf16.mxu0 %v1054_v11  ;;  %544 = vmatprep.mubr.bf16.mxu1 %v1057_v12  ;;  %v1052_v19 = vld [vmem:[%s1168_s11] ss:$12 sps:$4 sm:$0xff]   ;;  %v1060_v21 = vld [vmem:[%s1168_s11 + $0x1c] ss:$12 sps:$4 sm:$0xff]   ;;  %v1063_v24 = vld [vmem:[%s1168_s11 + $0x18] ss:$12 sps:$4 sm:$0xff]  }
  0x14   : > { %944 = vmatpush3.bf16.msra.mxu0 %v1043_v7  ;;  %1006 = vmatpush3.bf16.msra.mxu1 %v1043_v7  ;;  %v1062_v23 = vld [vmem:[%s1168_s11 + $0x8] ss:$12 sps:$4 sm:$0xff]   ;;  %v1064_v25 = vld [vmem:[%s1168_s11 + $0x20] ss:$12 sps:$4 sm:$0xff]   ;;  %v1067_v27 = vld [vmem:[%s1168_s11 + $0x38] ss:$12 sps:$4 sm:$0xff]  }
  0x15   : > { %945 = vmatprep.subr.bf16.mxu0 %v1044_v8  ;;  %999 = vmatprep.subr.bf16.mxu1 %v1044_v8  ;;  %v1065_v26 = vld [vmem:[%s1168_s11 + $0x34] ss:$12 sps:$4 sm:$0xff]   ;;  %v1068_v28 = vld [vmem:[%s1168_s11 + $0x30] ss:$12 sps:$4 sm:$0xff]  }
  0x16   : > { %v1069_v29 = vld [vmem:[%s1168_s11 + $0x50] ss:$12 sps:$4 sm:$0xff]   ;;  %s1217_s11 = scalar_lea.vmem %s1239_s2, %s860_s8 }
  0x18   : > { %946 = vmatpush3.bf16.msra.mxu0 %v1045_v9  ;;  %1007 = vmatpush3.bf16.msra.mxu1 %v1045_v9 }
  0x19   : > { %947 = vmatprep.subr.bf16.mxu0 %v1046_v10  ;;  %1000 = vmatprep.subr.bf16.mxu1 %v1046_v10 }
  0x1c   : > { %948 = vmatpush3.bf16.msra.mxu0 %v1047_v13  ;;  %1008 = vmatpush3.bf16.msra.mxu1 %v1047_v13 }
  0x1d   : > { %949 = vmatprep.subr.bf16.mxu0 %v1048_v14  ;;  %1001 = vmatprep.subr.bf16.mxu1 %v1048_v14 }
  0x20   : > { %950 = vmatpush3.bf16.msra.mxu0 %v1049_v15  ;;  %1009 = vmatpush3.bf16.msra.mxu1 %v1049_v15 }
  0x21   : > { %951 = vmatprep.subr.bf16.mxu0 %v1050_v16  ;;  %1002 = vmatprep.subr.bf16.mxu1 %v1050_v16 }
  0x24   : > { %952 = vmatpush3.bf16.msra.mxu0 %v1051_v17  ;;  %1010 = vmatpush3.bf16.msra.mxu1 %v1051_v17 }
  0x25   : > { %983 = vmatprep.subr.bf16.mxu1 %v1058_v18 }
  0x27   : > { %521 = vmatmul.mubr.bf16.vlgmr.msra.gmra.mrb[0].mxu0 %v1052_v19  ;;  %545 = vmatmul.mubr.bf16.vlgmr.msra.gmra.mrb[0].mxu1 %v1055_v20 }
  0x28   : > { %984 = vmatpush3.bf16.msra.mxu1 %v1058_v18  ;;  %528 = vmatprep.mubr.bf16.mxu0 %v1060_v21 }
  0x29   : > { %985 = vmatprep.subr.bf16.mxu1 %v1059_v22  ;;  %987 = vmatprep.mubr.msk.bf16.mxu1 %vm475_vm0, %v1062_v23 }
  0x2c   : > { %986 = vmatpush3.bf16.msra.mxu1 %v1059_v22 }
  0x2f   : > { %529 = vmatmul.mubr.bf16.gmra.mrb[4].mxu0 %v1063_v24  ;;  %988 = vmatmul.mubr.msk.bf16.vlgmr.msra.gmra.mrb[4].mxu1 %vm475_vm0, %v1064_v25 }
  0x30   : > { %536 = vmatprep.mubr.bf16.mxu0 %v1065_v26  ;;  %991 = vmatprep.mubr.msk.bf16.mxu1 %vm475_vm0, %v1067_v27 }
  0x37   : > { %537 = vmatmul.mubr.bf16.gmra.mrb[8].mxu0 %v1068_v28  ;;  %992 = vmatmul.mubr.msk.bf16.gmra.mrb[8].mxu1 %vm475_vm0, %v1069_v29 }
  0xfa   : > { %v953_v30 = vpop.f32.mrb[0].mxu0  ;;  %v971_v31 = vpop.f32.mrb[0].mxu1 }
  0xfb   : > { %v954_v32 = vpop.f32.mrb[1].mxu0  ;;  %v972_v33 = vpop.f32.mrb[1].mxu1 }
  0xfc   : > { %v955_v34 = vadd.f32 %v954_v32, %v953_v30  ;;  %v973_v35 = vadd.f32 %v972_v33, %v971_v31  ;;  %v956_v36 = vpop.f32.mrb[2].mxu0  ;;  %v974_v37 = vpop.f32.mrb[2].mxu1 }
  0xfd   : > { %v957_v38 = vpop.f32.mrb[3].mxu0  ;;  %v975_v39 = vpop.f32.mrb[3].mxu1 }
  0xfe   : > { %v958_v40 = vadd.f32 %v957_v38, %v956_v36  ;;  %v976_v41 = vadd.f32 %v975_v39, %v974_v37 }
 0x102   : > { %v959_v42 = vpop.f32.mrb[4].mxu0  ;;  %v989_v43 = vpop.f32.mrb[4].mxu1 }
 0x103   : > { %v960_v44 = vpop.f32.mrb[5].mxu0  ;;  %v587_v45 = vpop.f32.mrb[5].mxu1 }
 0x104   : > { %v961_v46 = vadd.f32 %v960_v44, %v959_v42  ;;  %v588_v47 = vadd.f32 %v955_v34, %v587_v45  ;;  %v962_v48 = vpop.f32.mrb[6].mxu0  ;;  %v990_v49 = vpop.f32.mrb[6].mxu1 }
 0x105   : > { %v963_v50 = vpop.f32.mrb[7].mxu0  ;;  %v590_v51 = vpop.f32.mrb[7].mxu1 }
 0x106   : > { %v596_v52 = vadd.f32 %v989_v43, %v961_v46  ;;  %v964_v53 = vadd.f32 %v963_v50, %v962_v48  ;;  %v591_v54 = vadd.f32 %v958_v40, %v590_v51  ;;  %v631_v55 = vmul.f32 %v588_v47, %v588_v47 }
 0x108   : > { %v599_v56 = vadd.f32 %v990_v49, %v964_v53  ;;  %v618_v57 = vadd.f32 %v591_v54, %v588_v47  ;;  %v632_v58 = vmul.f32 %v591_v54, %v591_v54  ;;  %v917_v59 = vpack.c.bf16 %v591_v54, %v588_v47 }
 0x109   : > { %v633_v60 = vmul.f32 %v596_v52, %v596_v52 }
 0x10a   : > { %v922_v61 = vpack.c.bf16 %v599_v56, %v596_v52  ;;  %v619_v62 = vadd.f32 %v618_v57, %v596_v52  ;;  %v639_v63 = vadd.f32 %v632_v58, %v631_v55  ;;  %v965_v0 = vpop.f32.mrb[8].mxu0  ;;  %v993_v1 = vpop.f32.mrb[8].mxu1  ;;  %918 = vst [vmem:[%s1217_s11] sm:$0xff] %v917_v59   ;;  %v634_v5 = vmul.f32 %v599_v56, %v599_v56 }
 0x10b   : > { %v612_v2 = vadd.f32 %v993_v1, %v973_v35  ;;  %v966_v3 = vpop.f32.mrb[9].mxu0  ;;  %v603_v4 = vpop.f32.mrb[9].mxu1  ;;  %v652_v35 = vlaneseq }
 0x10c   : > { %934 = vst [vmem:[%s1217_s11 + $0x8] sm:$0xff] %v922_v61   ;;  %v640_v6 = vadd.f32 %v639_v63, %v633_v60  ;;  %v967_v7 = vadd.f32 %v966_v3, %v965_v0  ;;  %v620_v8 = vadd.f32 %v619_v62, %v599_v56  ;;  %v968_v9 = vpop.f32.mrb[10].mxu0  ;;  %v994_v10 = vpop.f32.mrb[10].mxu1 }
 0x10d   : > { %v615_v11 = vadd.f32 %v994_v10, %v976_v41  ;;  %v969_v12 = vpop.f32.mrb[11].mxu0  ;;  %v606_v13 = vpop.f32.mrb[11].mxu1  ;;  %v637_v25 = vmul.f32 %v612_v2, %v612_v2  ;;  %v653_v40 = vshrl.u32 %v652_v35, 7 }
 0x10e   : > { %v604_v14 = vadd.f32 %v967_v7, %v603_v4  ;;  %v641_v15 = vadd.f32 %v640_v6, %v634_v5  ;;  %v970_v16 = vadd.f32 %v969_v12, %v968_v9 }
 0x10f   : > { %v932_v17 = vpack.c.bf16 %v615_v11, %v612_v2  ;;  %v638_v28 = vmul.f32 %v615_v11, %v615_v11  ;;  %vm655_vm1 = vcmp.eq.s32.totalorder %v653_v40, 1  ;;  %vm654_vm2 = vcmp.eq.s32.totalorder %v653_v40, 0 }
 0x110   : > { %v621_v18 = vadd.f32 %v620_v8, %v604_v14  ;;  %v635_v19 = vmul.f32 %v604_v14, %v604_v14  ;;  %v607_v20 = vadd.f32 %v970_v16, %v606_v13 }
 0x111   : > { %936 = vst [vmem:[%s1217_s11 + $0x18] sm:$0xff] %v932_v17  }
 0x112   : > { %v642_v21 = vadd.f32 %v641_v15, %v635_v19  ;;  %v622_v22 = vadd.f32 %v621_v18, %v607_v20  ;;  %v636_v23 = vmul.f32 %v607_v20, %v607_v20  ;;  %v927_v24 = vpack.c.bf16 %v607_v20, %v604_v14 }
 0x114   : > { %v623_v26 = vadd.f32 %v622_v22, %v612_v2  ;;  %v643_v27 = vadd.f32 %v642_v21, %v636_v23  ;;  %935 = vst [vmem:[%s1217_s11 + $0x10] sm:$0xff] %v927_v24  }
 0x116   : > { %v624_v29 = vadd.f32 %v623_v26, %v615_v11  ;;  %v644_v30 = vadd.f32 %v643_v27, %v637_v25 }
 0x118   : > { %v625_v31 = vrot.slane %v624_v29, 4  ;;  %v645_v32 = vadd.f32 %v644_v30, %v638_v28 }
 0x11a   : > { %v626_v33 = vadd.f32 %v625_v31, %v624_v29  ;;  %v646_v34 = vrot.slane %v645_v32, 4 }
 0x11c   : > { %v627_v36 = vrot.slane %v626_v33, 2  ;;  %v647_v37 = vadd.f32 %v646_v34, %v645_v32 }
 0x11e   : > { %v628_v38 = vadd.f32 %v627_v36, %v626_v33  ;;  %v648_v39 = vrot.slane %v647_v37, 2 }
 0x120   : > { %v649_v41 = vadd.f32 %v648_v39, %v647_v37  ;;  %v629_v42 = vrot.slane %v628_v38, 1 }
 0x122   : > { %v650_v43 = vrot.slane %v649_v41, 1  ;;  %v630_v45 = vadd.f32 %v629_v42, %v628_v38 }
 0x124   : > { %v651_v44 = vadd.f32 %v650_v43, %v649_v41 }
 0x126   : > { %v656_v46 = vsel %vm655_vm1, %v651_v44, 0.0 }
 0x127   : > { %v657_v47 = vsel %vm654_vm2, %v630_v45, %v656_v46 }
 0x128   : > { %658 = vst [vmem:[%s253_s19] sm:$0xff] %v657_v47 }
 0x129 PF: > { %s14_s14 = sadd.s32 1, %s1092_s14   ;;  %s1241_s12 = smov %s1088_s13 }
 0x12a   : > { %p11_p6 = scmp.ge.s32.totalorder %s14_s14, 4   ;;  %s1242_s13 = smov %s1244_s15 }
 0x12c   :  { %13 = sbr.rel (!%p11_p6) target bundleno = 2 (0x2), region = 73 }

// kernel: _lambda_.14
= control target key start
LH: loop header
LB: loop body
LE: loop exit
PB: predicated region body
PF: predicated region fallthrough
CT: control target
= control target key end

     0   :  { %s1020_s12 = smov 0   ;;  %s1022_s13 = smov 0   ;;  %s1098_s0 = inlined_call_operand.vmem [shape: bf16[4,128,128], index: 0, kind: input, shape index: {}]   ;;  %s1099_s1 = inlined_call_operand.vmem [shape: bf16[4,128,128], index: 1, kind: input, shape index: {}]   ;;  %s1100_s2 = inlined_call_operand.vmem [shape: bf16[4,128,128], index: 2, kind: output, shape index: {0}]   ;;  %s1101_s3 = inlined_call_operand.vmem [shape: f32[4,1,8,128], index: 3, kind: output, shape index: {1}]  }
   0x1   :  { %s1024_s14 = smov 0  }
   0x2 LB: > { %s26_s15 = sadd.s32 1, %s994_s13  ;;  %p764_p0 = scmp.ge.s32.totalorder %s998_s14, 1  ;;  %s998_s14 = sphi %s1024_s14, %s14_s14   ;;  %s994_s13 = sphi %s1022_s13, %s1103_s13   ;;  %s990_s12 = sphi %s1020_s12, %s1102_s12  }
   0x3   : > { %p28_p1 = scmp.ge.s32.totalorder %s26_s15, 4  ;;  %p173_p2 = scmp.lt.s32.totalorder %s998_s14, 5 }
   0x5   : > { %s1105_s15 = smov (%p28_p1, %s26_s15), 0  ;;  %p174_p3 = pnand %p764_p0, %p173_p2 }
   0x6   : > { %p218_p4 = scmp.lt.s32.totalorder (!%p174_p3), %s990_s12, 3 }
   0x7   : > { %177 = sbr.rel (%p174_p3) target bundleno = 312 (0x138), region = 28 }
   0xe   : > { %s1107_s12 = smov (!%p218_p4, %s990_s12), 3 }
   0xf   : > { %s1041_s16 = sshll.u32 %s1107_s12, 6  ;;  %s771_s26 = sshll.u32 %s1107_s12, 3 }
  0x10   : > { %s1047_s19 = scalar_lea.vmem %s1099_s1, %s1041_s16  ;;  %s1056_s22 = scalar_lea.vmem %s1098_s0, %s1041_s16 }
  0x11   : > { %v960_v0 = vld [vmem:[%s1047_s19] sm:$0xff]   ;;  %v961_v1 = vld [vmem:[%s1047_s19 + $0x8] sm:$0xff]   ;;  %v962_v2 = vld [vmem:[%s1047_s19 + $0x10] sm:$0xff]   ;;  %s1075_s25 = scalar_lea.vmem %s1100_s2, %s1041_s16  ;;  %s248_s29 = scalar_lea.vmem %s1101_s3, %s771_s26 }
  0x12   : > { %888 = vmatprep.subr.bf16.mxu0 %v960_v0  ;;  %920 = vmatprep.subr.bf16.mxu1 %v960_v0  ;;  %v963_v3 = vld [vmem:[%s1047_s19 + $0x18] sm:$0xff]   ;;  %v968_v4 = vld [vmem:[%s1056_s22] sm:$0xff]   ;;  %v965_v7 = vld [vmem:[%s1047_s19 + $0x28] sm:$0xff]  }
  0x13   : > { %889 = vmatpush3.bf16.msra.mxu0 %v960_v0  ;;  %928 = vmatpush3.bf16.msra.mxu1 %v960_v0  ;;  %v964_v5 = vld [vmem:[%s1047_s19 + $0x20] sm:$0xff]   ;;  %v966_v8 = vld [vmem:[%s1047_s19 + $0x30] sm:$0xff]   ;;  %v967_v9 = vld [vmem:[%s1047_s19 + $0x38] sm:$0xff]  }
  0x14   : > { %890 = vmatprep.subr.bf16.mxu0 %v961_v1  ;;  %921 = vmatprep.subr.bf16.mxu1 %v961_v1  ;;  %v972_v6 = vld [vmem:[%s1056_s22 + $0x20] sm:$0xff]   ;;  %v969_v10 = vld [vmem:[%s1056_s22 + $0x8] sm:$0xff]   ;;  %v970_v12 = vld [vmem:[%s1056_s22 + $0x10] sm:$0xff]  }
  0x15   : > { %904 = vmatprep.mubr.bf16.mxu0 %v968_v4  ;;  %912 = vmatprep.mubr.bf16.mxu1 %v972_v6  ;;  %v973_v11 = vld [vmem:[%s1056_s22 + $0x28] sm:$0xff]   ;;  %v974_v13 = vld [vmem:[%s1056_s22 + $0x30] sm:$0xff]   ;;  %v971_v14 = vld [vmem:[%s1056_s22 + $0x18] sm:$0xff]  }
  0x16   : > { %v975_v15 = vld [vmem:[%s1056_s22 + $0x38] sm:$0xff]  }
  0x17   : > { %891 = vmatpush3.bf16.msra.mxu0 %v961_v1  ;;  %929 = vmatpush3.bf16.msra.mxu1 %v961_v1 }
  0x18   : > { %892 = vmatprep.subr.bf16.mxu0 %v962_v2  ;;  %922 = vmatprep.subr.bf16.mxu1 %v962_v2 }
  0x1b   : > { %893 = vmatpush3.bf16.msra.mxu0 %v962_v2  ;;  %930 = vmatpush3.bf16.msra.mxu1 %v962_v2 }
  0x1c   : > { %894 = vmatprep.subr.bf16.mxu0 %v963_v3  ;;  %923 = vmatprep.subr.bf16.mxu1 %v963_v3 }
  0x1f   : > { %895 = vmatpush3.bf16.msra.mxu0 %v963_v3  ;;  %931 = vmatpush3.bf16.msra.mxu1 %v963_v3 }
  0x20   : > { %896 = vmatprep.subr.bf16.mxu0 %v964_v5  ;;  %924 = vmatprep.subr.bf16.mxu1 %v964_v5 }
  0x23   : > { %897 = vmatpush3.bf16.msra.mxu0 %v964_v5  ;;  %932 = vmatpush3.bf16.msra.mxu1 %v964_v5 }
  0x24   : > { %898 = vmatprep.subr.bf16.mxu0 %v965_v7  ;;  %925 = vmatprep.subr.bf16.mxu1 %v965_v7 }
  0x27   : > { %899 = vmatpush3.bf16.msra.mxu0 %v965_v7  ;;  %933 = vmatpush3.bf16.msra.mxu1 %v965_v7 }
  0x28   : > { %900 = vmatprep.subr.bf16.mxu0 %v966_v8  ;;  %926 = vmatprep.subr.bf16.mxu1 %v966_v8 }
  0x2b   : > { %901 = vmatpush3.bf16.msra.mxu0 %v966_v8  ;;  %934 = vmatpush3.bf16.msra.mxu1 %v966_v8 }
  0x2c   : > { %902 = vmatprep.subr.bf16.mxu0 %v967_v9  ;;  %927 = vmatprep.subr.bf16.mxu1 %v967_v9 }
  0x2f   : > { %903 = vmatpush3.bf16.msra.mxu0 %v967_v9  ;;  %935 = vmatpush3.bf16.msra.mxu1 %v967_v9 }
  0x32   : > { %905 = vmatmul.mubr.bf16.vlgmr.msra.gmra.mrb[0].mxu0 %v969_v10  ;;  %913 = vmatmul.mubr.bf16.vlgmr.msra.gmra.mrb[0].mxu1 %v973_v11 }
  0x33   : > { %908 = vmatprep.mubr.bf16.mxu0 %v970_v12  ;;  %916 = vmatprep.mubr.bf16.mxu1 %v974_v13 }
  0x3a   : > { %909 = vmatmul.mubr.bf16.gmra.mrb[4].mxu0 %v971_v14  ;;  %917 = vmatmul.mubr.bf16.gmra.mrb[4].mxu1 %v975_v15 }
 0x105   : > { %v906_v16 = vpop.f32.mrb[0].mxu0  ;;  %v914_v17 = vpop.f32.mrb[0].mxu1 }
 0x106   : > { %v412_v18 = vpop.f32.mrb[1].mxu0  ;;  %v444_v19 = vpop.f32.mrb[1].mxu1  ;;  %v498_v31 = vmul.f32 %v906_v16, %v906_v16  ;;  %v506_v3 = vmul.f32 %v914_v17, %v914_v17 }
 0x107   : > { %v907_v20 = vpop.f32.mrb[2].mxu0  ;;  %v915_v21 = vpop.f32.mrb[2].mxu1  ;;  %v496_v26 = vmul.f32 %v412_v18, %v412_v18  ;;  %v504_v61 = vmul.f32 %v444_v19, %v444_v19 }
 0x108   : > { %v833_v22 = vpack.c.bf16 %v907_v20, %v906_v16  ;;  %v415_v23 = vpop.f32.mrb[3].mxu0  ;;  %v853_v24 = vpack.c.bf16 %v915_v21, %v914_v17  ;;  %v447_v25 = vpop.f32.mrb[3].mxu1  ;;  %v499_v34 = vmul.f32 %v907_v20, %v907_v20  ;;  %v507_v6 = vmul.f32 %v915_v21, %v915_v21 }
 0x109   : > { %v475_v27 = vadd.f32 %v415_v23, %v412_v18  ;;  %v497_v28 = vmul.f32 %v415_v23, %v415_v23  ;;  %v828_v29 = vpack.c.bf16 %v415_v23, %v412_v18  ;;  %v848_v30 = vpack.c.bf16 %v447_v25, %v444_v19 }
 0x10a   : > { %865 = vst [vmem:[%s1075_s25 + $0x8] sm:$0xff] %v833_v22   ;;  %869 = vst [vmem:[%s1075_s25 + $0x28] sm:$0xff] %v853_v24   ;;  %v505_v2 = vmul.f32 %v447_v25, %v447_v25 }
 0x10b   : > { %v476_v32 = vadd.f32 %v906_v16, %v475_v27  ;;  %v512_v33 = vadd.f32 %v497_v28, %v496_v26  ;;  %829 = vst [vmem:[%s1075_s25] sm:$0xff] %v828_v29   ;;  %868 = vst [vmem:[%s1075_s25 + $0x20] sm:$0xff] %v848_v30   ;;  %v533_v26 = vlaneseq }
 0x10d   : > { %v513_v35 = vadd.f32 %v512_v33, %v498_v31  ;;  %v910_v36 = vpop.f32.mrb[4].mxu0  ;;  %v477_v37 = vadd.f32 %v907_v20, %v476_v32  ;;  %v918_v38 = vpop.f32.mrb[4].mxu1  ;;  %v534_v30 = vshrl.u32 %v533_v26, 7 }
 0x10e   : > { %v428_v39 = vpop.f32.mrb[5].mxu0  ;;  %v460_v40 = vpop.f32.mrb[5].mxu1  ;;  %v502_v55 = vmul.f32 %v910_v36, %v910_v36  ;;  %v510_v15 = vmul.f32 %v918_v38, %v918_v38 }
 0x10f   : > { %v478_v41 = vadd.f32 %v477_v37, %v428_v39  ;;  %v500_v42 = vmul.f32 %v428_v39, %v428_v39  ;;  %v514_v43 = vadd.f32 %v513_v35, %v499_v34  ;;  %v911_v44 = vpop.f32.mrb[6].mxu0  ;;  %v919_v45 = vpop.f32.mrb[6].mxu1  ;;  %v508_v9 = vmul.f32 %v460_v40, %v460_v40 }
 0x110   : > { %v843_v46 = vpack.c.bf16 %v911_v44, %v910_v36  ;;  %v431_v47 = vpop.f32.mrb[7].mxu0  ;;  %v863_v48 = vpack.c.bf16 %v919_v45, %v918_v38  ;;  %v463_v49 = vpop.f32.mrb[7].mxu1  ;;  %v503_v58 = vmul.f32 %v911_v44, %v911_v44  ;;  %vm536_vm0 = vcmp.eq.s32.totalorder %v534_v30, 1 }
 0x111   : > { %v515_v50 = vadd.f32 %v514_v43, %v500_v42  ;;  %v479_v51 = vadd.f32 %v478_v41, %v431_v47  ;;  %v501_v52 = vmul.f32 %v431_v47, %v431_v47  ;;  %v838_v53 = vpack.c.bf16 %v431_v47, %v428_v39 }
 0x112   : > { %867 = vst [vmem:[%s1075_s25 + $0x18] sm:$0xff] %v843_v46   ;;  %871 = vst [vmem:[%s1075_s25 + $0x38] sm:$0xff] %v863_v48   ;;  %v858_v54 = vpack.c.bf16 %v463_v49, %v460_v40  ;;  %v509_v14 = vmul.f32 %v463_v49, %v463_v49  ;;  %vm535_vm1 = vcmp.eq.s32.totalorder %v534_v30, 0 }
 0x113   : > { %v480_v56 = vadd.f32 %v910_v36, %v479_v51  ;;  %v516_v57 = vadd.f32 %v515_v50, %v501_v52  ;;  %866 = vst [vmem:[%s1075_s25 + $0x10] sm:$0xff] %v838_v53  }
 0x114   : > { %870 = vst [vmem:[%s1075_s25 + $0x30] sm:$0xff] %v858_v54  }
 0x115   : > { %v517_v59 = vadd.f32 %v516_v57, %v502_v55  ;;  %v481_v60 = vadd.f32 %v911_v44, %v480_v56 }
 0x117   : > { %v482_v62 = vadd.f32 %v481_v60, %v444_v19  ;;  %v518_v63 = vadd.f32 %v517_v59, %v503_v58  ;;  %v511_v19 = vmul.f32 %v919_v45, %v919_v45 }
 0x119   : > { %v519_v0 = vadd.f32 %v518_v63, %v504_v61  ;;  %v483_v1 = vadd.f32 %v482_v62, %v447_v25 }
 0x11b   : > { %v484_v4 = vadd.f32 %v914_v17, %v483_v1  ;;  %v520_v5 = vadd.f32 %v519_v0, %v505_v2 }
 0x11d   : > { %v521_v7 = vadd.f32 %v520_v5, %v506_v3  ;;  %v485_v8 = vadd.f32 %v915_v21, %v484_v4 }
 0x11f   : > { %v486_v10 = vadd.f32 %v485_v8, %v460_v40  ;;  %v522_v11 = vadd.f32 %v521_v7, %v507_v6 }
 0x121   : > { %v523_v12 = vadd.f32 %v522_v11, %v508_v9  ;;  %v487_v13 = vadd.f32 %v486_v10, %v463_v49 }
 0x123   : > { %v488_v16 = vadd.f32 %v918_v38, %v487_v13  ;;  %v524_v18 = vadd.f32 %v523_v12, %v509_v14 }
 0x125   : > { %v489_v20 = vadd.f32 %v919_v45, %v488_v16  ;;  %v525_v22 = vadd.f32 %v524_v18, %v510_v15 }
 0x127   : > { %v490_v23 = vrot.slane %v489_v20, 4  ;;  %v526_v24 = vadd.f32 %v525_v22, %v511_v19 }
 0x129   : > { %v491_v17 = vadd.f32 %v490_v23, %v489_v20  ;;  %v527_v25 = vrot.slane %v526_v24, 4 }
 0x12b   : > { %v492_v27 = vrot.slane %v491_v17, 2  ;;  %v528_v21 = vadd.f32 %v527_v25, %v526_v24 }
 0x12d   : > { %v493_v28 = vadd.f32 %v492_v27, %v491_v17  ;;  %v529_v29 = vrot.slane %v528_v21, 2 }
 0x12f   : > { %v530_v31 = vadd.f32 %v529_v29, %v528_v21  ;;  %v494_v32 = vrot.slane %v493_v28, 1 }
 0x131   : > { %v531_v33 = vrot.slane %v530_v31, 1  ;;  %v495_v35 = vadd.f32 %v494_v32, %v493_v28 }
 0x133   : > { %v532_v34 = vadd.f32 %v531_v33, %v530_v31 }
 0x135   : > { %v537_v36 = vsel %vm536_vm0, %v532_v34, 0.0 }
 0x136   : > { %v538_v37 = vsel %vm535_vm1, %v495_v35, %v537_v36 }
 0x137   : > { %539 = vst [vmem:[%s248_s29] sm:$0xff] %v538_v37 }
 0x138 PF: > { %s14_s14 = sadd.s32 1, %s998_s14   ;;  %s1102_s12 = smov %s994_s13 }
 0x139   : > { %p11_p5 = scmp.ge.s32.totalorder %s14_s14, 6   ;;  %s1103_s13 = smov %s1105_s15 }
 0x13b   :  { %13 = sbr.rel (!%p11_p5) target bundleno = 2 (0x2), region = 73 }

// kernel: _lambda_.15
= control target key start
LH: loop header
LB: loop body
LE: loop exit
PB: predicated region body
PF: predicated region fallthrough
CT: control target
= control target key end

     0   :  { %s1514_s12 = smov 0   ;;  %s1516_s13 = smov 0   ;;  %s1738_s0 = inlined_call_operand.vmem [shape: bf16[1,512,144], index: 0, kind: input, shape index: {}]   ;;  %s1739_s1 = inlined_call_operand.vmem [shape: bf16[1,144,128], index: 1, kind: input, shape index: {}]   ;;  %s1740_s2 = inlined_call_operand.vmem [shape: bf16[1,512,128], index: 2, kind: output, shape index: {0}]   ;;  %s1741_s3 = inlined_call_operand.vmem [shape: f32[1,2,8,128], index: 3, kind: output, shape index: {1}]  }
   0x1   :  { %s1518_s14 = smov 0  }
   0x2 LB: > { %s23_s15 = sadd.s32 1, %s1487_s13  ;;  %p1143_p0 = scmp.ge.s32.totalorder %s1491_s14, 1  ;;  %s1491_s14 = sphi %s1518_s14, %s14_s14   ;;  %s1487_s13 = sphi %s1516_s13, %s1743_s13   ;;  %s1483_s12 = sphi %s1514_s12, %s1742_s12  }
   0x3   : > { %p24_p1 = scmp.ge.s32.totalorder %s23_s15, 2  ;;  %p174_p2 = scmp.lt.s32.totalorder %s1491_s14, 3 }
   0x5   : > { %s1745_s15 = smov (%p24_p1, %s23_s15), 0  ;;  %p175_p3 = pnand %p1143_p0, %p174_p2 }
   0x6   : > { %v1412_v0 = vld [vmem:[%s1739_s1] sm:$0xff] (!%p175_p3)   ;;  %v1493_v1 = vmov (!%p175_p3), 0   ;;  %s1144_s18 = sshll.u32 (!%p175_p3), %s1483_s12, 5  ;;  %v1413_v2 = vld [vmem:[%s1739_s1 + $0x8] sm:$0xff] (!%p175_p3)   ;;  %v1414_v3 = vld [vmem:[%s1739_s1 + $0x10] sm:$0xff] (!%p175_p3)   ;;  %vm503_vm0 = vcmask (!%p175_p3), 130048  }
   0x7   : > { %178 = sbr.rel (%p175_p3) target bundleno = 364 (0x16c), region = 28  ;;  %552 = vmatprep.subr.bf16.mxu0 (!%p175_p3), %v1493_v1  ;;  %1369 = vmatprep.subr.bf16.mxu1 (!%p175_p3), %v1493_v1  ;;  %p223_p4 = scmp.lt.s32.totalorder (!%p175_p3), %s1144_s18, 63  ;;  %v1415_v4 = vld [vmem:[%s1739_s1 + $0x18] sm:$0xff] (!%p175_p3)   ;;  %v1416_v6 = vld [vmem:[%s1739_s1 + $0x20] sm:$0xff] (!%p175_p3)   ;;  %v1417_v8 = vld [vmem:[%s1739_s1 + $0x28] sm:$0xff] (!%p175_p3)  }
   0x8   : > { %553 = vmatpush1.bf16.msra.mxu0 (!%p175_p3), %v1412_v0  ;;  %1378 = vmatpush1.bf16.msra.mxu1 (!%p175_p3), %v1412_v0  ;;  %v1418_v9 = vld [vmem:[%s1739_s1 + $0x30] sm:$0xff] (!%p175_p3)   ;;  %v1419_v10 = vld [vmem:[%s1739_s1 + $0x38] sm:$0xff] (!%p175_p3)   ;;  %v1420_v11 = vld [vmem:[%s1739_s1 + $0x40] sm:$0xff] (!%p175_p3)   ;;  %p248_p5 = scmp.lt.s32.totalorder (!%p175_p3), %s1483_s12, 1 }
   0x9   : > { %554 = vmatprep.subr.bf16.mxu0 (!%p175_p3), %v1493_v1  ;;  %1370 = vmatprep.subr.bf16.mxu1 (!%p175_p3), %v1493_v1 }
   0xc   : > { %555 = vmatpush1.bf16.msra.mxu0 (!%p175_p3), %v1413_v2  ;;  %1379 = vmatpush1.bf16.msra.mxu1 (!%p175_p3), %v1413_v2 }
   0xd   : > { %556 = vmatprep.subr.bf16.mxu0 (!%p175_p3), %v1493_v1  ;;  %1371 = vmatprep.subr.bf16.mxu1 (!%p175_p3), %v1493_v1 }
   0xe   : > { %s1747_s18 = smov (!%p223_p4, %s1144_s18), 63  ;;  %s1749_s12 = smov (!%p248_p5, %s1483_s12), 1 }
   0xf   : > { %s1241_s23 = sshll.u32 %s1747_s18, 3  ;;  %s1148_s16 = sshll.u32 %s1747_s18, 2 }
  0x10   : > { %s1550_s26 = scalar_lea.vmem %s1738_s0, %s1241_s23  ;;  %557 = vmatpush1.bf16.msra.mxu0 %v1414_v3  ;;  %1380 = vmatpush1.bf16.msra.mxu1 %v1414_v3  ;;  %s1624_s20 = scalar_lea.vmem %s1740_s2, %s1148_s16 }
  0x11   : > { %v1423_v5 = vld [vmem:[%s1550_s26 + $0x4] ss:$8 sps:$4 sm:$0xff]   ;;  %558 = vmatprep.subr.bf16.mxu0 %v1493_v1  ;;  %1372 = vmatprep.subr.bf16.mxu1 %v1493_v1  ;;  %v1421_v12 = vld [vmem:[%s1550_s26] ss:$8 sps:$4 sm:$0xff]   ;;  %v1424_v14 = vld [vmem:[%s1550_s26 + $0x14] ss:$8 sps:$4 sm:$0xff]  }
  0x12   : > { %1191 = vmatprep.mubr.msk.bf16.mxu0 %vm503_vm0, %v1423_v5  ;;  %v1435_v7 = vld [vmem:[%s1550_s26 + $0x84] ss:$8 sps:$4 sm:$0xff]   ;;  %v1433_v13 = vld [vmem:[%s1550_s26 + $0x80] ss:$8 sps:$4 sm:$0xff]   ;;  %v1439_v15 = vld [vmem:[%s1550_s26 + $0x94] ss:$8 sps:$4 sm:$0xff]  }
  0x13   : > { %1199 = vmatprep.mubr.msk.bf16.mxu1 %vm503_vm0, %v1435_v7  ;;  %v1426_v16 = vld [vmem:[%s1550_s26 + $0x10] ss:$8 sps:$4 sm:$0xff]   ;;  %v1427_v18 = vld [vmem:[%s1550_s26 + $0x24] ss:$8 sps:$4 sm:$0xff]   ;;  %v1429_v20 = vld [vmem:[%s1550_s26 + $0x20] ss:$8 sps:$4 sm:$0xff]  }
  0x14   : > { %559 = vmatpush1.bf16.msra.mxu0 %v1415_v4  ;;  %1381 = vmatpush1.bf16.msra.mxu1 %v1415_v4  ;;  %v1441_v17 = vld [vmem:[%s1550_s26 + $0x90] ss:$8 sps:$4 sm:$0xff]   ;;  %v1445_v19 = vld [vmem:[%s1550_s26 + $0xa4] ss:$8 sps:$4 sm:$0xff]   ;;  %v1447_v21 = vld [vmem:[%s1550_s26 + $0xa0] ss:$8 sps:$4 sm:$0xff]  }
  0x15   : > { %560 = vmatprep.subr.bf16.mxu0 %v1493_v1  ;;  %1373 = vmatprep.subr.bf16.mxu1 %v1493_v1  ;;  %v1430_v22 = vld [vmem:[%s1550_s26 + $0x34] ss:$8 sps:$4 sm:$0xff]   ;;  %v1432_v24 = vld [vmem:[%s1550_s26 + $0x30] ss:$8 sps:$4 sm:$0xff]   ;;  %v1436_v26 = vld [vmem:[%s1550_s26 + $0x44] ss:$8 sps:$4 sm:$0xff]  }
  0x16   : > { %v1451_v23 = vld [vmem:[%s1550_s26 + $0xb4] ss:$8 sps:$4 sm:$0xff]   ;;  %v1453_v25 = vld [vmem:[%s1550_s26 + $0xb0] ss:$8 sps:$4 sm:$0xff]   ;;  %v1457_v27 = vld [vmem:[%s1550_s26 + $0xc4] ss:$8 sps:$4 sm:$0xff]  }
  0x17   : > { %v1438_v28 = vld [vmem:[%s1550_s26 + $0x40] ss:$8 sps:$4 sm:$0xff]   ;;  %v1442_v30 = vld [vmem:[%s1550_s26 + $0x54] ss:$8 sps:$4 sm:$0xff]   ;;  %v1444_v32 = vld [vmem:[%s1550_s26 + $0x50] ss:$8 sps:$4 sm:$0xff]  }
  0x18   : > { %561 = vmatpush1.bf16.msra.mxu0 %v1416_v6  ;;  %1382 = vmatpush1.bf16.msra.mxu1 %v1416_v6  ;;  %v1459_v29 = vld [vmem:[%s1550_s26 + $0xc0] ss:$8 sps:$4 sm:$0xff]   ;;  %v1460_v31 = vld [vmem:[%s1550_s26 + $0xd4] ss:$8 sps:$4 sm:$0xff]   ;;  %v1462_v33 = vld [vmem:[%s1550_s26 + $0xd0] ss:$8 sps:$4 sm:$0xff]  }
  0x19   : > { %562 = vmatprep.subr.bf16.mxu0 %v1493_v1  ;;  %1374 = vmatprep.subr.bf16.mxu1 %v1493_v1  ;;  %v1448_v34 = vld [vmem:[%s1550_s26 + $0x64] ss:$8 sps:$4 sm:$0xff]   ;;  %v1450_v36 = vld [vmem:[%s1550_s26 + $0x60] ss:$8 sps:$4 sm:$0xff]   ;;  %v1454_v38 = vld [vmem:[%s1550_s26 + $0x74] ss:$8 sps:$4 sm:$0xff]  }
  0x1a   : > { %v1463_v35 = vld [vmem:[%s1550_s26 + $0xe4] ss:$8 sps:$4 sm:$0xff]   ;;  %v1465_v37 = vld [vmem:[%s1550_s26 + $0xe0] ss:$8 sps:$4 sm:$0xff]   ;;  %v1466_v39 = vld [vmem:[%s1550_s26 + $0xf4] ss:$8 sps:$4 sm:$0xff]  }
  0x1b   : > { %v1456_v40 = vld [vmem:[%s1550_s26 + $0x70] ss:$8 sps:$4 sm:$0xff]   ;;  %s1149_s18 = sshll.u32 %s1749_s12, 3 }
  0x1c   : > { %563 = vmatpush1.bf16.msra.mxu0 %v1417_v8  ;;  %1383 = vmatpush1.bf16.msra.mxu1 %v1417_v8  ;;  %v1468_v41 = vld [vmem:[%s1550_s26 + $0xf0] ss:$8 sps:$4 sm:$0xff]   ;;  %s253_s23 = scalar_lea.vmem %s1741_s3, %s1149_s18 }
  0x1d   : > { %564 = vmatprep.subr.bf16.mxu0 %v1493_v1  ;;  %1375 = vmatprep.subr.bf16.mxu1 %v1493_v1 }
  0x20   : > { %565 = vmatpush1.bf16.msra.mxu0 %v1418_v9  ;;  %1384 = vmatpush1.bf16.msra.mxu1 %v1418_v9 }
  0x21   : > { %566 = vmatprep.subr.bf16.mxu0 %v1493_v1  ;;  %1376 = vmatprep.subr.bf16.mxu1 %v1493_v1 }
  0x24   : > { %567 = vmatpush1.bf16.msra.mxu0 %v1419_v10  ;;  %1385 = vmatpush1.bf16.msra.mxu1 %v1419_v10 }
  0x25   : > { %568 = vmatprep.subr.bf16.mxu0 %v1493_v1  ;;  %1377 = vmatprep.subr.bf16.mxu1 %v1493_v1 }
  0x28   : > { %569 = vmatpush1.bf16.msra.mxu0 %v1420_v11  ;;  %1386 = vmatpush1.bf16.msra.mxu1 %v1420_v11 }
  0x2b   : > { %585 = vmatmul.mubr.bf16.vlgmr.msra.gmra.mrb[0].mxu0 %v1421_v12  ;;  %649 = vmatmul.mubr.bf16.vlgmr.msra.gmra.mrb[0].mxu1 %v1433_v13 }
  0x2c   : > { %1192 = vmatprep.mubr.msk.bf16.mxu0 %vm503_vm0, %v1424_v14  ;;  %1200 = vmatprep.mubr.msk.bf16.mxu1 %vm503_vm0, %v1439_v15 }
  0x33   : > { %593 = vmatmul.mubr.bf16.gmra.mrb[4].mxu0 %v1426_v16  ;;  %657 = vmatmul.mubr.bf16.gmra.mrb[4].mxu1 %v1441_v17 }
  0x34   : > { %1193 = vmatprep.mubr.msk.bf16.mxu0 %vm503_vm0, %v1427_v18  ;;  %1201 = vmatprep.mubr.msk.bf16.mxu1 %vm503_vm0, %v1445_v19 }
  0x3b   : > { %601 = vmatmul.mubr.bf16.gmra.mrb[8].mxu0 %v1429_v20  ;;  %665 = vmatmul.mubr.bf16.gmra.mrb[8].mxu1 %v1447_v21 }
  0x3c   : > { %1194 = vmatprep.mubr.msk.bf16.mxu0 %vm503_vm0, %v1430_v22  ;;  %1202 = vmatprep.mubr.msk.bf16.mxu1 %vm503_vm0, %v1451_v23 }
  0x43   : > { %609 = vmatmul.mubr.bf16.gmra.mrb[12].mxu0 %v1432_v24  ;;  %673 = vmatmul.mubr.bf16.gmra.mrb[12].mxu1 %v1453_v25 }
  0x44   : > { %1195 = vmatprep.mubr.msk.bf16.mxu0 %vm503_vm0, %v1436_v26  ;;  %1203 = vmatprep.mubr.msk.bf16.mxu1 %vm503_vm0, %v1457_v27 }
  0x4b   : > { %617 = vmatmul.mubr.bf16.gmra.mrb[16].mxu0 %v1438_v28  ;;  %681 = vmatmul.mubr.bf16.gmra.mrb[16].mxu1 %v1459_v29 }
  0x4c   : > { %1196 = vmatprep.mubr.msk.bf16.mxu0 %vm503_vm0, %v1442_v30  ;;  %1204 = vmatprep.mubr.msk.bf16.mxu1 %vm503_vm0, %v1460_v31 }
  0x53   : > { %625 = vmatmul.mubr.bf16.gmra.mrb[20].mxu0 %v1444_v32  ;;  %689 = vmatmul.mubr.bf16.gmra.mrb[20].mxu1 %v1462_v33 }
  0x54   : > { %1197 = vmatprep.mubr.msk.bf16.mxu0 %vm503_vm0, %v1448_v34  ;;  %1205 = vmatprep.mubr.msk.bf16.mxu1 %vm503_vm0, %v1463_v35 }
  0x5b   : > { %633 = vmatmul.mubr.bf16.gmra.mrb[24].mxu0 %v1450_v36  ;;  %697 = vmatmul.mubr.bf16.gmra.mrb[24].mxu1 %v1465_v37 }
  0x5c   : > { %1198 = vmatprep.mubr.msk.bf16.mxu0 %vm503_vm0, %v1454_v38  ;;  %1206 = vmatprep.mubr.msk.bf16.mxu1 %vm503_vm0, %v1466_v39 }
  0x63   : > { %641 = vmatmul.mubr.bf16.gmra.mrb[28].mxu0 %v1456_v40  ;;  %705 = vmatmul.mubr.bf16.gmra.mrb[28].mxu1 %v1468_v41 }
  0xfe   : > { %v586_v42 = vpop.f32.mrb[0].mxu0  ;;  %v1619_v43 = vpop.f32.mrb[0].mxu1 }
  0xff   : > { %v588_v44 = vpop.f32.mrb[1].mxu0  ;;  %v652_v45 = vpop.f32.mrb[1].mxu1  ;;  %v750_v48 = vmul.f32 %v586_v42, %v586_v42 }
 0x100   : > { %v589_v46 = vpop.f32.mrb[2].mxu0  ;;  %v1626_v47 = vpop.f32.mrb[2].mxu1 }
 0x101   : > { %v713_v49 = vadd.f32 %v589_v46, %v586_v42  ;;  %v751_v50 = vmul.f32 %v589_v46, %v589_v46  ;;  %v1277_v51 = vpack.c.bf16 %v589_v46, %v586_v42  ;;  %v591_v52 = vpop.f32.mrb[3].mxu0  ;;  %v655_v53 = vpop.f32.mrb[3].mxu1  ;;  %v1317_v54 = vpack.c.bf16 %v1626_v47, %v1619_v43 }
 0x103   : > { %v782_v55 = vadd.f32 %v751_v50, %v750_v48  ;;  %1278 = vst [vmem:[%s1624_s20] sm:$0xff] %v1277_v51   ;;  %1361 = vst [vmem:[%s1624_s20 + $0x40] sm:$0xff] %v1317_v54  }
 0x106   : > { %v594_v56 = vpop.f32.mrb[4].mxu0  ;;  %v1632_v57 = vpop.f32.mrb[4].mxu1 }
 0x107   : > { %v714_v58 = vadd.f32 %v713_v49, %v594_v56  ;;  %v752_v59 = vmul.f32 %v594_v56, %v594_v56  ;;  %v596_v60 = vpop.f32.mrb[5].mxu0  ;;  %v660_v61 = vpop.f32.mrb[5].mxu1 }
 0x108   : > { %v597_v62 = vpop.f32.mrb[6].mxu0  ;;  %v1634_v63 = vpop.f32.mrb[6].mxu1 }
 0x109   : > { %v783_v0 = vadd.f32 %v782_v55, %v752_v59  ;;  %v715_v1 = vadd.f32 %v714_v58, %v597_v62  ;;  %v753_v2 = vmul.f32 %v597_v62, %v597_v62  ;;  %v1282_v3 = vpack.c.bf16 %v597_v62, %v594_v56  ;;  %v599_v4 = vpop.f32.mrb[7].mxu0  ;;  %v663_v5 = vpop.f32.mrb[7].mxu1 }
 0x10a   : > { %v1322_v6 = vpack.c.bf16 %v1634_v63, %v1632_v57 }
 0x10b   : > { %v784_v7 = vadd.f32 %v783_v0, %v753_v2  ;;  %1354 = vst [vmem:[%s1624_s20 + $0x8] sm:$0xff] %v1282_v3  }
 0x10c   : > { %1362 = vst [vmem:[%s1624_s20 + $0x48] sm:$0xff] %v1322_v6  }
 0x10e   : > { %v602_v8 = vpop.f32.mrb[8].mxu0  ;;  %v1640_v9 = vpop.f32.mrb[8].mxu1 }
 0x10f   : > { %v716_v10 = vadd.f32 %v715_v1, %v602_v8  ;;  %v754_v11 = vmul.f32 %v602_v8, %v602_v8  ;;  %v604_v12 = vpop.f32.mrb[9].mxu0  ;;  %v668_v13 = vpop.f32.mrb[9].mxu1 }
 0x110   : > { %v605_v14 = vpop.f32.mrb[10].mxu0  ;;  %v1642_v15 = vpop.f32.mrb[10].mxu1 }
 0x111   : > { %v785_v16 = vadd.f32 %v784_v7, %v754_v11  ;;  %v717_v17 = vadd.f32 %v716_v10, %v605_v14  ;;  %v755_v18 = vmul.f32 %v605_v14, %v605_v14  ;;  %v1287_v19 = vpack.c.bf16 %v605_v14, %v602_v8  ;;  %v607_v20 = vpop.f32.mrb[11].mxu0  ;;  %v671_v21 = vpop.f32.mrb[11].mxu1 }
 0x112   : > { %v1327_v22 = vpack.c.bf16 %v1642_v15, %v1640_v9 }
 0x113   : > { %v786_v23 = vadd.f32 %v785_v16, %v755_v18  ;;  %1355 = vst [vmem:[%s1624_s20 + $0x10] sm:$0xff] %v1287_v19  }
 0x114   : > { %1363 = vst [vmem:[%s1624_s20 + $0x50] sm:$0xff] %v1327_v22  }
 0x116   : > { %v610_v24 = vpop.f32.mrb[12].mxu0  ;;  %v1648_v25 = vpop.f32.mrb[12].mxu1 }
 0x117   : > { %v718_v26 = vadd.f32 %v717_v17, %v610_v24  ;;  %v756_v27 = vmul.f32 %v610_v24, %v610_v24  ;;  %v612_v28 = vpop.f32.mrb[13].mxu0  ;;  %v676_v29 = vpop.f32.mrb[13].mxu1 }
 0x118   : > { %v613_v30 = vpop.f32.mrb[14].mxu0  ;;  %v1650_v31 = vpop.f32.mrb[14].mxu1 }
 0x119   : > { %v787_v32 = vadd.f32 %v786_v23, %v756_v27  ;;  %v719_v33 = vadd.f32 %v718_v26, %v613_v30  ;;  %v757_v34 = vmul.f32 %v613_v30, %v613_v30  ;;  %v1292_v35 = vpack.c.bf16 %v613_v30, %v610_v24  ;;  %v615_v36 = vpop.f32.mrb[15].mxu0  ;;  %v679_v37 = vpop.f32.mrb[15].mxu1 }
 0x11a   : > { %v1332_v38 = vpack.c.bf16 %v1650_v31, %v1648_v25 }
 0x11b   : > { %v788_v39 = vadd.f32 %v787_v32, %v757_v34  ;;  %1356 = vst [vmem:[%s1624_s20 + $0x18] sm:$0xff] %v1292_v35  }
 0x11c   : > { %1364 = vst [vmem:[%s1624_s20 + $0x58] sm:$0xff] %v1332_v38  }
 0x11e   : > { %v618_v40 = vpop.f32.mrb[16].mxu0  ;;  %v1656_v41 = vpop.f32.mrb[16].mxu1 }
 0x11f   : > { %v720_v42 = vadd.f32 %v719_v33, %v618_v40  ;;  %v758_v44 = vmul.f32 %v618_v40, %v618_v40  ;;  %v620_v45 = vpop.f32.mrb[17].mxu0  ;;  %v684_v46 = vpop.f32.mrb[17].mxu1 }
 0x120   : > { %v621_v48 = vpop.f32.mrb[18].mxu0  ;;  %v1658_v49 = vpop.f32.mrb[18].mxu1 }
 0x121   : > { %v789_v50 = vadd.f32 %v788_v39, %v758_v44  ;;  %v721_v51 = vadd.f32 %v720_v42, %v621_v48  ;;  %v759_v52 = vmul.f32 %v621_v48, %v621_v48  ;;  %v1297_v53 = vpack.c.bf16 %v621_v48, %v618_v40  ;;  %v623_v54 = vpop.f32.mrb[19].mxu0  ;;  %v687_v55 = vpop.f32.mrb[19].mxu1 }
 0x122   : > { %v1337_v56 = vpack.c.bf16 %v1658_v49, %v1656_v41  ;;  %v767_v54 = vmul.f32 %v1626_v47, %v1626_v47 }
 0x123   : > { %v790_v58 = vadd.f32 %v789_v50, %v759_v52  ;;  %1357 = vst [vmem:[%s1624_s20 + $0x20] sm:$0xff] %v1297_v53  }
 0x124   : > { %1365 = vst [vmem:[%s1624_s20 + $0x60] sm:$0xff] %v1337_v56  }
 0x126   : > { %v626_v59 = vpop.f32.mrb[20].mxu0  ;;  %v1664_v60 = vpop.f32.mrb[20].mxu1 }
 0x127   : > { %v722_v61 = vadd.f32 %v721_v51, %v626_v59  ;;  %v760_v62 = vmul.f32 %v626_v59, %v626_v59  ;;  %v628_v0 = vpop.f32.mrb[21].mxu0  ;;  %v692_v1 = vpop.f32.mrb[21].mxu1  ;;  %v766_v51 = vmul.f32 %v1619_v43, %v1619_v43 }
 0x128   : > { %v629_v2 = vpop.f32.mrb[22].mxu0  ;;  %v1666_v3 = vpop.f32.mrb[22].mxu1  ;;  %v770_v1 = vmul.f32 %v1640_v9, %v1640_v9 }
 0x129   : > { %v791_v4 = vadd.f32 %v790_v58, %v760_v62  ;;  %v723_v5 = vadd.f32 %v722_v61, %v629_v2  ;;  %v761_v6 = vmul.f32 %v629_v2, %v629_v2  ;;  %v1302_v7 = vpack.c.bf16 %v629_v2, %v626_v59  ;;  %v631_v8 = vpop.f32.mrb[23].mxu0  ;;  %v695_v10 = vpop.f32.mrb[23].mxu1 }
 0x12a   : > { %v1342_v11 = vpack.c.bf16 %v1666_v3, %v1664_v60  ;;  %v768_v58 = vmul.f32 %v1632_v57, %v1632_v57  ;;  %v769_v62 = vmul.f32 %v1634_v63, %v1634_v63 }
 0x12b   : > { %v792_v12 = vadd.f32 %v791_v4, %v761_v6  ;;  %1358 = vst [vmem:[%s1624_s20 + $0x28] sm:$0xff] %v1302_v7  }
 0x12c   : > { %1366 = vst [vmem:[%s1624_s20 + $0x68] sm:$0xff] %v1342_v11  }
 0x12e   : > { %v634_v13 = vpop.f32.mrb[24].mxu0  ;;  %v1672_v14 = vpop.f32.mrb[24].mxu1 }
 0x12f   : > { %v724_v16 = vadd.f32 %v723_v5, %v634_v13  ;;  %v762_v17 = vmul.f32 %v634_v13, %v634_v13  ;;  %v636_v18 = vpop.f32.mrb[25].mxu0  ;;  %v700_v19 = vpop.f32.mrb[25].mxu1 }
 0x130   : > { %v637_v20 = vpop.f32.mrb[26].mxu0  ;;  %v1674_v21 = vpop.f32.mrb[26].mxu1  ;;  %v776_v19 = vmul.f32 %v1664_v60, %v1664_v60 }
 0x131   : > { %v793_v22 = vadd.f32 %v792_v12, %v762_v17  ;;  %v725_v23 = vadd.f32 %v724_v16, %v637_v20  ;;  %v763_v24 = vmul.f32 %v637_v20, %v637_v20  ;;  %v1307_v26 = vpack.c.bf16 %v637_v20, %v634_v13  ;;  %v639_v27 = vpop.f32.mrb[27].mxu0  ;;  %v703_v28 = vpop.f32.mrb[27].mxu1 }
 0x132   : > { %v1347_v29 = vpack.c.bf16 %v1674_v21, %v1672_v14  ;;  %v774_v12 = vmul.f32 %v1656_v41, %v1656_v41  ;;  %v775_v17 = vmul.f32 %v1658_v49, %v1658_v49 }
 0x133   : > { %v794_v30 = vadd.f32 %v793_v22, %v763_v24  ;;  %1359 = vst [vmem:[%s1624_s20 + $0x30] sm:$0xff] %v1307_v26   ;;  %v778_v24 = vmul.f32 %v1672_v14, %v1672_v14 }
 0x134   : > { %1367 = vst [vmem:[%s1624_s20 + $0x70] sm:$0xff] %v1347_v29  }
 0x136   : > { %v642_v32 = vpop.f32.mrb[28].mxu0  ;;  %v706_v33 = vpop.f32.mrb[28].mxu1 }
 0x137   : > { %v726_v34 = vadd.f32 %v725_v23, %v642_v32  ;;  %v764_v35 = vmul.f32 %v642_v32, %v642_v32  ;;  %v644_v36 = vpop.f32.mrb[29].mxu0  ;;  %v708_v37 = vpop.f32.mrb[29].mxu1  ;;  %v780_v27 = vmul.f32 %v706_v33, %v706_v33 }
 0x138   : > { %v645_v38 = vpop.f32.mrb[30].mxu0  ;;  %v709_v39 = vpop.f32.mrb[30].mxu1 }
 0x139   : > { %v795_v40 = vadd.f32 %v794_v30, %v764_v35  ;;  %v727_v42 = vadd.f32 %v726_v34, %v645_v38  ;;  %v765_v44 = vmul.f32 %v645_v38, %v645_v38  ;;  %v1312_v45 = vpack.c.bf16 %v645_v38, %v642_v32  ;;  %v647_v46 = vpop.f32.mrb[31].mxu0  ;;  %v711_v48 = vpop.f32.mrb[31].mxu1 }
 0x13a   : > { %v1352_v50 = vpack.c.bf16 %v709_v39, %v706_v33  ;;  %v781_v34 = vmul.f32 %v709_v39, %v709_v39  ;;  %v819_v38 = vlaneseq }
 0x13b   : > { %v728_v52 = vadd.f32 %v727_v42, %v1619_v43  ;;  %v796_v53 = vadd.f32 %v795_v40, %v765_v44  ;;  %1360 = vst [vmem:[%s1624_s20 + $0x38] sm:$0xff] %v1312_v45  }
 0x13c   : > { %1368 = vst [vmem:[%s1624_s20 + $0x78] sm:$0xff] %v1352_v50   ;;  %v820_v45 = vshrl.u32 %v819_v38, 7 }
 0x13d   : > { %v729_v55 = vadd.f32 %v728_v52, %v1626_v47  ;;  %v797_v56 = vadd.f32 %v796_v53, %v766_v51  ;;  %v771_v47 = vmul.f32 %v1642_v15, %v1642_v15 }
 0x13e   : > { %vm822_vm1 = vcmp.eq.s32.totalorder %v820_v45, 1  ;;  %vm821_vm2 = vcmp.eq.s32.totalorder %v820_v45, 0 }
 0x13f   : > { %v730_v59 = vadd.f32 %v729_v55, %v1632_v57  ;;  %v798_v61 = vadd.f32 %v797_v56, %v767_v54  ;;  %v772_v57 = vmul.f32 %v1648_v25, %v1648_v25 }
 0x141   : > { %v731_v43 = vadd.f32 %v730_v59, %v1634_v63  ;;  %v799_v0 = vadd.f32 %v798_v61, %v768_v58  ;;  %v773_v63 = vmul.f32 %v1650_v31, %v1650_v31 }
 0x143   : > { %v800_v2 = vadd.f32 %v799_v0, %v769_v62  ;;  %v732_v4 = vadd.f32 %v731_v43, %v1640_v9 }
 0x145   : > { %v733_v5 = vadd.f32 %v732_v4, %v1642_v15  ;;  %v801_v6 = vadd.f32 %v800_v2, %v770_v1 }
 0x147   : > { %v734_v7 = vadd.f32 %v733_v5, %v1648_v25  ;;  %v802_v8 = vadd.f32 %v801_v6, %v771_v47 }
 0x149   : > { %v735_v10 = vadd.f32 %v734_v7, %v1650_v31  ;;  %v803_v11 = vadd.f32 %v802_v8, %v772_v57 }
 0x14b   : > { %v736_v9 = vadd.f32 %v735_v10, %v1656_v41  ;;  %v804_v13 = vadd.f32 %v803_v11, %v773_v63  ;;  %v777_v41 = vmul.f32 %v1666_v3, %v1666_v3 }
 0x14d   : > { %v805_v15 = vadd.f32 %v804_v13, %v774_v12  ;;  %v737_v16 = vadd.f32 %v736_v9, %v1658_v49 }
 0x14f   : > { %v806_v25 = vadd.f32 %v805_v15, %v775_v17  ;;  %v738_v18 = vadd.f32 %v737_v16, %v1664_v60  ;;  %v779_v60 = vmul.f32 %v1674_v21, %v1674_v21 }
 0x151   : > { %v807_v31 = vadd.f32 %v806_v25, %v776_v19  ;;  %v739_v20 = vadd.f32 %v738_v18, %v1666_v3 }
 0x153   : > { %v808_v22 = vadd.f32 %v807_v31, %v777_v41  ;;  %v740_v23 = vadd.f32 %v739_v20, %v1672_v14 }
 0x155   : > { %v809_v49 = vadd.f32 %v808_v22, %v778_v24  ;;  %v741_v26 = vadd.f32 %v740_v23, %v1674_v21 }
 0x157   : > { %v810_v28 = vadd.f32 %v809_v49, %v779_v60  ;;  %v742_v29 = vadd.f32 %v741_v26, %v706_v33 }
 0x159   : > { %v811_v30 = vadd.f32 %v810_v28, %v780_v27  ;;  %v743_v32 = vadd.f32 %v742_v29, %v709_v39 }
 0x15b   : > { %v744_v3 = vrot.slane %v743_v32, 4  ;;  %v812_v35 = vadd.f32 %v811_v30, %v781_v34 }
 0x15d   : > { %v745_v36 = vadd.f32 %v744_v3, %v743_v32  ;;  %v813_v37 = vrot.slane %v812_v35, 4 }
 0x15f   : > { %v746_v14 = vrot.slane %v745_v36, 2  ;;  %v814_v40 = vadd.f32 %v813_v37, %v812_v35 }
 0x161   : > { %v747_v42 = vadd.f32 %v746_v14, %v745_v36  ;;  %v815_v44 = vrot.slane %v814_v40, 2 }
 0x163   : > { %v816_v46 = vadd.f32 %v815_v44, %v814_v40  ;;  %v748_v21 = vrot.slane %v747_v42, 1 }
 0x165   : > { %v817_v48 = vrot.slane %v816_v46, 1  ;;  %v749_v39 = vadd.f32 %v748_v21, %v747_v42 }
 0x167   : > { %v818_v33 = vadd.f32 %v817_v48, %v816_v46 }
 0x169   : > { %v823_v50 = vsel %vm822_vm1, %v818_v33, 0.0 }
 0x16a   : > { %v824_v51 = vsel %vm821_vm2, %v749_v39, %v823_v50 }
 0x16b   : > { %825 = vst [vmem:[%s253_s23] sm:$0xff] %v824_v51 }
 0x16c PF: > { %s14_s14 = sadd.s32 1, %s1491_s14   ;;  %s1742_s12 = smov %s1487_s13 }
 0x16d   : > { %p11_p6 = scmp.ge.s32.totalorder %s14_s14, 4   ;;  %s1743_s13 = smov %s1745_s15 }
 0x16f   :  { %13 = sbr.rel (!%p11_p6) target bundleno = 2 (0x2), region = 73 }

// kernel: _lambda_.16
= control target key start
LH: loop header
LB: loop body
LE: loop exit
PB: predicated region body
PF: predicated region fallthrough
CT: control target
= control target key end

     0   :  { %s2185_s12 = smov 0   ;;  %s2187_s13 = smov 0   ;;  %s2525_s0 = inlined_call_operand.vmem [shape: bf16[4,512,64], index: 0, kind: input, shape index: {}]   ;;  %s2526_s1 = inlined_call_operand.vmem [shape: bf16[4,64,128], index: 1, kind: input, shape index: {}]   ;;  %s2527_s2 = inlined_call_operand.vmem [shape: bf16[4,512,128], index: 2, kind: output, shape index: {0}]   ;;  %s2528_s3 = inlined_call_operand.vmem [shape: f32[4,1,8,128], index: 3, kind: output, shape index: {1}]  }
   0x1   :  { %s2189_s14 = smov 0  }
   0x2 LB: > { %s26_s15 = sadd.s32 1, %s2159_s13  ;;  %p1565_p0 = scmp.ge.s32.totalorder %s2163_s14, 1  ;;  %s2163_s14 = sphi %s2189_s14, %s14_s14   ;;  %s2159_s13 = sphi %s2187_s13, %s2530_s13   ;;  %s2155_s12 = sphi %s2185_s12, %s2529_s12  }
   0x3   : > { %p28_p1 = scmp.ge.s32.totalorder %s26_s15, 4  ;;  %p173_p2 = scmp.lt.s32.totalorder %s2163_s14, 5 }
   0x5   : > { %s2532_s15 = smov (%p28_p1, %s26_s15), 0  ;;  %p174_p3 = pnand %p1565_p0, %p173_p2 }
   0x6   : > { %p218_p4 = scmp.lt.s32.totalorder (!%p174_p3), %s2155_s12, 3  ;;  %vm506_vm0 = vcmask (!%p174_p3), 523264  }
   0x7   : > { %177 = sbr.rel (%p174_p3) target bundleno = 392 (0x188), region = 28 }
   0xe   : > { %s2534_s12 = smov (!%p218_p4, %s2155_s12), 3 }
   0xf   : > { %s1707_s16 = sshll.u32 %s2534_s12, 8  ;;  %s1708_s17 = sshll.u32 %s2534_s12, 5 }
  0x10   : > { %s231_s20 = scalar_lea.vmem %s2526_s1, %s1708_s17  ;;  %s2215_s23 = scalar_lea.vmem %s2525_s0, %s1707_s16 }
  0x11   : > { %v2105_v0 = vld [vmem:[%s231_s20] sm:$0xff]   ;;  %v2106_v1 = vld [vmem:[%s231_s20 + $0x8] sm:$0xff]   ;;  %v2107_v2 = vld [vmem:[%s231_s20 + $0x10] sm:$0xff]   ;;  %s2286_s26 = scalar_lea.vmem %s2527_s2, %s1707_s16  ;;  %s1572_s27 = sshll.u32 %s2534_s12, 3 }
  0x12   : > { %2001 = vmatprep.subr.bf16.mxu0 %v2105_v0  ;;  %2073 = vmatprep.subr.bf16.mxu1 %v2105_v0  ;;  %v2109_v3 = vld [vmem:[%s2215_s23] sm:$0xff]   ;;  %v2108_v4 = vld [vmem:[%s231_s20 + $0x18] sm:$0xff]   ;;  %v2110_v5 = vld [vmem:[%s2215_s23 + $0x8] sm:$0xff]   ;;  %s248_s30 = scalar_lea.vmem %s2528_s3, %s1572_s27 }
  0x13   : > { %2002 = vmatpush3.bf16.msra.mxu0 %v2105_v0  ;;  %2077 = vmatpush3.bf16.msra.mxu1 %v2105_v0  ;;  %v2111_v6 = vld [vmem:[%s2215_s23 + $0x10] sm:$0xff]   ;;  %v2112_v7 = vld [vmem:[%s2215_s23 + $0x18] sm:$0xff]   ;;  %v2125_v8 = vld [vmem:[%s2215_s23 + $0x80] sm:$0xff]  }
  0x14   : > { %2003 = vmatprep.subr.bf16.mxu0 %v2106_v1  ;;  %2074 = vmatprep.subr.bf16.mxu1 %v2106_v1  ;;  %v2126_v9 = vld [vmem:[%s2215_s23 + $0x88] sm:$0xff]   ;;  %v2127_v10 = vld [vmem:[%s2215_s23 + $0x90] sm:$0xff]   ;;  %v2113_v11 = vld [vmem:[%s2215_s23 + $0x20] sm:$0xff]  }
  0x15   : > { %2009 = vmatprep.mubr.msk.bf16.mxu0 %vm506_vm0, %v2109_v3  ;;  %2041 = vmatprep.mubr.msk.bf16.mxu1 %vm506_vm0, %v2125_v8  ;;  %v2128_v12 = vld [vmem:[%s2215_s23 + $0x98] sm:$0xff]   ;;  %v2129_v13 = vld [vmem:[%s2215_s23 + $0xa0] sm:$0xff]   ;;  %v2114_v14 = vld [vmem:[%s2215_s23 + $0x28] sm:$0xff]  }
  0x16   : > { %v2115_v15 = vld [vmem:[%s2215_s23 + $0x30] sm:$0xff]   ;;  %v2130_v16 = vld [vmem:[%s2215_s23 + $0xa8] sm:$0xff]   ;;  %v2116_v18 = vld [vmem:[%s2215_s23 + $0x38] sm:$0xff]  }
  0x17   : > { %2004 = vmatpush3.bf16.msra.mxu0 %v2106_v1  ;;  %2078 = vmatpush3.bf16.msra.mxu1 %v2106_v1  ;;  %v2131_v17 = vld [vmem:[%s2215_s23 + $0xb0] sm:$0xff]   ;;  %v2117_v19 = vld [vmem:[%s2215_s23 + $0x40] sm:$0xff]   ;;  %v2132_v20 = vld [vmem:[%s2215_s23 + $0xb8] sm:$0xff]  }
  0x18   : > { %2005 = vmatprep.subr.bf16.mxu0 %v2107_v2  ;;  %2075 = vmatprep.subr.bf16.mxu1 %v2107_v2  ;;  %v2133_v21 = vld [vmem:[%s2215_s23 + $0xc0] sm:$0xff]   ;;  %v2118_v22 = vld [vmem:[%s2215_s23 + $0x48] sm:$0xff]   ;;  %v2119_v23 = vld [vmem:[%s2215_s23 + $0x50] sm:$0xff]  }
  0x19   : > { %v2134_v24 = vld [vmem:[%s2215_s23 + $0xc8] sm:$0xff]   ;;  %v2135_v25 = vld [vmem:[%s2215_s23 + $0xd0] sm:$0xff]   ;;  %v2120_v26 = vld [vmem:[%s2215_s23 + $0x58] sm:$0xff]  }
  0x1a   : > { %v2121_v27 = vld [vmem:[%s2215_s23 + $0x60] sm:$0xff]   ;;  %v2136_v28 = vld [vmem:[%s2215_s23 + $0xd8] sm:$0xff]   ;;  %v2122_v30 = vld [vmem:[%s2215_s23 + $0x68] sm:$0xff]  }
  0x1b   : > { %2006 = vmatpush3.bf16.msra.mxu0 %v2107_v2  ;;  %2079 = vmatpush3.bf16.msra.mxu1 %v2107_v2  ;;  %v2137_v29 = vld [vmem:[%s2215_s23 + $0xe0] sm:$0xff]   ;;  %v2123_v31 = vld [vmem:[%s2215_s23 + $0x70] sm:$0xff]   ;;  %v2138_v32 = vld [vmem:[%s2215_s23 + $0xe8] sm:$0xff]  }
  0x1c   : > { %2007 = vmatprep.subr.bf16.mxu0 %v2108_v4  ;;  %2076 = vmatprep.subr.bf16.mxu1 %v2108_v4  ;;  %v2139_v33 = vld [vmem:[%s2215_s23 + $0xf0] sm:$0xff]   ;;  %v2124_v34 = vld [vmem:[%s2215_s23 + $0x78] sm:$0xff]  }
  0x1d   : > { %v2140_v35 = vld [vmem:[%s2215_s23 + $0xf8] sm:$0xff]  }
  0x1f   : > { %2008 = vmatpush3.bf16.msra.mxu0 %v2108_v4  ;;  %2080 = vmatpush3.bf16.msra.mxu1 %v2108_v4 }
  0x22   : > { %2010 = vmatmul.mubr.msk.bf16.vlgmr.msra.gmra.mrb[0].mxu0 %vm506_vm0, %v2110_v5  ;;  %2042 = vmatmul.mubr.msk.bf16.vlgmr.msra.gmra.mrb[0].mxu1 %vm506_vm0, %v2126_v9 }
  0x23   : > { %2013 = vmatprep.mubr.msk.bf16.mxu0 %vm506_vm0, %v2111_v6  ;;  %2045 = vmatprep.mubr.msk.bf16.mxu1 %vm506_vm0, %v2127_v10 }
  0x2a   : > { %2014 = vmatmul.mubr.msk.bf16.gmra.mrb[4].mxu0 %vm506_vm0, %v2112_v7  ;;  %2046 = vmatmul.mubr.msk.bf16.gmra.mrb[4].mxu1 %vm506_vm0, %v2128_v12 }
  0x2b   : > { %2017 = vmatprep.mubr.msk.bf16.mxu0 %vm506_vm0, %v2113_v11  ;;  %2049 = vmatprep.mubr.msk.bf16.mxu1 %vm506_vm0, %v2129_v13 }
  0x32   : > { %2018 = vmatmul.mubr.msk.bf16.gmra.mrb[8].mxu0 %vm506_vm0, %v2114_v14  ;;  %2050 = vmatmul.mubr.msk.bf16.gmra.mrb[8].mxu1 %vm506_vm0, %v2130_v16 }
  0x33   : > { %2021 = vmatprep.mubr.msk.bf16.mxu0 %vm506_vm0, %v2115_v15  ;;  %2053 = vmatprep.mubr.msk.bf16.mxu1 %vm506_vm0, %v2131_v17 }
  0x3a   : > { %2022 = vmatmul.mubr.msk.bf16.gmra.mrb[12].mxu0 %vm506_vm0, %v2116_v18  ;;  %2054 = vmatmul.mubr.msk.bf16.gmra.mrb[12].mxu1 %vm506_vm0, %v2132_v20 }
  0x3b   : > { %2025 = vmatprep.mubr.msk.bf16.mxu0 %vm506_vm0, %v2117_v19  ;;  %2057 = vmatprep.mubr.msk.bf16.mxu1 %vm506_vm0, %v2133_v21 }
  0x42   : > { %2026 = vmatmul.mubr.msk.bf16.gmra.mrb[16].mxu0 %vm506_vm0, %v2118_v22  ;;  %2058 = vmatmul.mubr.msk.bf16.gmra.mrb[16].mxu1 %vm506_vm0, %v2134_v24 }
  0x43   : > { %2029 = vmatprep.mubr.msk.bf16.mxu0 %vm506_vm0, %v2119_v23  ;;  %2061 = vmatprep.mubr.msk.bf16.mxu1 %vm506_vm0, %v2135_v25 }
  0x4a   : > { %2030 = vmatmul.mubr.msk.bf16.gmra.mrb[20].mxu0 %vm506_vm0, %v2120_v26  ;;  %2062 = vmatmul.mubr.msk.bf16.gmra.mrb[20].mxu1 %vm506_vm0, %v2136_v28 }
  0x4b   : > { %2033 = vmatprep.mubr.msk.bf16.mxu0 %vm506_vm0, %v2121_v27  ;;  %2065 = vmatprep.mubr.msk.bf16.mxu1 %vm506_vm0, %v2137_v29 }
  0x52   : > { %2034 = vmatmul.mubr.msk.bf16.gmra.mrb[24].mxu0 %vm506_vm0, %v2122_v30  ;;  %2066 = vmatmul.mubr.msk.bf16.gmra.mrb[24].mxu1 %vm506_vm0, %v2138_v32 }
  0x53   : > { %2037 = vmatprep.mubr.msk.bf16.mxu0 %vm506_vm0, %v2123_v31  ;;  %2069 = vmatprep.mubr.msk.bf16.mxu1 %vm506_vm0, %v2139_v33 }
  0x5a   : > { %2038 = vmatmul.mubr.msk.bf16.gmra.mrb[28].mxu0 %vm506_vm0, %v2124_v34  ;;  %2070 = vmatmul.mubr.msk.bf16.gmra.mrb[28].mxu1 %vm506_vm0, %v2140_v35 }
  0xf5   : > { %v2011_v36 = vpop.f32.mrb[0].mxu0  ;;  %v2289_v45 = vpop.f32.mrb[0].mxu1 }
  0xf6   : > { %v637_v37 = vpop.f32.mrb[1].mxu0  ;;  %v963_v46 = vmul.f32 %v2011_v36, %v2011_v36  ;;  %v2292_v49 = vpop.f32.mrb[1].mxu1 }
  0xf7   : > { %v2012_v38 = vpop.f32.mrb[2].mxu0  ;;  %v961_v41 = vmul.f32 %v637_v37, %v637_v37  ;;  %v2294_v50 = vpop.f32.mrb[2].mxu1 }
  0xf8   : > { %v1782_v39 = vpack.c.bf16 %v2012_v38, %v2011_v36  ;;  %v640_v40 = vpop.f32.mrb[3].mxu0  ;;  %v964_v51 = vmul.f32 %v2012_v38, %v2012_v38  ;;  %v1862_v55 = vpack.c.bf16 %v2294_v50, %v2289_v45  ;;  %v2298_v56 = vpop.f32.mrb[3].mxu1 }
  0xf9   : > { %v892_v42 = vadd.f32 %v640_v40, %v637_v37  ;;  %v962_v43 = vmul.f32 %v640_v40, %v640_v40  ;;  %v1777_v44 = vpack.c.bf16 %v640_v40, %v637_v37  ;;  %v1857_v58 = vpack.c.bf16 %v2298_v56, %v2292_v49 }
  0xfa   : > { %1934 = vst [vmem:[%s2286_s26 + $0x8] sm:$0xff] %v1782_v39   ;;  %1950 = vst [vmem:[%s2286_s26 + $0x88] sm:$0xff] %v1862_v55  }
  0xfb   : > { %v893_v47 = vadd.f32 %v2011_v36, %v892_v42  ;;  %v1025_v48 = vadd.f32 %v962_v43, %v961_v41  ;;  %1778 = vst [vmem:[%s2286_s26] sm:$0xff] %v1777_v44   ;;  %1949 = vst [vmem:[%s2286_s26 + $0x80] sm:$0xff] %v1857_v58  }
  0xfd   : > { %v1026_v52 = vadd.f32 %v1025_v48, %v963_v46  ;;  %v2015_v53 = vpop.f32.mrb[4].mxu0  ;;  %v894_v54 = vadd.f32 %v2012_v38, %v893_v47  ;;  %v2305_v5 = vpop.f32.mrb[4].mxu1 }
  0xfe   : > { %v653_v57 = vpop.f32.mrb[5].mxu0  ;;  %v967_v6 = vmul.f32 %v2015_v53, %v2015_v53  ;;  %v2308_v9 = vpop.f32.mrb[5].mxu1 }
  0xff   : > { %v895_v59 = vadd.f32 %v894_v54, %v653_v57  ;;  %v965_v60 = vmul.f32 %v653_v57, %v653_v57  ;;  %v1027_v61 = vadd.f32 %v1026_v52, %v964_v51  ;;  %v2016_v62 = vpop.f32.mrb[6].mxu0  ;;  %v2310_v10 = vpop.f32.mrb[6].mxu1 }
 0x100   : > { %v1792_v63 = vpack.c.bf16 %v2016_v62, %v2015_v53  ;;  %v656_v0 = vpop.f32.mrb[7].mxu0  ;;  %v968_v11 = vmul.f32 %v2016_v62, %v2016_v62  ;;  %v1872_v15 = vpack.c.bf16 %v2310_v10, %v2305_v5  ;;  %v2314_v16 = vpop.f32.mrb[7].mxu1 }
 0x101   : > { %v1028_v1 = vadd.f32 %v1027_v61, %v965_v60  ;;  %v896_v2 = vadd.f32 %v895_v59, %v656_v0  ;;  %v966_v3 = vmul.f32 %v656_v0, %v656_v0  ;;  %v1787_v4 = vpack.c.bf16 %v656_v0, %v653_v57 }
 0x102   : > { %1936 = vst [vmem:[%s2286_s26 + $0x18] sm:$0xff] %v1792_v63   ;;  %v1867_v18 = vpack.c.bf16 %v2314_v16, %v2308_v9  ;;  %1952 = vst [vmem:[%s2286_s26 + $0x98] sm:$0xff] %v1872_v15  }
 0x103   : > { %v897_v7 = vadd.f32 %v2015_v53, %v896_v2  ;;  %v1029_v8 = vadd.f32 %v1028_v1, %v966_v3  ;;  %1935 = vst [vmem:[%s2286_s26 + $0x10] sm:$0xff] %v1787_v4  }
 0x104   : > { %1951 = vst [vmem:[%s2286_s26 + $0x90] sm:$0xff] %v1867_v18  }
 0x105   : > { %v1030_v12 = vadd.f32 %v1029_v8, %v967_v6  ;;  %v2019_v13 = vpop.f32.mrb[8].mxu0  ;;  %v898_v14 = vadd.f32 %v2016_v62, %v897_v7  ;;  %v2321_v29 = vpop.f32.mrb[8].mxu1 }
 0x106   : > { %v669_v17 = vpop.f32.mrb[9].mxu0  ;;  %v971_v30 = vmul.f32 %v2019_v13, %v2019_v13  ;;  %v2324_v33 = vpop.f32.mrb[9].mxu1 }
 0x107   : > { %v899_v19 = vadd.f32 %v898_v14, %v669_v17  ;;  %v969_v20 = vmul.f32 %v669_v17, %v669_v17  ;;  %v1031_v21 = vadd.f32 %v1030_v12, %v968_v11  ;;  %v2020_v22 = vpop.f32.mrb[10].mxu0  ;;  %v2326_v34 = vpop.f32.mrb[10].mxu1 }
 0x108   : > { %v1802_v23 = vpack.c.bf16 %v2020_v22, %v2019_v13  ;;  %v672_v24 = vpop.f32.mrb[11].mxu0  ;;  %v972_v35 = vmul.f32 %v2020_v22, %v2020_v22  ;;  %v1882_v39 = vpack.c.bf16 %v2326_v34, %v2321_v29  ;;  %v2330_v40 = vpop.f32.mrb[11].mxu1 }
 0x109   : > { %v1032_v25 = vadd.f32 %v1031_v21, %v969_v20  ;;  %v900_v26 = vadd.f32 %v899_v19, %v672_v24  ;;  %v970_v27 = vmul.f32 %v672_v24, %v672_v24  ;;  %v1797_v28 = vpack.c.bf16 %v672_v24, %v669_v17 }
 0x10a   : > { %1938 = vst [vmem:[%s2286_s26 + $0x28] sm:$0xff] %v1802_v23   ;;  %v1877_v42 = vpack.c.bf16 %v2330_v40, %v2324_v33  ;;  %1954 = vst [vmem:[%s2286_s26 + $0xa8] sm:$0xff] %v1882_v39  }
 0x10b   : > { %v901_v31 = vadd.f32 %v2019_v13, %v900_v26  ;;  %v1033_v32 = vadd.f32 %v1032_v25, %v970_v27  ;;  %1937 = vst [vmem:[%s2286_s26 + $0x20] sm:$0xff] %v1797_v28  }
 0x10c   : > { %1953 = vst [vmem:[%s2286_s26 + $0xa0] sm:$0xff] %v1877_v42  }
 0x10d   : > { %v1034_v36 = vadd.f32 %v1033_v32, %v971_v30  ;;  %v2023_v37 = vpop.f32.mrb[12].mxu0  ;;  %v902_v38 = vadd.f32 %v2020_v22, %v901_v31  ;;  %v2337_v57 = vpop.f32.mrb[12].mxu1 }
 0x10e   : > { %v685_v41 = vpop.f32.mrb[13].mxu0  ;;  %v975_v58 = vmul.f32 %v2023_v37, %v2023_v37  ;;  %v2340_v61 = vpop.f32.mrb[13].mxu1 }
 0x10f   : > { %v903_v43 = vadd.f32 %v902_v38, %v685_v41  ;;  %v973_v44 = vmul.f32 %v685_v41, %v685_v41  ;;  %v1035_v46 = vadd.f32 %v1034_v36, %v972_v35  ;;  %v2024_v47 = vpop.f32.mrb[14].mxu0  ;;  %v2342_v62 = vpop.f32.mrb[14].mxu1 }
 0x110   : > { %v1812_v48 = vpack.c.bf16 %v2024_v47, %v2023_v37  ;;  %v688_v51 = vpop.f32.mrb[15].mxu0  ;;  %v976_v63 = vmul.f32 %v2024_v47, %v2024_v47  ;;  %v1892_v3 = vpack.c.bf16 %v2342_v62, %v2337_v57  ;;  %v2346_v4 = vpop.f32.mrb[15].mxu1 }
 0x111   : > { %v1036_v52 = vadd.f32 %v1035_v46, %v973_v44  ;;  %v904_v53 = vadd.f32 %v903_v43, %v688_v51  ;;  %v974_v54 = vmul.f32 %v688_v51, %v688_v51  ;;  %v1807_v55 = vpack.c.bf16 %v688_v51, %v685_v41 }
 0x112   : > { %1940 = vst [vmem:[%s2286_s26 + $0x38] sm:$0xff] %v1812_v48   ;;  %v1887_v7 = vpack.c.bf16 %v2346_v4, %v2340_v61  ;;  %1956 = vst [vmem:[%s2286_s26 + $0xb8] sm:$0xff] %v1892_v3  }
 0x113   : > { %v905_v59 = vadd.f32 %v2023_v37, %v904_v53  ;;  %v1037_v60 = vadd.f32 %v1036_v52, %v974_v54  ;;  %1939 = vst [vmem:[%s2286_s26 + $0x30] sm:$0xff] %v1807_v55  }
 0x114   : > { %1955 = vst [vmem:[%s2286_s26 + $0xb0] sm:$0xff] %v1887_v7  }
 0x115   : > { %v1038_v0 = vadd.f32 %v1037_v60, %v975_v58  ;;  %v2027_v1 = vpop.f32.mrb[16].mxu0  ;;  %v906_v2 = vadd.f32 %v2024_v47, %v905_v59  ;;  %v2353_v21 = vpop.f32.mrb[16].mxu1 }
 0x116   : > { %v701_v6 = vpop.f32.mrb[17].mxu0  ;;  %v979_v22 = vmul.f32 %v2027_v1, %v2027_v1  ;;  %v2356_v25 = vpop.f32.mrb[17].mxu1 }
 0x117   : > { %v907_v8 = vadd.f32 %v906_v2, %v701_v6  ;;  %v977_v11 = vmul.f32 %v701_v6, %v701_v6  ;;  %v1039_v12 = vadd.f32 %v1038_v0, %v976_v63  ;;  %v2028_v13 = vpop.f32.mrb[18].mxu0  ;;  %v2358_v26 = vpop.f32.mrb[18].mxu1 }
 0x118   : > { %v1822_v14 = vpack.c.bf16 %v2028_v13, %v2027_v1  ;;  %v704_v15 = vpop.f32.mrb[19].mxu0  ;;  %v980_v27 = vmul.f32 %v2028_v13, %v2028_v13  ;;  %v1902_v32 = vpack.c.bf16 %v2358_v26, %v2353_v21  ;;  %v2362_v35 = vpop.f32.mrb[19].mxu1 }
 0x119   : > { %v1040_v17 = vadd.f32 %v1039_v12, %v977_v11  ;;  %v908_v18 = vadd.f32 %v907_v8, %v704_v15  ;;  %v978_v19 = vmul.f32 %v704_v15, %v704_v15  ;;  %v1817_v20 = vpack.c.bf16 %v704_v15, %v701_v6 }
 0x11a   : > { %1942 = vst [vmem:[%s2286_s26 + $0x48] sm:$0xff] %v1822_v14   ;;  %v1897_v37 = vpack.c.bf16 %v2362_v35, %v2356_v25  ;;  %1958 = vst [vmem:[%s2286_s26 + $0xc8] sm:$0xff] %v1902_v32  }
 0x11b   : > { %v909_v23 = vadd.f32 %v2027_v1, %v908_v18  ;;  %v1041_v24 = vadd.f32 %v1040_v17, %v978_v19  ;;  %1941 = vst [vmem:[%s2286_s26 + $0x40] sm:$0xff] %v1817_v20  }
 0x11c   : > { %1957 = vst [vmem:[%s2286_s26 + $0xc0] sm:$0xff] %v1897_v37  }
 0x11d   : > { %v1042_v28 = vadd.f32 %v1041_v24, %v979_v22  ;;  %v2031_v30 = vpop.f32.mrb[20].mxu0  ;;  %v910_v31 = vadd.f32 %v2028_v13, %v909_v23  ;;  %v2369_v52 = vpop.f32.mrb[20].mxu1 }
 0x11e   : > { %v717_v36 = vpop.f32.mrb[21].mxu0  ;;  %v983_v53 = vmul.f32 %v2031_v30, %v2031_v30  ;;  %v2372_v58 = vpop.f32.mrb[21].mxu1 }
 0x11f   : > { %v911_v38 = vadd.f32 %v910_v31, %v717_v36  ;;  %v981_v39 = vmul.f32 %v717_v36, %v717_v36  ;;  %v1043_v41 = vadd.f32 %v1042_v28, %v980_v27  ;;  %v2032_v42 = vpop.f32.mrb[22].mxu0  ;;  %v2374_v59 = vpop.f32.mrb[22].mxu1 }
 0x120   : > { %v1832_v43 = vpack.c.bf16 %v2032_v42, %v2031_v30  ;;  %v720_v44 = vpop.f32.mrb[23].mxu0  ;;  %v984_v60 = vmul.f32 %v2032_v42, %v2032_v42  ;;  %v1912_v2 = vpack.c.bf16 %v2374_v59, %v2369_v52  ;;  %v2378_v3 = vpop.f32.mrb[23].mxu1 }
 0x121   : > { %v1044_v46 = vadd.f32 %v1043_v41, %v981_v39  ;;  %v912_v47 = vadd.f32 %v911_v38, %v720_v44  ;;  %v982_v48 = vmul.f32 %v720_v44, %v720_v44  ;;  %v1827_v51 = vpack.c.bf16 %v720_v44, %v717_v36 }
 0x122   : > { %1944 = vst [vmem:[%s2286_s26 + $0x58] sm:$0xff] %v1832_v43   ;;  %v1907_v7 = vpack.c.bf16 %v2378_v3, %v2372_v58  ;;  %1960 = vst [vmem:[%s2286_s26 + $0xd8] sm:$0xff] %v1912_v2  }
 0x123   : > { %v913_v54 = vadd.f32 %v2031_v30, %v912_v47  ;;  %v1045_v55 = vadd.f32 %v1044_v46, %v982_v48  ;;  %1943 = vst [vmem:[%s2286_s26 + $0x50] sm:$0xff] %v1827_v51  }
 0x124   : > { %1959 = vst [vmem:[%s2286_s26 + $0xd0] sm:$0xff] %v1907_v7   ;;  %v993_v7 = vmul.f32 %v2292_v49, %v2292_v49 }
 0x125   : > { %v1046_v63 = vadd.f32 %v1045_v55, %v983_v53  ;;  %v2035_v0 = vpop.f32.mrb[24].mxu0  ;;  %v914_v1 = vadd.f32 %v2032_v42, %v913_v54  ;;  %v2385_v22 = vpop.f32.mrb[24].mxu1 }
 0x126   : > { %v733_v6 = vpop.f32.mrb[25].mxu0  ;;  %v987_v23 = vmul.f32 %v2035_v0, %v2035_v0  ;;  %v2388_v28 = vpop.f32.mrb[25].mxu1 }
 0x127   : > { %v915_v8 = vadd.f32 %v914_v1, %v733_v6  ;;  %v985_v11 = vmul.f32 %v733_v6, %v733_v6  ;;  %v1047_v12 = vadd.f32 %v1046_v63, %v984_v60  ;;  %v2036_v13 = vpop.f32.mrb[26].mxu0  ;;  %v2390_v30 = vpop.f32.mrb[26].mxu1 }
 0x128   : > { %v1842_v14 = vpack.c.bf16 %v2036_v13, %v2035_v0  ;;  %v736_v15 = vpop.f32.mrb[27].mxu0  ;;  %v988_v31 = vmul.f32 %v2036_v13, %v2036_v13  ;;  %v1922_v38 = vpack.c.bf16 %v2390_v30, %v2385_v22  ;;  %v2394_v39 = vpop.f32.mrb[27].mxu1 }
 0x129   : > { %v1048_v17 = vadd.f32 %v1047_v12, %v985_v11  ;;  %v916_v18 = vadd.f32 %v915_v8, %v736_v15  ;;  %v986_v19 = vmul.f32 %v736_v15, %v736_v15  ;;  %v1837_v20 = vpack.c.bf16 %v736_v15, %v733_v6 }
 0x12a   : > { %1946 = vst [vmem:[%s2286_s26 + $0x68] sm:$0xff] %v1842_v14   ;;  %v1917_v42 = vpack.c.bf16 %v2394_v39, %v2388_v28  ;;  %1962 = vst [vmem:[%s2286_s26 + $0xe8] sm:$0xff] %v1922_v38   ;;  %v997_v38 = vmul.f32 %v2308_v9, %v2308_v9 }
 0x12b   : > { %v917_v24 = vadd.f32 %v2035_v0, %v916_v18  ;;  %v1049_v27 = vadd.f32 %v1048_v17, %v986_v19  ;;  %1945 = vst [vmem:[%s2286_s26 + $0x60] sm:$0xff] %v1837_v20  }
 0x12c   : > { %1961 = vst [vmem:[%s2286_s26 + $0xe0] sm:$0xff] %v1917_v42  }
 0x12d   : > { %v1050_v32 = vadd.f32 %v1049_v27, %v987_v23  ;;  %v2039_v36 = vpop.f32.mrb[28].mxu0  ;;  %v918_v37 = vadd.f32 %v2036_v13, %v917_v24  ;;  %v2401_v63 = vpop.f32.mrb[28].mxu1  ;;  %v994_v24 = vmul.f32 %v2298_v56, %v2298_v56  ;;  %v995_v27 = vmul.f32 %v2289_v45, %v2289_v45 }
 0x12e   : > { %v749_v41 = vpop.f32.mrb[29].mxu0  ;;  %v991_v0 = vmul.f32 %v2039_v36, %v2039_v36  ;;  %v2404_v6 = vpop.f32.mrb[29].mxu1 }
 0x12f   : > { %v919_v43 = vadd.f32 %v918_v37, %v749_v41  ;;  %v989_v44 = vmul.f32 %v749_v41, %v749_v41  ;;  %v1051_v46 = vadd.f32 %v1050_v32, %v988_v31  ;;  %v2040_v47 = vpop.f32.mrb[30].mxu0  ;;  %v2408_v8 = vpop.f32.mrb[30].mxu1 }
 0x130   : > { %v1852_v48 = vpack.c.bf16 %v2040_v47, %v2039_v36  ;;  %v752_v51 = vpop.f32.mrb[31].mxu0  ;;  %v992_v11 = vmul.f32 %v2040_v47, %v2040_v47  ;;  %v1932_v14 = vpack.c.bf16 %v2408_v8, %v2401_v63  ;;  %v2412_v15 = vpop.f32.mrb[31].mxu1 }
 0x131   : > { %v1052_v53 = vadd.f32 %v1051_v46, %v989_v44  ;;  %v920_v54 = vadd.f32 %v919_v43, %v752_v51  ;;  %v990_v55 = vmul.f32 %v752_v51, %v752_v51  ;;  %v1847_v60 = vpack.c.bf16 %v752_v51, %v749_v41 }
 0x132   : > { %1948 = vst [vmem:[%s2286_s26 + $0x78] sm:$0xff] %v1852_v48   ;;  %v1927_v17 = vpack.c.bf16 %v2412_v15, %v2404_v6  ;;  %1964 = vst [vmem:[%s2286_s26 + $0xf8] sm:$0xff] %v1932_v14   ;;  %v998_v44 = vmul.f32 %v2314_v16, %v2314_v16  ;;  %v1006_v14 = vmul.f32 %v2346_v4, %v2346_v4 }
 0x133   : > { %v921_v1 = vadd.f32 %v2039_v36, %v920_v54  ;;  %v1053_v2 = vadd.f32 %v1052_v53, %v990_v55  ;;  %1947 = vst [vmem:[%s2286_s26 + $0x70] sm:$0xff] %v1847_v60   ;;  %v996_v36 = vmul.f32 %v2294_v50, %v2294_v50  ;;  %v1002_v60 = vmul.f32 %v2330_v40, %v2330_v40 }
 0x134   : > { %1963 = vst [vmem:[%s2286_s26 + $0xf0] sm:$0xff] %v1927_v17  }
 0x135   : > { %v1054_v12 = vadd.f32 %v1053_v2, %v991_v0  ;;  %v922_v13 = vadd.f32 %v2040_v47, %v921_v1 }
 0x137   : > { %v923_v18 = vadd.f32 %v922_v13, %v2292_v49  ;;  %v1055_v19 = vadd.f32 %v1054_v12, %v992_v11 }
 0x139   : > { %v1056_v20 = vadd.f32 %v1055_v19, %v993_v7  ;;  %v924_v23 = vadd.f32 %v923_v18, %v2298_v56 }
 0x13b   : > { %v925_v31 = vadd.f32 %v2289_v45, %v924_v23  ;;  %v1057_v32 = vadd.f32 %v1056_v20, %v994_v24  ;;  %v999_v45 = vmul.f32 %v2305_v5, %v2305_v5 }
 0x13d   : > { %v1058_v37 = vadd.f32 %v1057_v32, %v995_v27  ;;  %v926_v49 = vadd.f32 %v2294_v50, %v925_v31  ;;  %v1000_v50 = vmul.f32 %v2310_v10, %v2310_v10  ;;  %v1010_v31 = vmul.f32 %v2362_v35, %v2362_v35 }
 0x13f   : > { %v927_v41 = vadd.f32 %v926_v49, %v2308_v9  ;;  %v1059_v42 = vadd.f32 %v1058_v37, %v996_v36  ;;  %v1001_v9 = vmul.f32 %v2324_v33, %v2324_v33 }
 0x141   : > { %v1060_v43 = vadd.f32 %v1059_v42, %v997_v38  ;;  %v928_v56 = vadd.f32 %v927_v41, %v2314_v16 }
 0x143   : > { %v929_v46 = vadd.f32 %v2305_v5, %v928_v56  ;;  %v1061_v47 = vadd.f32 %v1060_v43, %v998_v44  ;;  %v1003_v5 = vmul.f32 %v2321_v29, %v2321_v29  ;;  %v1014_v43 = vmul.f32 %v2378_v3, %v2378_v3 }
 0x145   : > { %v1062_v48 = vadd.f32 %v1061_v47, %v999_v45  ;;  %v930_v51 = vadd.f32 %v2310_v10, %v929_v46  ;;  %v1004_v10 = vmul.f32 %v2326_v34, %v2326_v34 }
 0x147   : > { %v931_v53 = vadd.f32 %v930_v51, %v2324_v33  ;;  %v1063_v54 = vadd.f32 %v1062_v48, %v1000_v50  ;;  %v1005_v33 = vmul.f32 %v2340_v61, %v2340_v61  ;;  %v1018_v51 = vmul.f32 %v2394_v39, %v2394_v39 }
 0x149   : > { %v1064_v55 = vadd.f32 %v1063_v54, %v1001_v9  ;;  %v932_v16 = vadd.f32 %v931_v53, %v2330_v40 }
 0x14b   : > { %v933_v0 = vadd.f32 %v2321_v29, %v932_v16  ;;  %v1065_v1 = vadd.f32 %v1064_v55, %v1002_v60  ;;  %v1007_v29 = vmul.f32 %v2337_v57, %v2337_v57 }
 0x14d   : > { %v1066_v2 = vadd.f32 %v1065_v1, %v1003_v5  ;;  %v934_v7 = vadd.f32 %v2326_v34, %v933_v0  ;;  %v1008_v34 = vmul.f32 %v2342_v62, %v2342_v62  ;;  %v1022_v0 = vmul.f32 %v2412_v15, %v2412_v15 }
 0x14f   : > { %v935_v11 = vadd.f32 %v934_v7, %v2340_v61  ;;  %v1067_v12 = vadd.f32 %v1066_v2, %v1004_v10  ;;  %v1009_v61 = vmul.f32 %v2356_v25, %v2356_v25 }
 0x151   : > { %v1068_v13 = vadd.f32 %v1067_v12, %v1005_v33  ;;  %v936_v40 = vadd.f32 %v935_v11, %v2346_v4 }
 0x153   : > { %v937_v17 = vadd.f32 %v2337_v57, %v936_v40  ;;  %v1069_v18 = vadd.f32 %v1068_v13, %v1006_v14  ;;  %v1011_v57 = vmul.f32 %v2353_v21, %v2353_v21  ;;  %v1094_v13 = vlaneseq }
 0x155   : > { %v1070_v19 = vadd.f32 %v1069_v18, %v1007_v29  ;;  %v938_v20 = vadd.f32 %v2342_v62, %v937_v17  ;;  %v1012_v62 = vmul.f32 %v2358_v26, %v2358_v26  ;;  %v1095_v17 = vshrl.u32 %v1094_v13, 7 }
 0x157   : > { %v939_v23 = vadd.f32 %v938_v20, %v2356_v25  ;;  %v1071_v24 = vadd.f32 %v1070_v19, %v1008_v34  ;;  %v1013_v25 = vmul.f32 %v2372_v58, %v2372_v58  ;;  %vm1097_vm1 = vcmp.eq.s32.totalorder %v1095_v17, 1 }
 0x158   : > { %vm1096_vm2 = vcmp.eq.s32.totalorder %v1095_v17, 0 }
 0x159   : > { %v1072_v27 = vadd.f32 %v1071_v24, %v1009_v61  ;;  %v940_v4 = vadd.f32 %v939_v23, %v2362_v35 }
 0x15b   : > { %v941_v32 = vadd.f32 %v2353_v21, %v940_v4  ;;  %v1073_v36 = vadd.f32 %v1072_v27, %v1010_v31  ;;  %v1015_v21 = vmul.f32 %v2369_v52, %v2369_v52 }
 0x15d   : > { %v1074_v37 = vadd.f32 %v1073_v36, %v1011_v57  ;;  %v942_v49 = vadd.f32 %v2358_v26, %v941_v32  ;;  %v1016_v26 = vmul.f32 %v2374_v59, %v2374_v59 }
 0x15f   : > { %v943_v38 = vadd.f32 %v942_v49, %v2372_v58  ;;  %v1075_v41 = vadd.f32 %v1074_v37, %v1012_v62  ;;  %v1017_v58 = vmul.f32 %v2388_v28, %v2388_v28 }
 0x161   : > { %v1076_v42 = vadd.f32 %v1075_v41, %v1013_v25  ;;  %v944_v35 = vadd.f32 %v943_v38, %v2378_v3 }
 0x163   : > { %v945_v56 = vadd.f32 %v2369_v52, %v944_v35  ;;  %v1077_v44 = vadd.f32 %v1076_v42, %v1014_v43  ;;  %v1019_v52 = vmul.f32 %v2385_v22, %v2385_v22 }
 0x165   : > { %v1078_v45 = vadd.f32 %v1077_v44, %v1015_v21  ;;  %v946_v46 = vadd.f32 %v2374_v59, %v945_v56  ;;  %v1020_v59 = vmul.f32 %v2390_v30, %v2390_v30 }
 0x167   : > { %v947_v47 = vadd.f32 %v946_v46, %v2388_v28  ;;  %v1079_v50 = vadd.f32 %v1078_v45, %v1016_v26  ;;  %v1021_v28 = vmul.f32 %v2404_v6, %v2404_v6 }
 0x169   : > { %v1080_v48 = vadd.f32 %v1079_v50, %v1017_v58  ;;  %v948_v3 = vadd.f32 %v947_v47, %v2394_v39 }
 0x16b   : > { %v949_v9 = vadd.f32 %v2385_v22, %v948_v3  ;;  %v1081_v53 = vadd.f32 %v1080_v48, %v1018_v51  ;;  %v1023_v22 = vmul.f32 %v2401_v63, %v2401_v63 }
 0x16d   : > { %v1082_v54 = vadd.f32 %v1081_v53, %v1019_v52  ;;  %v950_v55 = vadd.f32 %v2390_v30, %v949_v9  ;;  %v1024_v30 = vmul.f32 %v2408_v8, %v2408_v8 }
 0x16f   : > { %v951_v16 = vadd.f32 %v950_v55, %v2404_v6  ;;  %v1083_v60 = vadd.f32 %v1082_v54, %v1020_v59 }
 0x171   : > { %v1084_v5 = vadd.f32 %v1083_v60, %v1021_v28  ;;  %v952_v39 = vadd.f32 %v951_v16, %v2412_v15 }
 0x173   : > { %v953_v1 = vadd.f32 %v2401_v63, %v952_v39  ;;  %v1085_v10 = vadd.f32 %v1084_v5, %v1022_v0 }
 0x175   : > { %v954_v2 = vadd.f32 %v2408_v8, %v953_v1  ;;  %v1086_v6 = vadd.f32 %v1085_v10, %v1023_v22 }
 0x177   : > { %v955_v7 = vrot.slane %v954_v2, 4  ;;  %v1087_v33 = vadd.f32 %v1086_v6, %v1024_v30 }
 0x179   : > { %v956_v11 = vadd.f32 %v955_v7, %v954_v2  ;;  %v1088_v12 = vrot.slane %v1087_v33, 4 }
 0x17b   : > { %v957_v40 = vrot.slane %v956_v11, 2  ;;  %v1089_v15 = vadd.f32 %v1088_v12, %v1087_v33 }
 0x17d   : > { %v958_v14 = vadd.f32 %v957_v40, %v956_v11  ;;  %v1090_v29 = vrot.slane %v1089_v15, 2 }
 0x17f   : > { %v1091_v18 = vadd.f32 %v1090_v29, %v1089_v15  ;;  %v959_v63 = vrot.slane %v958_v14, 1 }
 0x181   : > { %v1092_v34 = vrot.slane %v1091_v18, 1  ;;  %v960_v8 = vadd.f32 %v959_v63, %v958_v14 }
 0x183   : > { %v1093_v19 = vadd.f32 %v1092_v34, %v1091_v18 }
 0x185   : > { %v1098_v20 = vsel %vm1097_vm1, %v1093_v19, 0.0 }
 0x186   : > { %v1099_v61 = vsel %vm1096_vm2, %v960_v8, %v1098_v20 }
 0x187   : > { %1100 = vst [vmem:[%s248_s30] sm:$0xff] %v1099_v61 }
 0x188 PF: > { %s14_s14 = sadd.s32 1, %s2163_s14   ;;  %s2529_s12 = smov %s2159_s13 }
 0x189   : > { %p11_p5 = scmp.ge.s32.totalorder %s14_s14, 6   ;;  %s2530_s13 = smov %s2532_s15 }
 0x18b   :  { %13 = sbr.rel (!%p11_p5) target bundleno = 2 (0x2), region = 73 }

// kernel: _lambda_.17
= control target key start
LH: loop header
LB: loop body
LE: loop exit
PB: predicated region body
PF: predicated region fallthrough
CT: control target
= control target key end

     0   :  { %s3809_s12 = smov 0   ;;  %s3811_s13 = smov 0   ;;  %s4452_s0 = inlined_call_operand.vmem [shape: bf16[1,2048,72], index: 0, kind: input, shape index: {}]   ;;  %s4453_s1 = inlined_call_operand.vmem [shape: bf16[1,72,128], index: 1, kind: input, shape index: {}]   ;;  %s4454_s2 = inlined_call_operand.vmem [shape: bf16[1,2048,128], index: 2, kind: output, shape index: {0}]   ;;  %s4455_s3 = inlined_call_operand.vmem [shape: f32[1,2,8,128], index: 3, kind: output, shape index: {1}]  }
   0x1   :  { %s3813_s14 = smov 0  }
   0x2 LB: > { %s23_s15 = sadd.s32 1, %s3783_s13  ;;  %p2673_p0 = scmp.ge.s32.totalorder %s3787_s14, 1  ;;  %s3787_s14 = sphi %s3813_s14, %s14_s14   ;;  %s3783_s13 = sphi %s3811_s13, %s4493_s13   ;;  %s3779_s12 = sphi %s3809_s12, %s4492_s12  }
   0x3   : > { %p24_p1 = scmp.ge.s32.totalorder %s23_s15, 2  ;;  %p173_p2 = scmp.lt.s32.totalorder %s3787_s14, 3 }
   0x5   : > { %s4495_s15 = smov (%p24_p1, %s23_s15), 0  ;;  %p174_p3 = pnand %p2673_p0, %p173_p2 }
   0x7   : > { %177 = sbr.rel (%p174_p3) target bundleno = 521 (0x209), region = 28 }
   0xe   : > { %v3696_v0 = vld [vmem:[%s4453_s1] sm:$0xff]   ;;  %v3697_v1 = vld [vmem:[%s4453_s1 + $0x8] sm:$0xff]   ;;  %s2674_s20 = sshll.u32 %s3779_s12, 7  ;;  %v3698_v2 = vld [vmem:[%s4453_s1 + $0x10] sm:$0xff]   ;;  %vm736_vm0 = vcmask 588800   ;;  %vm929_vm1 = vcmask 1043456  }
   0xf   : > { %3522 = vmatprep.subr.bf16.mxu0 %v3696_v0  ;;  %p221_p4 = scmp.lt.s32.totalorder %s2674_s20, 255  ;;  %3660 = vmatprep.subr.bf16.mxu1 %v3696_v0  ;;  %v3699_v3 = vld [vmem:[%s4453_s1 + $0x18] sm:$0xff]   ;;  %v3700_v5 = vld [vmem:[%s4453_s1 + $0x20] ss:$0 sps:$4 sm:$0xff]   ;;  %p245_p5 = scmp.lt.s32.totalorder %s3779_s12, 1 }
  0x10   : > { %3523 = vmatpush3.bf16.msra.mxu0 %v3696_v0  ;;  %3665 = vmatpush3.bf16.msra.mxu1 %v3696_v0  ;;  %v931_v6 = vsel %vm929_vm1, %v3700_v5, 0 }
  0x11   : > { %3524 = vmatprep.subr.bf16.mxu0 %v3697_v1  ;;  %s4497_s20 = smov (!%p221_p4, %s2674_s20), 255  ;;  %3661 = vmatprep.subr.bf16.mxu1 %v3697_v1  ;;  %s4499_s12 = smov (!%p245_p5, %s3779_s12), 1 }
  0x12   : > { %s2675_s23 = sshll.u32 %s4497_s20, 2  ;;  %s2678_s7 = sshll.u32 %s4499_s12, 3 }
  0x13   : > { %s3850_s28 = scalar_lea.vmem %s4452_s0, %s2675_s23  ;;  %s3988_s6 = scalar_lea.vmem %s4454_s2, %s2675_s23 }
  0x14   : > { %3525 = vmatpush3.bf16.msra.mxu0 %v3697_v1  ;;  %3666 = vmatpush3.bf16.msra.mxu1 %v3697_v1  ;;  %v3701_v4 = vld [vmem:[%s3850_s28] sm:$0xff]   ;;  %v3702_v7 = vld [vmem:[%s3850_s28 + $0x8] sm:$0xff]   ;;  %v3703_v8 = vld [vmem:[%s3850_s28 + $0x10] sm:$0xff]   ;;  %s250_s10 = scalar_lea.vmem %s4455_s3, %s2678_s7 }
  0x15   : > { %3526 = vmatprep.subr.bf16.mxu0 %v3698_v2  ;;  %3662 = vmatprep.subr.bf16.mxu1 %v3698_v2  ;;  %v3704_v9 = vld [vmem:[%s3850_s28 + $0x18] sm:$0xff]   ;;  %v3705_v10 = vld [vmem:[%s3850_s28 + $0x20] sm:$0xff]   ;;  %v3706_v11 = vld [vmem:[%s3850_s28 + $0x28] sm:$0xff]  }
  0x16   : > { %3532 = vmatprep.mubr.msk.bf16.mxu0 %vm736_vm0, %v3701_v4  ;;  %v3707_v12 = vld [vmem:[%s3850_s28 + $0x30] sm:$0xff]   ;;  %v3708_v13 = vld [vmem:[%s3850_s28 + $0x38] sm:$0xff]   ;;  %v3733_v14 = vld [vmem:[%s3850_s28 + $0x100] sm:$0xff]  }
  0x17   : > { %v3734_v15 = vld [vmem:[%s3850_s28 + $0x108] sm:$0xff]   ;;  %3596 = vmatprep.mubr.msk.bf16.mxu1 %vm736_vm0, %v3733_v14  ;;  %v3735_v16 = vld [vmem:[%s3850_s28 + $0x110] sm:$0xff]   ;;  %v3709_v17 = vld [vmem:[%s3850_s28 + $0x40] sm:$0xff]  }
  0x18   : > { %3527 = vmatpush3.bf16.msra.mxu0 %v3698_v2  ;;  %3667 = vmatpush3.bf16.msra.mxu1 %v3698_v2  ;;  %v3736_v18 = vld [vmem:[%s3850_s28 + $0x118] sm:$0xff]   ;;  %v3737_v19 = vld [vmem:[%s3850_s28 + $0x120] sm:$0xff]   ;;  %v3710_v20 = vld [vmem:[%s3850_s28 + $0x48] sm:$0xff]  }
  0x19   : > { %3528 = vmatprep.subr.bf16.mxu0 %v3699_v3  ;;  %3663 = vmatprep.subr.bf16.mxu1 %v3699_v3  ;;  %v3711_v21 = vld [vmem:[%s3850_s28 + $0x50] sm:$0xff]   ;;  %v3738_v22 = vld [vmem:[%s3850_s28 + $0x128] sm:$0xff]   ;;  %v3712_v24 = vld [vmem:[%s3850_s28 + $0x58] sm:$0xff]  }
  0x1a   : > { %v3739_v23 = vld [vmem:[%s3850_s28 + $0x130] sm:$0xff]   ;;  %v3713_v25 = vld [vmem:[%s3850_s28 + $0x60] sm:$0xff]   ;;  %v3740_v26 = vld [vmem:[%s3850_s28 + $0x138] sm:$0xff]  }
  0x1b   : > { %v3741_v27 = vld [vmem:[%s3850_s28 + $0x140] sm:$0xff]   ;;  %v3714_v28 = vld [vmem:[%s3850_s28 + $0x68] sm:$0xff]   ;;  %v3715_v29 = vld [vmem:[%s3850_s28 + $0x70] sm:$0xff]  }
  0x1c   : > { %3529 = vmatpush3.bf16.msra.mxu0 %v3699_v3  ;;  %3668 = vmatpush3.bf16.msra.mxu1 %v3699_v3  ;;  %v3742_v30 = vld [vmem:[%s3850_s28 + $0x148] sm:$0xff]   ;;  %v3743_v31 = vld [vmem:[%s3850_s28 + $0x150] sm:$0xff]   ;;  %v3716_v32 = vld [vmem:[%s3850_s28 + $0x78] sm:$0xff]  }
  0x1d   : > { %3670 = vmatprep.subr.msk.bf16.mxu0 %vm929_vm1, %v3700_v5  ;;  %3671 = vmatprep.subr.msk.bf16.mxu1 %vm929_vm1, %v3700_v5  ;;  %v3717_v33 = vld [vmem:[%s3850_s28 + $0x80] sm:$0xff]   ;;  %v3744_v34 = vld [vmem:[%s3850_s28 + $0x158] sm:$0xff]   ;;  %v3718_v36 = vld [vmem:[%s3850_s28 + $0x88] sm:$0xff]  }
  0x1e   : > { %v3745_v35 = vld [vmem:[%s3850_s28 + $0x160] sm:$0xff]   ;;  %v3719_v37 = vld [vmem:[%s3850_s28 + $0x90] sm:$0xff]   ;;  %v3746_v38 = vld [vmem:[%s3850_s28 + $0x168] sm:$0xff]  }
  0x1f   : > { %v3747_v39 = vld [vmem:[%s3850_s28 + $0x170] sm:$0xff]   ;;  %v3720_v40 = vld [vmem:[%s3850_s28 + $0x98] sm:$0xff]   ;;  %v3721_v41 = vld [vmem:[%s3850_s28 + $0xa0] sm:$0xff]  }
  0x20   : > { %3531 = vmatpush3.bf16.msra.mxu0 %v931_v6  ;;  %3669 = vmatpush3.bf16.msra.mxu1 %v931_v6  ;;  %v3748_v42 = vld [vmem:[%s3850_s28 + $0x178] sm:$0xff]   ;;  %v3749_v43 = vld [vmem:[%s3850_s28 + $0x180] sm:$0xff]   ;;  %v3722_v44 = vld [vmem:[%s3850_s28 + $0xa8] sm:$0xff]  }
  0x21   : > { %v3723_v45 = vld [vmem:[%s3850_s28 + $0xb0] sm:$0xff]   ;;  %v3750_v46 = vld [vmem:[%s3850_s28 + $0x188] sm:$0xff]   ;;  %v3724_v48 = vld [vmem:[%s3850_s28 + $0xb8] sm:$0xff]  }
  0x22   : > { %v3751_v47 = vld [vmem:[%s3850_s28 + $0x190] sm:$0xff]   ;;  %v3725_v49 = vld [vmem:[%s3850_s28 + $0xc0] sm:$0xff]   ;;  %v3752_v50 = vld [vmem:[%s3850_s28 + $0x198] sm:$0xff]  }
  0x23   : > { %3533 = vmatmul.mubr.msk.bf16.vlgmr.msra.gmra.mrb[0].mxu0 %vm736_vm0, %v3702_v7  ;;  %3597 = vmatmul.mubr.msk.bf16.vlgmr.msra.gmra.mrb[0].mxu1 %vm736_vm0, %v3734_v15  ;;  %v3753_v51 = vld [vmem:[%s3850_s28 + $0x1a0] sm:$0xff]   ;;  %v3726_v52 = vld [vmem:[%s3850_s28 + $0xc8] sm:$0xff]   ;;  %v3727_v53 = vld [vmem:[%s3850_s28 + $0xd0] sm:$0xff]  }
  0x24   : > { %3536 = vmatprep.mubr.msk.bf16.mxu0 %vm736_vm0, %v3703_v8  ;;  %3600 = vmatprep.mubr.msk.bf16.mxu1 %vm736_vm0, %v3735_v16  ;;  %v3754_v54 = vld [vmem:[%s3850_s28 + $0x1a8] sm:$0xff]   ;;  %v3755_v55 = vld [vmem:[%s3850_s28 + $0x1b0] sm:$0xff]   ;;  %v3728_v56 = vld [vmem:[%s3850_s28 + $0xd8] sm:$0xff]  }
  0x25   : > { %v3729_v57 = vld [vmem:[%s3850_s28 + $0xe0] sm:$0xff]   ;;  %v3756_v58 = vld [vmem:[%s3850_s28 + $0x1b8] sm:$0xff]   ;;  %v3730_v60 = vld [vmem:[%s3850_s28 + $0xe8] sm:$0xff]  }
  0x26   : > { %v3757_v59 = vld [vmem:[%s3850_s28 + $0x1c0] sm:$0xff]   ;;  %v3731_v61 = vld [vmem:[%s3850_s28 + $0xf0] sm:$0xff]   ;;  %v3758_v62 = vld [vmem:[%s3850_s28 + $0x1c8] sm:$0xff]  }
  0x27   : > { %v3759_v63 = vld [vmem:[%s3850_s28 + $0x1d0] sm:$0xff]   ;;  %v3732_v0 = vld [vmem:[%s3850_s28 + $0xf8] sm:$0xff]   ;;  %v3761_v2 = vld [vmem:[%s3850_s28 + $0x1e0] sm:$0xff]  }
  0x28   : > { %v3760_v1 = vld [vmem:[%s3850_s28 + $0x1d8] sm:$0xff]   ;;  %v3762_v3 = vld [vmem:[%s3850_s28 + $0x1e8] sm:$0xff]   ;;  %v3763_v4 = vld [vmem:[%s3850_s28 + $0x1f0] sm:$0xff]  }
  0x29   : > { %v3764_v5 = vld [vmem:[%s3850_s28 + $0x1f8] sm:$0xff]  }
  0x2b   : > { %3537 = vmatmul.mubr.msk.bf16.gmra.mrb[4].mxu0 %vm736_vm0, %v3704_v9  ;;  %3601 = vmatmul.mubr.msk.bf16.gmra.mrb[4].mxu1 %vm736_vm0, %v3736_v18 }
  0x2c   : > { %3540 = vmatprep.mubr.msk.bf16.mxu0 %vm736_vm0, %v3705_v10  ;;  %3604 = vmatprep.mubr.msk.bf16.mxu1 %vm736_vm0, %v3737_v19 }
  0x33   : > { %3541 = vmatmul.mubr.msk.bf16.gmra.mrb[8].mxu0 %vm736_vm0, %v3706_v11  ;;  %3605 = vmatmul.mubr.msk.bf16.gmra.mrb[8].mxu1 %vm736_vm0, %v3738_v22 }
  0x34   : > { %3544 = vmatprep.mubr.msk.bf16.mxu0 %vm736_vm0, %v3707_v12  ;;  %3608 = vmatprep.mubr.msk.bf16.mxu1 %vm736_vm0, %v3739_v23 }
  0x3b   : > { %3545 = vmatmul.mubr.msk.bf16.gmra.mrb[12].mxu0 %vm736_vm0, %v3708_v13  ;;  %3609 = vmatmul.mubr.msk.bf16.gmra.mrb[12].mxu1 %vm736_vm0, %v3740_v26 }
  0x3c   : > { %3548 = vmatprep.mubr.msk.bf16.mxu0 %vm736_vm0, %v3709_v17  ;;  %3612 = vmatprep.mubr.msk.bf16.mxu1 %vm736_vm0, %v3741_v27 }
  0x43   : > { %3549 = vmatmul.mubr.msk.bf16.gmra.mrb[16].mxu0 %vm736_vm0, %v3710_v20  ;;  %3613 = vmatmul.mubr.msk.bf16.gmra.mrb[16].mxu1 %vm736_vm0, %v3742_v30 }
  0x44   : > { %3552 = vmatprep.mubr.msk.bf16.mxu0 %vm736_vm0, %v3711_v21  ;;  %3616 = vmatprep.mubr.msk.bf16.mxu1 %vm736_vm0, %v3743_v31 }
  0x4b   : > { %3553 = vmatmul.mubr.msk.bf16.gmra.mrb[20].mxu0 %vm736_vm0, %v3712_v24  ;;  %3617 = vmatmul.mubr.msk.bf16.gmra.mrb[20].mxu1 %vm736_vm0, %v3744_v34 }
  0x4c   : > { %3556 = vmatprep.mubr.msk.bf16.mxu0 %vm736_vm0, %v3713_v25  ;;  %3620 = vmatprep.mubr.msk.bf16.mxu1 %vm736_vm0, %v3745_v35 }
  0x53   : > { %3557 = vmatmul.mubr.msk.bf16.gmra.mrb[24].mxu0 %vm736_vm0, %v3714_v28  ;;  %3621 = vmatmul.mubr.msk.bf16.gmra.mrb[24].mxu1 %vm736_vm0, %v3746_v38 }
  0x54   : > { %3560 = vmatprep.mubr.msk.bf16.mxu0 %vm736_vm0, %v3715_v29  ;;  %3624 = vmatprep.mubr.msk.bf16.mxu1 %vm736_vm0, %v3747_v39 }
  0x5b   : > { %3561 = vmatmul.mubr.msk.bf16.gmra.mrb[28].mxu0 %vm736_vm0, %v3716_v32  ;;  %3625 = vmatmul.mubr.msk.bf16.gmra.mrb[28].mxu1 %vm736_vm0, %v3748_v42 }
  0x5c   : > { %3564 = vmatprep.mubr.msk.bf16.mxu0 %vm736_vm0, %v3717_v33  ;;  %3628 = vmatprep.mubr.msk.bf16.mxu1 %vm736_vm0, %v3749_v43 }
  0x63   : > { %3565 = vmatmul.mubr.msk.bf16.gmra.mrb[32].mxu0 %vm736_vm0, %v3718_v36  ;;  %3629 = vmatmul.mubr.msk.bf16.gmra.mrb[32].mxu1 %vm736_vm0, %v3750_v46 }
  0x64   : > { %3568 = vmatprep.mubr.msk.bf16.mxu0 %vm736_vm0, %v3719_v37  ;;  %3632 = vmatprep.mubr.msk.bf16.mxu1 %vm736_vm0, %v3751_v47 }
  0x6b   : > { %3569 = vmatmul.mubr.msk.bf16.gmra.mrb[36].mxu0 %vm736_vm0, %v3720_v40  ;;  %3633 = vmatmul.mubr.msk.bf16.gmra.mrb[36].mxu1 %vm736_vm0, %v3752_v50 }
  0x6c   : > { %3572 = vmatprep.mubr.msk.bf16.mxu0 %vm736_vm0, %v3721_v41  ;;  %3636 = vmatprep.mubr.msk.bf16.mxu1 %vm736_vm0, %v3753_v51 }
  0x73   : > { %3573 = vmatmul.mubr.msk.bf16.gmra.mrb[40].mxu0 %vm736_vm0, %v3722_v44  ;;  %3637 = vmatmul.mubr.msk.bf16.gmra.mrb[40].mxu1 %vm736_vm0, %v3754_v54 }
  0x74   : > { %3576 = vmatprep.mubr.msk.bf16.mxu0 %vm736_vm0, %v3723_v45  ;;  %3640 = vmatprep.mubr.msk.bf16.mxu1 %vm736_vm0, %v3755_v55 }
  0x7b   : > { %3577 = vmatmul.mubr.msk.bf16.gmra.mrb[44].mxu0 %vm736_vm0, %v3724_v48  ;;  %3641 = vmatmul.mubr.msk.bf16.gmra.mrb[44].mxu1 %vm736_vm0, %v3756_v58 }
  0x7c   : > { %3580 = vmatprep.mubr.msk.bf16.mxu0 %vm736_vm0, %v3725_v49  ;;  %3644 = vmatprep.mubr.msk.bf16.mxu1 %vm736_vm0, %v3757_v59 }
  0x83   : > { %3581 = vmatmul.mubr.msk.bf16.gmra.mrb[48].mxu0 %vm736_vm0, %v3726_v52  ;;  %3645 = vmatmul.mubr.msk.bf16.gmra.mrb[48].mxu1 %vm736_vm0, %v3758_v62 }
  0x84   : > { %3584 = vmatprep.mubr.msk.bf16.mxu0 %vm736_vm0, %v3727_v53  ;;  %3648 = vmatprep.mubr.msk.bf16.mxu1 %vm736_vm0, %v3759_v63 }
  0x8b   : > { %3585 = vmatmul.mubr.msk.bf16.gmra.mrb[52].mxu0 %vm736_vm0, %v3728_v56  ;;  %3649 = vmatmul.mubr.msk.bf16.gmra.mrb[52].mxu1 %vm736_vm0, %v3760_v1 }
  0x8c   : > { %3588 = vmatprep.mubr.msk.bf16.mxu0 %vm736_vm0, %v3729_v57  ;;  %3652 = vmatprep.mubr.msk.bf16.mxu1 %vm736_vm0, %v3761_v2 }
  0x93   : > { %3589 = vmatmul.mubr.msk.bf16.gmra.mrb[56].mxu0 %vm736_vm0, %v3730_v60  ;;  %3653 = vmatmul.mubr.msk.bf16.gmra.mrb[56].mxu1 %vm736_vm0, %v3762_v3 }
  0x94   : > { %3592 = vmatprep.mubr.msk.bf16.mxu0 %vm736_vm0, %v3731_v61  ;;  %3656 = vmatprep.mubr.msk.bf16.mxu1 %vm736_vm0, %v3763_v4 }
  0x9b   : > { %3593 = vmatmul.mubr.msk.bf16.gmra.mrb[60].mxu0 %vm736_vm0, %v3732_v0  ;;  %3657 = vmatmul.mubr.msk.bf16.gmra.mrb[60].mxu1 %vm736_vm0, %v3764_v5 }
  0xf6   : > { %v3534_v6 = vpop.f32.mrb[0].mxu0  ;;  %v3995_v51 = vpop.f32.mrb[0].mxu1 }
  0xf7   : > { %v967_v7 = vpop.f32.mrb[1].mxu0  ;;  %v1613_v15 = vmul.f32 %v3534_v6, %v3534_v6  ;;  %v3998_v55 = vpop.f32.mrb[1].mxu1 }
  0xf8   : > { %v3535_v8 = vpop.f32.mrb[2].mxu0  ;;  %v1611_v11 = vmul.f32 %v967_v7, %v967_v7  ;;  %v4000_v56 = vpop.f32.mrb[2].mxu1 }
  0xf9   : > { %v3078_v9 = vpack.c.bf16 %v3535_v8, %v3534_v6  ;;  %v970_v10 = vpop.f32.mrb[3].mxu0  ;;  %v1614_v18 = vmul.f32 %v3535_v8, %v3535_v8  ;;  %v3238_v61 = vpack.c.bf16 %v4000_v56, %v3995_v51  ;;  %v4004_v62 = vpop.f32.mrb[3].mxu1 }
  0xfa   : > { %v1478_v12 = vadd.f32 %v970_v10, %v967_v7  ;;  %v1612_v13 = vmul.f32 %v970_v10, %v970_v10  ;;  %v3073_v14 = vpack.c.bf16 %v970_v10, %v967_v7  ;;  %v3233_v0 = vpack.c.bf16 %v4004_v62, %v3998_v55 }
  0xfb   : > { %3390 = vst [vmem:[%s3988_s6 + $0x8] sm:$0xff] %v3078_v9   ;;  %3422 = vst [vmem:[%s3988_s6 + $0x108] sm:$0xff] %v3238_v61  }
  0xfc   : > { %v1479_v16 = vadd.f32 %v3534_v6, %v1478_v12  ;;  %v1739_v17 = vadd.f32 %v1612_v13, %v1611_v11  ;;  %3074 = vst [vmem:[%s3988_s6] sm:$0xff] %v3073_v14   ;;  %3421 = vst [vmem:[%s3988_s6 + $0x100] sm:$0xff] %v3233_v0  }
  0xfe   : > { %v1740_v19 = vadd.f32 %v1739_v17, %v1613_v15  ;;  %v3538_v20 = vpop.f32.mrb[4].mxu0  ;;  %v1480_v21 = vadd.f32 %v3535_v8, %v1479_v16  ;;  %v4011_v11 = vpop.f32.mrb[4].mxu1 }
  0xff   : > { %v983_v22 = vpop.f32.mrb[5].mxu0  ;;  %v1617_v33 = vmul.f32 %v3538_v20, %v3538_v20  ;;  %v4014_v15 = vpop.f32.mrb[5].mxu1 }
 0x100   : > { %v1481_v23 = vadd.f32 %v1480_v21, %v983_v22  ;;  %v1615_v24 = vmul.f32 %v983_v22, %v983_v22  ;;  %v1741_v25 = vadd.f32 %v1740_v19, %v1614_v18  ;;  %v3539_v26 = vpop.f32.mrb[6].mxu0  ;;  %v4016_v16 = vpop.f32.mrb[6].mxu1 }
 0x101   : > { %v3088_v27 = vpack.c.bf16 %v3539_v26, %v3538_v20  ;;  %v986_v28 = vpop.f32.mrb[7].mxu0  ;;  %v1618_v36 = vmul.f32 %v3539_v26, %v3539_v26  ;;  %v3248_v21 = vpack.c.bf16 %v4016_v16, %v4011_v11 }
 0x102   : > { %v1742_v29 = vadd.f32 %v1741_v25, %v1615_v24  ;;  %v1482_v30 = vadd.f32 %v1481_v23, %v986_v28  ;;  %v1616_v31 = vmul.f32 %v986_v28, %v986_v28  ;;  %v3083_v32 = vpack.c.bf16 %v986_v28, %v983_v22  ;;  %v4020_v22 = vpop.f32.mrb[7].mxu1 }
 0x103   : > { %3392 = vst [vmem:[%s3988_s6 + $0x18] sm:$0xff] %v3088_v27   ;;  %v3243_v24 = vpack.c.bf16 %v4020_v22, %v4014_v15  ;;  %3424 = vst [vmem:[%s3988_s6 + $0x118] sm:$0xff] %v3248_v21  }
 0x104   : > { %v1483_v34 = vadd.f32 %v3538_v20, %v1482_v30  ;;  %v1743_v35 = vadd.f32 %v1742_v29, %v1616_v31  ;;  %3391 = vst [vmem:[%s3988_s6 + $0x10] sm:$0xff] %v3083_v32  }
 0x105   : > { %3423 = vst [vmem:[%s3988_s6 + $0x110] sm:$0xff] %v3243_v24  }
 0x106   : > { %v1744_v37 = vadd.f32 %v1743_v35, %v1617_v33  ;;  %v3542_v38 = vpop.f32.mrb[8].mxu0  ;;  %v1484_v39 = vadd.f32 %v3539_v26, %v1483_v34  ;;  %v4027_v35 = vpop.f32.mrb[8].mxu1 }
 0x107   : > { %v999_v40 = vpop.f32.mrb[9].mxu0  ;;  %v1621_v52 = vmul.f32 %v3542_v38, %v3542_v38 }
 0x108   : > { %v1485_v41 = vadd.f32 %v1484_v39, %v999_v40  ;;  %v1619_v42 = vmul.f32 %v999_v40, %v999_v40  ;;  %v1745_v43 = vadd.f32 %v1744_v37, %v1618_v36  ;;  %v3543_v44 = vpop.f32.mrb[10].mxu0  ;;  %v4030_v39 = vpop.f32.mrb[9].mxu1 }
 0x109   : > { %v3098_v45 = vpack.c.bf16 %v3543_v44, %v3542_v38  ;;  %v1002_v46 = vpop.f32.mrb[11].mxu0  ;;  %v1622_v57 = vmul.f32 %v3543_v44, %v3543_v44 }
 0x10a   : > { %v1746_v47 = vadd.f32 %v1745_v43, %v1619_v42  ;;  %v1486_v48 = vadd.f32 %v1485_v41, %v1002_v46  ;;  %v1620_v49 = vmul.f32 %v1002_v46, %v1002_v46  ;;  %v3093_v50 = vpack.c.bf16 %v1002_v46, %v999_v40  ;;  %v4032_v40 = vpop.f32.mrb[10].mxu1 }
 0x10b   : > { %3394 = vst [vmem:[%s3988_s6 + $0x28] sm:$0xff] %v3098_v45   ;;  %v3258_v45 = vpack.c.bf16 %v4032_v40, %v4027_v35  ;;  %v4036_v46 = vpop.f32.mrb[11].mxu1 }
 0x10c   : > { %v1487_v53 = vadd.f32 %v3542_v38, %v1486_v48  ;;  %v1747_v54 = vadd.f32 %v1746_v47, %v1620_v49  ;;  %3393 = vst [vmem:[%s3988_s6 + $0x20] sm:$0xff] %v3093_v50   ;;  %v3253_v48 = vpack.c.bf16 %v4036_v46, %v4030_v39 }
 0x10d   : > { %3426 = vst [vmem:[%s3988_s6 + $0x128] sm:$0xff] %v3258_v45  }
 0x10e   : > { %v1748_v58 = vadd.f32 %v1747_v54, %v1621_v52  ;;  %v3546_v59 = vpop.f32.mrb[12].mxu0  ;;  %v1488_v60 = vadd.f32 %v3543_v44, %v1487_v53  ;;  %3425 = vst [vmem:[%s3988_s6 + $0x120] sm:$0xff] %v3253_v48  }
 0x10f   : > { %v1015_v63 = vpop.f32.mrb[13].mxu0  ;;  %v1625_v12 = vmul.f32 %v3546_v59, %v3546_v59 }
 0x110   : > { %v1489_v1 = vadd.f32 %v1488_v60, %v1015_v63  ;;  %v1623_v2 = vmul.f32 %v1015_v63, %v1015_v63  ;;  %v1749_v3 = vadd.f32 %v1748_v58, %v1622_v57  ;;  %v3547_v4 = vpop.f32.mrb[14].mxu0 }
 0x111   : > { %v3108_v5 = vpack.c.bf16 %v3547_v4, %v3546_v59  ;;  %v1018_v6 = vpop.f32.mrb[15].mxu0  ;;  %v1626_v17 = vmul.f32 %v3547_v4, %v3547_v4 }
 0x112   : > { %v1750_v7 = vadd.f32 %v1749_v3, %v1623_v2  ;;  %v1490_v8 = vadd.f32 %v1489_v1, %v1018_v6  ;;  %v1624_v9 = vmul.f32 %v1018_v6, %v1018_v6  ;;  %v3103_v10 = vpack.c.bf16 %v1018_v6, %v1015_v63  ;;  %v4043_v63 = vpop.f32.mrb[12].mxu1 }
 0x113   : > { %3396 = vst [vmem:[%s3988_s6 + $0x38] sm:$0xff] %v3108_v5   ;;  %v4046_v3 = vpop.f32.mrb[13].mxu1 }
 0x114   : > { %v1491_v13 = vadd.f32 %v3546_v59, %v1490_v8  ;;  %v1751_v14 = vadd.f32 %v1750_v7, %v1624_v9  ;;  %3395 = vst [vmem:[%s3988_s6 + $0x30] sm:$0xff] %v3103_v10  }
 0x116   : > { %v1752_v18 = vadd.f32 %v1751_v14, %v1625_v12  ;;  %v3550_v19 = vpop.f32.mrb[16].mxu0  ;;  %v1492_v20 = vadd.f32 %v3547_v4, %v1491_v13  ;;  %v4048_v4 = vpop.f32.mrb[14].mxu1 }
 0x117   : > { %v1031_v23 = vpop.f32.mrb[17].mxu0  ;;  %v1629_v36 = vmul.f32 %v3550_v19, %v3550_v19  ;;  %v3268_v9 = vpack.c.bf16 %v4048_v4, %v4043_v63  ;;  %v4052_v10 = vpop.f32.mrb[15].mxu1 }
 0x118   : > { %v1493_v25 = vadd.f32 %v1492_v20, %v1031_v23  ;;  %v1627_v26 = vmul.f32 %v1031_v23, %v1031_v23  ;;  %v1753_v27 = vadd.f32 %v1752_v18, %v1626_v17  ;;  %v3551_v28 = vpop.f32.mrb[18].mxu0  ;;  %v3263_v13 = vpack.c.bf16 %v4052_v10, %v4046_v3 }
 0x119   : > { %v3118_v29 = vpack.c.bf16 %v3551_v28, %v3550_v19  ;;  %v1034_v30 = vpop.f32.mrb[19].mxu0  ;;  %v1630_v41 = vmul.f32 %v3551_v28, %v3551_v28  ;;  %3428 = vst [vmem:[%s3988_s6 + $0x138] sm:$0xff] %v3268_v9  }
 0x11a   : > { %v1754_v31 = vadd.f32 %v1753_v27, %v1627_v26  ;;  %v1494_v32 = vadd.f32 %v1493_v25, %v1034_v30  ;;  %v1628_v33 = vmul.f32 %v1034_v30, %v1034_v30  ;;  %v3113_v34 = vpack.c.bf16 %v1034_v30, %v1031_v23  ;;  %3427 = vst [vmem:[%s3988_s6 + $0x130] sm:$0xff] %v3263_v13   ;;  %v4059_v27 = vpop.f32.mrb[16].mxu1 }
 0x11b   : > { %3398 = vst [vmem:[%s3988_s6 + $0x48] sm:$0xff] %v3118_v29  }
 0x11c   : > { %v1495_v37 = vadd.f32 %v3550_v19, %v1494_v32  ;;  %v1755_v38 = vadd.f32 %v1754_v31, %v1628_v33  ;;  %3397 = vst [vmem:[%s3988_s6 + $0x40] sm:$0xff] %v3113_v34   ;;  %v4062_v31 = vpop.f32.mrb[17].mxu1 }
 0x11d   : > { %v4064_v32 = vpop.f32.mrb[18].mxu1 }
 0x11e   : > { %v1756_v42 = vadd.f32 %v1755_v38, %v1629_v36  ;;  %v3554_v43 = vpop.f32.mrb[20].mxu0  ;;  %v1496_v44 = vadd.f32 %v3551_v28, %v1495_v37  ;;  %v3278_v38 = vpack.c.bf16 %v4064_v32, %v4059_v27 }
 0x11f   : > { %v1047_v47 = vpop.f32.mrb[21].mxu0  ;;  %v1633_v0 = vmul.f32 %v3554_v43, %v3554_v43 }
 0x120   : > { %v1497_v49 = vadd.f32 %v1496_v44, %v1047_v47  ;;  %v1631_v50 = vmul.f32 %v1047_v47, %v1047_v47  ;;  %v1757_v52 = vadd.f32 %v1756_v42, %v1630_v41  ;;  %v3555_v53 = vpop.f32.mrb[22].mxu0  ;;  %v4068_v41 = vpop.f32.mrb[19].mxu1  ;;  %3430 = vst [vmem:[%s3988_s6 + $0x148] sm:$0xff] %v3278_v38  }
 0x121   : > { %v3128_v54 = vpack.c.bf16 %v3555_v53, %v3554_v43  ;;  %v1050_v57 = vpop.f32.mrb[23].mxu0  ;;  %v1634_v5 = vmul.f32 %v3555_v53, %v3555_v53 }
 0x122   : > { %v1758_v58 = vadd.f32 %v1757_v52, %v1631_v50  ;;  %v1498_v59 = vadd.f32 %v1497_v49, %v1050_v57  ;;  %v1632_v60 = vmul.f32 %v1050_v57, %v1050_v57  ;;  %v3123_v61 = vpack.c.bf16 %v1050_v57, %v1047_v47 }
 0x123   : > { %3400 = vst [vmem:[%s3988_s6 + $0x58] sm:$0xff] %v3128_v54  }
 0x124   : > { %v1499_v1 = vadd.f32 %v3554_v43, %v1498_v59  ;;  %v1759_v2 = vadd.f32 %v1758_v58, %v1632_v60  ;;  %3399 = vst [vmem:[%s3988_s6 + $0x50] sm:$0xff] %v3123_v61   ;;  %v3273_v43 = vpack.c.bf16 %v4068_v41, %v4062_v31  ;;  %v4075_v58 = vpop.f32.mrb[20].mxu1 }
 0x126   : > { %v1760_v6 = vadd.f32 %v1759_v2, %v1633_v0  ;;  %v3558_v7 = vpop.f32.mrb[24].mxu0  ;;  %v1500_v8 = vadd.f32 %v3555_v53, %v1499_v1  ;;  %3429 = vst [vmem:[%s3988_s6 + $0x140] sm:$0xff] %v3273_v43   ;;  %v4078_v0 = vpop.f32.mrb[21].mxu1 }
 0x127   : > { %v1063_v12 = vpop.f32.mrb[25].mxu0  ;;  %v1637_v28 = vmul.f32 %v3558_v7, %v3558_v7  ;;  %v4080_v1 = vpop.f32.mrb[22].mxu1 }
 0x128   : > { %v1501_v14 = vadd.f32 %v1500_v8, %v1063_v12  ;;  %v1635_v17 = vmul.f32 %v1063_v12, %v1063_v12  ;;  %v1761_v18 = vadd.f32 %v1760_v6, %v1634_v5  ;;  %v3559_v19 = vpop.f32.mrb[26].mxu0  ;;  %v3288_v8 = vpack.c.bf16 %v4080_v1, %v4075_v58  ;;  %v4084_v9 = vpop.f32.mrb[23].mxu1 }
 0x129   : > { %v3138_v20 = vpack.c.bf16 %v3559_v19, %v3558_v7  ;;  %v1066_v21 = vpop.f32.mrb[27].mxu0  ;;  %v1638_v33 = vmul.f32 %v3559_v19, %v3559_v19  ;;  %v3283_v13 = vpack.c.bf16 %v4084_v9, %v4078_v0 }
 0x12a   : > { %v1762_v23 = vadd.f32 %v1761_v18, %v1635_v17  ;;  %v1502_v24 = vadd.f32 %v1501_v14, %v1066_v21  ;;  %v1636_v25 = vmul.f32 %v1066_v21, %v1066_v21  ;;  %v3133_v26 = vpack.c.bf16 %v1066_v21, %v1063_v12  ;;  %3432 = vst [vmem:[%s3988_s6 + $0x158] sm:$0xff] %v3288_v8  }
 0x12b   : > { %3402 = vst [vmem:[%s3988_s6 + $0x68] sm:$0xff] %v3138_v20   ;;  %3431 = vst [vmem:[%s3988_s6 + $0x150] sm:$0xff] %v3283_v13  }
 0x12c   : > { %v1503_v29 = vadd.f32 %v3558_v7, %v1502_v24  ;;  %v1763_v30 = vadd.f32 %v1762_v23, %v1636_v25  ;;  %3401 = vst [vmem:[%s3988_s6 + $0x60] sm:$0xff] %v3133_v26  }
 0x12e   : > { %v1764_v34 = vadd.f32 %v1763_v30, %v1637_v28  ;;  %v3562_v36 = vpop.f32.mrb[28].mxu0  ;;  %v1504_v37 = vadd.f32 %v3559_v19, %v1503_v29  ;;  %v4091_v28 = vpop.f32.mrb[24].mxu1 }
 0x12f   : > { %v1079_v42 = vpop.f32.mrb[29].mxu0  ;;  %v1641_v59 = vmul.f32 %v3562_v36, %v3562_v36 }
 0x130   : > { %v1505_v44 = vadd.f32 %v1504_v37, %v1079_v42  ;;  %v1639_v45 = vmul.f32 %v1079_v42, %v1079_v42  ;;  %v1765_v47 = vadd.f32 %v1764_v34, %v1638_v33  ;;  %v3563_v48 = vpop.f32.mrb[30].mxu0  ;;  %v4094_v34 = vpop.f32.mrb[25].mxu1 }
 0x131   : > { %v3148_v49 = vpack.c.bf16 %v3563_v48, %v3562_v36  ;;  %v1082_v50 = vpop.f32.mrb[31].mxu0  ;;  %v1642_v2 = vmul.f32 %v3563_v48, %v3563_v48 }
 0x132   : > { %v1766_v52 = vadd.f32 %v1765_v47, %v1639_v45  ;;  %v1506_v53 = vadd.f32 %v1505_v44, %v1082_v50  ;;  %v1640_v54 = vmul.f32 %v1082_v50, %v1082_v50  ;;  %v3143_v57 = vpack.c.bf16 %v1082_v50, %v1079_v42 }
 0x133   : > { %3404 = vst [vmem:[%s3988_s6 + $0x78] sm:$0xff] %v3148_v49  }
 0x134   : > { %v1507_v60 = vadd.f32 %v3562_v36, %v1506_v53  ;;  %v1767_v61 = vadd.f32 %v1766_v52, %v1640_v54  ;;  %3403 = vst [vmem:[%s3988_s6 + $0x70] sm:$0xff] %v3143_v57   ;;  %v4096_v36 = vpop.f32.mrb[26].mxu1 }
 0x135   : > { %v3298_v44 = vpack.c.bf16 %v4096_v36, %v4091_v28  ;;  %v4100_v45 = vpop.f32.mrb[27].mxu1 }
 0x136   : > { %v1768_v5 = vadd.f32 %v1767_v61, %v1641_v59  ;;  %v3566_v6 = vpop.f32.mrb[32].mxu0  ;;  %v1508_v7 = vadd.f32 %v3563_v48, %v1507_v60  ;;  %v3293_v48 = vpack.c.bf16 %v4100_v45, %v4094_v34 }
 0x137   : > { %v1095_v12 = vpop.f32.mrb[33].mxu0  ;;  %v1645_v29 = vmul.f32 %v3566_v6, %v3566_v6  ;;  %3434 = vst [vmem:[%s3988_s6 + $0x168] sm:$0xff] %v3298_v44  }
 0x138   : > { %v1509_v14 = vadd.f32 %v1508_v7, %v1095_v12  ;;  %v1643_v17 = vmul.f32 %v1095_v12, %v1095_v12  ;;  %v1769_v18 = vadd.f32 %v1768_v5, %v1642_v2  ;;  %v3567_v19 = vpop.f32.mrb[34].mxu0  ;;  %3433 = vst [vmem:[%s3988_s6 + $0x160] sm:$0xff] %v3293_v48   ;;  %v4107_v5 = vpop.f32.mrb[28].mxu1 }
 0x139   : > { %v3158_v20 = vpack.c.bf16 %v3567_v19, %v3566_v6  ;;  %v1098_v21 = vpop.f32.mrb[35].mxu0  ;;  %v1646_v37 = vmul.f32 %v3567_v19, %v3567_v19 }
 0x13a   : > { %v1770_v23 = vadd.f32 %v1769_v18, %v1643_v17  ;;  %v1510_v24 = vadd.f32 %v1509_v14, %v1098_v21  ;;  %v1644_v25 = vmul.f32 %v1098_v21, %v1098_v21  ;;  %v3153_v26 = vpack.c.bf16 %v1098_v21, %v1095_v12  ;;  %v4110_v12 = vpop.f32.mrb[29].mxu1 }
 0x13b   : > { %3406 = vst [vmem:[%s3988_s6 + $0x88] sm:$0xff] %v3158_v20   ;;  %v4112_v13 = vpop.f32.mrb[30].mxu1 }
 0x13c   : > { %v1511_v30 = vadd.f32 %v3566_v6, %v1510_v24  ;;  %v1771_v33 = vadd.f32 %v1770_v23, %v1644_v25  ;;  %3405 = vst [vmem:[%s3988_s6 + $0x80] sm:$0xff] %v3153_v26   ;;  %v3308_v20 = vpack.c.bf16 %v4112_v13, %v4107_v5  ;;  %v4116_v21 = vpop.f32.mrb[31].mxu1 }
 0x13d   : > { %v3303_v24 = vpack.c.bf16 %v4116_v21, %v4110_v12 }
 0x13e   : > { %v1772_v38 = vadd.f32 %v1771_v33, %v1645_v29  ;;  %v3570_v42 = vpop.f32.mrb[36].mxu0  ;;  %v1512_v43 = vadd.f32 %v3567_v19, %v1511_v30  ;;  %3436 = vst [vmem:[%s3988_s6 + $0x178] sm:$0xff] %v3308_v20  }
 0x13f   : > { %v1111_v47 = vpop.f32.mrb[37].mxu0  ;;  %v1649_v6 = vmul.f32 %v3570_v42, %v3570_v42  ;;  %3435 = vst [vmem:[%s3988_s6 + $0x170] sm:$0xff] %v3303_v24  }
 0x140   : > { %v1513_v49 = vadd.f32 %v1512_v43, %v1111_v47  ;;  %v1647_v50 = vmul.f32 %v1111_v47, %v1111_v47  ;;  %v1773_v52 = vadd.f32 %v1772_v38, %v1646_v37  ;;  %v3571_v53 = vpop.f32.mrb[38].mxu0 }
 0x141   : > { %v3168_v54 = vpack.c.bf16 %v3571_v53, %v3570_v42  ;;  %v1114_v57 = vpop.f32.mrb[39].mxu0  ;;  %v1650_v14 = vmul.f32 %v3571_v53, %v3571_v53 }
 0x142   : > { %v1774_v59 = vadd.f32 %v1773_v52, %v1647_v50  ;;  %v1514_v60 = vadd.f32 %v1513_v49, %v1114_v57  ;;  %v1648_v61 = vmul.f32 %v1114_v57, %v1114_v57  ;;  %v3163_v2 = vpack.c.bf16 %v1114_v57, %v1111_v47  ;;  %v4123_v47 = vpop.f32.mrb[32].mxu1 }
 0x143   : > { %3408 = vst [vmem:[%s3988_s6 + $0x98] sm:$0xff] %v3168_v54   ;;  %v4126_v52 = vpop.f32.mrb[33].mxu1 }
 0x144   : > { %v1515_v7 = vadd.f32 %v3570_v42, %v1514_v60  ;;  %v1775_v8 = vadd.f32 %v1774_v59, %v1648_v61  ;;  %3407 = vst [vmem:[%s3988_s6 + $0x90] sm:$0xff] %v3163_v2  }
 0x146   : > { %v1776_v17 = vadd.f32 %v1775_v8, %v1649_v6  ;;  %v3574_v18 = vpop.f32.mrb[40].mxu0  ;;  %v1516_v19 = vadd.f32 %v3571_v53, %v1515_v7  ;;  %v4128_v53 = vpop.f32.mrb[34].mxu1 }
 0x147   : > { %v1127_v23 = vpop.f32.mrb[41].mxu0  ;;  %v1653_v48 = vmul.f32 %v3574_v18, %v3574_v18  ;;  %v3318_v61 = vpack.c.bf16 %v4128_v53, %v4123_v47  ;;  %v4132_v2 = vpop.f32.mrb[35].mxu1 }
 0x148   : > { %v1517_v25 = vadd.f32 %v1516_v19, %v1127_v23  ;;  %v1651_v26 = vmul.f32 %v1127_v23, %v1127_v23  ;;  %v1777_v29 = vadd.f32 %v1776_v17, %v1650_v14  ;;  %v3575_v30 = vpop.f32.mrb[42].mxu0  ;;  %v3313_v7 = vpack.c.bf16 %v4132_v2, %v4126_v52 }
 0x149   : > { %v3178_v33 = vpack.c.bf16 %v3575_v30, %v3574_v18  ;;  %v1130_v37 = vpop.f32.mrb[43].mxu0  ;;  %v1654_v54 = vmul.f32 %v3575_v30, %v3575_v30  ;;  %3438 = vst [vmem:[%s3988_s6 + $0x188] sm:$0xff] %v3318_v61  }
 0x14a   : > { %v1778_v38 = vadd.f32 %v1777_v29, %v1651_v26  ;;  %v1518_v42 = vadd.f32 %v1517_v25, %v1130_v37  ;;  %v1652_v43 = vmul.f32 %v1130_v37, %v1130_v37  ;;  %v3173_v44 = vpack.c.bf16 %v1130_v37, %v1127_v23  ;;  %3437 = vst [vmem:[%s3988_s6 + $0x180] sm:$0xff] %v3313_v7   ;;  %v4139_v29 = vpop.f32.mrb[36].mxu1 }
 0x14b   : > { %3410 = vst [vmem:[%s3988_s6 + $0xa8] sm:$0xff] %v3178_v33  }
 0x14c   : > { %v1519_v49 = vadd.f32 %v3574_v18, %v1518_v42  ;;  %v1779_v50 = vadd.f32 %v1778_v38, %v1652_v43  ;;  %3409 = vst [vmem:[%s3988_s6 + $0xa0] sm:$0xff] %v3173_v44   ;;  %v4142_v38 = vpop.f32.mrb[37].mxu1 }
 0x14d   : > { %v4144_v42 = vpop.f32.mrb[38].mxu1 }
 0x14e   : > { %v1780_v57 = vadd.f32 %v1779_v50, %v1653_v48  ;;  %v3578_v59 = vpop.f32.mrb[44].mxu0  ;;  %v1520_v60 = vadd.f32 %v3575_v30, %v1519_v49  ;;  %v3328_v50 = vpack.c.bf16 %v4144_v42, %v4139_v29 }
 0x14f   : > { %v1143_v6 = vpop.f32.mrb[45].mxu0  ;;  %v1657_v30 = vmul.f32 %v3578_v59, %v3578_v59 }
 0x150   : > { %v1521_v8 = vadd.f32 %v1520_v60, %v1143_v6  ;;  %v1655_v14 = vmul.f32 %v1143_v6, %v1143_v6  ;;  %v1781_v17 = vadd.f32 %v1780_v57, %v1654_v54  ;;  %v3579_v18 = vpop.f32.mrb[46].mxu0  ;;  %v4148_v54 = vpop.f32.mrb[39].mxu1  ;;  %3440 = vst [vmem:[%s3988_s6 + $0x198] sm:$0xff] %v3328_v50  }
 0x151   : > { %v3188_v19 = vpack.c.bf16 %v3579_v18, %v3578_v59  ;;  %v1146_v20 = vpop.f32.mrb[47].mxu0  ;;  %v1658_v43 = vmul.f32 %v3579_v18, %v3579_v18 }
 0x152   : > { %v1782_v23 = vadd.f32 %v1781_v17, %v1655_v14  ;;  %v1522_v24 = vadd.f32 %v1521_v8, %v1146_v20  ;;  %v1656_v25 = vmul.f32 %v1146_v20, %v1146_v20  ;;  %v3183_v26 = vpack.c.bf16 %v1146_v20, %v1143_v6 }
 0x153   : > { %3412 = vst [vmem:[%s3988_s6 + $0xb8] sm:$0xff] %v3188_v19  }
 0x154   : > { %v1523_v33 = vadd.f32 %v3578_v59, %v1522_v24  ;;  %v1783_v37 = vadd.f32 %v1782_v23, %v1656_v25  ;;  %3411 = vst [vmem:[%s3988_s6 + $0xb0] sm:$0xff] %v3183_v26   ;;  %v3323_v59 = vpack.c.bf16 %v4148_v54, %v4142_v38  ;;  %v4155_v23 = vpop.f32.mrb[40].mxu1 }
 0x155   : > { %4474 = vst [vmem:[#allocation2_spill] sm:$0xff] %v4155_v23 }
 0x156   : > { %v1784_v44 = vadd.f32 %v1783_v37, %v1657_v30  ;;  %v3582_v48 = vpop.f32.mrb[48].mxu0  ;;  %v1524_v49 = vadd.f32 %v3579_v18, %v1523_v33  ;;  %3439 = vst [vmem:[%s3988_s6 + $0x190] sm:$0xff] %v3323_v59   ;;  %v4158_v30 = vpop.f32.mrb[41].mxu1 }
 0x157   : > { %v1159_v57 = vpop.f32.mrb[49].mxu0  ;;  %v1661_v24 = vmul.f32 %v3582_v48, %v3582_v48  ;;  %v4160_v33 = vpop.f32.mrb[42].mxu1 }
 0x158   : > { %v1525_v60 = vadd.f32 %v1524_v49, %v1159_v57  ;;  %v1659_v61 = vmul.f32 %v1159_v57, %v1159_v57  ;;  %v1785_v6 = vadd.f32 %v1784_v44, %v1658_v43  ;;  %v3583_v7 = vpop.f32.mrb[50].mxu0  ;;  %4475 = vst [vmem:[#allocation3_spill] sm:$0xff] %v4160_v33  ;;  %v3338_v50 = vpack.c.bf16 %v4160_v33, %v4155_v23 }
 0x159   : > { %v3198_v8 = vpack.c.bf16 %v3583_v7, %v3582_v48  ;;  %v1162_v14 = vpop.f32.mrb[51].mxu0  ;;  %v1662_v37 = vmul.f32 %v3583_v7, %v3583_v7 }
 0x15a   : > { %v1786_v17 = vadd.f32 %v1785_v6, %v1659_v61  ;;  %v1526_v18 = vadd.f32 %v1525_v60, %v1162_v14  ;;  %v1660_v19 = vmul.f32 %v1162_v14, %v1162_v14  ;;  %v3193_v20 = vpack.c.bf16 %v1162_v14, %v1159_v57  ;;  %v4164_v57 = vpop.f32.mrb[43].mxu1  ;;  %3442 = vst [vmem:[%s3988_s6 + $0x1a8] sm:$0xff] %v3338_v50  }
 0x15b   : > { %3414 = vst [vmem:[%s3988_s6 + $0xc8] sm:$0xff] %v3198_v8   ;;  %4476 = vst [vmem:[#allocation4_spill] sm:$0xff] %v4164_v57 }
 0x15c   : > { %v1527_v25 = vadd.f32 %v3582_v48, %v1526_v18  ;;  %v1787_v26 = vadd.f32 %v1786_v17, %v1660_v19  ;;  %3413 = vst [vmem:[%s3988_s6 + $0xc0] sm:$0xff] %v3193_v20   ;;  %v3333_v48 = vpack.c.bf16 %v4164_v57, %v4158_v30 }
 0x15e   : > { %v1788_v43 = vadd.f32 %v1787_v26, %v1661_v24  ;;  %v3586_v44 = vpop.f32.mrb[52].mxu0  ;;  %v1528_v49 = vadd.f32 %v3583_v7, %v1527_v25  ;;  %3441 = vst [vmem:[%s3988_s6 + $0x1a0] sm:$0xff] %v3333_v48   ;;  %v4171_v24 = vpop.f32.mrb[44].mxu1 }
 0x15f   : > { %v1175_v59 = vpop.f32.mrb[53].mxu0  ;;  %4477 = vst [vmem:[#allocation5_spill] sm:$0xff] %v4171_v24  ;;  %v1665_v25 = vmul.f32 %v3586_v44, %v3586_v44 }
 0x160   : > { %v1529_v60 = vadd.f32 %v1528_v49, %v1175_v59  ;;  %v1663_v61 = vmul.f32 %v1175_v59, %v1175_v59  ;;  %v1789_v6 = vadd.f32 %v1788_v43, %v1662_v37  ;;  %v3587_v8 = vpop.f32.mrb[54].mxu0  ;;  %v4174_v49 = vpop.f32.mrb[45].mxu1 }
 0x161   : > { %v3208_v14 = vpack.c.bf16 %v3587_v8, %v3586_v44  ;;  %v1178_v17 = vpop.f32.mrb[55].mxu0  ;;  %v4176_v37 = vpop.f32.mrb[46].mxu1  ;;  %v1666_v43 = vmul.f32 %v3587_v8, %v3587_v8 }
 0x162   : > { %v1790_v7 = vadd.f32 %v1789_v6, %v1663_v61  ;;  %v1530_v18 = vadd.f32 %v1529_v60, %v1178_v17  ;;  %v1664_v19 = vmul.f32 %v1178_v17, %v1178_v17  ;;  %v3203_v20 = vpack.c.bf16 %v1178_v17, %v1175_v59  ;;  %4478 = vst [vmem:[#allocation6_spill] sm:$0xff] %v4176_v37  ;;  %v4180_v60 = vpop.f32.mrb[47].mxu1 }
 0x163   : > { %3416 = vst [vmem:[%s3988_s6 + $0xd8] sm:$0xff] %v3208_v14   ;;  %v3348_v59 = vpack.c.bf16 %v4176_v37, %v4171_v24  ;;  %v4187_v37 = vpop.f32.mrb[48].mxu1 }
 0x164   : > { %v1531_v26 = vadd.f32 %v3586_v44, %v1530_v18  ;;  %v1791_v33 = vadd.f32 %v1790_v7, %v1664_v19  ;;  %3415 = vst [vmem:[%s3988_s6 + $0xd0] sm:$0xff] %v3203_v20   ;;  %v3343_v44 = vpack.c.bf16 %v4180_v60, %v4174_v49  ;;  %4479 = vst [vmem:[#allocation7_spill] sm:$0xff] %v4187_v37 }
 0x165   : > { %3444 = vst [vmem:[%s3988_s6 + $0x1b8] sm:$0xff] %v3348_v59  }
 0x166   : > { %v1792_v50 = vadd.f32 %v1791_v33, %v1665_v25  ;;  %v3590_v48 = vpop.f32.mrb[56].mxu0  ;;  %v1532_v61 = vadd.f32 %v3587_v8, %v1531_v26  ;;  %3443 = vst [vmem:[%s3988_s6 + $0x1b0] sm:$0xff] %v3343_v44  }
 0x167   : > { %v1191_v6 = vpop.f32.mrb[57].mxu0  ;;  %v1669_v24 = vmul.f32 %v3590_v48, %v3590_v48 }
 0x168   : > { %v1533_v14 = vadd.f32 %v1532_v61, %v1191_v6  ;;  %v1667_v17 = vmul.f32 %v1191_v6, %v1191_v6  ;;  %v1793_v7 = vadd.f32 %v1792_v50, %v1666_v43  ;;  %v3591_v18 = vpop.f32.mrb[58].mxu0  ;;  %v4190_v61 = vpop.f32.mrb[49].mxu1 }
 0x169   : > { %v3218_v19 = vpack.c.bf16 %v3591_v18, %v3590_v48  ;;  %v1194_v33 = vpop.f32.mrb[59].mxu0  ;;  %4480 = vst [vmem:[#allocation8_spill] sm:$0xff] %v4190_v61  ;;  %v4192_v43 = vpop.f32.mrb[50].mxu1  ;;  %v1670_v50 = vmul.f32 %v3591_v18, %v3591_v18 }
 0x16a   : > { %v1794_v8 = vadd.f32 %v1793_v7, %v1667_v17  ;;  %v1534_v20 = vadd.f32 %v1533_v14, %v1194_v33  ;;  %v1668_v25 = vmul.f32 %v1194_v33, %v1194_v33  ;;  %v3213_v26 = vpack.c.bf16 %v1194_v33, %v1191_v6  ;;  %4481 = vst [vmem:[#allocation9_spill] sm:$0xff] %v4192_v43  ;;  %v4196_v14 = vpop.f32.mrb[51].mxu1 }
 0x16b   : > { %3418 = vst [vmem:[%s3988_s6 + $0xe8] sm:$0xff] %v3218_v19   ;;  %v3358_v6 = vpack.c.bf16 %v4192_v43, %v4187_v37  ;;  %4482 = vst [vmem:[#allocation10_spill] sm:$0xff] %v4196_v14  ;;  %v4203_v43 = vpop.f32.mrb[52].mxu1 }
 0x16c   : > { %v1535_v23 = vadd.f32 %v3590_v48, %v1534_v20  ;;  %v1795_v57 = vadd.f32 %v1794_v8, %v1668_v25  ;;  %3417 = vst [vmem:[%s3988_s6 + $0xe0] sm:$0xff] %v3213_v26   ;;  %v3353_v48 = vpack.c.bf16 %v4196_v14, %v4190_v61  ;;  %v4206_v61 = vpop.f32.mrb[53].mxu1 }
 0x16d   : > { %3446 = vst [vmem:[%s3988_s6 + $0x1c8] sm:$0xff] %v3358_v6  }
 0x16e   : > { %v1796_v59 = vadd.f32 %v1795_v57, %v1669_v24  ;;  %v3594_v44 = vpop.f32.mrb[60].mxu0  ;;  %v1536_v17 = vadd.f32 %v3591_v18, %v1535_v23  ;;  %3445 = vst [vmem:[%s3988_s6 + $0x1c0] sm:$0xff] %v3353_v48  }
 0x16f   : > { %v1207_v7 = vpop.f32.mrb[61].mxu0  ;;  %v1673_v37 = vmul.f32 %v3594_v44, %v3594_v44 }
 0x170   : > { %v1537_v19 = vadd.f32 %v1536_v17, %v1207_v7  ;;  %v1671_v33 = vmul.f32 %v1207_v7, %v1207_v7  ;;  %v1797_v8 = vadd.f32 %v1796_v59, %v1670_v50  ;;  %v3595_v20 = vpop.f32.mrb[62].mxu0  ;;  %v1675_v50 = vmul.f32 %v3998_v55, %v3998_v55  ;;  %v4210_v59 = vpop.f32.mrb[54].mxu1 }
 0x171   : > { %v3228_v25 = vpack.c.bf16 %v3595_v20, %v3594_v44  ;;  %v1210_v57 = vpop.f32.mrb[63].mxu0  ;;  %v1674_v6 = vmul.f32 %v3595_v20, %v3595_v20 }
 0x172   : > { %v1798_v23 = vadd.f32 %v1797_v8, %v1671_v33  ;;  %v1538_v24 = vadd.f32 %v1537_v19, %v1210_v57  ;;  %v1672_v18 = vmul.f32 %v1210_v57, %v1210_v57  ;;  %v3223_v26 = vpack.c.bf16 %v1210_v57, %v1207_v7  ;;  %v4214_v33 = vpop.f32.mrb[55].mxu1 }
 0x173   : > { %3420 = vst [vmem:[%s3988_s6 + $0xf8] sm:$0xff] %v3228_v25   ;;  %v3368_v7 = vpack.c.bf16 %v4210_v59, %v4203_v43 }
 0x174   : > { %v1539_v14 = vadd.f32 %v3594_v44, %v1538_v24  ;;  %v1799_v17 = vadd.f32 %v1798_v23, %v1672_v18  ;;  %3419 = vst [vmem:[%s3988_s6 + $0xf0] sm:$0xff] %v3223_v26   ;;  %v3363_v44 = vpack.c.bf16 %v4214_v33, %v4206_v61 }
 0x175   : > { %3448 = vst [vmem:[%s3988_s6 + $0x1d8] sm:$0xff] %v3368_v7  }
 0x176   : > { %v1540_v48 = vadd.f32 %v3595_v20, %v1539_v14  ;;  %v1800_v19 = vadd.f32 %v1799_v17, %v1673_v37  ;;  %3447 = vst [vmem:[%s3988_s6 + $0x1d0] sm:$0xff] %v3363_v44   ;;  %v1676_v14 = vmul.f32 %v4004_v62, %v4004_v62  ;;  %v4224_v37 = vpop.f32.mrb[56].mxu1  ;;  %v1677_v20 = vmul.f32 %v3995_v51, %v3995_v51 }
 0x177   : > { %v4229_v26 = vpop.f32.mrb[57].mxu1 }
 0x178   : > { %v1801_v8 = vadd.f32 %v1800_v19, %v1674_v6  ;;  %v1541_v25 = vadd.f32 %v1540_v48, %v3998_v55  ;;  %v1678_v55 = vmul.f32 %v4000_v56, %v4000_v56  ;;  %v4233_v17 = vpop.f32.mrb[58].mxu1  ;;  %v1679_v6 = vmul.f32 %v4014_v15, %v4014_v15 }
 0x179   : > { %v3378_v48 = vpack.c.bf16 %v4233_v17, %v4224_v37  ;;  %v4240_v19 = vpop.f32.mrb[59].mxu1 }
 0x17a   : > { %v1802_v57 = vadd.f32 %v1801_v8, %v1675_v50  ;;  %v1542_v23 = vadd.f32 %v1541_v25, %v4004_v62 }
 0x17b   : > { %3450 = vst [vmem:[%s3988_s6 + $0x1e8] sm:$0xff] %v3378_v48  }
 0x17c   : > { %v1543_v24 = vadd.f32 %v3995_v51, %v1542_v23  ;;  %v1803_v18 = vadd.f32 %v1802_v57, %v1676_v14  ;;  %v3373_v51 = vpack.c.bf16 %v4240_v19, %v4229_v26  ;;  %v4250_v57 = vpop.f32.mrb[60].mxu1  ;;  %v1681_v23 = vmul.f32 %v4011_v11, %v4011_v11 }
 0x17e   : > { %v1804_v50 = vadd.f32 %v1803_v18, %v1677_v20  ;;  %v1544_v62 = vadd.f32 %v4000_v56, %v1543_v24  ;;  %3449 = vst [vmem:[%s3988_s6 + $0x1e0] sm:$0xff] %v3373_v51   ;;  %v1680_v56 = vmul.f32 %v4020_v22, %v4020_v22  ;;  %v1682_v24 = vmul.f32 %v4016_v16, %v4016_v16 }
 0x180   : > { %v1545_v7 = vadd.f32 %v1544_v62, %v4014_v15  ;;  %v1805_v44 = vadd.f32 %v1804_v50, %v1678_v55  ;;  %v4255_v15 = vpop.f32.mrb[61].mxu1  ;;  %v1683_v50 = vmul.f32 %v4030_v39, %v4030_v39 }
 0x181   : > { %v4259_v18 = vpop.f32.mrb[62].mxu1 }
 0x182   : > { %v1806_v8 = vadd.f32 %v1805_v44, %v1679_v6  ;;  %v1546_v25 = vadd.f32 %v1545_v7, %v4020_v22  ;;  %v3388_v62 = vpack.c.bf16 %v4259_v18, %v4250_v57  ;;  %v4266_v6 = vpop.f32.mrb[63].mxu1 }
 0x184   : > { %v1547_v14 = vadd.f32 %v4011_v11, %v1546_v25  ;;  %v1807_v20 = vadd.f32 %v1806_v8, %v1680_v56  ;;  %v3383_v11 = vpack.c.bf16 %v4266_v6, %v4255_v15  ;;  %3452 = vst [vmem:[%s3988_s6 + $0x1f8] sm:$0xff] %v3388_v62   ;;  %v1685_v8 = vmul.f32 %v4027_v35, %v4027_v35 }
 0x186   : > { %v1808_v55 = vadd.f32 %v1807_v20, %v1681_v23  ;;  %v1548_v22 = vadd.f32 %v4016_v16, %v1547_v14  ;;  %3451 = vst [vmem:[%s3988_s6 + $0x1f0] sm:$0xff] %v3383_v11   ;;  %v1684_v16 = vmul.f32 %v4036_v46, %v4036_v46  ;;  %v1686_v23 = vmul.f32 %v4032_v40, %v4032_v40 }
 0x187   : > { %v1687_v20 = vmul.f32 %v4046_v3, %v4046_v3 }
 0x188   : > { %v1549_v48 = vadd.f32 %v1548_v22, %v4030_v39  ;;  %v1809_v51 = vadd.f32 %v1808_v55, %v1682_v24 }
 0x18a   : > { %v1810_v7 = vadd.f32 %v1809_v51, %v1683_v50  ;;  %v1550_v44 = vadd.f32 %v1549_v48, %v4036_v46  ;;  %v1688_v50 = vmul.f32 %v4052_v10, %v4052_v10 }
 0x18c   : > { %v1551_v25 = vadd.f32 %v4027_v35, %v1550_v44  ;;  %v1811_v56 = vadd.f32 %v1810_v7, %v1684_v16  ;;  %v1689_v35 = vmul.f32 %v4043_v63, %v4043_v63 }
 0x18e   : > { %v1812_v14 = vadd.f32 %v1811_v56, %v1685_v8  ;;  %v1552_v39 = vadd.f32 %v4032_v40, %v1551_v25  ;;  %v1690_v40 = vmul.f32 %v4048_v4, %v4048_v4  ;;  %v1692_v8 = vmul.f32 %v4068_v41, %v4068_v41 }
 0x190   : > { %v1553_v24 = vadd.f32 %v1552_v39, %v4046_v3  ;;  %v1813_v55 = vadd.f32 %v1812_v14, %v1686_v23  ;;  %v1691_v3 = vmul.f32 %v4062_v31, %v4062_v31 }
 0x192   : > { %v1814_v22 = vadd.f32 %v1813_v55, %v1687_v20  ;;  %v1554_v46 = vadd.f32 %v1553_v24, %v4052_v10  ;;  %v1696_v55 = vmul.f32 %v4084_v9, %v4084_v9 }
 0x194   : > { %v1555_v62 = vadd.f32 %v4043_v63, %v1554_v46  ;;  %v1815_v11 = vadd.f32 %v1814_v22, %v1688_v50  ;;  %v1693_v63 = vmul.f32 %v4059_v27, %v4059_v27 }
 0x196   : > { %v1816_v48 = vadd.f32 %v1815_v11, %v1689_v35  ;;  %v1556_v51 = vadd.f32 %v4048_v4, %v1555_v62  ;;  %v1694_v4 = vmul.f32 %v4064_v32, %v4064_v32 }
 0x198   : > { %v1557_v7 = vadd.f32 %v1556_v51, %v4062_v31  ;;  %v1817_v44 = vadd.f32 %v1816_v48, %v1690_v40  ;;  %v1695_v31 = vmul.f32 %v4078_v0, %v4078_v0  ;;  %v1700_v48 = vmul.f32 %v4100_v45, %v4100_v45 }
 0x19a   : > { %v1818_v16 = vadd.f32 %v1817_v44, %v1691_v3  ;;  %v1558_v10 = vadd.f32 %v1557_v7, %v4068_v41 }
 0x19c   : > { %v1559_v25 = vadd.f32 %v4059_v27, %v1558_v10  ;;  %v1819_v56 = vadd.f32 %v1818_v16, %v1692_v8  ;;  %v1697_v27 = vmul.f32 %v4075_v58, %v4075_v58 }
 0x19e   : > { %v1820_v23 = vadd.f32 %v1819_v56, %v1693_v63  ;;  %v1560_v14 = vadd.f32 %v4064_v32, %v1559_v25  ;;  %v1698_v32 = vmul.f32 %v4080_v1, %v4080_v1  ;;  %v1704_v63 = vmul.f32 %v4116_v21, %v4116_v21 }
 0x1a0   : > { %v1561_v39 = vadd.f32 %v1560_v14, %v4078_v0  ;;  %v1821_v20 = vadd.f32 %v1820_v23, %v1694_v4  ;;  %v1699_v0 = vmul.f32 %v4094_v34, %v4094_v34 }
 0x1a2   : > { %v1822_v24 = vadd.f32 %v1821_v20, %v1695_v31  ;;  %v1562_v41 = vadd.f32 %v1561_v39, %v4084_v9  ;;  %v1708_v20 = vmul.f32 %v4132_v2, %v4132_v2 }
 0x1a4   : > { %v1563_v22 = vadd.f32 %v4075_v58, %v1562_v41  ;;  %v1823_v46 = vadd.f32 %v1822_v24, %v1696_v55  ;;  %v1701_v58 = vmul.f32 %v4091_v28, %v4091_v28 }
 0x1a6   : > { %v1824_v50 = vadd.f32 %v1823_v46, %v1697_v27  ;;  %v1564_v35 = vadd.f32 %v4080_v1, %v1563_v22  ;;  %v1702_v1 = vmul.f32 %v4096_v36, %v4096_v36 }
 0x1a8   : > { %v1565_v62 = vadd.f32 %v1564_v35, %v4094_v34  ;;  %v1825_v11 = vadd.f32 %v1824_v50, %v1698_v32  ;;  %v1703_v34 = vmul.f32 %v4110_v12, %v4110_v12  ;;  %v1712_v50 = vmul.f32 %v4148_v54, %v4148_v54 }
 0x1aa   : > { %v1826_v40 = vadd.f32 %v1825_v11, %v1699_v0  ;;  %v1566_v9 = vadd.f32 %v1565_v62, %v4100_v45 }
 0x1ac   : > { %v1567_v51 = vadd.f32 %v4091_v28, %v1566_v9  ;;  %v1827_v3 = vadd.f32 %v1826_v40, %v1700_v48  ;;  %v1705_v28 = vmul.f32 %v4107_v5, %v4107_v5 }
 0x1ae   : > { %v1828_v7 = vadd.f32 %v1827_v3, %v1701_v58  ;;  %v1568_v44 = vadd.f32 %v4096_v36, %v1567_v51  ;;  %v1706_v36 = vmul.f32 %v4112_v13, %v4112_v13 }
 0x1b0   : > { %v1569_v16 = vadd.f32 %v1568_v44, %v4110_v12  ;;  %v1829_v10 = vadd.f32 %v1828_v7, %v1702_v1  ;;  %v1707_v12 = vmul.f32 %v4126_v52, %v4126_v52  ;;  %v4485_v44 = vld [vmem:[#allocation3_spill] sm:$0xff] }
 0x1b2   : > { %v1830_v8 = vadd.f32 %v1829_v10, %v1703_v34  ;;  %v1570_v45 = vadd.f32 %v1569_v16, %v4116_v21 }
 0x1b4   : > { %v1571_v25 = vadd.f32 %v4107_v5, %v1570_v45  ;;  %v1831_v56 = vadd.f32 %v1830_v8, %v1704_v63  ;;  %v1709_v5 = vmul.f32 %v4123_v47, %v4123_v47 }
 0x1b6   : > { %v1832_v4 = vadd.f32 %v1831_v56, %v1705_v28  ;;  %v1572_v23 = vadd.f32 %v4112_v13, %v1571_v25  ;;  %v1710_v13 = vmul.f32 %v4128_v53, %v4128_v53  ;;  %v1720_v28 = vmul.f32 %v4180_v60, %v4180_v60  ;;  %v4486_v25 = vld [vmem:[#allocation5_spill] sm:$0xff] }
 0x1b7   : > { %v1721_v56 = vmul.f32 %v4486_v25, %v4486_v25 }
 0x1b8   : > { %v1573_v14 = vadd.f32 %v1572_v23, %v4126_v52  ;;  %v1833_v31 = vadd.f32 %v1832_v4, %v1706_v36  ;;  %v1711_v52 = vmul.f32 %v4142_v38, %v4142_v38  ;;  %v4487_v23 = vld [vmem:[#allocation6_spill] sm:$0xff] }
 0x1ba   : > { %v1834_v39 = vadd.f32 %v1833_v31, %v1707_v12  ;;  %v1574_v21 = vadd.f32 %v1573_v14, %v4132_v2  ;;  %v1722_v12 = vmul.f32 %v4487_v23, %v4487_v23 }
 0x1bc   : > { %v1575_v24 = vadd.f32 %v4123_v47, %v1574_v21  ;;  %v1835_v41 = vadd.f32 %v1834_v39, %v1708_v20  ;;  %v1713_v47 = vmul.f32 %v4139_v29, %v4139_v29 }
 0x1be   : > { %v1836_v55 = vadd.f32 %v1835_v41, %v1709_v5  ;;  %v1576_v27 = vadd.f32 %v4128_v53, %v1575_v24  ;;  %v1714_v53 = vmul.f32 %v4144_v42, %v4144_v42 }
 0x1c0   : > { %v1577_v22 = vadd.f32 %v1576_v27, %v4142_v38  ;;  %v1837_v46 = vadd.f32 %v1836_v55, %v1710_v13  ;;  %v1715_v38 = vmul.f32 %v4158_v30, %v4158_v30  ;;  %v4490_v13 = vld [vmem:[#allocation7_spill] sm:$0xff] }
 0x1c1   : > { %v1725_v55 = vmul.f32 %v4490_v13, %v4490_v13 }
 0x1c2   : > { %v1838_v32 = vadd.f32 %v1837_v46, %v1711_v52  ;;  %v1578_v2 = vadd.f32 %v1577_v22, %v4148_v54  ;;  %v4483_v54 = vld [vmem:[#allocation4_spill] sm:$0xff]  ;;  %v4491_v22 = vld [vmem:[#allocation9_spill] sm:$0xff] }
 0x1c3   : > { %v1716_v51 = vmul.f32 %v4483_v54, %v4483_v54  ;;  %v1726_v46 = vmul.f32 %v4491_v22, %v4491_v22 }
 0x1c4   : > { %v1579_v35 = vadd.f32 %v4139_v29, %v1578_v2  ;;  %v1839_v0 = vadd.f32 %v1838_v32, %v1712_v50  ;;  %v4484_v29 = vld [vmem:[#allocation2_spill] sm:$0xff]  ;;  %v1727_v50 = vmul.f32 %v4206_v61, %v4206_v61 }
 0x1c5   : > { %v1717_v3 = vmul.f32 %v4484_v29, %v4484_v29 }
 0x1c6   : > { %v1840_v62 = vadd.f32 %v1839_v0, %v1713_v47  ;;  %v1580_v11 = vadd.f32 %v4144_v42, %v1579_v35  ;;  %v1718_v42 = vmul.f32 %v4485_v44, %v4485_v44 }
 0x1c8   : > { %v1581_v40 = vadd.f32 %v1580_v11, %v4158_v30  ;;  %v1841_v9 = vadd.f32 %v1840_v62, %v1714_v53  ;;  %v1719_v30 = vmul.f32 %v4174_v49, %v4174_v49  ;;  %v1728_v62 = vmul.f32 %v4214_v33, %v4214_v33 }
 0x1c9   : > { %v1729_v11 = vmul.f32 %v4203_v43, %v4203_v43 }
 0x1ca   : > { %v1842_v48 = vadd.f32 %v1841_v9, %v1715_v38  ;;  %v1582_v58 = vadd.f32 %v1581_v40, %v4483_v54  ;;  %v1730_v9 = vmul.f32 %v4210_v59, %v4210_v59 }
 0x1cc   : > { %v1583_v1 = vadd.f32 %v4484_v29, %v1582_v58  ;;  %v1843_v7 = vadd.f32 %v1842_v48, %v1716_v51 }
 0x1ce   : > { %v1844_v34 = vadd.f32 %v1843_v7, %v1717_v3  ;;  %v1584_v16 = vadd.f32 %v4485_v44, %v1583_v1  ;;  %v1732_v3 = vmul.f32 %v4240_v19, %v4240_v19 }
 0x1d0   : > { %v1585_v10 = vadd.f32 %v1584_v16, %v4174_v49  ;;  %v1845_v8 = vadd.f32 %v1844_v34, %v1718_v42  ;;  %v4488_v49 = vld [vmem:[#allocation8_spill] sm:$0xff]  ;;  %v1735_v42 = vmul.f32 %v4255_v15, %v4255_v15 }
 0x1d1   : > { %v1723_v39 = vmul.f32 %v4488_v49, %v4488_v49 }
 0x1d2   : > { %v1846_v45 = vadd.f32 %v1845_v8, %v1719_v30  ;;  %v1586_v63 = vadd.f32 %v1585_v10, %v4180_v60  ;;  %v4489_v60 = vld [vmem:[#allocation10_spill] sm:$0xff]  ;;  %v1737_v10 = vmul.f32 %v4250_v57, %v4250_v57 }
 0x1d3   : > { %v1724_v41 = vmul.f32 %v4489_v60, %v4489_v60 }
 0x1d4   : > { %v1587_v36 = vadd.f32 %v4486_v25, %v1586_v63  ;;  %v1847_v4 = vadd.f32 %v1846_v45, %v1720_v28 }
 0x1d6   : > { %v1848_v14 = vadd.f32 %v1847_v4, %v1721_v56  ;;  %v1588_v31 = vadd.f32 %v4487_v23, %v1587_v36  ;;  %v1872_v4 = vlaneseq }
 0x1d8   : > { %v1589_v21 = vadd.f32 %v1588_v31, %v4488_v49  ;;  %v1849_v20 = vadd.f32 %v1848_v14, %v1722_v12  ;;  %v1873_v31 = vshrl.u32 %v1872_v4, 7 }
 0x1da   : > { %v1850_v5 = vadd.f32 %v1849_v20, %v1723_v39  ;;  %v1590_v24 = vadd.f32 %v1589_v21, %v4489_v60  ;;  %vm1875_vm2 = vcmp.eq.s32.totalorder %v1873_v31, 1  ;;  %vm1874_vm3 = vcmp.eq.s32.totalorder %v1873_v31, 0 }
 0x1dc   : > { %v1591_v27 = vadd.f32 %v4490_v13, %v1590_v24  ;;  %v1851_v52 = vadd.f32 %v1850_v5, %v1724_v41 }
 0x1de   : > { %v1852_v32 = vadd.f32 %v1851_v52, %v1725_v55  ;;  %v1592_v2 = vadd.f32 %v4491_v22, %v1591_v27 }
 0x1e0   : > { %v1593_v47 = vadd.f32 %v1592_v2, %v4206_v61  ;;  %v1853_v35 = vadd.f32 %v1852_v32, %v1726_v46  ;;  %v1731_v61 = vmul.f32 %v4229_v26, %v4229_v26 }
 0x1e2   : > { %v1854_v0 = vadd.f32 %v1853_v35, %v1727_v50  ;;  %v1594_v53 = vadd.f32 %v1593_v47, %v4214_v33 }
 0x1e4   : > { %v1595_v38 = vadd.f32 %v4203_v43, %v1594_v53  ;;  %v1855_v40 = vadd.f32 %v1854_v0, %v1728_v62  ;;  %v1733_v43 = vmul.f32 %v4224_v37, %v4224_v37 }
 0x1e6   : > { %v1856_v48 = vadd.f32 %v1855_v40, %v1729_v11  ;;  %v1596_v54 = vadd.f32 %v4210_v59, %v1595_v38  ;;  %v1734_v59 = vmul.f32 %v4233_v17, %v4233_v17 }
 0x1e8   : > { %v1597_v58 = vadd.f32 %v1596_v54, %v4229_v26  ;;  %v1857_v51 = vadd.f32 %v1856_v48, %v1730_v9 }
 0x1ea   : > { %v1858_v29 = vadd.f32 %v1857_v51, %v1731_v61  ;;  %v1598_v33 = vadd.f32 %v1597_v58, %v4240_v19 }
 0x1ec   : > { %v1599_v1 = vadd.f32 %v4224_v37, %v1598_v33  ;;  %v1859_v7 = vadd.f32 %v1858_v29, %v1732_v3  ;;  %v1736_v37 = vmul.f32 %v4266_v6, %v4266_v6 }
 0x1ee   : > { %v1860_v44 = vadd.f32 %v1859_v7, %v1733_v43  ;;  %v1600_v26 = vadd.f32 %v4233_v17, %v1599_v1  ;;  %v1738_v17 = vmul.f32 %v4259_v18, %v4259_v18 }
 0x1f0   : > { %v1601_v34 = vadd.f32 %v1600_v26, %v4255_v15  ;;  %v1861_v16 = vadd.f32 %v1860_v44, %v1734_v59 }
 0x1f2   : > { %v1862_v19 = vadd.f32 %v1861_v16, %v1735_v42  ;;  %v1602_v30 = vadd.f32 %v1601_v34, %v4266_v6 }
 0x1f4   : > { %v1603_v8 = vadd.f32 %v4250_v57, %v1602_v30  ;;  %v1863_v45 = vadd.f32 %v1862_v19, %v1736_v37 }
 0x1f6   : > { %v1604_v63 = vadd.f32 %v4259_v18, %v1603_v8  ;;  %v1864_v15 = vadd.f32 %v1863_v45, %v1737_v10 }
 0x1f8   : > { %v1605_v28 = vrot.slane %v1604_v63, 4  ;;  %v1865_v25 = vadd.f32 %v1864_v15, %v1738_v17 }
 0x1fa   : > { %v1606_v56 = vadd.f32 %v1605_v28, %v1604_v63  ;;  %v1866_v36 = vrot.slane %v1865_v25, 4 }
 0x1fc   : > { %v1607_v23 = vrot.slane %v1606_v56, 2  ;;  %v1867_v6 = vadd.f32 %v1866_v36, %v1865_v25 }
 0x1fe   : > { %v1608_v12 = vadd.f32 %v1607_v23, %v1606_v56  ;;  %v1868_v14 = vrot.slane %v1867_v6, 2 }
 0x200   : > { %v1869_v57 = vadd.f32 %v1868_v14, %v1867_v6  ;;  %v1609_v49 = vrot.slane %v1608_v12, 1 }
 0x202   : > { %v1870_v39 = vrot.slane %v1869_v57, 1  ;;  %v1610_v18 = vadd.f32 %v1609_v49, %v1608_v12 }
 0x204   : > { %v1871_v21 = vadd.f32 %v1870_v39, %v1869_v57 }
 0x206   : > { %v1876_v20 = vsel %vm1875_vm2, %v1871_v21, 0.0 }
 0x207   : > { %v1877_v5 = vsel %vm1874_vm3, %v1610_v18, %v1876_v20 }
 0x208   : > { %1878 = vst [vmem:[%s250_s10] sm:$0xff] %v1877_v5 }
 0x209 PF: > { %s14_s14 = sadd.s32 1, %s3787_s14   ;;  %s4492_s12 = smov %s3783_s13 }
 0x20a   : > { %p11_p6 = scmp.ge.s32.totalorder %s14_s14, 4   ;;  %s4493_s13 = smov %s4495_s15 }
 0x20c   :  { %13 = sbr.rel (!%p11_p6) target bundleno = 2 (0x2), region = 73 }

// kernel: _lambda_.18
= control target key start
LH: loop header
LB: loop body
LE: loop exit
PB: predicated region body
PF: predicated region fallthrough
CT: control target
= control target key end

     0   :  { %s6955_s12 = smov 0   ;;  %s6957_s13 = smov 0   ;;  %s8159_s0 = inlined_call_operand.vmem [shape: bf16[4,2048,32], index: 0, kind: input, shape index: {}]   ;;  %s8160_s1 = inlined_call_operand.vmem [shape: bf16[4,32,128], index: 1, kind: input, shape index: {}]   ;;  %s8161_s2 = inlined_call_operand.vmem [shape: bf16[4,2048,128], index: 2, kind: output, shape index: {0}]   ;;  %s8162_s3 = inlined_call_operand.vmem [shape: f32[4,1,8,128], index: 3, kind: output, shape index: {1}]  }
   0x1   :  { %s6959_s14 = smov 0  }
   0x2 LB: > { %s26_s15 = sadd.s32 1, %s6929_s13  ;;  %p4813_p0 = scmp.ge.s32.totalorder %s6933_s14, 1  ;;  %s6933_s14 = sphi %s6959_s14, %s14_s14   ;;  %s6929_s13 = sphi %s6957_s13, %s8316_s13   ;;  %s6925_s12 = sphi %s6955_s12, %s8315_s12  }
   0x3   : > { %p28_p1 = scmp.ge.s32.totalorder %s26_s15, 4  ;;  %p173_p2 = scmp.lt.s32.totalorder %s6933_s14, 5 }
   0x5   : > { %s8318_s15 = smov (%p28_p1, %s26_s15), 0  ;;  %p174_p3 = pnand %p4813_p0, %p173_p2 }
   0x7   : > { %177 = sbr.rel (%p174_p3) target bundleno = 770 (0x302), region = 28 }
   0xe   : > { %p218_p4 = scmp.lt.s32.totalorder %s6925_s12, 3  ;;  %vm1162_vm0 = vcmask 261120  }
  0x10   : > { %s8320_s12 = smov (!%p218_p4, %s6925_s12), 3 }
  0x11   : > { %s5337_s16 = sshll.u32 %s8320_s12, 10  ;;  %s5338_s17 = sshll.u32 %s8320_s12, 4 }
  0x12   : > { %s6982_s20 = scalar_lea.vmem %s8159_s0, %s5337_s16  ;;  %s231_s23 = scalar_lea.vmem %s8160_s1, %s5338_s17 }
  0x13   : > { %v6781_v0 = vld [vmem:[%s231_s23] sm:$0xff]   ;;  %v6782_v1 = vld [vmem:[%s231_s23 + $0x8] sm:$0xff]   ;;  %v6785_v4 = vld [vmem:[%s6982_s20 + $0x10] sm:$0xff]   ;;  %s7150_s26 = scalar_lea.vmem %s8161_s2, %s5337_s16  ;;  %s4820_s27 = sshll.u32 %s8320_s12, 3 }
  0x14   : > { %6493 = vmatprep.subr.bf16.mxu0 %v6781_v0  ;;  %v6783_v2 = vld [vmem:[%s6982_s20] sm:$0xff]   ;;  %6753 = vmatprep.subr.bf16.mxu1 %v6781_v0  ;;  %v6784_v3 = vld [vmem:[%s6982_s20 + $0x8] sm:$0xff]   ;;  %v6786_v5 = vld [vmem:[%s6982_s20 + $0x18] sm:$0xff]   ;;  %s248_s30 = scalar_lea.vmem %s8162_s3, %s4820_s27 }
  0x15   : > { %6494 = vmatpush3.bf16.msra.mxu0 %v6781_v0  ;;  %6755 = vmatpush3.bf16.msra.mxu1 %v6781_v0  ;;  %v6787_v6 = vld [vmem:[%s6982_s20 + $0x20] sm:$0xff]   ;;  %v6788_v7 = vld [vmem:[%s6982_s20 + $0x28] sm:$0xff]   ;;  %v6789_v8 = vld [vmem:[%s6982_s20 + $0x30] sm:$0xff]  }
  0x16   : > { %6495 = vmatprep.subr.bf16.mxu0 %v6782_v1  ;;  %6497 = vmatprep.mubr.msk.bf16.mxu0 %vm1162_vm0, %v6783_v2  ;;  %v6790_v9 = vld [vmem:[%s6982_s20 + $0x38] sm:$0xff]   ;;  %v6791_v10 = vld [vmem:[%s6982_s20 + $0x40] sm:$0xff]   ;;  %v6792_v11 = vld [vmem:[%s6982_s20 + $0x48] sm:$0xff]  }
  0x17   : > { %6754 = vmatprep.subr.bf16.mxu1 %v6782_v1  ;;  %v6793_v12 = vld [vmem:[%s6982_s20 + $0x50] sm:$0xff]   ;;  %v6794_v13 = vld [vmem:[%s6982_s20 + $0x58] sm:$0xff]   ;;  %v6795_v14 = vld [vmem:[%s6982_s20 + $0x60] sm:$0xff]  }
  0x18   : > { %v6796_v15 = vld [vmem:[%s6982_s20 + $0x68] sm:$0xff]   ;;  %v6797_v16 = vld [vmem:[%s6982_s20 + $0x70] sm:$0xff]   ;;  %v6798_v17 = vld [vmem:[%s6982_s20 + $0x78] sm:$0xff]  }
  0x19   : > { %6496 = vmatpush3.bf16.msra.mxu0 %v6782_v1  ;;  %6756 = vmatpush3.bf16.msra.mxu1 %v6782_v1  ;;  %v6799_v18 = vld [vmem:[%s6982_s20 + $0x80] sm:$0xff]   ;;  %v6800_v19 = vld [vmem:[%s6982_s20 + $0x88] sm:$0xff]   ;;  %v6801_v20 = vld [vmem:[%s6982_s20 + $0x90] sm:$0xff]  }
  0x1a   : > { %v6802_v21 = vld [vmem:[%s6982_s20 + $0x98] sm:$0xff]   ;;  %v6803_v22 = vld [vmem:[%s6982_s20 + $0xa0] sm:$0xff]   ;;  %v6804_v23 = vld [vmem:[%s6982_s20 + $0xa8] sm:$0xff]  }
  0x1b   : > { %v6805_v24 = vld [vmem:[%s6982_s20 + $0xb0] sm:$0xff]   ;;  %v6806_v25 = vld [vmem:[%s6982_s20 + $0xb8] sm:$0xff]   ;;  %v6807_v26 = vld [vmem:[%s6982_s20 + $0xc0] sm:$0xff]  }
  0x1c   : > { %6498 = vmatmul.mubr.msk.bf16.vlgmr.msra.gmra.mrb[0].mxu0 %vm1162_vm0, %v6784_v3  ;;  %v6808_v27 = vld [vmem:[%s6982_s20 + $0xc8] sm:$0xff]   ;;  %v6809_v28 = vld [vmem:[%s6982_s20 + $0xd0] sm:$0xff]   ;;  %v6810_v29 = vld [vmem:[%s6982_s20 + $0xd8] sm:$0xff]  }
  0x1d   : > { %6501 = vmatprep.mubr.msk.bf16.mxu0 %vm1162_vm0, %v6785_v4  ;;  %v6811_v30 = vld [vmem:[%s6982_s20 + $0xe0] sm:$0xff]   ;;  %v6812_v31 = vld [vmem:[%s6982_s20 + $0xe8] sm:$0xff]   ;;  %v6813_v32 = vld [vmem:[%s6982_s20 + $0xf0] sm:$0xff]  }
  0x1e   : > { %v6814_v33 = vld [vmem:[%s6982_s20 + $0xf8] sm:$0xff]   ;;  %v6815_v34 = vld [vmem:[%s6982_s20 + $0x100] sm:$0xff]   ;;  %v6848_v36 = vld [vmem:[%s6982_s20 + $0x208] sm:$0xff]  }
  0x1f   : > { %v6847_v35 = vld [vmem:[%s6982_s20 + $0x200] sm:$0xff]   ;;  %v6816_v37 = vld [vmem:[%s6982_s20 + $0x108] sm:$0xff]   ;;  %v6817_v38 = vld [vmem:[%s6982_s20 + $0x110] sm:$0xff]  }
  0x20   : > { %6625 = vmatprep.mubr.msk.bf16.mxu1 %vm1162_vm0, %v6847_v35  ;;  %v6849_v39 = vld [vmem:[%s6982_s20 + $0x210] sm:$0xff]   ;;  %v6850_v40 = vld [vmem:[%s6982_s20 + $0x218] sm:$0xff]   ;;  %v6819_v42 = vld [vmem:[%s6982_s20 + $0x120] sm:$0xff]  }
  0x21   : > { %6626 = vmatmul.mubr.msk.bf16.vlgmr.msra.gmra.mrb[0].mxu1 %vm1162_vm0, %v6848_v36  ;;  %v6818_v41 = vld [vmem:[%s6982_s20 + $0x118] sm:$0xff]   ;;  %v6851_v43 = vld [vmem:[%s6982_s20 + $0x220] sm:$0xff]   ;;  %v6852_v44 = vld [vmem:[%s6982_s20 + $0x228] sm:$0xff]  }
  0x22   : > { %6629 = vmatprep.mubr.msk.bf16.mxu1 %vm1162_vm0, %v6849_v39  ;;  %v6820_v45 = vld [vmem:[%s6982_s20 + $0x128] sm:$0xff]   ;;  %v6821_v46 = vld [vmem:[%s6982_s20 + $0x130] sm:$0xff]   ;;  %v6854_v48 = vld [vmem:[%s6982_s20 + $0x238] sm:$0xff]  }
  0x23   : > { %v6853_v47 = vld [vmem:[%s6982_s20 + $0x230] sm:$0xff]   ;;  %v6822_v49 = vld [vmem:[%s6982_s20 + $0x138] sm:$0xff]   ;;  %v6823_v50 = vld [vmem:[%s6982_s20 + $0x140] sm:$0xff]  }
  0x24   : > { %6502 = vmatmul.mubr.msk.bf16.gmra.mrb[4].mxu0 %vm1162_vm0, %v6786_v5  ;;  %v6855_v51 = vld [vmem:[%s6982_s20 + $0x240] sm:$0xff]   ;;  %v6856_v52 = vld [vmem:[%s6982_s20 + $0x248] sm:$0xff]   ;;  %v6825_v54 = vld [vmem:[%s6982_s20 + $0x150] sm:$0xff]  }
  0x25   : > { %6505 = vmatprep.mubr.msk.bf16.mxu0 %vm1162_vm0, %v6787_v6  ;;  %v6824_v53 = vld [vmem:[%s6982_s20 + $0x148] sm:$0xff]   ;;  %v6857_v55 = vld [vmem:[%s6982_s20 + $0x250] sm:$0xff]   ;;  %v6858_v56 = vld [vmem:[%s6982_s20 + $0x258] sm:$0xff]  }
  0x26   : > { %v6826_v57 = vld [vmem:[%s6982_s20 + $0x158] sm:$0xff]   ;;  %v6827_v58 = vld [vmem:[%s6982_s20 + $0x160] sm:$0xff]   ;;  %v6860_v60 = vld [vmem:[%s6982_s20 + $0x268] sm:$0xff]  }
  0x27   : > { %v6859_v59 = vld [vmem:[%s6982_s20 + $0x260] sm:$0xff]   ;;  %v6828_v61 = vld [vmem:[%s6982_s20 + $0x168] sm:$0xff]   ;;  %v6829_v62 = vld [vmem:[%s6982_s20 + $0x170] sm:$0xff]  }
  0x28   : > { %v6861_v63 = vld [vmem:[%s6982_s20 + $0x270] sm:$0xff]   ;;  %v6862_v0 = vld [vmem:[%s6982_s20 + $0x278] sm:$0xff]   ;;  %v6831_v2 = vld [vmem:[%s6982_s20 + $0x180] sm:$0xff]  }
  0x29   : > { %6630 = vmatmul.mubr.msk.bf16.gmra.mrb[4].mxu1 %vm1162_vm0, %v6850_v40  ;;  %v6830_v1 = vld [vmem:[%s6982_s20 + $0x178] sm:$0xff]   ;;  %v6863_v3 = vld [vmem:[%s6982_s20 + $0x280] sm:$0xff]   ;;  %v6864_v4 = vld [vmem:[%s6982_s20 + $0x288] sm:$0xff]  }
  0x2a   : > { %6633 = vmatprep.mubr.msk.bf16.mxu1 %vm1162_vm0, %v6851_v43  ;;  %v6832_v5 = vld [vmem:[%s6982_s20 + $0x188] sm:$0xff]   ;;  %v6833_v6 = vld [vmem:[%s6982_s20 + $0x190] sm:$0xff]  }
  0x2b   : > { %v6872_v36 = vld [vmem:[%s6982_s20 + $0x2c8] sm:$0xff]   ;;  %v6841_v43 = vld [vmem:[%s6982_s20 + $0x1d0] sm:$0xff]  }
  0x2c   : > { %6506 = vmatmul.mubr.msk.bf16.gmra.mrb[8].mxu0 %vm1162_vm0, %v6788_v7  ;;  %v6865_v7 = vld [vmem:[%s6982_s20 + $0x290] sm:$0xff]  }
  0x2d   : > { %6509 = vmatprep.mubr.msk.bf16.mxu0 %vm1162_vm0, %v6789_v8  ;;  %v6866_v8 = vld [vmem:[%s6982_s20 + $0x298] sm:$0xff]  }
  0x31   : > { %6634 = vmatmul.mubr.msk.bf16.gmra.mrb[8].mxu1 %vm1162_vm0, %v6852_v44 }
  0x32   : > { %6637 = vmatprep.mubr.msk.bf16.mxu1 %vm1162_vm0, %v6853_v47 }
  0x34   : > { %6510 = vmatmul.mubr.msk.bf16.gmra.mrb[12].mxu0 %vm1162_vm0, %v6790_v9  ;;  %v6834_v9 = vld [vmem:[%s6982_s20 + $0x198] sm:$0xff]  }
  0x35   : > { %6513 = vmatprep.mubr.msk.bf16.mxu0 %vm1162_vm0, %v6791_v10  ;;  %v6835_v10 = vld [vmem:[%s6982_s20 + $0x1a0] sm:$0xff]  }
  0x39   : > { %6638 = vmatmul.mubr.msk.bf16.gmra.mrb[12].mxu1 %vm1162_vm0, %v6854_v48 }
  0x3a   : > { %6641 = vmatprep.mubr.msk.bf16.mxu1 %vm1162_vm0, %v6855_v51 }
  0x3c   : > { %6514 = vmatmul.mubr.msk.bf16.gmra.mrb[16].mxu0 %vm1162_vm0, %v6792_v11  ;;  %v6867_v11 = vld [vmem:[%s6982_s20 + $0x2a0] sm:$0xff]  }
  0x3d   : > { %6517 = vmatprep.mubr.msk.bf16.mxu0 %vm1162_vm0, %v6793_v12  ;;  %v6868_v12 = vld [vmem:[%s6982_s20 + $0x2a8] sm:$0xff]  }
  0x41   : > { %6642 = vmatmul.mubr.msk.bf16.gmra.mrb[16].mxu1 %vm1162_vm0, %v6856_v52 }
  0x42   : > { %6645 = vmatprep.mubr.msk.bf16.mxu1 %vm1162_vm0, %v6857_v55 }
  0x44   : > { %6518 = vmatmul.mubr.msk.bf16.gmra.mrb[20].mxu0 %vm1162_vm0, %v6794_v13  ;;  %v6836_v13 = vld [vmem:[%s6982_s20 + $0x1a8] sm:$0xff]  }
  0x45   : > { %6521 = vmatprep.mubr.msk.bf16.mxu0 %vm1162_vm0, %v6795_v14  ;;  %v6837_v14 = vld [vmem:[%s6982_s20 + $0x1b0] sm:$0xff]  }
  0x49   : > { %6646 = vmatmul.mubr.msk.bf16.gmra.mrb[20].mxu1 %vm1162_vm0, %v6858_v56 }
  0x4a   : > { %6649 = vmatprep.mubr.msk.bf16.mxu1 %vm1162_vm0, %v6859_v59 }
  0x4c   : > { %6522 = vmatmul.mubr.msk.bf16.gmra.mrb[24].mxu0 %vm1162_vm0, %v6796_v15  ;;  %v6869_v15 = vld [vmem:[%s6982_s20 + $0x2b0] sm:$0xff]  }
  0x4d   : > { %6525 = vmatprep.mubr.msk.bf16.mxu0 %vm1162_vm0, %v6797_v16 }
  0x51   : > { %6650 = vmatmul.mubr.msk.bf16.gmra.mrb[24].mxu1 %vm1162_vm0, %v6860_v60  ;;  %v6842_v60 = vld [vmem:[%s6982_s20 + $0x1d8] sm:$0xff]  }
  0x52   : > { %6653 = vmatprep.mubr.msk.bf16.mxu1 %vm1162_vm0, %v6861_v63 }
  0x54   : > { %6526 = vmatmul.mubr.msk.bf16.gmra.mrb[28].mxu0 %vm1162_vm0, %v6798_v17  ;;  %v6870_v17 = vld [vmem:[%s6982_s20 + $0x2b8] sm:$0xff]  }
  0x55   : > { %6529 = vmatprep.mubr.msk.bf16.mxu0 %vm1162_vm0, %v6799_v18 }
  0x59   : > { %6654 = vmatmul.mubr.msk.bf16.gmra.mrb[28].mxu1 %vm1162_vm0, %v6862_v0 }
  0x5a   : > { %6657 = vmatprep.mubr.msk.bf16.mxu1 %vm1162_vm0, %v6863_v3 }
  0x5c   : > { %6530 = vmatmul.mubr.msk.bf16.gmra.mrb[32].mxu0 %vm1162_vm0, %v6800_v19  ;;  %v6838_v19 = vld [vmem:[%s6982_s20 + $0x1b8] sm:$0xff]  }
  0x5d   : > { %6533 = vmatprep.mubr.msk.bf16.mxu0 %vm1162_vm0, %v6801_v20 }
  0x61   : > { %6658 = vmatmul.mubr.msk.bf16.gmra.mrb[32].mxu1 %vm1162_vm0, %v6864_v4 }
  0x62   : > { %6661 = vmatprep.mubr.msk.bf16.mxu1 %vm1162_vm0, %v6865_v7 }
  0x64   : > { %6534 = vmatmul.mubr.msk.bf16.gmra.mrb[36].mxu0 %vm1162_vm0, %v6802_v21  ;;  %v6839_v21 = vld [vmem:[%s6982_s20 + $0x1c0] sm:$0xff]  }
  0x65   : > { %6537 = vmatprep.mubr.msk.bf16.mxu0 %vm1162_vm0, %v6803_v22 }
  0x69   : > { %6662 = vmatmul.mubr.msk.bf16.gmra.mrb[36].mxu1 %vm1162_vm0, %v6866_v8 }
  0x6a   : > { %6665 = vmatprep.mubr.msk.bf16.mxu1 %vm1162_vm0, %v6867_v11  ;;  %v6875_v11 = vld [vmem:[%s6982_s20 + $0x2e0] sm:$0xff]  }
  0x6c   : > { %6538 = vmatmul.mubr.msk.bf16.gmra.mrb[40].mxu0 %vm1162_vm0, %v6804_v23 }
  0x6d   : > { %6541 = vmatprep.mubr.msk.bf16.mxu0 %vm1162_vm0, %v6805_v24 }
  0x71   : > { %6666 = vmatmul.mubr.msk.bf16.gmra.mrb[40].mxu1 %vm1162_vm0, %v6868_v12 }
  0x72   : > { %6669 = vmatprep.mubr.msk.bf16.mxu1 %vm1162_vm0, %v6869_v15 }
  0x74   : > { %6542 = vmatmul.mubr.msk.bf16.gmra.mrb[44].mxu0 %vm1162_vm0, %v6806_v25 }
  0x75   : > { %6545 = vmatprep.mubr.msk.bf16.mxu0 %vm1162_vm0, %v6807_v26 }
  0x79   : > { %6670 = vmatmul.mubr.msk.bf16.gmra.mrb[44].mxu1 %vm1162_vm0, %v6870_v17 }
  0x7c   : > { %6546 = vmatmul.mubr.msk.bf16.gmra.mrb[48].mxu0 %vm1162_vm0, %v6808_v27 }
  0x7d   : > { %6549 = vmatprep.mubr.msk.bf16.mxu0 %vm1162_vm0, %v6809_v28 }
  0x84   : > { %6550 = vmatmul.mubr.msk.bf16.gmra.mrb[52].mxu0 %vm1162_vm0, %v6810_v29 }
  0x85   : > { %6553 = vmatprep.mubr.msk.bf16.mxu0 %vm1162_vm0, %v6811_v30 }
  0x8c   : > { %6554 = vmatmul.mubr.msk.bf16.gmra.mrb[56].mxu0 %vm1162_vm0, %v6812_v31  ;;  %v6871_v31 = vld [vmem:[%s6982_s20 + $0x2c0] sm:$0xff]  }
  0x8d   : > { %6557 = vmatprep.mubr.msk.bf16.mxu0 %vm1162_vm0, %v6813_v32  ;;  %6673 = vmatprep.mubr.msk.bf16.mxu1 %vm1162_vm0, %v6871_v31 }
  0x8e   : > { %6674 = vmatmul.mubr.msk.bf16.gmra.mrb[48].mxu1 %vm1162_vm0, %v6872_v36 }
  0x94   : > { %6558 = vmatmul.mubr.msk.bf16.gmra.mrb[60].mxu0 %vm1162_vm0, %v6814_v33 }
  0x95   : > { %6561 = vmatprep.mubr.msk.bf16.mxu0 %vm1162_vm0, %v6815_v34 }
  0x9c   : > { %6562 = vmatmul.mubr.msk.bf16.gmra.mrb[64].mxu0 %vm1162_vm0, %v6816_v37 }
  0x9d   : > { %6565 = vmatprep.mubr.msk.bf16.mxu0 %vm1162_vm0, %v6817_v38  ;;  %v6840_v38 = vld [vmem:[%s6982_s20 + $0x1c8] sm:$0xff]  }
  0xa4   : > { %6566 = vmatmul.mubr.msk.bf16.gmra.mrb[68].mxu0 %vm1162_vm0, %v6818_v41 }
  0xa5   : > { %6569 = vmatprep.mubr.msk.bf16.mxu0 %vm1162_vm0, %v6819_v42 }
  0xac   : > { %6570 = vmatmul.mubr.msk.bf16.gmra.mrb[72].mxu0 %vm1162_vm0, %v6820_v45 }
  0xad   : > { %6573 = vmatprep.mubr.msk.bf16.mxu0 %vm1162_vm0, %v6821_v46 }
  0xb4   : > { %6574 = vmatmul.mubr.msk.bf16.gmra.mrb[76].mxu0 %vm1162_vm0, %v6822_v49 }
  0xb5   : > { %6577 = vmatprep.mubr.msk.bf16.mxu0 %vm1162_vm0, %v6823_v50 }
  0xbc   : > { %6578 = vmatmul.mubr.msk.bf16.gmra.mrb[80].mxu0 %vm1162_vm0, %v6824_v53  ;;  %v6873_v53 = vld [vmem:[%s6982_s20 + $0x2d0] sm:$0xff]  }
  0xbd   : > { %6581 = vmatprep.mubr.msk.bf16.mxu0 %vm1162_vm0, %v6825_v54  ;;  %6677 = vmatprep.mubr.msk.bf16.mxu1 %vm1162_vm0, %v6873_v53 }
  0xc4   : > { %6582 = vmatmul.mubr.msk.bf16.gmra.mrb[84].mxu0 %vm1162_vm0, %v6826_v57 }
  0xc5   : > { %6585 = vmatprep.mubr.msk.bf16.mxu0 %vm1162_vm0, %v6827_v58  ;;  %v6874_v58 = vld [vmem:[%s6982_s20 + $0x2d8] sm:$0xff]  }
  0xc6   : > { %6678 = vmatmul.mubr.msk.bf16.gmra.mrb[52].mxu1 %vm1162_vm0, %v6874_v58 }
  0xc7   : > { %6681 = vmatprep.mubr.msk.bf16.mxu1 %vm1162_vm0, %v6875_v11 }
  0xcc   : > { %6586 = vmatmul.mubr.msk.bf16.gmra.mrb[88].mxu0 %vm1162_vm0, %v6828_v61 }
  0xcd   : > { %6589 = vmatprep.mubr.msk.bf16.mxu0 %vm1162_vm0, %v6829_v62 }
  0xd4   : > { %6590 = vmatmul.mubr.msk.bf16.gmra.mrb[92].mxu0 %vm1162_vm0, %v6830_v1  ;;  %v6843_v1 = vld [vmem:[%s6982_s20 + $0x1e0] sm:$0xff]  }
  0xd5   : > { %6593 = vmatprep.mubr.msk.bf16.mxu0 %vm1162_vm0, %v6831_v2 }
  0xdc   : > { %6594 = vmatmul.mubr.msk.bf16.gmra.mrb[96].mxu0 %vm1162_vm0, %v6832_v5 }
  0xdd   : > { %6597 = vmatprep.mubr.msk.bf16.mxu0 %vm1162_vm0, %v6833_v6 }
  0xe4   : > { %6598 = vmatmul.mubr.msk.bf16.gmra.mrb[100].mxu0 %vm1162_vm0, %v6834_v9 }
  0xe5   : > { %6601 = vmatprep.mubr.msk.bf16.mxu0 %vm1162_vm0, %v6835_v10 }
  0xec   : > { %6602 = vmatmul.mubr.msk.bf16.gmra.mrb[104].mxu0 %vm1162_vm0, %v6836_v13 }
  0xed   : > { %6605 = vmatprep.mubr.msk.bf16.mxu0 %vm1162_vm0, %v6837_v14 }
  0xef   : > { %v6499_v16 = vpop.f32.mrb[0].mxu0 }
  0xf0   : > { %v1581_v18 = vpop.f32.mrb[1].mxu0  ;;  %v2867_v28 = vmul.f32 %v6499_v16, %v6499_v16 }
  0xf1   : > { %v6500_v20 = vpop.f32.mrb[2].mxu0  ;;  %v2865_v24 = vmul.f32 %v1581_v18, %v1581_v18 }
  0xf2   : > { %v5604_v22 = vpack.c.bf16 %v6500_v20, %v6499_v16  ;;  %v1584_v23 = vpop.f32.mrb[3].mxu0  ;;  %v2868_v32 = vmul.f32 %v6500_v20, %v6500_v20 }
  0xf3   : > { %v2604_v25 = vadd.f32 %v1584_v23, %v1581_v18  ;;  %v2866_v26 = vmul.f32 %v1584_v23, %v1584_v23  ;;  %v5599_v27 = vpack.c.bf16 %v1584_v23, %v1581_v18  ;;  %v6844_v18 = vld [vmem:[%s6982_s20 + $0x1e8] sm:$0xff]   ;;  %v6845_v23 = vld [vmem:[%s6982_s20 + $0x1f0] sm:$0xff]  }
  0xf4   : > { %6236 = vst [vmem:[%s7150_s26 + $0x8] sm:$0xff] %v5604_v22   ;;  %6606 = vmatmul.mubr.msk.bf16.gmra.mrb[108].mxu0 %vm1162_vm0, %v6838_v19 }
  0xf5   : > { %v2605_v29 = vadd.f32 %v6499_v16, %v2604_v25  ;;  %v3121_v30 = vadd.f32 %v2866_v26, %v2865_v24  ;;  %5600 = vst [vmem:[%s7150_s26] sm:$0xff] %v5599_v27   ;;  %6609 = vmatprep.mubr.msk.bf16.mxu0 %vm1162_vm0, %v6839_v21  ;;  %v6876_v16 = vld [vmem:[%s6982_s20 + $0x2e8] sm:$0xff]  }
  0xf6   : > { %6682 = vmatmul.mubr.msk.bf16.gmra.mrb[56].mxu1 %vm1162_vm0, %v6876_v16 }
  0xf7   : > { %v2606_v33 = vadd.f32 %v6500_v20, %v2605_v29  ;;  %v3122_v34 = vadd.f32 %v3121_v30, %v2867_v28  ;;  %v6503_v35 = vpop.f32.mrb[4].mxu0 }
  0xf8   : > { %v1597_v37 = vpop.f32.mrb[5].mxu0  ;;  %v2871_v50 = vmul.f32 %v6503_v35, %v6503_v35 }
  0xf9   : > { %v3123_v39 = vadd.f32 %v3122_v34, %v2868_v32  ;;  %v2607_v40 = vadd.f32 %v2606_v33, %v1597_v37  ;;  %v2869_v41 = vmul.f32 %v1597_v37, %v1597_v37  ;;  %v6504_v42 = vpop.f32.mrb[6].mxu0  ;;  %v6877_v33 = vld [vmem:[%s6982_s20 + $0x2f0] sm:$0xff]  }
  0xfa   : > { %v5614_v44 = vpack.c.bf16 %v6504_v42, %v6503_v35  ;;  %v1600_v45 = vpop.f32.mrb[7].mxu0  ;;  %v2872_v54 = vmul.f32 %v6504_v42, %v6504_v42  ;;  %6685 = vmatprep.mubr.msk.bf16.mxu1 %vm1162_vm0, %v6877_v33 }
  0xfb   : > { %v3124_v46 = vadd.f32 %v3123_v39, %v2869_v41  ;;  %v2608_v47 = vadd.f32 %v2607_v40, %v1600_v45  ;;  %v2870_v48 = vmul.f32 %v1600_v45, %v1600_v45  ;;  %v5609_v49 = vpack.c.bf16 %v1600_v45, %v1597_v37  ;;  %v6846_v40 = vld [vmem:[%s6982_s20 + $0x1f8] sm:$0xff]  }
  0xfc   : > { %6238 = vst [vmem:[%s7150_s26 + $0x18] sm:$0xff] %v5614_v44   ;;  %6610 = vmatmul.mubr.msk.bf16.gmra.mrb[112].mxu0 %vm1162_vm0, %v6840_v38  ;;  %v6878_v38 = vld [vmem:[%s6982_s20 + $0x2f8] sm:$0xff]  }
  0xfd   : > { %v2609_v51 = vadd.f32 %v6503_v35, %v2608_v47  ;;  %v3125_v52 = vadd.f32 %v3124_v46, %v2870_v48  ;;  %6237 = vst [vmem:[%s7150_s26 + $0x10] sm:$0xff] %v5609_v49   ;;  %6613 = vmatprep.mubr.msk.bf16.mxu0 %vm1162_vm0, %v6841_v43 }
  0xfe   : > { %6686 = vmatmul.mubr.msk.bf16.gmra.mrb[60].mxu1 %vm1162_vm0, %v6878_v38 }
  0xff   : > { %v2610_v55 = vadd.f32 %v6504_v42, %v2609_v51  ;;  %v3126_v56 = vadd.f32 %v3125_v52, %v2871_v50  ;;  %v6507_v57 = vpop.f32.mrb[8].mxu0 }
 0x100   : > { %v1613_v59 = vpop.f32.mrb[9].mxu0  ;;  %v2875_v8 = vmul.f32 %v6507_v57, %v6507_v57 }
 0x101   : > { %v3127_v61 = vadd.f32 %v3126_v56, %v2872_v54  ;;  %v2611_v62 = vadd.f32 %v2610_v55, %v1613_v59  ;;  %v2873_v63 = vmul.f32 %v1613_v59, %v1613_v59  ;;  %v6508_v0 = vpop.f32.mrb[10].mxu0  ;;  %v6879_v54 = vld [vmem:[%s6982_s20 + $0x300] sm:$0xff]  }
 0x102   : > { %v5624_v2 = vpack.c.bf16 %v6508_v0, %v6507_v57  ;;  %v1616_v3 = vpop.f32.mrb[11].mxu0  ;;  %v2876_v12 = vmul.f32 %v6508_v0, %v6508_v0  ;;  %6689 = vmatprep.mubr.msk.bf16.mxu1 %vm1162_vm0, %v6879_v54 }
 0x103   : > { %v3128_v4 = vadd.f32 %v3127_v61, %v2873_v63  ;;  %v2612_v5 = vadd.f32 %v2611_v62, %v1616_v3  ;;  %v2874_v6 = vmul.f32 %v1616_v3, %v1616_v3  ;;  %v5619_v7 = vpack.c.bf16 %v1616_v3, %v1613_v59  ;;  %v6880_v59 = vld [vmem:[%s6982_s20 + $0x308] sm:$0xff]  }
 0x104   : > { %6240 = vst [vmem:[%s7150_s26 + $0x28] sm:$0xff] %v5624_v2   ;;  %6614 = vmatmul.mubr.msk.bf16.gmra.mrb[116].mxu0 %vm1162_vm0, %v6842_v60 }
 0x105   : > { %v2613_v9 = vadd.f32 %v6507_v57, %v2612_v5  ;;  %v3129_v10 = vadd.f32 %v3128_v4, %v2874_v6  ;;  %6239 = vst [vmem:[%s7150_s26 + $0x20] sm:$0xff] %v5619_v7   ;;  %6617 = vmatprep.mubr.msk.bf16.mxu0 %vm1162_vm0, %v6843_v1 }
 0x106   : > { %6690 = vmatmul.mubr.msk.bf16.gmra.mrb[64].mxu1 %vm1162_vm0, %v6880_v59 }
 0x107   : > { %v2614_v13 = vadd.f32 %v6508_v0, %v2613_v9  ;;  %v3130_v14 = vadd.f32 %v3129_v10, %v2875_v8  ;;  %v6511_v15 = vpop.f32.mrb[12].mxu0  ;;  %v6881_v10 = vld [vmem:[%s6982_s20 + $0x310] sm:$0xff]  }
 0x108   : > { %v1629_v17 = vpop.f32.mrb[13].mxu0  ;;  %v2879_v30 = vmul.f32 %v6511_v15, %v6511_v15  ;;  %6693 = vmatprep.mubr.msk.bf16.mxu1 %vm1162_vm0, %v6881_v10 }
 0x109   : > { %v3131_v19 = vadd.f32 %v3130_v14, %v2876_v12  ;;  %v2615_v20 = vadd.f32 %v2614_v13, %v1629_v17  ;;  %v2877_v21 = vmul.f32 %v1629_v17, %v1629_v17  ;;  %v6512_v22 = vpop.f32.mrb[14].mxu0 }
 0x10a   : > { %v5634_v24 = vpack.c.bf16 %v6512_v22, %v6511_v15  ;;  %v1632_v25 = vpop.f32.mrb[15].mxu0  ;;  %v2880_v34 = vmul.f32 %v6512_v22, %v6512_v22 }
 0x10b   : > { %v3132_v26 = vadd.f32 %v3131_v19, %v2877_v21  ;;  %v2616_v27 = vadd.f32 %v2615_v20, %v1632_v25  ;;  %v2878_v28 = vmul.f32 %v1632_v25, %v1632_v25  ;;  %v5629_v29 = vpack.c.bf16 %v1632_v25, %v1629_v17 }
 0x10c   : > { %6242 = vst [vmem:[%s7150_s26 + $0x38] sm:$0xff] %v5634_v24   ;;  %6618 = vmatmul.mubr.msk.bf16.gmra.mrb[120].mxu0 %vm1162_vm0, %v6844_v18 }
 0x10d   : > { %v2617_v31 = vadd.f32 %v6511_v15, %v2616_v27  ;;  %v3133_v32 = vadd.f32 %v3132_v26, %v2878_v28  ;;  %6241 = vst [vmem:[%s7150_s26 + $0x30] sm:$0xff] %v5629_v29   ;;  %6621 = vmatprep.mubr.msk.bf16.mxu0 %vm1162_vm0, %v6845_v23  ;;  %v6882_v15 = vld [vmem:[%s6982_s20 + $0x318] sm:$0xff]  }
 0x10e   : > { %6694 = vmatmul.mubr.msk.bf16.gmra.mrb[68].mxu1 %vm1162_vm0, %v6882_v15 }
 0x10f   : > { %v2618_v35 = vadd.f32 %v6512_v22, %v2617_v31  ;;  %v3134_v36 = vadd.f32 %v3133_v32, %v2879_v30  ;;  %v6515_v37 = vpop.f32.mrb[16].mxu0  ;;  %v6883_v30 = vld [vmem:[%s6982_s20 + $0x320] sm:$0xff]  }
 0x110   : > { %v1645_v39 = vpop.f32.mrb[17].mxu0  ;;  %v2883_v51 = vmul.f32 %v6515_v37, %v6515_v37  ;;  %6697 = vmatprep.mubr.msk.bf16.mxu1 %vm1162_vm0, %v6883_v30 }
 0x111   : > { %v3135_v41 = vadd.f32 %v3134_v36, %v2880_v34  ;;  %v2619_v42 = vadd.f32 %v2618_v35, %v1645_v39  ;;  %v2881_v43 = vmul.f32 %v1645_v39, %v1645_v39  ;;  %v6516_v44 = vpop.f32.mrb[18].mxu0  ;;  %v6884_v35 = vld [vmem:[%s6982_s20 + $0x328] sm:$0xff]  }
 0x112   : > { %v5644_v45 = vpack.c.bf16 %v6516_v44, %v6515_v37  ;;  %v1648_v46 = vpop.f32.mrb[19].mxu0  ;;  %v2884_v55 = vmul.f32 %v6516_v44, %v6516_v44 }
 0x113   : > { %v3136_v47 = vadd.f32 %v3135_v41, %v2881_v43  ;;  %v2620_v48 = vadd.f32 %v2619_v42, %v1648_v46  ;;  %v2882_v49 = vmul.f32 %v1648_v46, %v1648_v46  ;;  %v5639_v50 = vpack.c.bf16 %v1648_v46, %v1645_v39 }
 0x114   : > { %6244 = vst [vmem:[%s7150_s26 + $0x48] sm:$0xff] %v5644_v45   ;;  %6622 = vmatmul.mubr.msk.bf16.gmra.mrb[124].mxu0 %vm1162_vm0, %v6846_v40 }
 0x115   : > { %v2621_v52 = vadd.f32 %v6515_v37, %v2620_v48  ;;  %v3137_v53 = vadd.f32 %v3136_v47, %v2882_v49  ;;  %6243 = vst [vmem:[%s7150_s26 + $0x40] sm:$0xff] %v5639_v50   ;;  %v6885_v50 = vld [vmem:[%s6982_s20 + $0x330] sm:$0xff]  }
 0x116   : > { %6698 = vmatmul.mubr.msk.bf16.gmra.mrb[72].mxu1 %vm1162_vm0, %v6884_v35 }
 0x117   : > { %v2622_v56 = vadd.f32 %v6516_v44, %v2621_v52  ;;  %v3138_v57 = vadd.f32 %v3137_v53, %v2883_v51  ;;  %v6519_v58 = vpop.f32.mrb[20].mxu0  ;;  %6701 = vmatprep.mubr.msk.bf16.mxu1 %vm1162_vm0, %v6885_v50 }
 0x118   : > { %v1661_v60 = vpop.f32.mrb[21].mxu0  ;;  %v2887_v7 = vmul.f32 %v6519_v58, %v6519_v58 }
 0x119   : > { %v3139_v61 = vadd.f32 %v3138_v57, %v2884_v55  ;;  %v2623_v62 = vadd.f32 %v2622_v56, %v1661_v60  ;;  %v2885_v63 = vmul.f32 %v1661_v60, %v1661_v60  ;;  %v6520_v0 = vpop.f32.mrb[22].mxu0  ;;  %v6886_v55 = vld [vmem:[%s6982_s20 + $0x338] sm:$0xff]  }
 0x11a   : > { %v5654_v1 = vpack.c.bf16 %v6520_v0, %v6519_v58  ;;  %v1664_v2 = vpop.f32.mrb[23].mxu0  ;;  %v2888_v11 = vmul.f32 %v6520_v0, %v6520_v0 }
 0x11b   : > { %v3140_v3 = vadd.f32 %v3139_v61, %v2885_v63  ;;  %v2624_v4 = vadd.f32 %v2623_v62, %v1664_v2  ;;  %v2886_v5 = vmul.f32 %v1664_v2, %v1664_v2  ;;  %v5649_v6 = vpack.c.bf16 %v1664_v2, %v1661_v60 }
 0x11c   : > { %6246 = vst [vmem:[%s7150_s26 + $0x58] sm:$0xff] %v5654_v1  }
 0x11d   : > { %v2625_v8 = vadd.f32 %v6519_v58, %v2624_v4  ;;  %v3141_v9 = vadd.f32 %v3140_v3, %v2886_v5  ;;  %6245 = vst [vmem:[%s7150_s26 + $0x50] sm:$0xff] %v5649_v6   ;;  %v6887_v6 = vld [vmem:[%s6982_s20 + $0x340] sm:$0xff]  }
 0x11e   : > { %6702 = vmatmul.mubr.msk.bf16.gmra.mrb[76].mxu1 %vm1162_vm0, %v6886_v55 }
 0x11f   : > { %v2626_v12 = vadd.f32 %v6520_v0, %v2625_v8  ;;  %v3142_v13 = vadd.f32 %v3141_v9, %v2887_v7  ;;  %v6523_v14 = vpop.f32.mrb[24].mxu0  ;;  %6705 = vmatprep.mubr.msk.bf16.mxu1 %vm1162_vm0, %v6887_v6 }
 0x120   : > { %v1677_v16 = vpop.f32.mrb[25].mxu0  ;;  %v2891_v27 = vmul.f32 %v6523_v14, %v6523_v14 }
 0x121   : > { %v3143_v17 = vadd.f32 %v3142_v13, %v2888_v11  ;;  %v2627_v18 = vadd.f32 %v2626_v12, %v1677_v16  ;;  %v2889_v19 = vmul.f32 %v1677_v16, %v1677_v16  ;;  %v6524_v20 = vpop.f32.mrb[26].mxu0  ;;  %v6888_v11 = vld [vmem:[%s6982_s20 + $0x348] sm:$0xff]  }
 0x122   : > { %v5664_v21 = vpack.c.bf16 %v6524_v20, %v6523_v14  ;;  %v1680_v22 = vpop.f32.mrb[27].mxu0  ;;  %v2892_v31 = vmul.f32 %v6524_v20, %v6524_v20 }
 0x123   : > { %v3144_v23 = vadd.f32 %v3143_v17, %v2889_v19  ;;  %v2628_v24 = vadd.f32 %v2627_v18, %v1680_v22  ;;  %v2890_v25 = vmul.f32 %v1680_v22, %v1680_v22  ;;  %v5659_v26 = vpack.c.bf16 %v1680_v22, %v1677_v16 }
 0x124   : > { %6248 = vst [vmem:[%s7150_s26 + $0x68] sm:$0xff] %v5664_v21  }
 0x125   : > { %v2629_v28 = vadd.f32 %v6523_v14, %v2628_v24  ;;  %v3145_v29 = vadd.f32 %v3144_v23, %v2890_v25  ;;  %6247 = vst [vmem:[%s7150_s26 + $0x60] sm:$0xff] %v5659_v26   ;;  %v6889_v26 = vld [vmem:[%s6982_s20 + $0x350] sm:$0xff]  }
 0x126   : > { %6706 = vmatmul.mubr.msk.bf16.gmra.mrb[80].mxu1 %vm1162_vm0, %v6888_v11 }
 0x127   : > { %v2630_v32 = vadd.f32 %v6524_v20, %v2629_v28  ;;  %v3146_v33 = vadd.f32 %v3145_v29, %v2891_v27  ;;  %v6527_v34 = vpop.f32.mrb[28].mxu0  ;;  %6709 = vmatprep.mubr.msk.bf16.mxu1 %vm1162_vm0, %v6889_v26 }
 0x128   : > { %v1693_v36 = vpop.f32.mrb[29].mxu0  ;;  %v2895_v47 = vmul.f32 %v6527_v34, %v6527_v34 }
 0x129   : > { %v3147_v37 = vadd.f32 %v3146_v33, %v2892_v31  ;;  %v2631_v38 = vadd.f32 %v2630_v32, %v1693_v36  ;;  %v2893_v39 = vmul.f32 %v1693_v36, %v1693_v36  ;;  %v6528_v40 = vpop.f32.mrb[30].mxu0  ;;  %v6890_v31 = vld [vmem:[%s6982_s20 + $0x358] sm:$0xff]  }
 0x12a   : > { %v5674_v41 = vpack.c.bf16 %v6528_v40, %v6527_v34  ;;  %v1696_v42 = vpop.f32.mrb[31].mxu0  ;;  %v2896_v51 = vmul.f32 %v6528_v40, %v6528_v40 }
 0x12b   : > { %v3148_v43 = vadd.f32 %v3147_v37, %v2893_v39  ;;  %v2632_v44 = vadd.f32 %v2631_v38, %v1696_v42  ;;  %v2894_v45 = vmul.f32 %v1696_v42, %v1696_v42  ;;  %v5669_v46 = vpack.c.bf16 %v1696_v42, %v1693_v36 }
 0x12c   : > { %6250 = vst [vmem:[%s7150_s26 + $0x78] sm:$0xff] %v5674_v41  }
 0x12d   : > { %v2633_v48 = vadd.f32 %v6527_v34, %v2632_v44  ;;  %v3149_v49 = vadd.f32 %v3148_v43, %v2894_v45  ;;  %6249 = vst [vmem:[%s7150_s26 + $0x70] sm:$0xff] %v5669_v46   ;;  %v6891_v46 = vld [vmem:[%s6982_s20 + $0x360] sm:$0xff]  }
 0x12e   : > { %6710 = vmatmul.mubr.msk.bf16.gmra.mrb[84].mxu1 %vm1162_vm0, %v6890_v31 }
 0x12f   : > { %v2634_v52 = vadd.f32 %v6528_v40, %v2633_v48  ;;  %v3150_v53 = vadd.f32 %v3149_v49, %v2895_v47  ;;  %v6531_v54 = vpop.f32.mrb[32].mxu0  ;;  %6713 = vmatprep.mubr.msk.bf16.mxu1 %vm1162_vm0, %v6891_v46 }
 0x130   : > { %v1709_v56 = vpop.f32.mrb[33].mxu0  ;;  %v2899_v3 = vmul.f32 %v6531_v54, %v6531_v54 }
 0x131   : > { %v3151_v57 = vadd.f32 %v3150_v53, %v2896_v51  ;;  %v2635_v58 = vadd.f32 %v2634_v52, %v1709_v56  ;;  %v2897_v59 = vmul.f32 %v1709_v56, %v1709_v56  ;;  %v6532_v60 = vpop.f32.mrb[34].mxu0  ;;  %v6892_v51 = vld [vmem:[%s6982_s20 + $0x368] sm:$0xff]  }
 0x132   : > { %v5684_v61 = vpack.c.bf16 %v6532_v60, %v6531_v54  ;;  %v1712_v62 = vpop.f32.mrb[35].mxu0  ;;  %v2900_v7 = vmul.f32 %v6532_v60, %v6532_v60 }
 0x133   : > { %v3152_v63 = vadd.f32 %v3151_v57, %v2897_v59  ;;  %v2636_v0 = vadd.f32 %v2635_v58, %v1712_v62  ;;  %v2898_v1 = vmul.f32 %v1712_v62, %v1712_v62  ;;  %v5679_v2 = vpack.c.bf16 %v1712_v62, %v1709_v56 }
 0x134   : > { %6252 = vst [vmem:[%s7150_s26 + $0x88] sm:$0xff] %v5684_v61  }
 0x135   : > { %v2637_v4 = vadd.f32 %v6531_v54, %v2636_v0  ;;  %v3153_v5 = vadd.f32 %v3152_v63, %v2898_v1  ;;  %6251 = vst [vmem:[%s7150_s26 + $0x80] sm:$0xff] %v5679_v2   ;;  %v6893_v2 = vld [vmem:[%s6982_s20 + $0x370] sm:$0xff]  }
 0x136   : > { %6714 = vmatmul.mubr.msk.bf16.gmra.mrb[88].mxu1 %vm1162_vm0, %v6892_v51 }
 0x137   : > { %v2638_v8 = vadd.f32 %v6532_v60, %v2637_v4  ;;  %v3154_v9 = vadd.f32 %v3153_v5, %v2899_v3  ;;  %v6535_v10 = vpop.f32.mrb[36].mxu0  ;;  %6717 = vmatprep.mubr.msk.bf16.mxu1 %vm1162_vm0, %v6893_v2 }
 0x138   : > { %v1725_v12 = vpop.f32.mrb[37].mxu0  ;;  %v2903_v23 = vmul.f32 %v6535_v10, %v6535_v10 }
 0x139   : > { %v3155_v13 = vadd.f32 %v3154_v9, %v2900_v7  ;;  %v2639_v14 = vadd.f32 %v2638_v8, %v1725_v12  ;;  %v2901_v15 = vmul.f32 %v1725_v12, %v1725_v12  ;;  %v6536_v16 = vpop.f32.mrb[38].mxu0  ;;  %v6894_v7 = vld [vmem:[%s6982_s20 + $0x378] sm:$0xff]  }
 0x13a   : > { %v5694_v17 = vpack.c.bf16 %v6536_v16, %v6535_v10  ;;  %v1728_v18 = vpop.f32.mrb[39].mxu0  ;;  %v2904_v27 = vmul.f32 %v6536_v16, %v6536_v16 }
 0x13b   : > { %v3156_v19 = vadd.f32 %v3155_v13, %v2901_v15  ;;  %v2640_v20 = vadd.f32 %v2639_v14, %v1728_v18  ;;  %v2902_v21 = vmul.f32 %v1728_v18, %v1728_v18  ;;  %v5689_v22 = vpack.c.bf16 %v1728_v18, %v1725_v12 }
 0x13c   : > { %6254 = vst [vmem:[%s7150_s26 + $0x98] sm:$0xff] %v5694_v17  }
 0x13d   : > { %v2641_v24 = vadd.f32 %v6535_v10, %v2640_v20  ;;  %v3157_v25 = vadd.f32 %v3156_v19, %v2902_v21  ;;  %6253 = vst [vmem:[%s7150_s26 + $0x90] sm:$0xff] %v5689_v22   ;;  %v6895_v22 = vld [vmem:[%s6982_s20 + $0x380] sm:$0xff]  }
 0x13e   : > { %6718 = vmatmul.mubr.msk.bf16.gmra.mrb[92].mxu1 %vm1162_vm0, %v6894_v7 }
 0x13f   : > { %v2642_v28 = vadd.f32 %v6536_v16, %v2641_v24  ;;  %v3158_v29 = vadd.f32 %v3157_v25, %v2903_v23  ;;  %v6539_v30 = vpop.f32.mrb[40].mxu0  ;;  %6721 = vmatprep.mubr.msk.bf16.mxu1 %vm1162_vm0, %v6895_v22 }
 0x140   : > { %v1741_v32 = vpop.f32.mrb[41].mxu0  ;;  %v2907_v43 = vmul.f32 %v6539_v30, %v6539_v30 }
 0x141   : > { %v3159_v33 = vadd.f32 %v3158_v29, %v2904_v27  ;;  %v2643_v34 = vadd.f32 %v2642_v28, %v1741_v32  ;;  %v2905_v35 = vmul.f32 %v1741_v32, %v1741_v32  ;;  %v6540_v36 = vpop.f32.mrb[42].mxu0  ;;  %v6896_v27 = vld [vmem:[%s6982_s20 + $0x388] sm:$0xff]  }
 0x142   : > { %v5704_v37 = vpack.c.bf16 %v6540_v36, %v6539_v30  ;;  %v1744_v38 = vpop.f32.mrb[43].mxu0  ;;  %v2908_v47 = vmul.f32 %v6540_v36, %v6540_v36 }
 0x143   : > { %v3160_v39 = vadd.f32 %v3159_v33, %v2905_v35  ;;  %v2644_v40 = vadd.f32 %v2643_v34, %v1744_v38  ;;  %v2906_v41 = vmul.f32 %v1744_v38, %v1744_v38  ;;  %v5699_v42 = vpack.c.bf16 %v1744_v38, %v1741_v32 }
 0x144   : > { %6256 = vst [vmem:[%s7150_s26 + $0xa8] sm:$0xff] %v5704_v37  }
 0x145   : > { %v2645_v44 = vadd.f32 %v6539_v30, %v2644_v40  ;;  %v3161_v45 = vadd.f32 %v3160_v39, %v2906_v41  ;;  %6255 = vst [vmem:[%s7150_s26 + $0xa0] sm:$0xff] %v5699_v42   ;;  %v6897_v42 = vld [vmem:[%s6982_s20 + $0x390] sm:$0xff]  }
 0x146   : > { %6722 = vmatmul.mubr.msk.bf16.gmra.mrb[96].mxu1 %vm1162_vm0, %v6896_v27  ;;  %v6902_v27 = vld [vmem:[%s6982_s20 + $0x3b8] sm:$0xff]  }
 0x147   : > { %v2646_v48 = vadd.f32 %v6540_v36, %v2645_v44  ;;  %v3162_v49 = vadd.f32 %v3161_v45, %v2907_v43  ;;  %v6543_v50 = vpop.f32.mrb[44].mxu0  ;;  %6725 = vmatprep.mubr.msk.bf16.mxu1 %vm1162_vm0, %v6897_v42 }
 0x148   : > { %v1757_v52 = vpop.f32.mrb[45].mxu0  ;;  %v2911_v63 = vmul.f32 %v6543_v50, %v6543_v50 }
 0x149   : > { %v3163_v53 = vadd.f32 %v3162_v49, %v2908_v47  ;;  %v2647_v54 = vadd.f32 %v2646_v48, %v1757_v52  ;;  %v2909_v55 = vmul.f32 %v1757_v52, %v1757_v52  ;;  %v6544_v56 = vpop.f32.mrb[46].mxu0  ;;  %v6898_v47 = vld [vmem:[%s6982_s20 + $0x398] sm:$0xff]  }
 0x14a   : > { %v5714_v57 = vpack.c.bf16 %v6544_v56, %v6543_v50  ;;  %v1760_v58 = vpop.f32.mrb[47].mxu0  ;;  %v2912_v3 = vmul.f32 %v6544_v56, %v6544_v56 }
 0x14b   : > { %v3164_v59 = vadd.f32 %v3163_v53, %v2909_v55  ;;  %v2648_v60 = vadd.f32 %v2647_v54, %v1760_v58  ;;  %v2910_v61 = vmul.f32 %v1760_v58, %v1760_v58  ;;  %v5709_v62 = vpack.c.bf16 %v1760_v58, %v1757_v52 }
 0x14c   : > { %6258 = vst [vmem:[%s7150_s26 + $0xb8] sm:$0xff] %v5714_v57  }
 0x14d   : > { %v2649_v0 = vadd.f32 %v6543_v50, %v2648_v60  ;;  %v3165_v1 = vadd.f32 %v3164_v59, %v2910_v61  ;;  %6257 = vst [vmem:[%s7150_s26 + $0xb0] sm:$0xff] %v5709_v62   ;;  %v6899_v62 = vld [vmem:[%s6982_s20 + $0x3a0] sm:$0xff]  }
 0x14e   : > { %6726 = vmatmul.mubr.msk.bf16.gmra.mrb[100].mxu1 %vm1162_vm0, %v6898_v47  ;;  %v6903_v47 = vld [vmem:[%s6982_s20 + $0x3c0] sm:$0xff]  }
 0x14f   : > { %v2650_v4 = vadd.f32 %v6544_v56, %v2649_v0  ;;  %v3166_v5 = vadd.f32 %v3165_v1, %v2911_v63  ;;  %v6547_v6 = vpop.f32.mrb[48].mxu0  ;;  %6729 = vmatprep.mubr.msk.bf16.mxu1 %vm1162_vm0, %v6899_v62 }
 0x150   : > { %v1773_v8 = vpop.f32.mrb[49].mxu0  ;;  %v2915_v19 = vmul.f32 %v6547_v6, %v6547_v6 }
 0x151   : > { %v3167_v9 = vadd.f32 %v3166_v5, %v2912_v3  ;;  %v2651_v10 = vadd.f32 %v2650_v4, %v1773_v8  ;;  %v2913_v11 = vmul.f32 %v1773_v8, %v1773_v8  ;;  %v6548_v12 = vpop.f32.mrb[50].mxu0  ;;  %v6900_v3 = vld [vmem:[%s6982_s20 + $0x3a8] sm:$0xff]  }
 0x152   : > { %v5724_v13 = vpack.c.bf16 %v6548_v12, %v6547_v6  ;;  %v1776_v14 = vpop.f32.mrb[51].mxu0  ;;  %v2916_v23 = vmul.f32 %v6548_v12, %v6548_v12 }
 0x153   : > { %v3168_v15 = vadd.f32 %v3167_v9, %v2913_v11  ;;  %v2652_v16 = vadd.f32 %v2651_v10, %v1776_v14  ;;  %v2914_v17 = vmul.f32 %v1776_v14, %v1776_v14  ;;  %v5719_v18 = vpack.c.bf16 %v1776_v14, %v1773_v8 }
 0x154   : > { %6260 = vst [vmem:[%s7150_s26 + $0xc8] sm:$0xff] %v5724_v13  }
 0x155   : > { %v2653_v20 = vadd.f32 %v6547_v6, %v2652_v16  ;;  %v3169_v21 = vadd.f32 %v3168_v15, %v2914_v17  ;;  %6259 = vst [vmem:[%s7150_s26 + $0xc0] sm:$0xff] %v5719_v18   ;;  %v7261_v15 = vpop.f32.mrb[0].mxu1 }
 0x156   : > { %6730 = vmatmul.mubr.msk.bf16.gmra.mrb[104].mxu1 %vm1162_vm0, %v6900_v3 }
 0x157   : > { %v2654_v24 = vadd.f32 %v6548_v12, %v2653_v20  ;;  %v3170_v25 = vadd.f32 %v3169_v21, %v2915_v19  ;;  %v6551_v26 = vpop.f32.mrb[52].mxu0  ;;  %v7264_v19 = vpop.f32.mrb[1].mxu1  ;;  %v6901_v21 = vld [vmem:[%s6982_s20 + $0x3b0] sm:$0xff]  }
 0x158   : > { %v1789_v28 = vpop.f32.mrb[53].mxu0  ;;  %v2919_v39 = vmul.f32 %v6551_v26, %v6551_v26  ;;  %v7266_v20 = vpop.f32.mrb[2].mxu1  ;;  %6733 = vmatprep.mubr.msk.bf16.mxu1 %vm1162_vm0, %v6901_v21 }
 0x159   : > { %v3171_v29 = vadd.f32 %v3170_v25, %v2916_v23  ;;  %v2655_v30 = vadd.f32 %v2654_v24, %v1789_v28  ;;  %v2917_v31 = vmul.f32 %v1789_v28, %v1789_v28  ;;  %v6552_v32 = vpop.f32.mrb[54].mxu0 }
 0x15a   : > { %v5734_v33 = vpack.c.bf16 %v6552_v32, %v6551_v26  ;;  %v1792_v34 = vpop.f32.mrb[55].mxu0  ;;  %v2920_v43 = vmul.f32 %v6552_v32, %v6552_v32 }
 0x15b   : > { %v3172_v35 = vadd.f32 %v3171_v29, %v2917_v31  ;;  %v2656_v36 = vadd.f32 %v2655_v30, %v1792_v34  ;;  %v2918_v37 = vmul.f32 %v1792_v34, %v1792_v34  ;;  %v5729_v38 = vpack.c.bf16 %v1792_v34, %v1789_v28 }
 0x15c   : > { %6262 = vst [vmem:[%s7150_s26 + $0xd8] sm:$0xff] %v5734_v33   ;;  %v5924_v33 = vpack.c.bf16 %v7266_v20, %v7261_v15 }
 0x15d   : > { %v2657_v40 = vadd.f32 %v6551_v26, %v2656_v36  ;;  %v3173_v41 = vadd.f32 %v3172_v35, %v2918_v37  ;;  %6261 = vst [vmem:[%s7150_s26 + $0xd0] sm:$0xff] %v5729_v38   ;;  %v7269_v26 = vpop.f32.mrb[3].mxu1 }
 0x15e   : > { %6734 = vmatmul.mubr.msk.bf16.gmra.mrb[108].mxu1 %vm1162_vm0, %v6902_v27  ;;  %v5919_v36 = vpack.c.bf16 %v7269_v26, %v7264_v19  ;;  %6300 = vst [vmem:[%s7150_s26 + $0x208] sm:$0xff] %v5924_v33  }
 0x15f   : > { %v2658_v44 = vadd.f32 %v6552_v32, %v2657_v40  ;;  %v3174_v45 = vadd.f32 %v3173_v41, %v2919_v39  ;;  %v6555_v46 = vpop.f32.mrb[56].mxu0  ;;  %v7281_v41 = vpop.f32.mrb[4].mxu1  ;;  %6737 = vmatprep.mubr.msk.bf16.mxu1 %vm1162_vm0, %v6903_v47 }
 0x160   : > { %v1805_v48 = vpop.f32.mrb[57].mxu0  ;;  %v2923_v59 = vmul.f32 %v6555_v46, %v6555_v46  ;;  %6299 = vst [vmem:[%s7150_s26 + $0x200] sm:$0xff] %v5919_v36  }
 0x161   : > { %v3175_v49 = vadd.f32 %v3174_v45, %v2920_v43  ;;  %v2659_v50 = vadd.f32 %v2658_v44, %v1805_v48  ;;  %v2921_v51 = vmul.f32 %v1805_v48, %v1805_v48  ;;  %v6556_v52 = vpop.f32.mrb[58].mxu0  ;;  %v7284_v45 = vpop.f32.mrb[5].mxu1 }
 0x162   : > { %v5744_v53 = vpack.c.bf16 %v6556_v52, %v6555_v46  ;;  %v1808_v54 = vpop.f32.mrb[59].mxu0  ;;  %v2924_v63 = vmul.f32 %v6556_v52, %v6556_v52 }
 0x163   : > { %v3176_v55 = vadd.f32 %v3175_v49, %v2921_v51  ;;  %v2660_v56 = vadd.f32 %v2659_v50, %v1808_v54  ;;  %v2922_v57 = vmul.f32 %v1808_v54, %v1808_v54  ;;  %v5739_v58 = vpack.c.bf16 %v1808_v54, %v1805_v48 }
 0x164   : > { %6264 = vst [vmem:[%s7150_s26 + $0xe8] sm:$0xff] %v5744_v53   ;;  %v6904_v53 = vld [vmem:[%s6982_s20 + $0x3c8] sm:$0xff]  }
 0x165   : > { %v2661_v60 = vadd.f32 %v6555_v46, %v2660_v56  ;;  %v3177_v61 = vadd.f32 %v3176_v55, %v2922_v57  ;;  %6263 = vst [vmem:[%s7150_s26 + $0xe0] sm:$0xff] %v5739_v58   ;;  %v7286_v46 = vpop.f32.mrb[6].mxu1 }
 0x166   : > { %6738 = vmatmul.mubr.msk.bf16.gmra.mrb[112].mxu1 %vm1162_vm0, %v6904_v53 }
 0x167   : > { %v2662_v0 = vadd.f32 %v6556_v52, %v2661_v60  ;;  %v3178_v1 = vadd.f32 %v3177_v61, %v2923_v59  ;;  %v6559_v2 = vpop.f32.mrb[60].mxu0  ;;  %v7289_v52 = vpop.f32.mrb[7].mxu1  ;;  %v5934_v59 = vpack.c.bf16 %v7286_v46, %v7281_v41 }
 0x168   : > { %v1821_v4 = vpop.f32.mrb[61].mxu0  ;;  %v2927_v16 = vmul.f32 %v6559_v2, %v6559_v2  ;;  %v5929_v62 = vpack.c.bf16 %v7289_v52, %v7284_v45  ;;  %v7301_v3 = vpop.f32.mrb[8].mxu1 }
 0x169   : > { %v3179_v5 = vadd.f32 %v3178_v1, %v2924_v63  ;;  %v2663_v6 = vadd.f32 %v2662_v0, %v1821_v4  ;;  %v2925_v7 = vmul.f32 %v1821_v4, %v1821_v4  ;;  %v6560_v8 = vpop.f32.mrb[62].mxu0  ;;  %6302 = vst [vmem:[%s7150_s26 + $0x218] sm:$0xff] %v5934_v59  }
 0x16a   : > { %v5754_v9 = vpack.c.bf16 %v6560_v8, %v6559_v2  ;;  %v1824_v10 = vpop.f32.mrb[63].mxu0  ;;  %v2928_v22 = vmul.f32 %v6560_v8, %v6560_v8  ;;  %6301 = vst [vmem:[%s7150_s26 + $0x210] sm:$0xff] %v5929_v62  }
 0x16b   : > { %v3180_v11 = vadd.f32 %v3179_v5, %v2925_v7  ;;  %v2664_v12 = vadd.f32 %v2663_v6, %v1824_v10  ;;  %v2926_v13 = vmul.f32 %v1824_v10, %v1824_v10  ;;  %v5749_v14 = vpack.c.bf16 %v1824_v10, %v1821_v4  ;;  %v7304_v7 = vpop.f32.mrb[9].mxu1 }
 0x16c   : > { %6266 = vst [vmem:[%s7150_s26 + $0xf8] sm:$0xff] %v5754_v9   ;;  %v6905_v9 = vld [vmem:[%s6982_s20 + $0x3d0] sm:$0xff]  }
 0x16d   : > { %v2665_v17 = vadd.f32 %v6559_v2, %v2664_v12  ;;  %v3181_v18 = vadd.f32 %v3180_v11, %v2926_v13  ;;  %6265 = vst [vmem:[%s7150_s26 + $0xf0] sm:$0xff] %v5749_v14   ;;  %6741 = vmatprep.mubr.msk.bf16.mxu1 %vm1162_vm0, %v6905_v9 }
 0x16f   : > { %v2666_v23 = vadd.f32 %v6560_v8, %v2665_v17  ;;  %v3182_v24 = vadd.f32 %v3181_v18, %v2927_v16  ;;  %v6563_v25 = vpop.f32.mrb[64].mxu0  ;;  %v7306_v8 = vpop.f32.mrb[10].mxu1  ;;  %v6906_v16 = vld [vmem:[%s6982_s20 + $0x3d8] sm:$0xff]  }
 0x170   : > { %v1837_v28 = vpop.f32.mrb[65].mxu0  ;;  %v2931_v42 = vmul.f32 %v6563_v25, %v6563_v25  ;;  %v7309_v14 = vpop.f32.mrb[11].mxu1  ;;  %6742 = vmatmul.mubr.msk.bf16.gmra.mrb[116].mxu1 %vm1162_vm0, %v6906_v16  ;;  %v6910_v16 = vld [vmem:[%s6982_s20 + $0x3f8] sm:$0xff]  }
 0x171   : > { %v3183_v29 = vadd.f32 %v3182_v24, %v2928_v22  ;;  %v2667_v30 = vadd.f32 %v2666_v23, %v1837_v28  ;;  %v2929_v31 = vmul.f32 %v1837_v28, %v1837_v28  ;;  %v6564_v32 = vpop.f32.mrb[66].mxu0  ;;  %v5944_v24 = vpack.c.bf16 %v7306_v8, %v7301_v3  ;;  %v7321_v33 = vpop.f32.mrb[12].mxu1 }
 0x172   : > { %v5764_v34 = vpack.c.bf16 %v6564_v32, %v6563_v25  ;;  %v1840_v35 = vpop.f32.mrb[67].mxu0  ;;  %v2932_v48 = vmul.f32 %v6564_v32, %v6564_v32 }
 0x173   : > { %v3184_v37 = vadd.f32 %v3183_v29, %v2929_v31  ;;  %v2668_v38 = vadd.f32 %v2667_v30, %v1840_v35  ;;  %v2930_v39 = vmul.f32 %v1840_v35, %v1840_v35  ;;  %v5759_v40 = vpack.c.bf16 %v1840_v35, %v1837_v28  ;;  %6304 = vst [vmem:[%s7150_s26 + $0x228] sm:$0xff] %v5944_v24  }
 0x174   : > { %6268 = vst [vmem:[%s7150_s26 + $0x108] sm:$0xff] %v5764_v34   ;;  %v5939_v28 = vpack.c.bf16 %v7309_v14, %v7304_v7 }
 0x175   : > { %v2669_v43 = vadd.f32 %v6563_v25, %v2668_v38  ;;  %v3185_v44 = vadd.f32 %v3184_v37, %v2930_v39  ;;  %6267 = vst [vmem:[%s7150_s26 + $0x100] sm:$0xff] %v5759_v40   ;;  %v7324_v37 = vpop.f32.mrb[13].mxu1  ;;  %v6907_v39 = vld [vmem:[%s6982_s20 + $0x3e0] sm:$0xff]  }
 0x176   : > { %6303 = vst [vmem:[%s7150_s26 + $0x220] sm:$0xff] %v5939_v28   ;;  %v7326_v38 = vpop.f32.mrb[14].mxu1  ;;  %6745 = vmatprep.mubr.msk.bf16.mxu1 %vm1162_vm0, %v6907_v39 }
 0x177   : > { %v3186_v49 = vadd.f32 %v3185_v44, %v2931_v42  ;;  %v6567_v50 = vpop.f32.mrb[68].mxu0  ;;  %v2670_v51 = vadd.f32 %v6564_v32, %v2669_v43  ;;  %v7329_v47 = vpop.f32.mrb[15].mxu1 }
 0x178   : > { %v1853_v54 = vpop.f32.mrb[69].mxu0  ;;  %v2935_v4 = vmul.f32 %v6567_v50, %v6567_v50 }
 0x179   : > { %v2671_v55 = vadd.f32 %v2670_v51, %v1853_v54  ;;  %v2933_v56 = vmul.f32 %v1853_v54, %v1853_v54  ;;  %v3187_v57 = vadd.f32 %v3186_v49, %v2932_v48  ;;  %v6568_v58 = vpop.f32.mrb[70].mxu0  ;;  %v6908_v48 = vld [vmem:[%s6982_s20 + $0x3e8] sm:$0xff]  }
 0x17a   : > { %v5774_v60 = vpack.c.bf16 %v6568_v58, %v6567_v50  ;;  %v1856_v61 = vpop.f32.mrb[71].mxu0  ;;  %v2936_v10 = vmul.f32 %v6568_v58, %v6568_v58  ;;  %6746 = vmatmul.mubr.msk.bf16.gmra.mrb[120].mxu1 %vm1162_vm0, %v6908_v48 }
 0x17b   : > { %v3188_v63 = vadd.f32 %v3187_v57, %v2933_v56  ;;  %v2672_v0 = vadd.f32 %v2671_v55, %v1856_v61  ;;  %v2934_v1 = vmul.f32 %v1856_v61, %v1856_v61  ;;  %v5769_v2 = vpack.c.bf16 %v1856_v61, %v1853_v54 }
 0x17c   : > { %6270 = vst [vmem:[%s7150_s26 + $0x118] sm:$0xff] %v5774_v60   ;;  %v5954_v55 = vpack.c.bf16 %v7326_v38, %v7321_v33 }
 0x17d   : > { %v2673_v5 = vadd.f32 %v6567_v50, %v2672_v0  ;;  %v3189_v6 = vadd.f32 %v3188_v63, %v2934_v1  ;;  %6269 = vst [vmem:[%s7150_s26 + $0x110] sm:$0xff] %v5769_v2   ;;  %v7341_v63 = vpop.f32.mrb[16].mxu1 }
 0x17e   : > { %6306 = vst [vmem:[%s7150_s26 + $0x238] sm:$0xff] %v5954_v55  }
 0x17f   : > { %v3190_v11 = vadd.f32 %v3189_v6, %v2935_v4  ;;  %v6571_v12 = vpop.f32.mrb[72].mxu0  ;;  %v2674_v13 = vadd.f32 %v6568_v58, %v2673_v5  ;;  %v5949_v58 = vpack.c.bf16 %v7329_v47, %v7324_v37  ;;  %v7344_v4 = vpop.f32.mrb[17].mxu1  ;;  %v6909_v6 = vld [vmem:[%s6982_s20 + $0x3f0] sm:$0xff]  }
 0x180   : > { %v1869_v17 = vpop.f32.mrb[73].mxu0  ;;  %v2939_v34 = vmul.f32 %v6571_v12, %v6571_v12  ;;  %v7346_v5 = vpop.f32.mrb[18].mxu1  ;;  %6749 = vmatprep.mubr.msk.bf16.mxu1 %vm1162_vm0, %v6909_v6 }
 0x181   : > { %v2675_v18 = vadd.f32 %v2674_v13, %v1869_v17  ;;  %v2937_v21 = vmul.f32 %v1869_v17, %v1869_v17  ;;  %v3191_v22 = vadd.f32 %v3190_v11, %v2936_v10  ;;  %v6572_v23 = vpop.f32.mrb[74].mxu0  ;;  %6305 = vst [vmem:[%s7150_s26 + $0x230] sm:$0xff] %v5949_v58   ;;  %v7349_v13 = vpop.f32.mrb[19].mxu1  ;;  %v5964_v24 = vpack.c.bf16 %v7346_v5, %v7341_v63 }
 0x182   : > { %v5784_v25 = vpack.c.bf16 %v6572_v23, %v6571_v12  ;;  %v1872_v27 = vpop.f32.mrb[75].mxu0  ;;  %v2940_v40 = vmul.f32 %v6572_v23, %v6572_v23  ;;  %6750 = vmatmul.mubr.msk.bf16.gmra.mrb[124].mxu1 %vm1162_vm0, %v6910_v16  ;;  %v5959_v28 = vpack.c.bf16 %v7349_v13, %v7344_v4 }
 0x183   : > { %v3192_v29 = vadd.f32 %v3191_v22, %v2937_v21  ;;  %v2676_v30 = vadd.f32 %v2675_v18, %v1872_v27  ;;  %v2938_v31 = vmul.f32 %v1872_v27, %v1872_v27  ;;  %v5779_v32 = vpack.c.bf16 %v1872_v27, %v1869_v17  ;;  %6308 = vst [vmem:[%s7150_s26 + $0x248] sm:$0xff] %v5964_v24  }
 0x184   : > { %6272 = vst [vmem:[%s7150_s26 + $0x128] sm:$0xff] %v5784_v25   ;;  %6307 = vst [vmem:[%s7150_s26 + $0x240] sm:$0xff] %v5959_v28  }
 0x185   : > { %v2677_v35 = vadd.f32 %v6571_v12, %v2676_v30  ;;  %v3193_v36 = vadd.f32 %v3192_v29, %v2938_v31  ;;  %6271 = vst [vmem:[%s7150_s26 + $0x120] sm:$0xff] %v5779_v32  }
 0x187   : > { %v3194_v42 = vadd.f32 %v3193_v36, %v2939_v34  ;;  %v6575_v43 = vpop.f32.mrb[76].mxu0  ;;  %v2678_v44 = vadd.f32 %v6572_v23, %v2677_v35  ;;  %v7361_v34 = vpop.f32.mrb[20].mxu1 }
 0x188   : > { %v1885_v49 = vpop.f32.mrb[77].mxu0  ;;  %v2943_v0 = vmul.f32 %v6575_v43, %v6575_v43 }
 0x189   : > { %v2679_v50 = vadd.f32 %v2678_v44, %v1885_v49  ;;  %v2941_v51 = vmul.f32 %v1885_v49, %v1885_v49  ;;  %v3195_v53 = vadd.f32 %v3194_v42, %v2940_v40  ;;  %v6576_v54 = vpop.f32.mrb[78].mxu0  ;;  %v7364_v40 = vpop.f32.mrb[21].mxu1 }
 0x18a   : > { %v5794_v56 = vpack.c.bf16 %v6576_v54, %v6575_v43  ;;  %v1888_v57 = vpop.f32.mrb[79].mxu0  ;;  %v2944_v9 = vmul.f32 %v6576_v54, %v6576_v54  ;;  %v7366_v42 = vpop.f32.mrb[22].mxu1 }
 0x18b   : > { %v3196_v59 = vadd.f32 %v3195_v53, %v2941_v51  ;;  %v2680_v60 = vadd.f32 %v2679_v50, %v1888_v57  ;;  %v2942_v61 = vmul.f32 %v1888_v57, %v1888_v57  ;;  %v5789_v62 = vpack.c.bf16 %v1888_v57, %v1885_v49  ;;  %v7368_v50 = vpop.f32.mrb[23].mxu1 }
 0x18c   : > { %6274 = vst [vmem:[%s7150_s26 + $0x138] sm:$0xff] %v5794_v56   ;;  %v5974_v57 = vpack.c.bf16 %v7366_v42, %v7361_v34 }
 0x18d   : > { %v2681_v1 = vadd.f32 %v6575_v43, %v2680_v60  ;;  %v3197_v2 = vadd.f32 %v3196_v59, %v2942_v61  ;;  %6273 = vst [vmem:[%s7150_s26 + $0x130] sm:$0xff] %v5789_v62   ;;  %v5969_v60 = vpack.c.bf16 %v7368_v50, %v7364_v40 }
 0x18e   : > { %6310 = vst [vmem:[%s7150_s26 + $0x258] sm:$0xff] %v5974_v57  }
 0x18f   : > { %v3198_v10 = vadd.f32 %v3197_v2, %v2943_v0  ;;  %v6579_v11 = vpop.f32.mrb[80].mxu0  ;;  %v2682_v12 = vadd.f32 %v6576_v54, %v2681_v1  ;;  %6309 = vst [vmem:[%s7150_s26 + $0x250] sm:$0xff] %v5969_v60   ;;  %v7377_v2 = vpop.f32.mrb[24].mxu1 }
 0x190   : > { %v1901_v17 = vpop.f32.mrb[81].mxu0  ;;  %v2947_v35 = vmul.f32 %v6579_v11, %v6579_v11 }
 0x191   : > { %v2683_v18 = vadd.f32 %v2682_v12, %v1901_v17  ;;  %v2945_v21 = vmul.f32 %v1901_v17, %v1901_v17  ;;  %v3199_v22 = vadd.f32 %v3198_v10, %v2944_v9  ;;  %v6580_v23 = vpop.f32.mrb[82].mxu0 }
 0x192   : > { %v5804_v25 = vpack.c.bf16 %v6580_v23, %v6579_v11  ;;  %v1904_v27 = vpop.f32.mrb[83].mxu0  ;;  %v2948_v43 = vmul.f32 %v6580_v23, %v6580_v23 }
 0x193   : > { %v3200_v29 = vadd.f32 %v3199_v22, %v2945_v21  ;;  %v2684_v30 = vadd.f32 %v2683_v18, %v1904_v27  ;;  %v2946_v31 = vmul.f32 %v1904_v27, %v1904_v27  ;;  %v5799_v32 = vpack.c.bf16 %v1904_v27, %v1901_v17 }
 0x194   : > { %6276 = vst [vmem:[%s7150_s26 + $0x148] sm:$0xff] %v5804_v25  }
 0x195   : > { %v2685_v36 = vadd.f32 %v6579_v11, %v2684_v30  ;;  %v3201_v39 = vadd.f32 %v3200_v29, %v2946_v31  ;;  %6275 = vst [vmem:[%s7150_s26 + $0x140] sm:$0xff] %v5799_v32   ;;  %v7380_v11 = vpop.f32.mrb[25].mxu1 }
 0x196   : > { %v7382_v12 = vpop.f32.mrb[26].mxu1 }
 0x197   : > { %v3202_v44 = vadd.f32 %v3201_v39, %v2947_v35  ;;  %v6583_v48 = vpop.f32.mrb[84].mxu0  ;;  %v2686_v49 = vadd.f32 %v6580_v23, %v2685_v36  ;;  %v7384_v22 = vpop.f32.mrb[27].mxu1  ;;  %v5984_v29 = vpack.c.bf16 %v7382_v12, %v7377_v2 }
 0x198   : > { %v1917_v51 = vpop.f32.mrb[85].mxu0  ;;  %v2951_v6 = vmul.f32 %v6583_v48, %v6583_v48  ;;  %v5979_v32 = vpack.c.bf16 %v7384_v22, %v7380_v11 }
 0x199   : > { %v2687_v53 = vadd.f32 %v2686_v49, %v1917_v51  ;;  %v2949_v54 = vmul.f32 %v1917_v51, %v1917_v51  ;;  %v3203_v55 = vadd.f32 %v3202_v44, %v2948_v43  ;;  %v6584_v56 = vpop.f32.mrb[86].mxu0  ;;  %6312 = vst [vmem:[%s7150_s26 + $0x268] sm:$0xff] %v5984_v29   ;;  %v7393_v44 = vpop.f32.mrb[28].mxu1 }
 0x19a   : > { %v5814_v58 = vpack.c.bf16 %v6584_v56, %v6583_v48  ;;  %v1920_v59 = vpop.f32.mrb[87].mxu0  ;;  %v2952_v16 = vmul.f32 %v6584_v56, %v6584_v56  ;;  %6311 = vst [vmem:[%s7150_s26 + $0x260] sm:$0xff] %v5979_v32  }
 0x19b   : > { %v3204_v61 = vadd.f32 %v3203_v55, %v2949_v54  ;;  %v2688_v62 = vadd.f32 %v2687_v53, %v1920_v59  ;;  %v2950_v0 = vmul.f32 %v1920_v59, %v1920_v59  ;;  %v5809_v1 = vpack.c.bf16 %v1920_v59, %v1917_v51  ;;  %v7396_v53 = vpop.f32.mrb[29].mxu1 }
 0x19c   : > { %6278 = vst [vmem:[%s7150_s26 + $0x158] sm:$0xff] %v5814_v58   ;;  %v7398_v54 = vpop.f32.mrb[30].mxu1 }
 0x19d   : > { %v2689_v9 = vadd.f32 %v6583_v48, %v2688_v62  ;;  %v3205_v10 = vadd.f32 %v3204_v61, %v2950_v0  ;;  %6277 = vst [vmem:[%s7150_s26 + $0x150] sm:$0xff] %v5809_v1   ;;  %v7400_v59 = vpop.f32.mrb[31].mxu1 }
 0x19f   : > { %v3206_v17 = vadd.f32 %v3205_v10, %v2951_v6  ;;  %v6587_v18 = vpop.f32.mrb[88].mxu0  ;;  %v2690_v21 = vadd.f32 %v6584_v56, %v2689_v9  ;;  %v5994_v6 = vpack.c.bf16 %v7398_v54, %v7393_v44 }
 0x1a0   : > { %v1933_v23 = vpop.f32.mrb[89].mxu0  ;;  %v2955_v48 = vmul.f32 %v6587_v18, %v6587_v18 }
 0x1a1   : > { %v2691_v24 = vadd.f32 %v2690_v21, %v1933_v23  ;;  %v2953_v25 = vmul.f32 %v1933_v23, %v1933_v23  ;;  %v3207_v27 = vadd.f32 %v3206_v17, %v2952_v16  ;;  %v6588_v28 = vpop.f32.mrb[90].mxu0  ;;  %v5989_v16 = vpack.c.bf16 %v7400_v59, %v7396_v53  ;;  %6314 = vst [vmem:[%s7150_s26 + $0x278] sm:$0xff] %v5994_v6  }
 0x1a2   : > { %v5824_v30 = vpack.c.bf16 %v6588_v28, %v6587_v18  ;;  %v1936_v31 = vpop.f32.mrb[91].mxu0  ;;  %v2956_v55 = vmul.f32 %v6588_v28, %v6588_v28 }
 0x1a3   : > { %v3208_v35 = vadd.f32 %v3207_v27, %v2953_v25  ;;  %v2692_v36 = vadd.f32 %v2691_v24, %v1936_v31  ;;  %v2954_v39 = vmul.f32 %v1936_v31, %v1936_v31  ;;  %v5819_v43 = vpack.c.bf16 %v1936_v31, %v1933_v23  ;;  %6313 = vst [vmem:[%s7150_s26 + $0x270] sm:$0xff] %v5989_v16   ;;  %v7409_v24 = vpop.f32.mrb[32].mxu1 }
 0x1a4   : > { %6280 = vst [vmem:[%s7150_s26 + $0x168] sm:$0xff] %v5824_v30   ;;  %v7412_v29 = vpop.f32.mrb[33].mxu1 }
 0x1a5   : > { %v2693_v49 = vadd.f32 %v6587_v18, %v2692_v36  ;;  %v3209_v51 = vadd.f32 %v3208_v35, %v2954_v39  ;;  %6279 = vst [vmem:[%s7150_s26 + $0x160] sm:$0xff] %v5819_v43   ;;  %v7414_v30 = vpop.f32.mrb[34].mxu1 }
 0x1a6   : > { %v7416_v39 = vpop.f32.mrb[35].mxu1 }
 0x1a7   : > { %v3210_v56 = vadd.f32 %v3209_v51, %v2955_v48  ;;  %v6591_v57 = vpop.f32.mrb[92].mxu0  ;;  %v2694_v58 = vadd.f32 %v6588_v28, %v2693_v49  ;;  %v7425_v6 = vpop.f32.mrb[36].mxu1 }
 0x1a8   : > { %v1949_v60 = vpop.f32.mrb[93].mxu0  ;;  %v2959_v25 = vmul.f32 %v6591_v57, %v6591_v57 }
 0x1a9   : > { %v2695_v61 = vadd.f32 %v2694_v58, %v1949_v60  ;;  %v2957_v62 = vmul.f32 %v1949_v60, %v1949_v60  ;;  %v3211_v0 = vadd.f32 %v3210_v56, %v2956_v55  ;;  %v6592_v1 = vpop.f32.mrb[94].mxu0  ;;  %v6004_v56 = vpack.c.bf16 %v7414_v30, %v7409_v24 }
 0x1aa   : > { %v5834_v9 = vpack.c.bf16 %v6592_v1, %v6591_v57  ;;  %v1952_v10 = vpop.f32.mrb[95].mxu0  ;;  %v2960_v31 = vmul.f32 %v6592_v1, %v6592_v1 }
 0x1ab   : > { %v3212_v17 = vadd.f32 %v3211_v0, %v2957_v62  ;;  %v2696_v18 = vadd.f32 %v2695_v61, %v1952_v10  ;;  %v2958_v21 = vmul.f32 %v1952_v10, %v1952_v10  ;;  %v5829_v23 = vpack.c.bf16 %v1952_v10, %v1949_v60  ;;  %6316 = vst [vmem:[%s7150_s26 + $0x288] sm:$0xff] %v6004_v56  }
 0x1ac   : > { %6282 = vst [vmem:[%s7150_s26 + $0x178] sm:$0xff] %v5834_v9   ;;  %v5999_v60 = vpack.c.bf16 %v7416_v39, %v7412_v29 }
 0x1ad   : > { %v2697_v27 = vadd.f32 %v6591_v57, %v2696_v18  ;;  %v3213_v28 = vadd.f32 %v3212_v17, %v2958_v21  ;;  %6281 = vst [vmem:[%s7150_s26 + $0x170] sm:$0xff] %v5829_v23   ;;  %v7428_v17 = vpop.f32.mrb[37].mxu1 }
 0x1ae   : > { %6315 = vst [vmem:[%s7150_s26 + $0x280] sm:$0xff] %v5999_v60   ;;  %v7430_v18 = vpop.f32.mrb[38].mxu1 }
 0x1af   : > { %v3214_v32 = vadd.f32 %v3213_v28, %v2959_v25  ;;  %v6595_v35 = vpop.f32.mrb[96].mxu0  ;;  %v2698_v36 = vadd.f32 %v6592_v1, %v2697_v27  ;;  %v7432_v28 = vpop.f32.mrb[39].mxu1 }
 0x1b0   : > { %v1965_v43 = vpop.f32.mrb[97].mxu0  ;;  %v2963_v9 = vmul.f32 %v6595_v35, %v6595_v35  ;;  %v6009_v56 = vpack.c.bf16 %v7432_v28, %v7428_v17 }
 0x1b1   : > { %v2699_v48 = vadd.f32 %v2698_v36, %v1965_v43  ;;  %v2961_v49 = vmul.f32 %v1965_v43, %v1965_v43  ;;  %v3215_v51 = vadd.f32 %v3214_v32, %v2960_v31  ;;  %v6596_v55 = vpop.f32.mrb[98].mxu0 }
 0x1b2   : > { %v5844_v57 = vpack.c.bf16 %v6596_v55, %v6595_v35  ;;  %v1968_v58 = vpop.f32.mrb[99].mxu0  ;;  %v2964_v21 = vmul.f32 %v6596_v55, %v6596_v55  ;;  %6317 = vst [vmem:[%s7150_s26 + $0x290] sm:$0xff] %v6009_v56  }
 0x1b3   : > { %v3216_v61 = vadd.f32 %v3215_v51, %v2961_v49  ;;  %v2700_v62 = vadd.f32 %v2699_v48, %v1968_v58  ;;  %v2962_v0 = vmul.f32 %v1968_v58, %v1968_v58  ;;  %v5839_v1 = vpack.c.bf16 %v1968_v58, %v1965_v43 }
 0x1b4   : > { %6284 = vst [vmem:[%s7150_s26 + $0x188] sm:$0xff] %v5844_v57   ;;  %v6014_v48 = vpack.c.bf16 %v7430_v18, %v7425_v6 }
 0x1b5   : > { %v2701_v10 = vadd.f32 %v6595_v35, %v2700_v62  ;;  %v3217_v16 = vadd.f32 %v3216_v61, %v2962_v0  ;;  %6283 = vst [vmem:[%s7150_s26 + $0x180] sm:$0xff] %v5839_v1   ;;  %v7441_v61 = vpop.f32.mrb[40].mxu1 }
 0x1b6   : > { %6318 = vst [vmem:[%s7150_s26 + $0x298] sm:$0xff] %v6014_v48   ;;  %8239 = vst [vmem:[#allocation2_spill] sm:$0xff] %v7441_v61 }
 0x1b7   : > { %v3218_v23 = vadd.f32 %v3217_v16, %v2963_v9  ;;  %v6599_v25 = vpop.f32.mrb[100].mxu0  ;;  %v2702_v27 = vadd.f32 %v6596_v55, %v2701_v10  ;;  %v7444_v9 = vpop.f32.mrb[41].mxu1 }
 0x1b8   : > { %v1981_v31 = vpop.f32.mrb[101].mxu0  ;;  %v2967_v62 = vmul.f32 %v6599_v25, %v6599_v25  ;;  %8240 = vst [vmem:[#allocation3_spill] sm:$0xff] %v7444_v9  ;;  %v7446_v10 = vpop.f32.mrb[42].mxu1 }
 0x1b9   : > { %v2703_v32 = vadd.f32 %v2702_v27, %v1981_v31  ;;  %v2965_v36 = vmul.f32 %v1981_v31, %v1981_v31  ;;  %v3219_v43 = vadd.f32 %v3218_v23, %v2964_v21  ;;  %v6600_v35 = vpop.f32.mrb[102].mxu0  ;;  %8241 = vst [vmem:[#allocation4_spill] sm:$0xff] %v7446_v10 }
 0x1ba   : > { %v5854_v49 = vpack.c.bf16 %v6600_v35, %v6599_v25  ;;  %v1984_v51 = vpop.f32.mrb[103].mxu0  ;;  %v2968_v16 = vmul.f32 %v6600_v35, %v6600_v35 }
 0x1bb   : > { %v3220_v57 = vadd.f32 %v3219_v43, %v2965_v36  ;;  %v2704_v55 = vadd.f32 %v2703_v32, %v1984_v51  ;;  %v2966_v58 = vmul.f32 %v1984_v51, %v1984_v51  ;;  %v5849_v60 = vpack.c.bf16 %v1984_v51, %v1981_v31  ;;  %v7448_v31 = vpop.f32.mrb[43].mxu1 }
 0x1bc   : > { %6286 = vst [vmem:[%s7150_s26 + $0x198] sm:$0xff] %v5854_v49   ;;  %8242 = vst [vmem:[#allocation5_spill] sm:$0xff] %v7448_v31  ;;  %v6024_v49 = vpack.c.bf16 %v7446_v10, %v7441_v61 }
 0x1bd   : > { %v2705_v0 = vadd.f32 %v6599_v25, %v2704_v55  ;;  %v3221_v1 = vadd.f32 %v3220_v57, %v2966_v58  ;;  %6285 = vst [vmem:[%s7150_s26 + $0x190] sm:$0xff] %v5849_v60   ;;  %v6019_v57 = vpack.c.bf16 %v7448_v31, %v7444_v9 }
 0x1be   : > { %6320 = vst [vmem:[%s7150_s26 + $0x2a8] sm:$0xff] %v6024_v49  }
 0x1bf   : > { %v3222_v21 = vadd.f32 %v3221_v1, %v2967_v62  ;;  %v6603_v23 = vpop.f32.mrb[104].mxu0  ;;  %v2706_v27 = vadd.f32 %v6600_v35, %v2705_v0  ;;  %6319 = vst [vmem:[%s7150_s26 + $0x2a0] sm:$0xff] %v6019_v57   ;;  %v7457_v62 = vpop.f32.mrb[44].mxu1 }
 0x1c0   : > { %v1997_v32 = vpop.f32.mrb[105].mxu0  ;;  %8243 = vst [vmem:[#allocation6_spill] sm:$0xff] %v7457_v62  ;;  %v2971_v0 = vmul.f32 %v6603_v23, %v6603_v23 }
 0x1c1   : > { %v2707_v36 = vadd.f32 %v2706_v27, %v1997_v32  ;;  %v2969_v43 = vmul.f32 %v1997_v32, %v1997_v32  ;;  %v3223_v48 = vadd.f32 %v3222_v21, %v2968_v16  ;;  %v6604_v25 = vpop.f32.mrb[106].mxu0  ;;  %v7460_v21 = vpop.f32.mrb[45].mxu1 }
 0x1c2   : > { %v5864_v51 = vpack.c.bf16 %v6604_v25, %v6603_v23  ;;  %v2000_v56 = vpop.f32.mrb[107].mxu0  ;;  %8244 = vst [vmem:[#allocation7_spill] sm:$0xff] %v7460_v21  ;;  %v7462_v27 = vpop.f32.mrb[46].mxu1  ;;  %v2972_v10 = vmul.f32 %v6604_v25, %v6604_v25 }
 0x1c3   : > { %v3224_v55 = vadd.f32 %v3223_v48, %v2969_v43  ;;  %v2708_v35 = vadd.f32 %v2707_v36, %v2000_v56  ;;  %v2970_v58 = vmul.f32 %v2000_v56, %v2000_v56  ;;  %v5859_v60 = vpack.c.bf16 %v2000_v56, %v1997_v32  ;;  %8245 = vst [vmem:[#allocation8_spill] sm:$0xff] %v7462_v27  ;;  %v7464_v32 = vpop.f32.mrb[47].mxu1 }
 0x1c4   : > { %6288 = vst [vmem:[%s7150_s26 + $0x1a8] sm:$0xff] %v5864_v51   ;;  %8246 = vst [vmem:[#allocation9_spill] sm:$0xff] %v7464_v32  ;;  %v6034_v56 = vpack.c.bf16 %v7462_v27, %v7457_v62 }
 0x1c5   : > { %v2709_v1 = vadd.f32 %v6603_v23, %v2708_v35  ;;  %v3225_v16 = vadd.f32 %v3224_v55, %v2970_v58  ;;  %6287 = vst [vmem:[%s7150_s26 + $0x1a0] sm:$0xff] %v5859_v60   ;;  %v6029_v35 = vpack.c.bf16 %v7464_v32, %v7460_v21 }
 0x1c6   : > { %6322 = vst [vmem:[%s7150_s26 + $0x2b8] sm:$0xff] %v6034_v56  }
 0x1c7   : > { %v3226_v61 = vadd.f32 %v3225_v16, %v2971_v0  ;;  %v6607_v31 = vpop.f32.mrb[108].mxu0  ;;  %v2710_v36 = vadd.f32 %v6604_v25, %v2709_v1  ;;  %6321 = vst [vmem:[%s7150_s26 + $0x2b0] sm:$0xff] %v6029_v35   ;;  %v7473_v1 = vpop.f32.mrb[48].mxu1 }
 0x1c8   : > { %v2013_v43 = vpop.f32.mrb[109].mxu0  ;;  %8247 = vst [vmem:[#allocation10_spill] sm:$0xff] %v7473_v1 }
 0x1c9   : > { %v2711_v48 = vadd.f32 %v2710_v36, %v2013_v43  ;;  %v2973_v49 = vmul.f32 %v2013_v43, %v2013_v43  ;;  %v3227_v51 = vadd.f32 %v3226_v61, %v2972_v10  ;;  %v6608_v23 = vpop.f32.mrb[110].mxu0  ;;  %v2975_v61 = vmul.f32 %v6607_v31, %v6607_v31  ;;  %v7476_v36 = vpop.f32.mrb[49].mxu1 }
 0x1ca   : > { %v5874_v57 = vpack.c.bf16 %v6608_v23, %v6607_v31  ;;  %v2016_v55 = vpop.f32.mrb[111].mxu0  ;;  %8248 = vst [vmem:[#allocation11_spill] sm:$0xff] %v7476_v36  ;;  %v7478_v27 = vpop.f32.mrb[50].mxu1  ;;  %v2976_v62 = vmul.f32 %v6608_v23, %v6608_v23 }
 0x1cb   : > { %v3228_v58 = vadd.f32 %v3227_v51, %v2973_v49  ;;  %v2712_v25 = vadd.f32 %v2711_v48, %v2016_v55  ;;  %v2974_v60 = vmul.f32 %v2016_v55, %v2016_v55  ;;  %v5869_v0 = vpack.c.bf16 %v2016_v55, %v2013_v43  ;;  %8249 = vst [vmem:[#allocation12_spill] sm:$0xff] %v7478_v27  ;;  %v7480_v43 = vpop.f32.mrb[51].mxu1 }
 0x1cc   : > { %6290 = vst [vmem:[%s7150_s26 + $0x1b8] sm:$0xff] %v5874_v57   ;;  %8250 = vst [vmem:[#allocation13_spill] sm:$0xff] %v7480_v43  ;;  %v6044_v55 = vpack.c.bf16 %v7478_v27, %v7473_v1 }
 0x1cd   : > { %v2713_v10 = vadd.f32 %v6607_v31, %v2712_v25  ;;  %v3229_v16 = vadd.f32 %v3228_v58, %v2974_v60  ;;  %6289 = vst [vmem:[%s7150_s26 + $0x1b0] sm:$0xff] %v5869_v0   ;;  %v6039_v25 = vpack.c.bf16 %v7480_v43, %v7476_v36 }
 0x1ce   : > { %6324 = vst [vmem:[%s7150_s26 + $0x2c8] sm:$0xff] %v6044_v55  }
 0x1cf   : > { %v3230_v9 = vadd.f32 %v3229_v16, %v2975_v61  ;;  %v6611_v32 = vpop.f32.mrb[112].mxu0  ;;  %v2714_v48 = vadd.f32 %v6608_v23, %v2713_v10  ;;  %6323 = vst [vmem:[%s7150_s26 + $0x2c0] sm:$0xff] %v6039_v25   ;;  %v7489_v10 = vpop.f32.mrb[52].mxu1 }
 0x1d0   : > { %v2029_v49 = vpop.f32.mrb[113].mxu0  ;;  %8251 = vst [vmem:[#allocation14_spill] sm:$0xff] %v7489_v10 }
 0x1d1   : > { %v2715_v51 = vadd.f32 %v2714_v48, %v2029_v49  ;;  %v2977_v56 = vmul.f32 %v2029_v49, %v2029_v49  ;;  %v3231_v57 = vadd.f32 %v3230_v9, %v2976_v62  ;;  %v6612_v31 = vpop.f32.mrb[114].mxu0  ;;  %v2979_v9 = vmul.f32 %v6611_v32, %v6611_v32  ;;  %v7492_v48 = vpop.f32.mrb[53].mxu1 }
 0x1d2   : > { %v5884_v35 = vpack.c.bf16 %v6612_v31, %v6611_v32  ;;  %v2032_v58 = vpop.f32.mrb[115].mxu0  ;;  %8252 = vst [vmem:[#allocation15_spill] sm:$0xff] %v7492_v48  ;;  %v7494_v27 = vpop.f32.mrb[54].mxu1  ;;  %v2980_v1 = vmul.f32 %v6612_v31, %v6612_v31 }
 0x1d3   : > { %v3232_v60 = vadd.f32 %v3231_v57, %v2977_v56  ;;  %v2716_v23 = vadd.f32 %v2715_v51, %v2032_v58  ;;  %v2978_v0 = vmul.f32 %v2032_v58, %v2032_v58  ;;  %v5879_v61 = vpack.c.bf16 %v2032_v58, %v2029_v49  ;;  %8253 = vst [vmem:[#allocation16_spill] sm:$0xff] %v7494_v27  ;;  %v7496_v49 = vpop.f32.mrb[55].mxu1 }
 0x1d4   : > { %6292 = vst [vmem:[%s7150_s26 + $0x1c8] sm:$0xff] %v5884_v35   ;;  %8254 = vst [vmem:[#allocation17_spill] sm:$0xff] %v7496_v49  ;;  %v6054_v58 = vpack.c.bf16 %v7494_v27, %v7489_v10 }
 0x1d5   : > { %v2717_v62 = vadd.f32 %v6611_v32, %v2716_v23  ;;  %v3233_v16 = vadd.f32 %v3232_v60, %v2978_v0  ;;  %6291 = vst [vmem:[%s7150_s26 + $0x1c0] sm:$0xff] %v5879_v61   ;;  %v6049_v23 = vpack.c.bf16 %v7496_v49, %v7492_v48 }
 0x1d6   : > { %6326 = vst [vmem:[%s7150_s26 + $0x2d8] sm:$0xff] %v6054_v58  }
 0x1d7   : > { %v3234_v21 = vadd.f32 %v3233_v16, %v2979_v9  ;;  %v6615_v43 = vpop.f32.mrb[116].mxu0  ;;  %v2718_v51 = vadd.f32 %v6612_v31, %v2717_v62  ;;  %6325 = vst [vmem:[%s7150_s26 + $0x2d0] sm:$0xff] %v6049_v23   ;;  %v7505_v62 = vpop.f32.mrb[56].mxu1 }
 0x1d8   : > { %v2045_v56 = vpop.f32.mrb[117].mxu0  ;;  %8255 = vst [vmem:[#allocation18_spill] sm:$0xff] %v7505_v62 }
 0x1d9   : > { %v2719_v57 = vadd.f32 %v2718_v51, %v2045_v56  ;;  %v2981_v55 = vmul.f32 %v2045_v56, %v2045_v56  ;;  %v3235_v35 = vadd.f32 %v3234_v21, %v2980_v1  ;;  %v6616_v32 = vpop.f32.mrb[118].mxu0  ;;  %v2983_v21 = vmul.f32 %v6615_v43, %v6615_v43  ;;  %v7508_v51 = vpop.f32.mrb[57].mxu1 }
 0x1da   : > { %v5894_v25 = vpack.c.bf16 %v6616_v32, %v6615_v43  ;;  %v2048_v60 = vpop.f32.mrb[119].mxu0  ;;  %v7510_v27 = vpop.f32.mrb[58].mxu1  ;;  %v2984_v10 = vmul.f32 %v6616_v32, %v6616_v32 }
 0x1db   : > { %v3236_v0 = vadd.f32 %v3235_v35, %v2981_v55  ;;  %v2720_v31 = vadd.f32 %v2719_v57, %v2048_v60  ;;  %v2982_v61 = vmul.f32 %v2048_v60, %v2048_v60  ;;  %v5889_v9 = vpack.c.bf16 %v2048_v60, %v2045_v56  ;;  %8256 = vst [vmem:[#allocation19_spill] sm:$0xff] %v7510_v27  ;;  %v7512_v56 = vpop.f32.mrb[59].mxu1 }
 0x1dc   : > { %6294 = vst [vmem:[%s7150_s26 + $0x1d8] sm:$0xff] %v5894_v25   ;;  %8257 = vst [vmem:[#allocation20_spill] sm:$0xff] %v7512_v56  ;;  %v6064_v60 = vpack.c.bf16 %v7510_v27, %v7505_v62 }
 0x1dd   : > { %v2721_v1 = vadd.f32 %v6615_v43, %v2720_v31  ;;  %v3237_v16 = vadd.f32 %v3236_v0, %v2982_v61  ;;  %6293 = vst [vmem:[%s7150_s26 + $0x1d0] sm:$0xff] %v5889_v9   ;;  %v6059_v31 = vpack.c.bf16 %v7512_v56, %v7508_v51 }
 0x1de   : > { %6328 = vst [vmem:[%s7150_s26 + $0x2e8] sm:$0xff] %v6064_v60  }
 0x1df   : > { %v3238_v36 = vadd.f32 %v3237_v16, %v2983_v21  ;;  %v6619_v49 = vpop.f32.mrb[120].mxu0  ;;  %v2722_v57 = vadd.f32 %v6616_v32, %v2721_v1  ;;  %6327 = vst [vmem:[%s7150_s26 + $0x2e0] sm:$0xff] %v6059_v31   ;;  %v7521_v1 = vpop.f32.mrb[60].mxu1 }
 0x1e0   : > { %v2061_v55 = vpop.f32.mrb[121].mxu0  ;;  %8258 = vst [vmem:[#allocation21_spill] sm:$0xff] %v7521_v1 }
 0x1e1   : > { %v2723_v35 = vadd.f32 %v2722_v57, %v2061_v55  ;;  %v2985_v58 = vmul.f32 %v2061_v55, %v2061_v55  ;;  %v3239_v25 = vadd.f32 %v3238_v36, %v2984_v10  ;;  %v6620_v43 = vpop.f32.mrb[122].mxu0  ;;  %v2987_v36 = vmul.f32 %v6619_v49, %v6619_v49  ;;  %v7524_v57 = vpop.f32.mrb[61].mxu1 }
 0x1e2   : > { %v5904_v23 = vpack.c.bf16 %v6620_v43, %v6619_v49  ;;  %v2064_v0 = vpop.f32.mrb[123].mxu0  ;;  %v7526_v27 = vpop.f32.mrb[62].mxu1  ;;  %v2988_v62 = vmul.f32 %v6620_v43, %v6620_v43 }
 0x1e3   : > { %v3240_v61 = vadd.f32 %v3239_v25, %v2985_v58  ;;  %v2724_v32 = vadd.f32 %v2723_v35, %v2064_v0  ;;  %v2986_v9 = vmul.f32 %v2064_v0, %v2064_v0  ;;  %v5899_v21 = vpack.c.bf16 %v2064_v0, %v2061_v55  ;;  %8259 = vst [vmem:[#allocation22_spill] sm:$0xff] %v7526_v27  ;;  %v7528_v55 = vpop.f32.mrb[63].mxu1 }
 0x1e4   : > { %6296 = vst [vmem:[%s7150_s26 + $0x1e8] sm:$0xff] %v5904_v23   ;;  %v6074_v0 = vpack.c.bf16 %v7526_v27, %v7521_v1 }
 0x1e5   : > { %v2725_v10 = vadd.f32 %v6619_v49, %v2724_v32  ;;  %v3241_v16 = vadd.f32 %v3240_v61, %v2986_v9  ;;  %6295 = vst [vmem:[%s7150_s26 + $0x1e0] sm:$0xff] %v5899_v21   ;;  %v6069_v32 = vpack.c.bf16 %v7528_v55, %v7524_v57 }
 0x1e6   : > { %6330 = vst [vmem:[%s7150_s26 + $0x2f8] sm:$0xff] %v6074_v0  }
 0x1e7   : > { %v3242_v48 = vadd.f32 %v3241_v16, %v2987_v36  ;;  %v6623_v56 = vpop.f32.mrb[124].mxu0  ;;  %v2726_v35 = vadd.f32 %v6620_v43, %v2725_v10  ;;  %6329 = vst [vmem:[%s7150_s26 + $0x2f0] sm:$0xff] %v6069_v32   ;;  %v7537_v10 = vpop.f32.mrb[64].mxu1 }
 0x1e8   : > { %v2077_v58 = vpop.f32.mrb[125].mxu0 }
 0x1e9   : > { %v2727_v25 = vadd.f32 %v2726_v35, %v2077_v58  ;;  %v2989_v60 = vmul.f32 %v2077_v58, %v2077_v58  ;;  %v3243_v23 = vadd.f32 %v3242_v48, %v2988_v62  ;;  %v6624_v49 = vpop.f32.mrb[126].mxu0  ;;  %v2991_v48 = vmul.f32 %v6623_v56, %v6623_v56  ;;  %v7540_v35 = vpop.f32.mrb[65].mxu1 }
 0x1ea   : > { %v5914_v31 = vpack.c.bf16 %v6624_v49, %v6623_v56  ;;  %v2080_v61 = vpop.f32.mrb[127].mxu0  ;;  %v7542_v27 = vpop.f32.mrb[66].mxu1  ;;  %v2992_v1 = vmul.f32 %v6624_v49, %v6624_v49 }
 0x1eb   : > { %v3244_v9 = vadd.f32 %v3243_v23, %v2989_v60  ;;  %v2728_v43 = vadd.f32 %v2727_v25, %v2080_v61  ;;  %v2990_v21 = vmul.f32 %v2080_v61, %v2080_v61  ;;  %v5909_v36 = vpack.c.bf16 %v2080_v61, %v2077_v58  ;;  %v7546_v23 = vpop.f32.mrb[67].mxu1 }
 0x1ec   : > { %6298 = vst [vmem:[%s7150_s26 + $0x1f8] sm:$0xff] %v5914_v31   ;;  %v2993_v58 = vmul.f32 %v7264_v19, %v7264_v19  ;;  %v6084_v0 = vpack.c.bf16 %v7542_v27, %v7537_v10  ;;  %v6079_v61 = vpack.c.bf16 %v7546_v23, %v7540_v35 }
 0x1ed   : > { %v2729_v62 = vadd.f32 %v6623_v56, %v2728_v43  ;;  %v3245_v16 = vadd.f32 %v3244_v9, %v2990_v21  ;;  %6297 = vst [vmem:[%s7150_s26 + $0x1f0] sm:$0xff] %v5909_v36   ;;  %v7558_v43 = vpop.f32.mrb[68].mxu1  ;;  %v2995_v21 = vmul.f32 %v7261_v15, %v7261_v15 }
 0x1ee   : > { %6332 = vst [vmem:[%s7150_s26 + $0x308] sm:$0xff] %v6084_v0   ;;  %6331 = vst [vmem:[%s7150_s26 + $0x300] sm:$0xff] %v6079_v61   ;;  %v7563_v36 = vpop.f32.mrb[69].mxu1 }
 0x1ef   : > { %v2730_v60 = vadd.f32 %v6624_v49, %v2729_v62  ;;  %v3246_v25 = vadd.f32 %v3245_v16, %v2991_v48  ;;  %v2994_v49 = vmul.f32 %v7269_v26, %v7269_v26  ;;  %v7565_v48 = vpop.f32.mrb[70].mxu1  ;;  %v2996_v62 = vmul.f32 %v7266_v20, %v7266_v20 }
 0x1f1   : > { %v3247_v31 = vadd.f32 %v3246_v25, %v2992_v1  ;;  %v2731_v56 = vadd.f32 %v2730_v60, %v7264_v19  ;;  %v2997_v60 = vmul.f32 %v7284_v45, %v7284_v45  ;;  %v7572_v25 = vpop.f32.mrb[71].mxu1 }
 0x1f3   : > { %v3248_v32 = vadd.f32 %v3247_v31, %v2993_v58  ;;  %v2732_v9 = vadd.f32 %v2731_v56, %v7269_v26  ;;  %v6089_v31 = vpack.c.bf16 %v7572_v25, %v7563_v36 }
 0x1f5   : > { %v2733_v1 = vadd.f32 %v7261_v15, %v2732_v9  ;;  %v3249_v19 = vadd.f32 %v3248_v32, %v2994_v49  ;;  %v6094_v15 = vpack.c.bf16 %v7565_v48, %v7558_v43  ;;  %6333 = vst [vmem:[%s7150_s26 + $0x310] sm:$0xff] %v6089_v31   ;;  %v7584_v32 = vpop.f32.mrb[72].mxu1  ;;  %v2999_v9 = vmul.f32 %v7281_v41, %v7281_v41 }
 0x1f7   : > { %v2734_v26 = vadd.f32 %v7266_v20, %v2733_v1  ;;  %v3250_v16 = vadd.f32 %v3249_v19, %v2995_v21  ;;  %6334 = vst [vmem:[%s7150_s26 + $0x318] sm:$0xff] %v6094_v15   ;;  %v2998_v20 = vmul.f32 %v7289_v52, %v7289_v52  ;;  %v7589_v21 = vpop.f32.mrb[73].mxu1  ;;  %v3000_v19 = vmul.f32 %v7286_v46, %v7286_v46 }
 0x1f8   : > { %v7591_v1 = vpop.f32.mrb[74].mxu1 }
 0x1f9   : > { %v3251_v58 = vadd.f32 %v3250_v16, %v2996_v62  ;;  %v2735_v0 = vadd.f32 %v2734_v26, %v7284_v45  ;;  %v3001_v26 = vmul.f32 %v7304_v7, %v7304_v7  ;;  %v7598_v16 = vpop.f32.mrb[75].mxu1 }
 0x1fb   : > { %v3252_v56 = vadd.f32 %v3251_v58, %v2997_v60  ;;  %v2736_v61 = vadd.f32 %v2735_v0, %v7289_v52  ;;  %v6099_v58 = vpack.c.bf16 %v7598_v16, %v7589_v21 }
 0x1fd   : > { %v2737_v49 = vadd.f32 %v7281_v41, %v2736_v61  ;;  %v3253_v45 = vadd.f32 %v3252_v56, %v2998_v20  ;;  %v6104_v41 = vpack.c.bf16 %v7591_v1, %v7584_v32  ;;  %6335 = vst [vmem:[%s7150_s26 + $0x320] sm:$0xff] %v6099_v58   ;;  %v7610_v56 = vpop.f32.mrb[76].mxu1  ;;  %v3003_v61 = vmul.f32 %v7301_v3, %v7301_v3 }
 0x1ff   : > { %v2738_v52 = vadd.f32 %v7286_v46, %v2737_v49  ;;  %v3254_v62 = vadd.f32 %v3253_v45, %v2999_v9  ;;  %6336 = vst [vmem:[%s7150_s26 + $0x328] sm:$0xff] %v6104_v41   ;;  %v3002_v46 = vmul.f32 %v7309_v14, %v7309_v14  ;;  %v7615_v9 = vpop.f32.mrb[77].mxu1  ;;  %v3004_v45 = vmul.f32 %v7306_v8, %v7306_v8 }
 0x200   : > { %v7617_v49 = vpop.f32.mrb[78].mxu1 }
 0x201   : > { %v3255_v60 = vadd.f32 %v3254_v62, %v3000_v19  ;;  %v2739_v15 = vadd.f32 %v2738_v52, %v7304_v7  ;;  %v3005_v52 = vmul.f32 %v7324_v37, %v7324_v37  ;;  %v7624_v62 = vpop.f32.mrb[79].mxu1 }
 0x203   : > { %v3256_v0 = vadd.f32 %v3255_v60, %v3001_v26  ;;  %v2740_v31 = vadd.f32 %v2739_v15, %v7309_v14  ;;  %v6109_v60 = vpack.c.bf16 %v7624_v62, %v7615_v9 }
 0x205   : > { %v2741_v20 = vadd.f32 %v7301_v3, %v2740_v31  ;;  %v3257_v7 = vadd.f32 %v3256_v0, %v3002_v46  ;;  %v6114_v3 = vpack.c.bf16 %v7617_v49, %v7610_v56  ;;  %6337 = vst [vmem:[%s7150_s26 + $0x330] sm:$0xff] %v6109_v60   ;;  %v7636_v0 = vpop.f32.mrb[80].mxu1  ;;  %v3007_v31 = vmul.f32 %v7321_v33, %v7321_v33 }
 0x207   : > { %v2742_v14 = vadd.f32 %v7306_v8, %v2741_v20  ;;  %v3258_v19 = vadd.f32 %v3257_v7, %v3003_v61  ;;  %6338 = vst [vmem:[%s7150_s26 + $0x338] sm:$0xff] %v6114_v3   ;;  %v3006_v8 = vmul.f32 %v7329_v47, %v7329_v47  ;;  %v7641_v61 = vpop.f32.mrb[81].mxu1  ;;  %v3008_v7 = vmul.f32 %v7326_v38, %v7326_v38 }
 0x208   : > { %v7643_v20 = vpop.f32.mrb[82].mxu1 }
 0x209   : > { %v3259_v26 = vadd.f32 %v3258_v19, %v3004_v45  ;;  %v2743_v41 = vadd.f32 %v2742_v14, %v7324_v37  ;;  %v3009_v14 = vmul.f32 %v7344_v4, %v7344_v4  ;;  %v7650_v19 = vpop.f32.mrb[83].mxu1 }
 0x20b   : > { %v3260_v15 = vadd.f32 %v3259_v26, %v3005_v52  ;;  %v2744_v58 = vadd.f32 %v2743_v41, %v7329_v47  ;;  %v6119_v26 = vpack.c.bf16 %v7650_v19, %v7641_v61 }
 0x20d   : > { %v2745_v46 = vadd.f32 %v7321_v33, %v2744_v58  ;;  %v3261_v37 = vadd.f32 %v3260_v15, %v3006_v8  ;;  %v6124_v33 = vpack.c.bf16 %v7643_v20, %v7636_v0  ;;  %6339 = vst [vmem:[%s7150_s26 + $0x340] sm:$0xff] %v6119_v26   ;;  %v7662_v15 = vpop.f32.mrb[84].mxu1  ;;  %v3011_v58 = vmul.f32 %v7341_v63, %v7341_v63 }
 0x20f   : > { %v2746_v47 = vadd.f32 %v7326_v38, %v2745_v46  ;;  %v3262_v45 = vadd.f32 %v3261_v37, %v3007_v31  ;;  %6340 = vst [vmem:[%s7150_s26 + $0x348] sm:$0xff] %v6124_v33   ;;  %v3010_v38 = vmul.f32 %v7349_v13, %v7349_v13  ;;  %v7667_v31 = vpop.f32.mrb[85].mxu1  ;;  %v3012_v37 = vmul.f32 %v7346_v5, %v7346_v5 }
 0x210   : > { %v7669_v46 = vpop.f32.mrb[86].mxu1 }
 0x211   : > { %v3263_v52 = vadd.f32 %v3262_v45, %v3008_v7  ;;  %v2747_v3 = vadd.f32 %v2746_v47, %v7344_v4  ;;  %v3013_v47 = vmul.f32 %v7364_v40, %v7364_v40  ;;  %v7676_v45 = vpop.f32.mrb[87].mxu1 }
 0x213   : > { %v3264_v41 = vadd.f32 %v3263_v52, %v3009_v14  ;;  %v2748_v60 = vadd.f32 %v2747_v3, %v7349_v13  ;;  %v6129_v52 = vpack.c.bf16 %v7676_v45, %v7667_v31 }
 0x215   : > { %v2749_v8 = vadd.f32 %v7341_v63, %v2748_v60  ;;  %v3265_v4 = vadd.f32 %v3264_v41, %v3010_v38  ;;  %v6134_v63 = vpack.c.bf16 %v7669_v46, %v7662_v15  ;;  %6341 = vst [vmem:[%s7150_s26 + $0x350] sm:$0xff] %v6129_v52   ;;  %v7688_v41 = vpop.f32.mrb[88].mxu1  ;;  %v3015_v60 = vmul.f32 %v7361_v34, %v7361_v34 }
 0x217   : > { %v2750_v13 = vadd.f32 %v7346_v5, %v2749_v8  ;;  %v3266_v7 = vadd.f32 %v3265_v4, %v3011_v58  ;;  %6342 = vst [vmem:[%s7150_s26 + $0x358] sm:$0xff] %v6134_v63   ;;  %v3014_v5 = vmul.f32 %v7368_v50, %v7368_v50  ;;  %v7693_v58 = vpop.f32.mrb[89].mxu1  ;;  %v3016_v4 = vmul.f32 %v7366_v42, %v7366_v42 }
 0x218   : > { %v7695_v8 = vpop.f32.mrb[90].mxu1 }
 0x219   : > { %v3267_v14 = vadd.f32 %v3266_v7, %v3012_v37  ;;  %v2751_v33 = vadd.f32 %v2750_v13, %v7364_v40  ;;  %v3017_v13 = vmul.f32 %v7380_v11, %v7380_v11  ;;  %v7702_v7 = vpop.f32.mrb[91].mxu1 }
 0x21b   : > { %v3268_v3 = vadd.f32 %v3267_v14, %v3013_v47  ;;  %v2752_v26 = vadd.f32 %v2751_v33, %v7368_v50  ;;  %v6139_v14 = vpack.c.bf16 %v7702_v7, %v7693_v58 }
 0x21d   : > { %v2753_v38 = vadd.f32 %v7361_v34, %v2752_v26  ;;  %v3269_v40 = vadd.f32 %v3268_v3, %v3014_v5  ;;  %v6144_v34 = vpack.c.bf16 %v7695_v8, %v7688_v41  ;;  %6343 = vst [vmem:[%s7150_s26 + $0x360] sm:$0xff] %v6139_v14   ;;  %v7714_v3 = vpop.f32.mrb[92].mxu1  ;;  %v3019_v26 = vmul.f32 %v7377_v2, %v7377_v2 }
 0x21f   : > { %v2754_v50 = vadd.f32 %v7366_v42, %v2753_v38  ;;  %v3270_v37 = vadd.f32 %v3269_v40, %v3015_v60  ;;  %6344 = vst [vmem:[%s7150_s26 + $0x368] sm:$0xff] %v6144_v34   ;;  %v3018_v42 = vmul.f32 %v7384_v22, %v7384_v22  ;;  %v7719_v60 = vpop.f32.mrb[93].mxu1  ;;  %v3020_v40 = vmul.f32 %v7382_v12, %v7382_v12 }
 0x220   : > { %v7721_v38 = vpop.f32.mrb[94].mxu1 }
 0x221   : > { %v3271_v47 = vadd.f32 %v3270_v37, %v3016_v4  ;;  %v2755_v63 = vadd.f32 %v2754_v50, %v7380_v11  ;;  %v3021_v50 = vmul.f32 %v7396_v53, %v7396_v53  ;;  %v7728_v37 = vpop.f32.mrb[95].mxu1 }
 0x223   : > { %v3272_v33 = vadd.f32 %v3271_v47, %v3017_v13  ;;  %v2756_v52 = vadd.f32 %v2755_v63, %v7384_v22  ;;  %v6149_v47 = vpack.c.bf16 %v7728_v37, %v7719_v60 }
 0x225   : > { %v2757_v5 = vadd.f32 %v7377_v2, %v2756_v52  ;;  %v3273_v11 = vadd.f32 %v3272_v33, %v3018_v42  ;;  %v6154_v2 = vpack.c.bf16 %v7721_v38, %v7714_v3  ;;  %6345 = vst [vmem:[%s7150_s26 + $0x370] sm:$0xff] %v6149_v47   ;;  %v7740_v33 = vpop.f32.mrb[96].mxu1  ;;  %v3023_v52 = vmul.f32 %v7393_v44, %v7393_v44 }
 0x227   : > { %v2758_v22 = vadd.f32 %v7382_v12, %v2757_v5  ;;  %v3274_v4 = vadd.f32 %v3273_v11, %v3019_v26  ;;  %6346 = vst [vmem:[%s7150_s26 + $0x378] sm:$0xff] %v6154_v2   ;;  %v3022_v12 = vmul.f32 %v7400_v59, %v7400_v59  ;;  %v7745_v26 = vpop.f32.mrb[97].mxu1  ;;  %v3024_v11 = vmul.f32 %v7398_v54, %v7398_v54 }
 0x228   : > { %v7747_v5 = vpop.f32.mrb[98].mxu1 }
 0x229   : > { %v3275_v13 = vadd.f32 %v3274_v4, %v3020_v40  ;;  %v2759_v34 = vadd.f32 %v2758_v22, %v7396_v53  ;;  %v3025_v22 = vmul.f32 %v7412_v29, %v7412_v29  ;;  %v7754_v4 = vpop.f32.mrb[99].mxu1 }
 0x22b   : > { %v3276_v63 = vadd.f32 %v3275_v13, %v3021_v50  ;;  %v2760_v14 = vadd.f32 %v2759_v34, %v7400_v59  ;;  %v6159_v13 = vpack.c.bf16 %v7754_v4, %v7745_v26 }
 0x22d   : > { %v2761_v42 = vadd.f32 %v7393_v44, %v2760_v14  ;;  %v3277_v53 = vadd.f32 %v3276_v63, %v3022_v12  ;;  %v6164_v44 = vpack.c.bf16 %v7747_v5, %v7740_v33  ;;  %6347 = vst [vmem:[%s7150_s26 + $0x380] sm:$0xff] %v6159_v13   ;;  %v7766_v63 = vpop.f32.mrb[100].mxu1  ;;  %v3027_v14 = vmul.f32 %v7409_v24, %v7409_v24 }
 0x22f   : > { %v2762_v59 = vadd.f32 %v7398_v54, %v2761_v42  ;;  %v3278_v40 = vadd.f32 %v3277_v53, %v3023_v52  ;;  %6348 = vst [vmem:[%s7150_s26 + $0x388] sm:$0xff] %v6164_v44   ;;  %v3026_v54 = vmul.f32 %v7416_v39, %v7416_v39  ;;  %v7771_v52 = vpop.f32.mrb[101].mxu1  ;;  %v3028_v53 = vmul.f32 %v7414_v30, %v7414_v30 }
 0x230   : > { %v7773_v42 = vpop.f32.mrb[102].mxu1 }
 0x231   : > { %v3279_v50 = vadd.f32 %v3278_v40, %v3024_v11  ;;  %v2763_v2 = vadd.f32 %v2762_v59, %v7412_v29  ;;  %v3029_v59 = vmul.f32 %v7428_v17, %v7428_v17  ;;  %v7780_v40 = vpop.f32.mrb[103].mxu1 }
 0x233   : > { %v3280_v34 = vadd.f32 %v3279_v50, %v3025_v22  ;;  %v2764_v47 = vadd.f32 %v2763_v2, %v7416_v39  ;;  %v6169_v50 = vpack.c.bf16 %v7780_v40, %v7771_v52 }
 0x235   : > { %v2765_v12 = vadd.f32 %v7409_v24, %v2764_v47  ;;  %v3281_v29 = vadd.f32 %v3280_v34, %v3026_v54  ;;  %v6174_v24 = vpack.c.bf16 %v7773_v42, %v7766_v63  ;;  %6349 = vst [vmem:[%s7150_s26 + $0x390] sm:$0xff] %v6169_v50   ;;  %v7792_v34 = vpop.f32.mrb[104].mxu1  ;;  %v3031_v47 = vmul.f32 %v7425_v6, %v7425_v6 }
 0x236   : > { %8260 = vst [vmem:[#allocation23_spill] sm:$0xff] %v7792_v34 }
 0x237   : > { %v2766_v39 = vadd.f32 %v7414_v30, %v2765_v12  ;;  %v3282_v11 = vadd.f32 %v3281_v29, %v3027_v14  ;;  %6350 = vst [vmem:[%s7150_s26 + $0x398] sm:$0xff] %v6174_v24   ;;  %v3030_v30 = vmul.f32 %v7432_v28, %v7432_v28  ;;  %v7797_v14 = vpop.f32.mrb[105].mxu1  ;;  %v3032_v29 = vmul.f32 %v7430_v18, %v7430_v18 }
 0x238   : > { %v7799_v12 = vpop.f32.mrb[106].mxu1 }
 0x239   : > { %v3283_v22 = vadd.f32 %v3282_v11, %v3028_v53  ;;  %v2767_v44 = vadd.f32 %v2766_v39, %v7428_v17  ;;  %8261 = vst [vmem:[#allocation24_spill] sm:$0xff] %v7799_v12  ;;  %v8262_v39 = vld [vmem:[#allocation3_spill] sm:$0xff] }
 0x23a   : > { %v3033_v11 = vmul.f32 %v8262_v39, %v8262_v39 }
 0x23b   : > { %v3284_v2 = vadd.f32 %v3283_v22, %v3029_v59  ;;  %v2768_v13 = vadd.f32 %v2767_v44, %v7432_v28  ;;  %v7806_v59 = vpop.f32.mrb[107].mxu1 }
 0x23c   : > { %8263 = vst [vmem:[#allocation3_spill] sm:$0xff] %v7806_v59  ;;  %v6179_v44 = vpack.c.bf16 %v7806_v59, %v7797_v14 }
 0x23d   : > { %v2769_v54 = vadd.f32 %v7425_v6, %v2768_v13  ;;  %v3285_v17 = vadd.f32 %v3284_v2, %v3030_v30  ;;  %v6184_v6 = vpack.c.bf16 %v7799_v12, %v7792_v34  ;;  %v8264_v2 = vld [vmem:[#allocation5_spill] sm:$0xff]  ;;  %v7818_v30 = vpop.f32.mrb[108].mxu1 }
 0x23e   : > { %6351 = vst [vmem:[%s7150_s26 + $0x3a0] sm:$0xff] %v6179_v44   ;;  %8265 = vst [vmem:[#allocation5_spill] sm:$0xff] %v7818_v30  ;;  %v8272_v34 = vld [vmem:[#allocation9_spill] sm:$0xff] }
 0x23f   : > { %v2770_v28 = vadd.f32 %v7430_v18, %v2769_v54  ;;  %v3286_v53 = vadd.f32 %v3285_v17, %v3031_v47  ;;  %6352 = vst [vmem:[%s7150_s26 + $0x3a8] sm:$0xff] %v6184_v6   ;;  %v3034_v18 = vmul.f32 %v8264_v2, %v8264_v2  ;;  %v8266_v47 = vld [vmem:[#allocation2_spill] sm:$0xff] }
 0x240   : > { %v3035_v54 = vmul.f32 %v8266_v47, %v8266_v47 }
 0x241   : > { %v3287_v24 = vadd.f32 %v3286_v53, %v3032_v29  ;;  %v2771_v22 = vadd.f32 %v2770_v28, %v8262_v39  ;;  %v7823_v28 = vpop.f32.mrb[109].mxu1  ;;  %v8269_v39 = vld [vmem:[#allocation4_spill] sm:$0xff] }
 0x242   : > { %8267 = vst [vmem:[#allocation2_spill] sm:$0xff] %v7823_v28  ;;  %v7825_v53 = vpop.f32.mrb[110].mxu1 }
 0x243   : > { %v3288_v50 = vadd.f32 %v3287_v24, %v3033_v11  ;;  %v2772_v13 = vadd.f32 %v2771_v22, %v8264_v2  ;;  %8268 = vst [vmem:[#allocation25_spill] sm:$0xff] %v7825_v53  ;;  %v3036_v11 = vmul.f32 %v8269_v39, %v8269_v39  ;;  %v8270_v22 = vld [vmem:[#allocation7_spill] sm:$0xff]  ;;  %v7832_v2 = vpop.f32.mrb[111].mxu1 }
 0x244   : > { %v3037_v44 = vmul.f32 %v8270_v22, %v8270_v22  ;;  %8271 = vst [vmem:[#allocation4_spill] sm:$0xff] %v7832_v2 }
 0x245   : > { %v2773_v17 = vadd.f32 %v8266_v47, %v2772_v13  ;;  %v3289_v29 = vadd.f32 %v3288_v50, %v3034_v18  ;;  %v6194_v13 = vpack.c.bf16 %v7825_v53, %v7818_v30  ;;  %v6189_v47 = vpack.c.bf16 %v7832_v2, %v7823_v28  ;;  %v8280_v2 = vld [vmem:[#allocation13_spill] sm:$0xff] }
 0x247   : > { %v2774_v6 = vadd.f32 %v8269_v39, %v2773_v17  ;;  %v3290_v24 = vadd.f32 %v3289_v29, %v3035_v54  ;;  %6354 = vst [vmem:[%s7150_s26 + $0x3b8] sm:$0xff] %v6194_v13   ;;  %v3038_v54 = vmul.f32 %v8272_v34, %v8272_v34  ;;  %6353 = vst [vmem:[%s7150_s26 + $0x3b0] sm:$0xff] %v6189_v47   ;;  %v7844_v17 = vpop.f32.mrb[112].mxu1  ;;  %v8274_v29 = vld [vmem:[#allocation6_spill] sm:$0xff] }
 0x248   : > { %8273 = vst [vmem:[#allocation7_spill] sm:$0xff] %v7844_v17  ;;  %v3039_v39 = vmul.f32 %v8274_v29, %v8274_v29 }
 0x249   : > { %v3291_v50 = vadd.f32 %v3290_v24, %v3036_v11  ;;  %v2775_v18 = vadd.f32 %v2774_v6, %v8270_v22  ;;  %v7849_v24 = vpop.f32.mrb[113].mxu1 }
 0x24a   : > { %8275 = vst [vmem:[#allocation9_spill] sm:$0xff] %v7849_v24  ;;  %v7851_v22 = vpop.f32.mrb[114].mxu1 }
 0x24b   : > { %v3292_v12 = vadd.f32 %v3291_v50, %v3037_v44  ;;  %v2776_v59 = vadd.f32 %v2775_v18, %v8272_v34  ;;  %8276 = vst [vmem:[#allocation6_spill] sm:$0xff] %v7851_v22  ;;  %v8277_v44 = vld [vmem:[#allocation8_spill] sm:$0xff]  ;;  %v8278_v18 = vld [vmem:[#allocation11_spill] sm:$0xff]  ;;  %v7858_v53 = vpop.f32.mrb[115].mxu1 }
 0x24c   : > { %v3040_v13 = vmul.f32 %v8277_v44, %v8277_v44  ;;  %v3041_v47 = vmul.f32 %v8278_v18, %v8278_v18  ;;  %8279 = vst [vmem:[#allocation8_spill] sm:$0xff] %v7858_v53 }
 0x24d   : > { %v2777_v11 = vadd.f32 %v8274_v29, %v2776_v59  ;;  %v3293_v6 = vadd.f32 %v3292_v12, %v3038_v54  ;;  %v6204_v59 = vpack.c.bf16 %v7851_v22, %v7844_v17  ;;  %v6199_v29 = vpack.c.bf16 %v7858_v53, %v7849_v24  ;;  %v8287_v53 = vld [vmem:[#allocation17_spill] sm:$0xff] }
 0x24f   : > { %v2778_v34 = vadd.f32 %v8277_v44, %v2777_v11  ;;  %v3294_v50 = vadd.f32 %v3293_v6, %v3039_v39  ;;  %6356 = vst [vmem:[%s7150_s26 + $0x3c8] sm:$0xff] %v6204_v59   ;;  %v3042_v39 = vmul.f32 %v8280_v2, %v8280_v2  ;;  %6355 = vst [vmem:[%s7150_s26 + $0x3c0] sm:$0xff] %v6199_v29   ;;  %v7870_v11 = vpop.f32.mrb[116].mxu1  ;;  %v8282_v6 = vld [vmem:[#allocation10_spill] sm:$0xff] }
 0x250   : > { %8281 = vst [vmem:[#allocation11_spill] sm:$0xff] %v7870_v11  ;;  %v3043_v44 = vmul.f32 %v8282_v6, %v8282_v6 }
 0x251   : > { %v3295_v12 = vadd.f32 %v3294_v50, %v3040_v13  ;;  %v2779_v54 = vadd.f32 %v2778_v34, %v8278_v18  ;;  %v7875_v50 = vpop.f32.mrb[117].mxu1 }
 0x252   : > { %v7877_v18 = vpop.f32.mrb[118].mxu1 }
 0x253   : > { %v3296_v30 = vadd.f32 %v3295_v12, %v3041_v47  ;;  %v2780_v28 = vadd.f32 %v2779_v54, %v8280_v2  ;;  %8283 = vst [vmem:[#allocation13_spill] sm:$0xff] %v7877_v18  ;;  %v8284_v47 = vld [vmem:[#allocation12_spill] sm:$0xff]  ;;  %v8285_v54 = vld [vmem:[#allocation15_spill] sm:$0xff]  ;;  %v7884_v22 = vpop.f32.mrb[119].mxu1 }
 0x254   : > { %v3044_v59 = vmul.f32 %v8284_v47, %v8284_v47  ;;  %v3045_v29 = vmul.f32 %v8285_v54, %v8285_v54  ;;  %8286 = vst [vmem:[#allocation10_spill] sm:$0xff] %v7884_v22 }
 0x255   : > { %v2781_v13 = vadd.f32 %v8282_v6, %v2780_v28  ;;  %v3297_v34 = vadd.f32 %v3296_v30, %v3042_v39  ;;  %v6214_v28 = vpack.c.bf16 %v7877_v18, %v7870_v11  ;;  %v6209_v6 = vpack.c.bf16 %v7884_v22, %v7875_v50  ;;  %v8292_v11 = vld [vmem:[#allocation20_spill] sm:$0xff] }
 0x257   : > { %v2782_v2 = vadd.f32 %v8284_v47, %v2781_v13  ;;  %v3298_v12 = vadd.f32 %v3297_v34, %v3043_v44  ;;  %6358 = vst [vmem:[%s7150_s26 + $0x3d8] sm:$0xff] %v6214_v28   ;;  %v3046_v44 = vmul.f32 %v8287_v53, %v8287_v53  ;;  %6357 = vst [vmem:[%s7150_s26 + $0x3d0] sm:$0xff] %v6209_v6   ;;  %v7896_v13 = vpop.f32.mrb[120].mxu1  ;;  %v8289_v34 = vld [vmem:[#allocation14_spill] sm:$0xff] }
 0x258   : > { %8288 = vst [vmem:[#allocation12_spill] sm:$0xff] %v7896_v13  ;;  %v3047_v47 = vmul.f32 %v8289_v34, %v8289_v34 }
 0x259   : > { %v3299_v30 = vadd.f32 %v3298_v12, %v3044_v59  ;;  %v2783_v39 = vadd.f32 %v2782_v2, %v8285_v54  ;;  %v7901_v12 = vpop.f32.mrb[121].mxu1 }
 0x25a   : > { %v7903_v54 = vpop.f32.mrb[122].mxu1 }
 0x25b   : > { %v3300_v17 = vadd.f32 %v3299_v30, %v3045_v29  ;;  %v2784_v24 = vadd.f32 %v2783_v39, %v8287_v53  ;;  %8290 = vst [vmem:[#allocation15_spill] sm:$0xff] %v7903_v54  ;;  %v8291_v29 = vld [vmem:[#allocation16_spill] sm:$0xff]  ;;  %v3049_v39 = vmul.f32 %v7508_v51, %v7508_v51  ;;  %v7910_v6 = vpop.f32.mrb[123].mxu1 }
 0x25c   : > { %v3048_v28 = vmul.f32 %v8291_v29, %v8291_v29 }
 0x25d   : > { %v2785_v59 = vadd.f32 %v8289_v34, %v2784_v24  ;;  %v3301_v2 = vadd.f32 %v3300_v17, %v3046_v44  ;;  %v6224_v24 = vpack.c.bf16 %v7903_v54, %v7896_v13  ;;  %v6219_v34 = vpack.c.bf16 %v7910_v6, %v7901_v12 }
 0x25f   : > { %v2786_v53 = vadd.f32 %v8291_v29, %v2785_v59  ;;  %v3302_v30 = vadd.f32 %v3301_v2, %v3047_v47  ;;  %6360 = vst [vmem:[%s7150_s26 + $0x3e8] sm:$0xff] %v6224_v24   ;;  %v3050_v47 = vmul.f32 %v8292_v11, %v8292_v11  ;;  %6359 = vst [vmem:[%s7150_s26 + $0x3e0] sm:$0xff] %v6219_v34   ;;  %v7922_v59 = vpop.f32.mrb[124].mxu1  ;;  %v8293_v2 = vld [vmem:[#allocation18_spill] sm:$0xff] }
 0x260   : > { %v3051_v29 = vmul.f32 %v8293_v2, %v8293_v2 }
 0x261   : > { %v3303_v17 = vadd.f32 %v3302_v30, %v3048_v28  ;;  %v2787_v44 = vadd.f32 %v2786_v53, %v7508_v51  ;;  %v7927_v53 = vpop.f32.mrb[125].mxu1 }
 0x262   : > { %v7929_v30 = vpop.f32.mrb[126].mxu1 }
 0x263   : > { %v3304_v18 = vadd.f32 %v3303_v17, %v3049_v39  ;;  %v2788_v22 = vadd.f32 %v2787_v44, %v8292_v11  ;;  %8294 = vst [vmem:[#allocation17_spill] sm:$0xff] %v7929_v30  ;;  %v8295_v39 = vld [vmem:[#allocation19_spill] sm:$0xff]  ;;  %v3053_v44 = vmul.f32 %v7524_v57, %v7524_v57  ;;  %v7936_v34 = vpop.f32.mrb[127].mxu1 }
 0x264   : > { %v3052_v24 = vmul.f32 %v8295_v39, %v8295_v39 }
 0x265   : > { %v2789_v28 = vadd.f32 %v8293_v2, %v2788_v22  ;;  %v3305_v51 = vadd.f32 %v3304_v18, %v3050_v47  ;;  %v6234_v22 = vpack.c.bf16 %v7929_v30, %v7922_v59  ;;  %v6229_v2 = vpack.c.bf16 %v7936_v34, %v7927_v53 }
 0x267   : > { %v2790_v11 = vadd.f32 %v8295_v39, %v2789_v28  ;;  %v3306_v17 = vadd.f32 %v3305_v51, %v3051_v29  ;;  %6362 = vst [vmem:[%s7150_s26 + $0x3f8] sm:$0xff] %v6234_v22   ;;  %v3054_v29 = vmul.f32 %v7528_v55, %v7528_v55  ;;  %6361 = vst [vmem:[%s7150_s26 + $0x3f0] sm:$0xff] %v6229_v2   ;;  %v8296_v28 = vld [vmem:[#allocation21_spill] sm:$0xff] }
 0x268   : > { %v3055_v51 = vmul.f32 %v8296_v28, %v8296_v28  ;;  %v3058_v2 = vmul.f32 %v7546_v23, %v7546_v23 }
 0x269   : > { %v3307_v18 = vadd.f32 %v3306_v17, %v3052_v24  ;;  %v2791_v47 = vadd.f32 %v2790_v11, %v7524_v57  ;;  %v8297_v24 = vld [vmem:[#allocation22_spill] sm:$0xff] }
 0x26a   : > { %v3056_v57 = vmul.f32 %v8297_v24, %v8297_v24 }
 0x26b   : > { %v3308_v54 = vadd.f32 %v3307_v18, %v3053_v44  ;;  %v2792_v13 = vadd.f32 %v2791_v47, %v7528_v55  ;;  %v3057_v44 = vmul.f32 %v7540_v35, %v7540_v35 }
 0x26d   : > { %v2793_v39 = vadd.f32 %v8296_v28, %v2792_v13  ;;  %v3309_v30 = vadd.f32 %v3308_v54, %v3054_v29  ;;  %v3059_v13 = vmul.f32 %v7537_v10, %v7537_v10 }
 0x26f   : > { %v2794_v11 = vadd.f32 %v8297_v24, %v2793_v39  ;;  %v3310_v17 = vadd.f32 %v3309_v30, %v3055_v51  ;;  %v3060_v30 = vmul.f32 %v7542_v27, %v7542_v27 }
 0x271   : > { %v3311_v22 = vadd.f32 %v3310_v17, %v3056_v57  ;;  %v2795_v18 = vadd.f32 %v2794_v11, %v7540_v35  ;;  %v3061_v35 = vmul.f32 %v7563_v36, %v7563_v36  ;;  %v3062_v11 = vmul.f32 %v7572_v25, %v7572_v25 }
 0x273   : > { %v3312_v55 = vadd.f32 %v3311_v22, %v3057_v44  ;;  %v2796_v47 = vadd.f32 %v2795_v18, %v7546_v23 }
 0x275   : > { %v2797_v54 = vadd.f32 %v7537_v10, %v2796_v47  ;;  %v3313_v29 = vadd.f32 %v3312_v55, %v3058_v2  ;;  %v3063_v10 = vmul.f32 %v7558_v43, %v7558_v43 }
 0x277   : > { %v3314_v28 = vadd.f32 %v3313_v29, %v3059_v13  ;;  %v2798_v51 = vadd.f32 %v7542_v27, %v2797_v54  ;;  %v3064_v27 = vmul.f32 %v7565_v48, %v7565_v48  ;;  %v3066_v13 = vmul.f32 %v7598_v16, %v7598_v16 }
 0x279   : > { %v2799_v39 = vadd.f32 %v2798_v51, %v7563_v36  ;;  %v3315_v24 = vadd.f32 %v3314_v28, %v3060_v30  ;;  %v3065_v36 = vmul.f32 %v7589_v21, %v7589_v21 }
 0x27b   : > { %v3316_v57 = vadd.f32 %v3315_v24, %v3061_v35  ;;  %v2800_v23 = vadd.f32 %v2799_v39, %v7572_v25  ;;  %v3070_v24 = vmul.f32 %v7624_v62, %v7624_v62 }
 0x27d   : > { %v2801_v17 = vadd.f32 %v7558_v43, %v2800_v23  ;;  %v3317_v44 = vadd.f32 %v3316_v57, %v3062_v11  ;;  %v3067_v43 = vmul.f32 %v7584_v32, %v7584_v32 }
 0x27f   : > { %v3318_v22 = vadd.f32 %v3317_v44, %v3063_v10  ;;  %v2802_v18 = vadd.f32 %v7565_v48, %v2801_v17  ;;  %v3068_v48 = vmul.f32 %v7591_v1, %v7591_v1 }
 0x281   : > { %v2803_v55 = vadd.f32 %v2802_v18, %v7589_v21  ;;  %v3319_v47 = vadd.f32 %v3318_v22, %v3064_v27  ;;  %v3069_v21 = vmul.f32 %v7615_v9, %v7615_v9  ;;  %v3074_v22 = vmul.f32 %v7650_v19, %v7650_v19 }
 0x283   : > { %v3320_v2 = vadd.f32 %v3319_v47, %v3065_v36  ;;  %v2804_v25 = vadd.f32 %v2803_v55, %v7598_v16 }
 0x285   : > { %v2805_v54 = vadd.f32 %v7584_v32, %v2804_v25  ;;  %v3321_v29 = vadd.f32 %v3320_v2, %v3066_v13  ;;  %v3071_v32 = vmul.f32 %v7610_v56, %v7610_v56 }
 0x287   : > { %v3322_v30 = vadd.f32 %v3321_v29, %v3067_v43  ;;  %v2806_v28 = vadd.f32 %v7591_v1, %v2805_v54  ;;  %v3072_v1 = vmul.f32 %v7617_v49, %v7617_v49  ;;  %v3078_v43 = vmul.f32 %v7676_v45, %v7676_v45 }
 0x289   : > { %v2807_v51 = vadd.f32 %v2806_v28, %v7615_v9  ;;  %v3323_v35 = vadd.f32 %v3322_v30, %v3068_v48  ;;  %v3073_v9 = vmul.f32 %v7641_v61, %v7641_v61 }
 0x28b   : > { %v3324_v39 = vadd.f32 %v3323_v35, %v3069_v21  ;;  %v2808_v16 = vadd.f32 %v2807_v51, %v7624_v62  ;;  %v3082_v35 = vmul.f32 %v7702_v7, %v7702_v7 }
 0x28d   : > { %v2809_v57 = vadd.f32 %v7610_v56, %v2808_v16  ;;  %v3325_v23 = vadd.f32 %v3324_v39, %v3070_v24  ;;  %v3075_v56 = vmul.f32 %v7636_v0, %v7636_v0 }
 0x28f   : > { %v3326_v11 = vadd.f32 %v3325_v23, %v3071_v32  ;;  %v2810_v10 = vadd.f32 %v7617_v49, %v2809_v57  ;;  %v3076_v49 = vmul.f32 %v7643_v20, %v7643_v20 }
 0x291   : > { %v2811_v17 = vadd.f32 %v2810_v10, %v7641_v61  ;;  %v3327_v44 = vadd.f32 %v3326_v11, %v3072_v1  ;;  %v3077_v61 = vmul.f32 %v7667_v31, %v7667_v31  ;;  %v3086_v11 = vmul.f32 %v7728_v37, %v7728_v37 }
 0x293   : > { %v3328_v27 = vadd.f32 %v3327_v44, %v3073_v9  ;;  %v2812_v62 = vadd.f32 %v2811_v17, %v7650_v19 }
 0x295   : > { %v2813_v18 = vadd.f32 %v7636_v0, %v2812_v62  ;;  %v3329_v36 = vadd.f32 %v3328_v27, %v3074_v22  ;;  %v3079_v0 = vmul.f32 %v7662_v15, %v7662_v15 }
 0x297   : > { %v3330_v55 = vadd.f32 %v3329_v36, %v3075_v56  ;;  %v2814_v47 = vadd.f32 %v7643_v20, %v2813_v18  ;;  %v3080_v20 = vmul.f32 %v7669_v46, %v7669_v46  ;;  %v3090_v56 = vmul.f32 %v7754_v4, %v7754_v4 }
 0x299   : > { %v2815_v2 = vadd.f32 %v2814_v47, %v7667_v31  ;;  %v3331_v25 = vadd.f32 %v3330_v55, %v3076_v49  ;;  %v3081_v31 = vmul.f32 %v7693_v58, %v7693_v58 }
 0x29b   : > { %v3332_v13 = vadd.f32 %v3331_v25, %v3077_v61  ;;  %v2816_v19 = vadd.f32 %v2815_v2, %v7676_v45  ;;  %v3094_v25 = vmul.f32 %v7780_v40, %v7780_v40 }
 0x29d   : > { %v2817_v54 = vadd.f32 %v7662_v15, %v2816_v19  ;;  %v3333_v29 = vadd.f32 %v3332_v13, %v3078_v43  ;;  %v3083_v15 = vmul.f32 %v7688_v41, %v7688_v41 }
 0x29f   : > { %v3334_v48 = vadd.f32 %v3333_v29, %v3079_v0  ;;  %v2818_v30 = vadd.f32 %v7669_v46, %v2817_v54  ;;  %v3084_v46 = vmul.f32 %v7695_v8, %v7695_v8 }
 0x2a1   : > { %v2819_v28 = vadd.f32 %v2818_v30, %v7693_v58  ;;  %v3335_v21 = vadd.f32 %v3334_v48, %v3080_v20  ;;  %v3085_v58 = vmul.f32 %v7719_v60, %v7719_v60 }
 0x2a3   : > { %v3336_v51 = vadd.f32 %v3335_v21, %v3081_v31  ;;  %v2820_v45 = vadd.f32 %v2819_v28, %v7702_v7 }
 0x2a5   : > { %v2821_v39 = vadd.f32 %v7688_v41, %v2820_v45  ;;  %v3337_v16 = vadd.f32 %v3336_v51, %v3082_v35  ;;  %v3087_v41 = vmul.f32 %v7714_v3, %v7714_v3  ;;  %v8300_v51 = vld [vmem:[#allocation24_spill] sm:$0xff] }
 0x2a7   : > { %v3338_v24 = vadd.f32 %v3337_v16, %v3083_v15  ;;  %v2822_v32 = vadd.f32 %v7695_v8, %v2821_v39  ;;  %v3088_v8 = vmul.f32 %v7721_v38, %v7721_v38 }
 0x2a9   : > { %v2823_v57 = vadd.f32 %v2822_v32, %v7719_v60  ;;  %v3339_v23 = vadd.f32 %v3338_v24, %v3084_v46  ;;  %v3089_v60 = vmul.f32 %v7745_v26, %v7745_v26  ;;  %v8302_v24 = vld [vmem:[#allocation4_spill] sm:$0xff] }
 0x2ab   : > { %v3340_v1 = vadd.f32 %v3339_v23, %v3085_v58  ;;  %v2824_v7 = vadd.f32 %v2823_v57, %v7728_v37  ;;  %v3102_v58 = vmul.f32 %v8302_v24, %v8302_v24  ;;  %v8303_v57 = vld [vmem:[#allocation5_spill] sm:$0xff] }
 0x2ac   : > { %v3103_v23 = vmul.f32 %v8303_v57, %v8303_v57 }
 0x2ad   : > { %v2825_v10 = vadd.f32 %v7714_v3, %v2824_v7  ;;  %v3341_v9 = vadd.f32 %v3340_v1, %v3086_v11  ;;  %v3091_v3 = vmul.f32 %v7740_v33, %v7740_v33  ;;  %v8304_v11 = vld [vmem:[#allocation25_spill] sm:$0xff] }
 0x2af   : > { %v3342_v17 = vadd.f32 %v3341_v9, %v3087_v41  ;;  %v2826_v44 = vadd.f32 %v7721_v38, %v2825_v10  ;;  %v3092_v38 = vmul.f32 %v7747_v5, %v7747_v5  ;;  %v3104_v41 = vmul.f32 %v8304_v11, %v8304_v11 }
 0x2b1   : > { %v2827_v27 = vadd.f32 %v2826_v44, %v7745_v26  ;;  %v3343_v62 = vadd.f32 %v3342_v17, %v3088_v8  ;;  %v3093_v26 = vmul.f32 %v7771_v52, %v7771_v52  ;;  %v8305_v8 = vld [vmem:[#allocation9_spill] sm:$0xff] }
 0x2b2   : > { %v3105_v17 = vmul.f32 %v8305_v8, %v8305_v8 }
 0x2b3   : > { %v3344_v22 = vadd.f32 %v3343_v62, %v3089_v60  ;;  %v2828_v37 = vadd.f32 %v2827_v27, %v7754_v4  ;;  %v8306_v62 = vld [vmem:[#allocation8_spill] sm:$0xff] }
 0x2b5   : > { %v2829_v18 = vadd.f32 %v7740_v33, %v2828_v37  ;;  %v3345_v36 = vadd.f32 %v3344_v22, %v3090_v56  ;;  %v3095_v33 = vmul.f32 %v7766_v63, %v7766_v63  ;;  %v3106_v37 = vmul.f32 %v8306_v62, %v8306_v62  ;;  %v8307_v56 = vld [vmem:[#allocation7_spill] sm:$0xff] }
 0x2b7   : > { %v3346_v49 = vadd.f32 %v3345_v36, %v3091_v3  ;;  %v2830_v55 = vadd.f32 %v7747_v5, %v2829_v18  ;;  %v3096_v5 = vmul.f32 %v7773_v42, %v7773_v42  ;;  %v3107_v3 = vmul.f32 %v8307_v56, %v8307_v56 }
 0x2b9   : > { %v2831_v47 = vadd.f32 %v2830_v55, %v7771_v52  ;;  %v3347_v61 = vadd.f32 %v3346_v49, %v3092_v38  ;;  %v3097_v52 = vmul.f32 %v7797_v14, %v7797_v14  ;;  %v8308_v38 = vld [vmem:[#allocation6_spill] sm:$0xff] }
 0x2ba   : > { %v3108_v49 = vmul.f32 %v8308_v38, %v8308_v38 }
 0x2bb   : > { %v3348_v2 = vadd.f32 %v3347_v61, %v3093_v26  ;;  %v2832_v4 = vadd.f32 %v2831_v47, %v7780_v40  ;;  %v8298_v40 = vld [vmem:[#allocation3_spill] sm:$0xff]  ;;  %v3109_v47 = vmul.f32 %v7875_v50, %v7875_v50 }
 0x2bc   : > { %v3098_v30 = vmul.f32 %v8298_v40, %v8298_v40 }
 0x2bd   : > { %v2833_v13 = vadd.f32 %v7766_v63, %v2832_v4  ;;  %v3349_v19 = vadd.f32 %v3348_v2, %v3094_v25  ;;  %v8299_v63 = vld [vmem:[#allocation23_spill] sm:$0xff]  ;;  %v8309_v25 = vld [vmem:[#allocation10_spill] sm:$0xff] }
 0x2be   : > { %v3099_v31 = vmul.f32 %v8299_v63, %v8299_v63 }
 0x2bf   : > { %v3350_v43 = vadd.f32 %v3349_v19, %v3095_v33  ;;  %v2834_v0 = vadd.f32 %v7773_v42, %v2833_v13  ;;  %v3100_v42 = vmul.f32 %v8300_v51, %v8300_v51  ;;  %v3110_v13 = vmul.f32 %v8309_v25, %v8309_v25  ;;  %v8310_v19 = vld [vmem:[#allocation11_spill] sm:$0xff] }
 0x2c1   : > { %v2835_v54 = vadd.f32 %v2834_v0, %v7797_v14  ;;  %v3351_v29 = vadd.f32 %v3350_v43, %v3096_v5  ;;  %v8301_v14 = vld [vmem:[#allocation2_spill] sm:$0xff]  ;;  %v3111_v5 = vmul.f32 %v8310_v19, %v8310_v19 }
 0x2c2   : > { %v3101_v15 = vmul.f32 %v8301_v14, %v8301_v14 }
 0x2c3   : > { %v3352_v20 = vadd.f32 %v3351_v29, %v3097_v52  ;;  %v2836_v48 = vadd.f32 %v2835_v54, %v8298_v40  ;;  %v8311_v52 = vld [vmem:[#allocation13_spill] sm:$0xff] }
 0x2c4   : > { %v3112_v54 = vmul.f32 %v8311_v52, %v8311_v52 }
 0x2c5   : > { %v2837_v28 = vadd.f32 %v8299_v63, %v2836_v48  ;;  %v3353_v21 = vadd.f32 %v3352_v20, %v3098_v30 }
 0x2c7   : > { %v3354_v45 = vadd.f32 %v3353_v21, %v3099_v31  ;;  %v2838_v35 = vadd.f32 %v8300_v51, %v2837_v28  ;;  %v3114_v31 = vmul.f32 %v7910_v6, %v7910_v6  ;;  %v8312_v28 = vld [vmem:[#allocation12_spill] sm:$0xff] }
 0x2c8   : > { %v3115_v21 = vmul.f32 %v8312_v28, %v8312_v28 }
 0x2c9   : > { %v2839_v39 = vadd.f32 %v2838_v35, %v8301_v14  ;;  %v3355_v16 = vadd.f32 %v3354_v45, %v3100_v42  ;;  %v8313_v45 = vld [vmem:[#allocation15_spill] sm:$0xff] }
 0x2ca   : > { %v3116_v35 = vmul.f32 %v8313_v45, %v8313_v45 }
 0x2cb   : > { %v3356_v46 = vadd.f32 %v3355_v16, %v3101_v15  ;;  %v2840_v32 = vadd.f32 %v2839_v39, %v8302_v24  ;;  %v3118_v24 = vmul.f32 %v7936_v34, %v7936_v34 }
 0x2cd   : > { %v2841_v1 = vadd.f32 %v8303_v57, %v2840_v32  ;;  %v3357_v7 = vadd.f32 %v3356_v46, %v3102_v58  ;;  %v3119_v32 = vmul.f32 %v7922_v59, %v7922_v59 }
 0x2cf   : > { %v3358_v10 = vadd.f32 %v3357_v7, %v3103_v23  ;;  %v2842_v9 = vadd.f32 %v8304_v11, %v2841_v1  ;;  %v8314_v23 = vld [vmem:[#allocation17_spill] sm:$0xff] }
 0x2d0   : > { %v3120_v1 = vmul.f32 %v8314_v23, %v8314_v23 }
 0x2d1   : > { %v2843_v44 = vadd.f32 %v2842_v9, %v8305_v8  ;;  %v3359_v60 = vadd.f32 %v3358_v10, %v3104_v41  ;;  %v3382_v8 = vlaneseq }
 0x2d3   : > { %v3360_v27 = vadd.f32 %v3359_v60, %v3105_v17  ;;  %v2844_v22 = vadd.f32 %v2843_v44, %v8306_v62 }
 0x2d5   : > { %v2845_v18 = vadd.f32 %v8307_v56, %v2844_v22  ;;  %v3361_v36 = vadd.f32 %v3360_v27, %v3106_v37  ;;  %v3383_v27 = vshrl.u32 %v3382_v8, 7 }
 0x2d7   : > { %v3362_v55 = vadd.f32 %v3361_v36, %v3107_v3  ;;  %v2846_v26 = vadd.f32 %v8308_v38, %v2845_v18  ;;  %vm3385_vm1 = vcmp.eq.s32.totalorder %v3383_v27, 1  ;;  %vm3384_vm2 = vcmp.eq.s32.totalorder %v3383_v27, 0 }
 0x2d9   : > { %v2847_v61 = vadd.f32 %v2846_v26, %v7875_v50  ;;  %v3363_v2 = vadd.f32 %v3362_v55, %v3108_v49  ;;  %v3113_v50 = vmul.f32 %v7901_v12, %v7901_v12 }
 0x2db   : > { %v3364_v4 = vadd.f32 %v3363_v2, %v3109_v47  ;;  %v2848_v33 = vadd.f32 %v2847_v61, %v8309_v25 }
 0x2dd   : > { %v2849_v43 = vadd.f32 %v8310_v19, %v2848_v33  ;;  %v3365_v0 = vadd.f32 %v3364_v4, %v3110_v13 }
 0x2df   : > { %v3366_v29 = vadd.f32 %v3365_v0, %v3111_v5  ;;  %v2850_v20 = vadd.f32 %v8311_v52, %v2849_v43 }
 0x2e1   : > { %v2851_v40 = vadd.f32 %v2850_v20, %v7901_v12  ;;  %v3367_v48 = vadd.f32 %v3366_v29, %v3112_v54  ;;  %v3117_v12 = vmul.f32 %v7927_v53, %v7927_v53 }
 0x2e3   : > { %v3368_v30 = vadd.f32 %v3367_v48, %v3113_v50  ;;  %v2852_v63 = vadd.f32 %v2851_v40, %v7910_v6 }
 0x2e5   : > { %v2853_v51 = vadd.f32 %v8312_v28, %v2852_v63  ;;  %v3369_v42 = vadd.f32 %v3368_v30, %v3114_v31 }
 0x2e7   : > { %v3370_v14 = vadd.f32 %v3369_v42, %v3115_v21  ;;  %v2854_v15 = vadd.f32 %v8313_v45, %v2853_v51 }
 0x2e9   : > { %v2855_v39 = vadd.f32 %v2854_v15, %v7927_v53  ;;  %v3371_v16 = vadd.f32 %v3370_v14, %v3116_v35 }
 0x2eb   : > { %v3372_v46 = vadd.f32 %v3371_v16, %v3117_v12  ;;  %v2856_v6 = vadd.f32 %v2855_v39, %v7936_v34 }
 0x2ed   : > { %v2857_v58 = vadd.f32 %v7922_v59, %v2856_v6  ;;  %v3373_v57 = vadd.f32 %v3372_v46, %v3118_v24 }
 0x2ef   : > { %v2858_v7 = vadd.f32 %v8314_v23, %v2857_v58  ;;  %v3374_v53 = vadd.f32 %v3373_v57, %v3119_v32 }
 0x2f1   : > { %v2859_v11 = vrot.slane %v2858_v7, 4  ;;  %v3375_v41 = vadd.f32 %v3374_v53, %v3120_v1 }
 0x2f3   : > { %v2860_v10 = vadd.f32 %v2859_v11, %v2858_v7  ;;  %v3376_v9 = vrot.slane %v3375_v41, 4 }
 0x2f5   : > { %v2861_v17 = vrot.slane %v2860_v10, 2  ;;  %v3377_v34 = vadd.f32 %v3376_v9, %v3375_v41 }
 0x2f7   : > { %v2862_v44 = vadd.f32 %v2861_v17, %v2860_v10  ;;  %v3378_v60 = vrot.slane %v3377_v34, 2 }
 0x2f9   : > { %v3379_v62 = vadd.f32 %v3378_v60, %v3377_v34  ;;  %v2863_v59 = vrot.slane %v2862_v44, 1 }
 0x2fb   : > { %v3380_v22 = vrot.slane %v3379_v62, 1  ;;  %v2864_v56 = vadd.f32 %v2863_v59, %v2862_v44 }
 0x2fd   : > { %v3381_v37 = vadd.f32 %v3380_v22, %v3379_v62 }
 0x2ff   : > { %v3386_v3 = vsel %vm3385_vm1, %v3381_v37, 0.0 }
 0x300   : > { %v3387_v18 = vsel %vm3384_vm2, %v2864_v56, %v3386_v3 }
 0x301   : > { %3388 = vst [vmem:[%s248_s30] sm:$0xff] %v3387_v18 }
 0x302 PF: > { %s14_s14 = sadd.s32 1, %s6933_s14   ;;  %s8315_s12 = smov %s6929_s13 }
 0x303   : > { %p11_p5 = scmp.ge.s32.totalorder %s14_s14, 6   ;;  %s8316_s13 = smov %s8318_s15 }
 0x305   :  { %13 = sbr.rel (!%p11_p5) target bundleno = 2 (0x2), region = 73 }

// kernel: _lambda_.19
= control target key start
LH: loop header
LB: loop body
LE: loop exit
PB: predicated region body
PF: predicated region fallthrough
CT: control target
= control target key end

     0   :  { %9 = vsyncpa [#allocation3], 0  ;;  %s9130_s0 = inlined_call_operand.vmem [shape: bf16[1,8192,72], index: 0, kind: input, shape index: {}]   ;;  %s9131_s1 = inlined_call_operand.vmem [shape: bf16[1,72,128], index: 1, kind: input, shape index: {}]   ;;  %s9132_s2 = inlined_call_operand.vmem [shape: bf16[1,8192,128], index: 2, kind: output, shape index: {0}]   ;;  %s9133_s3 = inlined_call_operand.hbm [shape: f32[1,4,8,128], index: 3, kind: output, shape index: {1}]  }
   0x1   :  { %11 = vsyncpa [#allocation3 + $0x1], 0  ;;  %s7610_s12 = smov 0   ;;  %s7612_s13 = smov 0  }
   0x2   :  { %s7614_s14 = smov 0   ;;  %s7616_s15 = smov 0  }
   0x3   :  { %s7618_s16 = smov 0   ;;  %s7620_s17 = smov 0  }
   0x4 LB: > { %s5355_s18 = sadd.s32 4294967295, %s7587_s17   ;;  %s5356_s19 = sadd.s32 4294967294, %s7587_s17   ;;  %s7587_s17 = sphi %s7620_s17, %s17_s17   ;;  %s7583_s16 = sphi %s7618_s16, %s9332_s16   ;;  %s7579_s15 = sphi %s7616_s15, %s9331_s15   ;;  %s7575_s14 = sphi %s7614_s14, %s9330_s14   ;;  %s7571_s13 = sphi %s7612_s13, %s9329_s13   ;;  %s7567_s12 = sphi %s7610_s12, %s9328_s12  }
   0x5   : > { %s26_s20 = sadd.s32 1, %s7583_s16  ;;  %s120_s21 = sadd.s32 1, %s7575_s14 }
   0x6   : > { %p27_p0 = scmp.ge.s32.totalorder %s26_s20, 4  ;;  %p130_p1 = scmp.ne.s32.totalorder %s7575_s14, %s7571_s13 }
   0x7   : > { %p131_p2 = scmp.eq.s32.totalorder %s5355_s18, 3  ;;  %p136_p3 = scmp.ne.s32.totalorder %s7571_s13, %s7567_s12 }
   0x8   : > { %s9334_s20 = smov (%p27_p0, %s26_s20), 0  ;;  %p137_p5 = scmp.eq.s32.totalorder %s5356_s19, 3 }
   0x9   : > { %p7650_p4 = por %p131_p2, %p130_p1  ;;  %s116_s23 = ssub.s32 %s7583_s16, %s9334_s20 }
   0xa   : > { %p5360_p6 = scmp.ge.s32.totalorder %s7587_s17, 1  ;;  %p118_p7 = scmp.eq.s32.totalorder %s116_s23, 0 }
   0xb   : > { %p7657_p8 = por %p137_p5, %p136_p3  ;;  %p176_p9 = scmp.lt.s32.totalorder %s7587_s17, 5 }
   0xc   : > { %s7663_s25 = scalar_select %p118_p7, %s7575_s14, %s120_s21  }
   0xd   : > { %p177_p10 = pnand %p5360_p6, %p176_p9 }
   0xf   : > { %180 = sbr.rel (%p177_p10) target bundleno = 802 (0x322), region = 28 }
  0x16   : > { %v7376_v0 = vld [vmem:[%s9131_s1] sm:$0xff]   ;;  %v7377_v1 = vld [vmem:[%s9131_s1 + $0x8] sm:$0xff]   ;;  %s5362_s30 = sshll.u32 %s7579_s15, 8  ;;  %v7378_v2 = vld [vmem:[%s9131_s1 + $0x10] sm:$0xff]   ;;  %vm1176_vm0 = vcmask 588800   ;;  %vm1561_vm1 = vcmask 1043456  }
  0x17   : > { %7043 = vmatprep.subr.bf16.mxu0 %v7376_v0  ;;  %p221_p11 = scmp.lt.s32.totalorder %s5362_s30, 1023  ;;  %7309 = vmatprep.subr.bf16.mxu1 %v7376_v0  ;;  %v7379_v3 = vld [vmem:[%s9131_s1 + $0x18] sm:$0xff]   ;;  %v7380_v5 = vld [vmem:[%s9131_s1 + $0x20] ss:$0 sps:$4 sm:$0xff]   ;;  %s215_s27 = sand.u32 1, %s7571_s13  }
  0x18   : > { %7044 = vmatpush3.bf16.msra.mxu0 %v7376_v0  ;;  %7314 = vmatpush3.bf16.msra.mxu1 %v7376_v0  ;;  %v1563_v6 = vsel %vm1561_vm1, %v7380_v5, 0  ;;  %s5361_s28 = sshll.u32 %s215_s27, 3  ;;  %s5884_s29 = sshll.u32 %s7579_s15, 7 }
  0x19   : > { %7045 = vmatprep.subr.bf16.mxu0 %v7377_v1  ;;  %s9336_s30 = smov (!%p221_p11, %s5362_s30), 1023  ;;  %7310 = vmatprep.subr.bf16.mxu1 %v7377_v1  ;;  %s9083_s7 = scalar_lea.hbm %s9133_s3, %s5884_s29 }
  0x1a   : > { %s5363_s6 = sshll.u32 %s9336_s30, 2  ;;  %s217_s30 = scalar_lea.vmem [#allocation2], %s5361_s28 }
  0x1b   : > { %s7686_s11 = scalar_lea.vmem %s9130_s0, %s5363_s6  ;;  %s7857_s26 = scalar_lea.vmem %s9132_s2, %s5363_s6 }
  0x1c   : > { %7046 = vmatpush3.bf16.msra.mxu0 %v7377_v1  ;;  %7315 = vmatpush3.bf16.msra.mxu1 %v7377_v1  ;;  %v7381_v4 = vld [vmem:[%s7686_s11] sm:$0xff]   ;;  %v7382_v7 = vld [vmem:[%s7686_s11 + $0x8] sm:$0xff]   ;;  %v7383_v8 = vld [vmem:[%s7686_s11 + $0x10] sm:$0xff]   ;;  %s5228_s4 = sshll.u32 %s217_s30, 4  ;;  %s5209_s8 = scalar_lea.sflag [#allocation3], %s215_s27  ;;  %s9085_s4 = int_to_ptr.vmem [resolvable:$true] %s5228_s4 }
  0x1d   : > { %7047 = vmatprep.subr.bf16.mxu0 %v7378_v2  ;;  %7311 = vmatprep.subr.bf16.mxu1 %v7378_v2  ;;  %v7384_v9 = vld [vmem:[%s7686_s11 + $0x18] sm:$0xff]   ;;  %v7385_v10 = vld [vmem:[%s7686_s11 + $0x20] sm:$0xff]   ;;  %v7386_v11 = vld [vmem:[%s7686_s11 + $0x28] sm:$0xff]   ;;  %s7509_s15 = scalar_lea.vmem %s9085_s4, 128  ;;  %s7589_s9 = smov [#allocation2]  }
  0x1e   : > { %7053 = vmatprep.mubr.msk.bf16.mxu0 %vm1176_vm0, %v7381_v4  ;;  %v7387_v12 = vld [vmem:[%s7686_s11 + $0x30] sm:$0xff]   ;;  %v7388_v13 = vld [vmem:[%s7686_s11 + $0x38] sm:$0xff]   ;;  %v7389_v14 = vld [vmem:[%s7686_s11 + $0x40] sm:$0xff]   ;;  %p7510_p12 = scmp.ne.s32.totalorder %s9085_s4, %s7509_s15  ;;  %s7513_s10 = sshll.u32 %s7589_s9, 4  ;;  %s7514_s10 = int_to_ptr.vmem [resolvable:$false] %s7513_s10 }
  0x1f   : > { %v7390_v15 = vld [vmem:[%s7686_s11 + $0x48] sm:$0xff]   ;;  %v7391_v16 = vld [vmem:[%s7686_s11 + $0x50] sm:$0xff]   ;;  %v7392_v17 = vld [vmem:[%s7686_s11 + $0x58] sm:$0xff]   ;;  %p7516_p1 = scmp.lt.s32.totalorder %s9085_s4, %s7514_s10 }
  0x20   : > { %7048 = vmatpush3.bf16.msra.mxu0 %v7378_v2  ;;  %7316 = vmatpush3.bf16.msra.mxu1 %v7378_v2  ;;  %v7393_v18 = vld [vmem:[%s7686_s11 + $0x60] sm:$0xff]   ;;  %v7394_v19 = vld [vmem:[%s7686_s11 + $0x68] sm:$0xff]   ;;  %v7395_v20 = vld [vmem:[%s7686_s11 + $0x70] sm:$0xff]   ;;  %p7511_p13 = pnand %p7510_p12, %p7650_p4 }
  0x21   : > { %7049 = vmatprep.subr.bf16.mxu0 %v7379_v3  ;;  %7312 = vmatprep.subr.bf16.mxu1 %v7379_v3  ;;  %v7396_v21 = vld [vmem:[%s7686_s11 + $0x78] sm:$0xff]   ;;  %v7397_v22 = vld [vmem:[%s7686_s11 + $0x80] sm:$0xff]   ;;  %v7398_v23 = vld [vmem:[%s7686_s11 + $0x88] sm:$0xff]  }
  0x22   : > { %v7399_v24 = vld [vmem:[%s7686_s11 + $0x90] sm:$0xff]   ;;  %v7400_v25 = vld [vmem:[%s7686_s11 + $0x98] sm:$0xff]   ;;  %v7401_v26 = vld [vmem:[%s7686_s11 + $0xa0] sm:$0xff]   ;;  %p7512_p0 = pneg %p7511_p13 }
  0x23   : > { %v7402_v27 = vld [vmem:[%s7686_s11 + $0xa8] sm:$0xff]   ;;  %v7403_v28 = vld [vmem:[%s7686_s11 + $0xb0] sm:$0xff]   ;;  %v7404_v29 = vld [vmem:[%s7686_s11 + $0xb8] sm:$0xff]  }
  0x24   : > { %7050 = vmatpush3.bf16.msra.mxu0 %v7379_v3  ;;  %7317 = vmatpush3.bf16.msra.mxu1 %v7379_v3  ;;  %v7405_v30 = vld [vmem:[%s7686_s11 + $0xc0] sm:$0xff]   ;;  %v7406_v31 = vld [vmem:[%s7686_s11 + $0xc8] sm:$0xff]   ;;  %v7407_v32 = vld [vmem:[%s7686_s11 + $0xd0] sm:$0xff]  }
  0x25   : > { %7319 = vmatprep.subr.msk.bf16.mxu0 %vm1561_vm1, %v7380_v5  ;;  %7320 = vmatprep.subr.msk.bf16.mxu1 %vm1561_vm1, %v7380_v5  ;;  %v7408_v33 = vld [vmem:[%s7686_s11 + $0xd8] sm:$0xff]   ;;  %v7409_v34 = vld [vmem:[%s7686_s11 + $0xe0] sm:$0xff]   ;;  %v7410_v35 = vld [vmem:[%s7686_s11 + $0xe8] sm:$0xff]  }
  0x26   : > { %v7411_v36 = vld [vmem:[%s7686_s11 + $0xf0] sm:$0xff]   ;;  %v7412_v37 = vld [vmem:[%s7686_s11 + $0xf8] sm:$0xff]   ;;  %v7413_v38 = vld [vmem:[%s7686_s11 + $0x100] sm:$0xff]  }
  0x27   : > { %v7445_v39 = vld [vmem:[%s7686_s11 + $0x200] sm:$0xff]   ;;  %v7446_v40 = vld [vmem:[%s7686_s11 + $0x208] sm:$0xff]   ;;  %v7415_v42 = vld [vmem:[%s7686_s11 + $0x110] sm:$0xff]  }
  0x28   : > { %7052 = vmatpush3.bf16.msra.mxu0 %v1563_v6  ;;  %7318 = vmatpush3.bf16.msra.mxu1 %v1563_v6  ;;  %v7414_v41 = vld [vmem:[%s7686_s11 + $0x108] sm:$0xff]   ;;  %v7447_v43 = vld [vmem:[%s7686_s11 + $0x210] sm:$0xff]   ;;  %v7448_v44 = vld [vmem:[%s7686_s11 + $0x218] sm:$0xff]  }
  0x29   : > { %7181 = vmatprep.mubr.msk.bf16.mxu1 %vm1176_vm0, %v7445_v39  ;;  %v7416_v45 = vld [vmem:[%s7686_s11 + $0x118] sm:$0xff]   ;;  %v7417_v46 = vld [vmem:[%s7686_s11 + $0x120] sm:$0xff]   ;;  %v7450_v48 = vld [vmem:[%s7686_s11 + $0x228] sm:$0xff]  }
  0x2a   : > { %v7449_v47 = vld [vmem:[%s7686_s11 + $0x220] sm:$0xff]   ;;  %v7418_v49 = vld [vmem:[%s7686_s11 + $0x128] sm:$0xff]   ;;  %v7419_v50 = vld [vmem:[%s7686_s11 + $0x130] sm:$0xff]  }
  0x2b   : > { %7054 = vmatmul.mubr.msk.bf16.vlgmr.msra.gmra.mrb[0].mxu0 %vm1176_vm0, %v7382_v7  ;;  %7182 = vmatmul.mubr.msk.bf16.vlgmr.msra.gmra.mrb[0].mxu1 %vm1176_vm0, %v7446_v40  ;;  %v7451_v51 = vld [vmem:[%s7686_s11 + $0x230] sm:$0xff]   ;;  %v7452_v52 = vld [vmem:[%s7686_s11 + $0x238] sm:$0xff]   ;;  %v7421_v54 = vld [vmem:[%s7686_s11 + $0x140] sm:$0xff]  }
  0x2c   : > { %7057 = vmatprep.mubr.msk.bf16.mxu0 %vm1176_vm0, %v7383_v8  ;;  %7185 = vmatprep.mubr.msk.bf16.mxu1 %vm1176_vm0, %v7447_v43  ;;  %v7420_v53 = vld [vmem:[%s7686_s11 + $0x138] sm:$0xff]   ;;  %v7453_v55 = vld [vmem:[%s7686_s11 + $0x240] sm:$0xff]   ;;  %v7454_v56 = vld [vmem:[%s7686_s11 + $0x248] sm:$0xff]  }
  0x2d   : > { %v7422_v57 = vld [vmem:[%s7686_s11 + $0x148] sm:$0xff]   ;;  %v7423_v58 = vld [vmem:[%s7686_s11 + $0x150] sm:$0xff]   ;;  %v7456_v60 = vld [vmem:[%s7686_s11 + $0x258] sm:$0xff]  }
  0x2e   : > { %v7455_v59 = vld [vmem:[%s7686_s11 + $0x250] sm:$0xff]   ;;  %v7424_v61 = vld [vmem:[%s7686_s11 + $0x158] sm:$0xff]   ;;  %v7425_v62 = vld [vmem:[%s7686_s11 + $0x160] sm:$0xff]  }
  0x2f   : > { %v7457_v63 = vld [vmem:[%s7686_s11 + $0x260] sm:$0xff]   ;;  %v7458_v0 = vld [vmem:[%s7686_s11 + $0x268] sm:$0xff]   ;;  %v7427_v2 = vld [vmem:[%s7686_s11 + $0x170] sm:$0xff]  }
  0x30   : > { %v7426_v1 = vld [vmem:[%s7686_s11 + $0x168] sm:$0xff]   ;;  %v7459_v3 = vld [vmem:[%s7686_s11 + $0x270] sm:$0xff]   ;;  %v7460_v4 = vld [vmem:[%s7686_s11 + $0x278] sm:$0xff]  }
  0x31   : > { %v7428_v5 = vld [vmem:[%s7686_s11 + $0x178] sm:$0xff]   ;;  %v7429_v6 = vld [vmem:[%s7686_s11 + $0x180] sm:$0xff]   ;;  %v7462_v8 = vld [vmem:[%s7686_s11 + $0x288] sm:$0xff]  }
  0x32   : > { %v7461_v7 = vld [vmem:[%s7686_s11 + $0x280] sm:$0xff]  }
  0x33   : > { %7058 = vmatmul.mubr.msk.bf16.gmra.mrb[4].mxu0 %vm1176_vm0, %v7384_v9  ;;  %7186 = vmatmul.mubr.msk.bf16.gmra.mrb[4].mxu1 %vm1176_vm0, %v7448_v44  ;;  %v7430_v9 = vld [vmem:[%s7686_s11 + $0x188] sm:$0xff]  }
  0x34   : > { %7061 = vmatprep.mubr.msk.bf16.mxu0 %vm1176_vm0, %v7385_v10  ;;  %7189 = vmatprep.mubr.msk.bf16.mxu1 %vm1176_vm0, %v7449_v47  ;;  %v7431_v10 = vld [vmem:[%s7686_s11 + $0x190] sm:$0xff]  }
  0x3b   : > { %7062 = vmatmul.mubr.msk.bf16.gmra.mrb[8].mxu0 %vm1176_vm0, %v7386_v11  ;;  %7190 = vmatmul.mubr.msk.bf16.gmra.mrb[8].mxu1 %vm1176_vm0, %v7450_v48  ;;  %v7463_v11 = vld [vmem:[%s7686_s11 + $0x290] sm:$0xff]  }
  0x3c   : > { %7065 = vmatprep.mubr.msk.bf16.mxu0 %vm1176_vm0, %v7387_v12  ;;  %7193 = vmatprep.mubr.msk.bf16.mxu1 %vm1176_vm0, %v7451_v51  ;;  %v7464_v12 = vld [vmem:[%s7686_s11 + $0x298] sm:$0xff]   ;;  %v7439_v51 = vld [vmem:[%s7686_s11 + $0x1d0] sm:$0xff]  }
  0x43   : > { %7066 = vmatmul.mubr.msk.bf16.gmra.mrb[12].mxu0 %vm1176_vm0, %v7388_v13  ;;  %7194 = vmatmul.mubr.msk.bf16.gmra.mrb[12].mxu1 %vm1176_vm0, %v7452_v52  ;;  %v7432_v13 = vld [vmem:[%s7686_s11 + $0x198] sm:$0xff]  }
  0x44   : > { %7069 = vmatprep.mubr.msk.bf16.mxu0 %vm1176_vm0, %v7389_v14  ;;  %7197 = vmatprep.mubr.msk.bf16.mxu1 %vm1176_vm0, %v7453_v55  ;;  %v7433_v14 = vld [vmem:[%s7686_s11 + $0x1a0] sm:$0xff]  }
  0x4b   : > { %7070 = vmatmul.mubr.msk.bf16.gmra.mrb[16].mxu0 %vm1176_vm0, %v7390_v15  ;;  %7198 = vmatmul.mubr.msk.bf16.gmra.mrb[16].mxu1 %vm1176_vm0, %v7454_v56  ;;  %v7465_v15 = vld [vmem:[%s7686_s11 + $0x2a0] sm:$0xff]  }
  0x4c   : > { %7073 = vmatprep.mubr.msk.bf16.mxu0 %vm1176_vm0, %v7391_v16  ;;  %7201 = vmatprep.mubr.msk.bf16.mxu1 %vm1176_vm0, %v7455_v59  ;;  %v7466_v16 = vld [vmem:[%s7686_s11 + $0x2a8] sm:$0xff]  }
  0x53   : > { %7074 = vmatmul.mubr.msk.bf16.gmra.mrb[20].mxu0 %vm1176_vm0, %v7392_v17  ;;  %7202 = vmatmul.mubr.msk.bf16.gmra.mrb[20].mxu1 %vm1176_vm0, %v7456_v60  ;;  %v7434_v17 = vld [vmem:[%s7686_s11 + $0x1a8] sm:$0xff]  }
  0x54   : > { %7077 = vmatprep.mubr.msk.bf16.mxu0 %vm1176_vm0, %v7393_v18  ;;  %7205 = vmatprep.mubr.msk.bf16.mxu1 %vm1176_vm0, %v7457_v63  ;;  %v7435_v18 = vld [vmem:[%s7686_s11 + $0x1b0] sm:$0xff]  }
  0x5b   : > { %7078 = vmatmul.mubr.msk.bf16.gmra.mrb[24].mxu0 %vm1176_vm0, %v7394_v19  ;;  %7206 = vmatmul.mubr.msk.bf16.gmra.mrb[24].mxu1 %vm1176_vm0, %v7458_v0  ;;  %v7467_v19 = vld [vmem:[%s7686_s11 + $0x2b0] sm:$0xff]  }
  0x5c   : > { %7081 = vmatprep.mubr.msk.bf16.mxu0 %vm1176_vm0, %v7395_v20  ;;  %7209 = vmatprep.mubr.msk.bf16.mxu1 %vm1176_vm0, %v7459_v3 }
  0x63   : > { %7082 = vmatmul.mubr.msk.bf16.gmra.mrb[28].mxu0 %vm1176_vm0, %v7396_v21  ;;  %7210 = vmatmul.mubr.msk.bf16.gmra.mrb[28].mxu1 %vm1176_vm0, %v7460_v4  ;;  %v7468_v21 = vld [vmem:[%s7686_s11 + $0x2b8] sm:$0xff]  }
  0x64   : > { %7085 = vmatprep.mubr.msk.bf16.mxu0 %vm1176_vm0, %v7397_v22  ;;  %7213 = vmatprep.mubr.msk.bf16.mxu1 %vm1176_vm0, %v7461_v7 }
  0x6b   : > { %7086 = vmatmul.mubr.msk.bf16.gmra.mrb[32].mxu0 %vm1176_vm0, %v7398_v23  ;;  %7214 = vmatmul.mubr.msk.bf16.gmra.mrb[32].mxu1 %vm1176_vm0, %v7462_v8  ;;  %v7472_v8 = vld [vmem:[%s7686_s11 + $0x2d8] sm:$0xff]  }
  0x6c   : > { %7089 = vmatprep.mubr.msk.bf16.mxu0 %vm1176_vm0, %v7399_v24  ;;  %7217 = vmatprep.mubr.msk.bf16.mxu1 %vm1176_vm0, %v7463_v11  ;;  %v7436_v24 = vld [vmem:[%s7686_s11 + $0x1b8] sm:$0xff]  }
  0x6d   : > { %v7440_v11 = vld [vmem:[%s7686_s11 + $0x1d8] sm:$0xff]  }
  0x73   : > { %7090 = vmatmul.mubr.msk.bf16.gmra.mrb[36].mxu0 %vm1176_vm0, %v7400_v25  ;;  %7218 = vmatmul.mubr.msk.bf16.gmra.mrb[36].mxu1 %vm1176_vm0, %v7464_v12 }
  0x74   : > { %7093 = vmatprep.mubr.msk.bf16.mxu0 %vm1176_vm0, %v7401_v26  ;;  %7221 = vmatprep.mubr.msk.bf16.mxu1 %vm1176_vm0, %v7465_v15 }
  0x7b   : > { %7094 = vmatmul.mubr.msk.bf16.gmra.mrb[40].mxu0 %vm1176_vm0, %v7402_v27  ;;  %7222 = vmatmul.mubr.msk.bf16.gmra.mrb[40].mxu1 %vm1176_vm0, %v7466_v16  ;;  %v7437_v27 = vld [vmem:[%s7686_s11 + $0x1c0] sm:$0xff]  }
  0x7c   : > { %7097 = vmatprep.mubr.msk.bf16.mxu0 %vm1176_vm0, %v7403_v28  ;;  %7225 = vmatprep.mubr.msk.bf16.mxu1 %vm1176_vm0, %v7467_v19 }
  0x83   : > { %7098 = vmatmul.mubr.msk.bf16.gmra.mrb[44].mxu0 %vm1176_vm0, %v7404_v29  ;;  %7226 = vmatmul.mubr.msk.bf16.gmra.mrb[44].mxu1 %vm1176_vm0, %v7468_v21 }
  0x84   : > { %7101 = vmatprep.mubr.msk.bf16.mxu0 %vm1176_vm0, %v7405_v30 }
  0x8b   : > { %7102 = vmatmul.mubr.msk.bf16.gmra.mrb[48].mxu0 %vm1176_vm0, %v7406_v31 }
  0x8c   : > { %7105 = vmatprep.mubr.msk.bf16.mxu0 %vm1176_vm0, %v7407_v32 }
  0x93   : > { %7106 = vmatmul.mubr.msk.bf16.gmra.mrb[52].mxu0 %vm1176_vm0, %v7408_v33 }
  0x94   : > { %7109 = vmatprep.mubr.msk.bf16.mxu0 %vm1176_vm0, %v7409_v34 }
  0x9b   : > { %7110 = vmatmul.mubr.msk.bf16.gmra.mrb[56].mxu0 %vm1176_vm0, %v7410_v35 }
  0x9c   : > { %7113 = vmatprep.mubr.msk.bf16.mxu0 %vm1176_vm0, %v7411_v36  ;;  %v7469_v36 = vld [vmem:[%s7686_s11 + $0x2c0] sm:$0xff]  }
  0x9d   : > { %7229 = vmatprep.mubr.msk.bf16.mxu1 %vm1176_vm0, %v7469_v36 }
  0xa3   : > { %7114 = vmatmul.mubr.msk.bf16.gmra.mrb[60].mxu0 %vm1176_vm0, %v7412_v37 }
  0xa4   : > { %7117 = vmatprep.mubr.msk.bf16.mxu0 %vm1176_vm0, %v7413_v38 }
  0xab   : > { %7118 = vmatmul.mubr.msk.bf16.gmra.mrb[64].mxu0 %vm1176_vm0, %v7414_v41 }
  0xac   : > { %7121 = vmatprep.mubr.msk.bf16.mxu0 %vm1176_vm0, %v7415_v42  ;;  %v7470_v42 = vld [vmem:[%s7686_s11 + $0x2c8] sm:$0xff]  }
  0xad   : > { %7230 = vmatmul.mubr.msk.bf16.gmra.mrb[48].mxu1 %vm1176_vm0, %v7470_v42 }
  0xb3   : > { %7122 = vmatmul.mubr.msk.bf16.gmra.mrb[68].mxu0 %vm1176_vm0, %v7416_v45  ;;  %v7438_v45 = vld [vmem:[%s7686_s11 + $0x1c8] sm:$0xff]  }
  0xb4   : > { %7125 = vmatprep.mubr.msk.bf16.mxu0 %vm1176_vm0, %v7417_v46 }
  0xbb   : > { %7126 = vmatmul.mubr.msk.bf16.gmra.mrb[72].mxu0 %vm1176_vm0, %v7418_v49 }
  0xbc   : > { %7129 = vmatprep.mubr.msk.bf16.mxu0 %vm1176_vm0, %v7419_v50 }
  0xc3   : > { %7130 = vmatmul.mubr.msk.bf16.gmra.mrb[76].mxu0 %vm1176_vm0, %v7420_v53 }
  0xc4   : > { %7133 = vmatprep.mubr.msk.bf16.mxu0 %vm1176_vm0, %v7421_v54 }
  0xcb   : > { %7134 = vmatmul.mubr.msk.bf16.gmra.mrb[80].mxu0 %vm1176_vm0, %v7422_v57 }
  0xcc   : > { %7137 = vmatprep.mubr.msk.bf16.mxu0 %vm1176_vm0, %v7423_v58 }
  0xd3   : > { %7138 = vmatmul.mubr.msk.bf16.gmra.mrb[84].mxu0 %vm1176_vm0, %v7424_v61 }
  0xd4   : > { %7141 = vmatprep.mubr.msk.bf16.mxu0 %vm1176_vm0, %v7425_v62 }
  0xdb   : > { %7142 = vmatmul.mubr.msk.bf16.gmra.mrb[88].mxu0 %vm1176_vm0, %v7426_v1 }
  0xdc   : > { %7145 = vmatprep.mubr.msk.bf16.mxu0 %vm1176_vm0, %v7427_v2  ;;  %v7471_v2 = vld [vmem:[%s7686_s11 + $0x2d0] sm:$0xff]  }
  0xdd   : > { %7233 = vmatprep.mubr.msk.bf16.mxu1 %vm1176_vm0, %v7471_v2 }
  0xde   : > { %7234 = vmatmul.mubr.msk.bf16.gmra.mrb[52].mxu1 %vm1176_vm0, %v7472_v8 }
  0xe3   : > { %7146 = vmatmul.mubr.msk.bf16.gmra.mrb[92].mxu0 %vm1176_vm0, %v7428_v5 }
  0xe4   : > { %7149 = vmatprep.mubr.msk.bf16.mxu0 %vm1176_vm0, %v7429_v6 }
  0xeb   : > { %7150 = vmatmul.mubr.msk.bf16.gmra.mrb[96].mxu0 %vm1176_vm0, %v7430_v9 }
  0xec   : > { %7153 = vmatprep.mubr.msk.bf16.mxu0 %vm1176_vm0, %v7431_v10 }
  0xf3   : > { %7154 = vmatmul.mubr.msk.bf16.gmra.mrb[100].mxu0 %vm1176_vm0, %v7432_v13 }
  0xf4   : > { %7157 = vmatprep.mubr.msk.bf16.mxu0 %vm1176_vm0, %v7433_v14 }
  0xfb   : > { %7158 = vmatmul.mubr.msk.bf16.gmra.mrb[104].mxu0 %vm1176_vm0, %v7434_v17  ;;  %v7441_v17 = vld [vmem:[%s7686_s11 + $0x1e0] sm:$0xff]  }
  0xfc   : > { %7161 = vmatprep.mubr.msk.bf16.mxu0 %vm1176_vm0, %v7435_v18 }
  0xfe   : > { %v7055_v20 = vpop.f32.mrb[0].mxu0 }
  0xff   : > { %v2624_v22 = vmax.f32 %v7055_v20, 0.0  ;;  %v1599_v23 = vpop.f32.mrb[1].mxu0 }
 0x100   : > { %v2622_v25 = vmax.f32 %v1599_v23, 0.0  ;;  %v7056_v26 = vpop.f32.mrb[2].mxu0 }
 0x101   : > { %v2625_v28 = vmax.f32 %v7056_v26, 0.0  ;;  %v1602_v29 = vpop.f32.mrb[3].mxu0  ;;  %v2880_v32 = vmin.f32 %v2624_v22, 1.0 }
 0x102   : > { %v2878_v30 = vmin.f32 %v2622_v25, 1.0  ;;  %v2623_v31 = vmax.f32 %v1602_v29, 0.0 }
 0x103   : > { %v2881_v33 = vmin.f32 %v2625_v28, 1.0  ;;  %7162 = vmatmul.mubr.msk.bf16.gmra.mrb[108].mxu0 %vm1176_vm0, %v7436_v24  ;;  %v3397_v46 = vmul.f32 %v2880_v32, %v2880_v32 }
 0x104   : > { %v2879_v34 = vmin.f32 %v2623_v31, 1.0  ;;  %7165 = vmatprep.mubr.msk.bf16.mxu0 %vm1176_vm0, %v7437_v27  ;;  %v3395_v37 = vmul.f32 %v2878_v30, %v2878_v30 }
 0x105   : > { %v6151_v35 = vpack.c.bf16 %v2881_v33, %v2880_v32  ;;  %v3398_v52 = vmul.f32 %v2881_v33, %v2881_v33 }
 0x106   : > { %v3134_v38 = vadd.f32 %v2879_v34, %v2878_v30  ;;  %v3396_v39 = vmul.f32 %v2879_v34, %v2879_v34  ;;  %v6146_v40 = vpack.c.bf16 %v2879_v34, %v2878_v30  ;;  %v7059_v41 = vpop.f32.mrb[4].mxu0 }
 0x107   : > { %6783 = vst [vmem:[%s7857_s26 + $0x8] sm:$0xff] %v6151_v35   ;;  %v2628_v43 = vmax.f32 %v7059_v41, 0.0  ;;  %v1615_v44 = vpop.f32.mrb[5].mxu0  ;;  %v7442_v41 = vld [vmem:[%s7686_s11 + $0x1e8] sm:$0xff]  }
 0x108   : > { %v3135_v47 = vadd.f32 %v3134_v38, %v2880_v32  ;;  %v3651_v48 = vadd.f32 %v3396_v39, %v3395_v37  ;;  %6147 = vst [vmem:[%s7857_s26] sm:$0xff] %v6146_v40   ;;  %v2626_v49 = vmax.f32 %v1615_v44, 0.0  ;;  %v7060_v50 = vpop.f32.mrb[6].mxu0  ;;  %v7473_v32 = vld [vmem:[%s7686_s11 + $0x2e0] sm:$0xff]   ;;  %v7474_v38 = vld [vmem:[%s7686_s11 + $0x2e8] sm:$0xff]  }
 0x109   : > { %v2629_v53 = vmax.f32 %v7060_v50, 0.0  ;;  %v1618_v54 = vpop.f32.mrb[7].mxu0  ;;  %v2884_v59 = vmin.f32 %v2628_v43, 1.0  ;;  %7237 = vmatprep.mubr.msk.bf16.mxu1 %vm1176_vm0, %v7473_v32 }
 0x10a   : > { %v3136_v55 = vadd.f32 %v3135_v47, %v2881_v33  ;;  %v3652_v56 = vadd.f32 %v3651_v48, %v3397_v46  ;;  %v2882_v57 = vmin.f32 %v2626_v49, 1.0  ;;  %v2627_v58 = vmax.f32 %v1618_v54, 0.0  ;;  %v7443_v47 = vld [vmem:[%s7686_s11 + $0x1f0] sm:$0xff]   ;;  %7238 = vmatmul.mubr.msk.bf16.gmra.mrb[56].mxu1 %vm1176_vm0, %v7474_v38 }
 0x10b   : > { %v2885_v60 = vmin.f32 %v2629_v53, 1.0  ;;  %7166 = vmatmul.mubr.msk.bf16.gmra.mrb[112].mxu0 %vm1176_vm0, %v7438_v45  ;;  %v3401_v12 = vmul.f32 %v2884_v59, %v2884_v59 }
 0x10c   : > { %v3653_v61 = vadd.f32 %v3652_v56, %v3398_v52  ;;  %v3137_v62 = vadd.f32 %v3136_v55, %v2882_v57  ;;  %v3399_v63 = vmul.f32 %v2882_v57, %v2882_v57  ;;  %v2883_v0 = vmin.f32 %v2627_v58, 1.0  ;;  %7169 = vmatprep.mubr.msk.bf16.mxu0 %vm1176_vm0, %v7439_v51 }
 0x10d   : > { %v6161_v1 = vpack.c.bf16 %v2885_v60, %v2884_v59  ;;  %v3402_v18 = vmul.f32 %v2885_v60, %v2885_v60 }
 0x10e   : > { %v3654_v3 = vadd.f32 %v3653_v61, %v3399_v63  ;;  %v3138_v4 = vadd.f32 %v3137_v62, %v2883_v0  ;;  %v3400_v5 = vmul.f32 %v2883_v0, %v2883_v0  ;;  %v6156_v6 = vpack.c.bf16 %v2883_v0, %v2882_v57  ;;  %v7063_v7 = vpop.f32.mrb[8].mxu0  ;;  %v7475_v62 = vld [vmem:[%s7686_s11 + $0x2f0] sm:$0xff]  }
 0x10f   : > { %6785 = vst [vmem:[%s7857_s26 + $0x18] sm:$0xff] %v6161_v1   ;;  %v2632_v9 = vmax.f32 %v7063_v7, 0.0  ;;  %v1631_v10 = vpop.f32.mrb[9].mxu0  ;;  %v7444_v7 = vld [vmem:[%s7686_s11 + $0x1f8] sm:$0xff]   ;;  %7241 = vmatprep.mubr.msk.bf16.mxu1 %vm1176_vm0, %v7475_v62 }
 0x110   : > { %v3139_v13 = vadd.f32 %v3138_v4, %v2884_v59  ;;  %v3655_v14 = vadd.f32 %v3654_v3, %v3400_v5  ;;  %6784 = vst [vmem:[%s7857_s26 + $0x10] sm:$0xff] %v6156_v6   ;;  %v2630_v15 = vmax.f32 %v1631_v10, 0.0  ;;  %v7064_v16 = vpop.f32.mrb[10].mxu0  ;;  %v7476_v4 = vld [vmem:[%s7686_s11 + $0x2f8] sm:$0xff]  }
 0x111   : > { %v2633_v19 = vmax.f32 %v7064_v16, 0.0  ;;  %v1634_v20 = vpop.f32.mrb[11].mxu0  ;;  %v2888_v25 = vmin.f32 %v2632_v9, 1.0 }
 0x112   : > { %v3140_v21 = vadd.f32 %v3139_v13, %v2885_v60  ;;  %v3656_v22 = vadd.f32 %v3655_v14, %v3401_v12  ;;  %v2886_v23 = vmin.f32 %v2630_v15, 1.0  ;;  %v2631_v24 = vmax.f32 %v1634_v20, 0.0  ;;  %7242 = vmatmul.mubr.msk.bf16.gmra.mrb[60].mxu1 %vm1176_vm0, %v7476_v4 }
 0x113   : > { %v2889_v26 = vmin.f32 %v2633_v19, 1.0  ;;  %7170 = vmatmul.mubr.msk.bf16.gmra.mrb[116].mxu0 %vm1176_vm0, %v7440_v11  ;;  %v3405_v42 = vmul.f32 %v2888_v25, %v2888_v25 }
 0x114   : > { %v3657_v27 = vadd.f32 %v3656_v22, %v3402_v18  ;;  %v3141_v28 = vadd.f32 %v3140_v21, %v2886_v23  ;;  %v3403_v29 = vmul.f32 %v2886_v23, %v2886_v23  ;;  %v2887_v30 = vmin.f32 %v2631_v24, 1.0  ;;  %7173 = vmatprep.mubr.msk.bf16.mxu0 %vm1176_vm0, %v7441_v17 }
 0x115   : > { %v6171_v31 = vpack.c.bf16 %v2889_v26, %v2888_v25  ;;  %v3406_v48 = vmul.f32 %v2889_v26, %v2889_v26 }
 0x116   : > { %v3658_v33 = vadd.f32 %v3657_v27, %v3403_v29  ;;  %v3142_v34 = vadd.f32 %v3141_v28, %v2887_v30  ;;  %v3404_v35 = vmul.f32 %v2887_v30, %v2887_v30  ;;  %v6166_v36 = vpack.c.bf16 %v2887_v30, %v2886_v23  ;;  %v7067_v37 = vpop.f32.mrb[12].mxu0  ;;  %v7477_v27 = vld [vmem:[%s7686_s11 + $0x300] sm:$0xff]  }
 0x117   : > { %6787 = vst [vmem:[%s7857_s26 + $0x28] sm:$0xff] %v6171_v31   ;;  %v2636_v39 = vmax.f32 %v7067_v37, 0.0  ;;  %v1647_v40 = vpop.f32.mrb[13].mxu0  ;;  %7245 = vmatprep.mubr.msk.bf16.mxu1 %vm1176_vm0, %v7477_v27 }
 0x118   : > { %v3143_v43 = vadd.f32 %v3142_v34, %v2888_v25  ;;  %v3659_v44 = vadd.f32 %v3658_v33, %v3404_v35  ;;  %6786 = vst [vmem:[%s7857_s26 + $0x20] sm:$0xff] %v6166_v36   ;;  %v2634_v45 = vmax.f32 %v1647_v40, 0.0  ;;  %v7068_v46 = vpop.f32.mrb[14].mxu0  ;;  %v7478_v33 = vld [vmem:[%s7686_s11 + $0x308] sm:$0xff]  }
 0x119   : > { %v2637_v49 = vmax.f32 %v7068_v46, 0.0  ;;  %v1650_v50 = vpop.f32.mrb[15].mxu0  ;;  %v2892_v55 = vmin.f32 %v2636_v39, 1.0 }
 0x11a   : > { %v3144_v51 = vadd.f32 %v3143_v43, %v2889_v26  ;;  %v3660_v52 = vadd.f32 %v3659_v44, %v3405_v42  ;;  %v2890_v53 = vmin.f32 %v2634_v45, 1.0  ;;  %v2635_v54 = vmax.f32 %v1650_v50, 0.0  ;;  %7246 = vmatmul.mubr.msk.bf16.gmra.mrb[64].mxu1 %vm1176_vm0, %v7478_v33 }
 0x11b   : > { %v2893_v56 = vmin.f32 %v2637_v49, 1.0  ;;  %7174 = vmatmul.mubr.msk.bf16.gmra.mrb[120].mxu0 %vm1176_vm0, %v7442_v41  ;;  %v3409_v8 = vmul.f32 %v2892_v55, %v2892_v55 }
 0x11c   : > { %v3661_v57 = vadd.f32 %v3660_v52, %v3406_v48  ;;  %v3145_v58 = vadd.f32 %v3144_v51, %v2890_v53  ;;  %v3407_v59 = vmul.f32 %v2890_v53, %v2890_v53  ;;  %v2891_v60 = vmin.f32 %v2635_v54, 1.0  ;;  %7177 = vmatprep.mubr.msk.bf16.mxu0 %vm1176_vm0, %v7443_v47 }
 0x11d   : > { %v6181_v61 = vpack.c.bf16 %v2893_v56, %v2892_v55  ;;  %v3410_v13 = vmul.f32 %v2893_v56, %v2893_v56 }
 0x11e   : > { %v3662_v63 = vadd.f32 %v3661_v57, %v3407_v59  ;;  %v3146_v0 = vadd.f32 %v3145_v58, %v2891_v60  ;;  %v3408_v1 = vmul.f32 %v2891_v60, %v2891_v60  ;;  %v6176_v2 = vpack.c.bf16 %v2891_v60, %v2890_v53  ;;  %v7071_v3 = vpop.f32.mrb[16].mxu0 }
 0x11f   : > { %6789 = vst [vmem:[%s7857_s26 + $0x38] sm:$0xff] %v6181_v61   ;;  %v2640_v5 = vmax.f32 %v7071_v3, 0.0  ;;  %v1663_v6 = vpop.f32.mrb[17].mxu0  ;;  %v7480_v61 = vld [vmem:[%s7686_s11 + $0x318] sm:$0xff]  }
 0x120   : > { %v3147_v9 = vadd.f32 %v3146_v0, %v2892_v55  ;;  %v3663_v10 = vadd.f32 %v3662_v63, %v3408_v1  ;;  %6788 = vst [vmem:[%s7857_s26 + $0x30] sm:$0xff] %v6176_v2   ;;  %v2638_v11 = vmax.f32 %v1663_v6, 0.0  ;;  %v7072_v12 = vpop.f32.mrb[18].mxu0  ;;  %v7479_v55 = vld [vmem:[%s7686_s11 + $0x310] sm:$0xff]  }
 0x121   : > { %v2641_v14 = vmax.f32 %v7072_v12, 0.0  ;;  %v1666_v15 = vpop.f32.mrb[19].mxu0  ;;  %v2896_v20 = vmin.f32 %v2640_v5, 1.0  ;;  %7249 = vmatprep.mubr.msk.bf16.mxu1 %vm1176_vm0, %v7479_v55 }
 0x122   : > { %v3148_v16 = vadd.f32 %v3147_v9, %v2893_v56  ;;  %v3664_v17 = vadd.f32 %v3663_v10, %v3409_v8  ;;  %v2894_v18 = vmin.f32 %v2638_v11, 1.0  ;;  %v2639_v19 = vmax.f32 %v1666_v15, 0.0  ;;  %7250 = vmatmul.mubr.msk.bf16.gmra.mrb[68].mxu1 %vm1176_vm0, %v7480_v61 }
 0x123   : > { %v2897_v21 = vmin.f32 %v2641_v14, 1.0  ;;  %7178 = vmatmul.mubr.msk.bf16.gmra.mrb[124].mxu0 %vm1176_vm0, %v7444_v7  ;;  %v3413_v36 = vmul.f32 %v2896_v20, %v2896_v20 }
 0x124   : > { %v3665_v22 = vadd.f32 %v3664_v17, %v3410_v13  ;;  %v3149_v23 = vadd.f32 %v3148_v16, %v2894_v18  ;;  %v3411_v24 = vmul.f32 %v2894_v18, %v2894_v18  ;;  %v2895_v25 = vmin.f32 %v2639_v19, 1.0  ;;  %v7481_v19 = vld [vmem:[%s7686_s11 + $0x320] sm:$0xff]  }
 0x125   : > { %v6191_v26 = vpack.c.bf16 %v2897_v21, %v2896_v20  ;;  %v3414_v41 = vmul.f32 %v2897_v21, %v2897_v21  ;;  %7253 = vmatprep.mubr.msk.bf16.mxu1 %vm1176_vm0, %v7481_v19 }
 0x126   : > { %v3666_v28 = vadd.f32 %v3665_v22, %v3411_v24  ;;  %v3150_v29 = vadd.f32 %v3149_v23, %v2895_v25  ;;  %v3412_v30 = vmul.f32 %v2895_v25, %v2895_v25  ;;  %v6186_v31 = vpack.c.bf16 %v2895_v25, %v2894_v18  ;;  %v7075_v32 = vpop.f32.mrb[20].mxu0  ;;  %v7482_v25 = vld [vmem:[%s7686_s11 + $0x328] sm:$0xff]  }
 0x127   : > { %6791 = vst [vmem:[%s7857_s26 + $0x48] sm:$0xff] %v6191_v26   ;;  %v2644_v34 = vmax.f32 %v7075_v32, 0.0  ;;  %v1679_v35 = vpop.f32.mrb[21].mxu0 }
 0x128   : > { %v3151_v37 = vadd.f32 %v3150_v29, %v2896_v20  ;;  %v3667_v38 = vadd.f32 %v3666_v28, %v3412_v30  ;;  %6790 = vst [vmem:[%s7857_s26 + $0x40] sm:$0xff] %v6186_v31   ;;  %v2642_v39 = vmax.f32 %v1679_v35, 0.0  ;;  %v7076_v40 = vpop.f32.mrb[22].mxu0 }
 0x129   : > { %v2645_v42 = vmax.f32 %v7076_v40, 0.0  ;;  %v1682_v43 = vpop.f32.mrb[23].mxu0  ;;  %v2900_v48 = vmin.f32 %v2644_v34, 1.0 }
 0x12a   : > { %v3152_v44 = vadd.f32 %v3151_v37, %v2897_v21  ;;  %v3668_v45 = vadd.f32 %v3667_v38, %v3413_v36  ;;  %v2898_v46 = vmin.f32 %v2642_v39, 1.0  ;;  %v2643_v47 = vmax.f32 %v1682_v43, 0.0  ;;  %7254 = vmatmul.mubr.msk.bf16.gmra.mrb[72].mxu1 %vm1176_vm0, %v7482_v25 }
 0x12b   : > { %v2901_v49 = vmin.f32 %v2645_v42, 1.0  ;;  %v3417_v0 = vmul.f32 %v2900_v48, %v2900_v48 }
 0x12c   : > { %v3669_v50 = vadd.f32 %v3668_v45, %v3414_v41  ;;  %v3153_v51 = vadd.f32 %v3152_v44, %v2898_v46  ;;  %v3415_v52 = vmul.f32 %v2898_v46, %v2898_v46  ;;  %v2899_v53 = vmin.f32 %v2643_v47, 1.0  ;;  %v7483_v47 = vld [vmem:[%s7686_s11 + $0x330] sm:$0xff]  }
 0x12d   : > { %v6201_v54 = vpack.c.bf16 %v2901_v49, %v2900_v48  ;;  %v3418_v5 = vmul.f32 %v2901_v49, %v2901_v49  ;;  %7257 = vmatprep.mubr.msk.bf16.mxu1 %vm1176_vm0, %v7483_v47 }
 0x12e   : > { %v3670_v56 = vadd.f32 %v3669_v50, %v3415_v52  ;;  %v3154_v57 = vadd.f32 %v3153_v51, %v2899_v53  ;;  %v3416_v58 = vmul.f32 %v2899_v53, %v2899_v53  ;;  %v6196_v59 = vpack.c.bf16 %v2899_v53, %v2898_v46  ;;  %v7079_v60 = vpop.f32.mrb[24].mxu0  ;;  %v7484_v53 = vld [vmem:[%s7686_s11 + $0x338] sm:$0xff]  }
 0x12f   : > { %6793 = vst [vmem:[%s7857_s26 + $0x58] sm:$0xff] %v6201_v54   ;;  %v2648_v62 = vmax.f32 %v7079_v60, 0.0  ;;  %v1695_v63 = vpop.f32.mrb[25].mxu0 }
 0x130   : > { %v3155_v1 = vadd.f32 %v3154_v57, %v2900_v48  ;;  %v3671_v2 = vadd.f32 %v3670_v56, %v3416_v58  ;;  %6792 = vst [vmem:[%s7857_s26 + $0x50] sm:$0xff] %v6196_v59   ;;  %v2646_v3 = vmax.f32 %v1695_v63, 0.0  ;;  %v7080_v4 = vpop.f32.mrb[26].mxu0 }
 0x131   : > { %v2649_v6 = vmax.f32 %v7080_v4, 0.0  ;;  %v1698_v7 = vpop.f32.mrb[27].mxu0  ;;  %v2904_v12 = vmin.f32 %v2648_v62, 1.0 }
 0x132   : > { %v3156_v8 = vadd.f32 %v3155_v1, %v2901_v49  ;;  %v3672_v9 = vadd.f32 %v3671_v2, %v3417_v0  ;;  %v2902_v10 = vmin.f32 %v2646_v3, 1.0  ;;  %v2647_v11 = vmax.f32 %v1698_v7, 0.0  ;;  %7258 = vmatmul.mubr.msk.bf16.gmra.mrb[76].mxu1 %vm1176_vm0, %v7484_v53 }
 0x133   : > { %v2905_v13 = vmin.f32 %v2649_v6, 1.0  ;;  %v3421_v28 = vmul.f32 %v2904_v12, %v2904_v12 }
 0x134   : > { %v3673_v14 = vadd.f32 %v3672_v9, %v3418_v5  ;;  %v3157_v15 = vadd.f32 %v3156_v8, %v2902_v10  ;;  %v3419_v16 = vmul.f32 %v2902_v10, %v2902_v10  ;;  %v2903_v17 = vmin.f32 %v2647_v11, 1.0  ;;  %v7485_v11 = vld [vmem:[%s7686_s11 + $0x340] sm:$0xff]  }
 0x135   : > { %v6211_v18 = vpack.c.bf16 %v2905_v13, %v2904_v12  ;;  %v3422_v33 = vmul.f32 %v2905_v13, %v2905_v13  ;;  %7261 = vmatprep.mubr.msk.bf16.mxu1 %vm1176_vm0, %v7485_v11 }
 0x136   : > { %v3674_v20 = vadd.f32 %v3673_v14, %v3419_v16  ;;  %v3158_v21 = vadd.f32 %v3157_v15, %v2903_v17  ;;  %v3420_v22 = vmul.f32 %v2903_v17, %v2903_v17  ;;  %v6206_v23 = vpack.c.bf16 %v2903_v17, %v2902_v10  ;;  %v7083_v24 = vpop.f32.mrb[28].mxu0  ;;  %v7486_v17 = vld [vmem:[%s7686_s11 + $0x348] sm:$0xff]  }
 0x137   : > { %6795 = vst [vmem:[%s7857_s26 + $0x68] sm:$0xff] %v6211_v18   ;;  %v2652_v26 = vmax.f32 %v7083_v24, 0.0  ;;  %v1711_v27 = vpop.f32.mrb[29].mxu0 }
 0x138   : > { %v3159_v29 = vadd.f32 %v3158_v21, %v2904_v12  ;;  %v3675_v30 = vadd.f32 %v3674_v20, %v3420_v22  ;;  %6794 = vst [vmem:[%s7857_s26 + $0x60] sm:$0xff] %v6206_v23   ;;  %v2650_v31 = vmax.f32 %v1711_v27, 0.0  ;;  %v7084_v32 = vpop.f32.mrb[30].mxu0 }
 0x139   : > { %v2653_v34 = vmax.f32 %v7084_v32, 0.0  ;;  %v1714_v35 = vpop.f32.mrb[31].mxu0  ;;  %v2908_v40 = vmin.f32 %v2652_v26, 1.0 }
 0x13a   : > { %v3160_v36 = vadd.f32 %v3159_v29, %v2905_v13  ;;  %v3676_v37 = vadd.f32 %v3675_v30, %v3421_v28  ;;  %v2906_v38 = vmin.f32 %v2650_v31, 1.0  ;;  %v2651_v39 = vmax.f32 %v1714_v35, 0.0  ;;  %7262 = vmatmul.mubr.msk.bf16.gmra.mrb[80].mxu1 %vm1176_vm0, %v7486_v17 }
 0x13b   : > { %v2909_v41 = vmin.f32 %v2653_v34, 1.0  ;;  %v3425_v56 = vmul.f32 %v2908_v40, %v2908_v40 }
 0x13c   : > { %v3677_v42 = vadd.f32 %v3676_v37, %v3422_v33  ;;  %v3161_v43 = vadd.f32 %v3160_v36, %v2906_v38  ;;  %v3423_v44 = vmul.f32 %v2906_v38, %v2906_v38  ;;  %v2907_v45 = vmin.f32 %v2651_v39, 1.0  ;;  %v7487_v39 = vld [vmem:[%s7686_s11 + $0x350] sm:$0xff]  }
 0x13d   : > { %v6221_v46 = vpack.c.bf16 %v2909_v41, %v2908_v40  ;;  %v3426_v61 = vmul.f32 %v2909_v41, %v2909_v41  ;;  %7265 = vmatprep.mubr.msk.bf16.mxu1 %vm1176_vm0, %v7487_v39 }
 0x13e   : > { %v3678_v48 = vadd.f32 %v3677_v42, %v3423_v44  ;;  %v3162_v49 = vadd.f32 %v3161_v43, %v2907_v45  ;;  %v3424_v50 = vmul.f32 %v2907_v45, %v2907_v45  ;;  %v6216_v51 = vpack.c.bf16 %v2907_v45, %v2906_v38  ;;  %v7087_v52 = vpop.f32.mrb[32].mxu0  ;;  %v7488_v45 = vld [vmem:[%s7686_s11 + $0x358] sm:$0xff]  }
 0x13f   : > { %6797 = vst [vmem:[%s7857_s26 + $0x78] sm:$0xff] %v6221_v46   ;;  %v2656_v54 = vmax.f32 %v7087_v52, 0.0  ;;  %v1727_v55 = vpop.f32.mrb[33].mxu0 }
 0x140   : > { %v3163_v57 = vadd.f32 %v3162_v49, %v2908_v40  ;;  %v3679_v58 = vadd.f32 %v3678_v48, %v3424_v50  ;;  %6796 = vst [vmem:[%s7857_s26 + $0x70] sm:$0xff] %v6216_v51   ;;  %v2654_v59 = vmax.f32 %v1727_v55, 0.0  ;;  %v7088_v60 = vpop.f32.mrb[34].mxu0 }
 0x141   : > { %v2657_v62 = vmax.f32 %v7088_v60, 0.0  ;;  %v1730_v63 = vpop.f32.mrb[35].mxu0  ;;  %v2912_v4 = vmin.f32 %v2656_v54, 1.0 }
 0x142   : > { %v3164_v0 = vadd.f32 %v3163_v57, %v2909_v41  ;;  %v3680_v1 = vadd.f32 %v3679_v58, %v3425_v56  ;;  %v2910_v2 = vmin.f32 %v2654_v59, 1.0  ;;  %v2655_v3 = vmax.f32 %v1730_v63, 0.0  ;;  %7266 = vmatmul.mubr.msk.bf16.gmra.mrb[84].mxu1 %vm1176_vm0, %v7488_v45 }
 0x143   : > { %v2913_v5 = vmin.f32 %v2657_v62, 1.0  ;;  %v3429_v20 = vmul.f32 %v2912_v4, %v2912_v4 }
 0x144   : > { %v3681_v6 = vadd.f32 %v3680_v1, %v3426_v61  ;;  %v3165_v7 = vadd.f32 %v3164_v0, %v2910_v2  ;;  %v3427_v8 = vmul.f32 %v2910_v2, %v2910_v2  ;;  %v2911_v9 = vmin.f32 %v2655_v3, 1.0  ;;  %v7489_v3 = vld [vmem:[%s7686_s11 + $0x360] sm:$0xff]  }
 0x145   : > { %v6231_v10 = vpack.c.bf16 %v2913_v5, %v2912_v4  ;;  %v3430_v25 = vmul.f32 %v2913_v5, %v2913_v5  ;;  %7269 = vmatprep.mubr.msk.bf16.mxu1 %vm1176_vm0, %v7489_v3 }
 0x146   : > { %v3682_v12 = vadd.f32 %v3681_v6, %v3427_v8  ;;  %v3166_v13 = vadd.f32 %v3165_v7, %v2911_v9  ;;  %v3428_v14 = vmul.f32 %v2911_v9, %v2911_v9  ;;  %v6226_v15 = vpack.c.bf16 %v2911_v9, %v2910_v2  ;;  %v7091_v16 = vpop.f32.mrb[36].mxu0  ;;  %v7490_v9 = vld [vmem:[%s7686_s11 + $0x368] sm:$0xff]  }
 0x147   : > { %6799 = vst [vmem:[%s7857_s26 + $0x88] sm:$0xff] %v6231_v10   ;;  %v2660_v18 = vmax.f32 %v7091_v16, 0.0  ;;  %v1743_v19 = vpop.f32.mrb[37].mxu0 }
 0x148   : > { %v3167_v21 = vadd.f32 %v3166_v13, %v2912_v4  ;;  %v3683_v22 = vadd.f32 %v3682_v12, %v3428_v14  ;;  %6798 = vst [vmem:[%s7857_s26 + $0x80] sm:$0xff] %v6226_v15   ;;  %v2658_v23 = vmax.f32 %v1743_v19, 0.0  ;;  %v7092_v24 = vpop.f32.mrb[38].mxu0 }
 0x149   : > { %v2661_v26 = vmax.f32 %v7092_v24, 0.0  ;;  %v1746_v27 = vpop.f32.mrb[39].mxu0  ;;  %v2916_v32 = vmin.f32 %v2660_v18, 1.0 }
 0x14a   : > { %v3168_v28 = vadd.f32 %v3167_v21, %v2913_v5  ;;  %v3684_v29 = vadd.f32 %v3683_v22, %v3429_v20  ;;  %v2914_v30 = vmin.f32 %v2658_v23, 1.0  ;;  %v2659_v31 = vmax.f32 %v1746_v27, 0.0  ;;  %7270 = vmatmul.mubr.msk.bf16.gmra.mrb[88].mxu1 %vm1176_vm0, %v7490_v9 }
 0x14b   : > { %v2917_v33 = vmin.f32 %v2661_v26, 1.0  ;;  %v3433_v48 = vmul.f32 %v2916_v32, %v2916_v32 }
 0x14c   : > { %v3685_v34 = vadd.f32 %v3684_v29, %v3430_v25  ;;  %v3169_v35 = vadd.f32 %v3168_v28, %v2914_v30  ;;  %v3431_v36 = vmul.f32 %v2914_v30, %v2914_v30  ;;  %v2915_v37 = vmin.f32 %v2659_v31, 1.0  ;;  %v7491_v31 = vld [vmem:[%s7686_s11 + $0x370] sm:$0xff]  }
 0x14d   : > { %v6241_v38 = vpack.c.bf16 %v2917_v33, %v2916_v32  ;;  %v3434_v53 = vmul.f32 %v2917_v33, %v2917_v33  ;;  %7273 = vmatprep.mubr.msk.bf16.mxu1 %vm1176_vm0, %v7491_v31 }
 0x14e   : > { %v3686_v40 = vadd.f32 %v3685_v34, %v3431_v36  ;;  %v3170_v41 = vadd.f32 %v3169_v35, %v2915_v37  ;;  %v3432_v42 = vmul.f32 %v2915_v37, %v2915_v37  ;;  %v6236_v43 = vpack.c.bf16 %v2915_v37, %v2914_v30  ;;  %v7095_v44 = vpop.f32.mrb[40].mxu0  ;;  %v7492_v37 = vld [vmem:[%s7686_s11 + $0x378] sm:$0xff]  }
 0x14f   : > { %6801 = vst [vmem:[%s7857_s26 + $0x98] sm:$0xff] %v6241_v38   ;;  %v2664_v46 = vmax.f32 %v7095_v44, 0.0  ;;  %v1759_v47 = vpop.f32.mrb[41].mxu0 }
 0x150   : > { %v3171_v49 = vadd.f32 %v3170_v41, %v2916_v32  ;;  %v3687_v50 = vadd.f32 %v3686_v40, %v3432_v42  ;;  %6800 = vst [vmem:[%s7857_s26 + $0x90] sm:$0xff] %v6236_v43   ;;  %v2662_v51 = vmax.f32 %v1759_v47, 0.0  ;;  %v7096_v52 = vpop.f32.mrb[42].mxu0 }
 0x151   : > { %v2665_v54 = vmax.f32 %v7096_v52, 0.0  ;;  %v1762_v55 = vpop.f32.mrb[43].mxu0  ;;  %v2920_v60 = vmin.f32 %v2664_v46, 1.0 }
 0x152   : > { %v3172_v56 = vadd.f32 %v3171_v49, %v2917_v33  ;;  %v3688_v57 = vadd.f32 %v3687_v50, %v3433_v48  ;;  %v2918_v58 = vmin.f32 %v2662_v51, 1.0  ;;  %v2663_v59 = vmax.f32 %v1762_v55, 0.0  ;;  %7274 = vmatmul.mubr.msk.bf16.gmra.mrb[92].mxu1 %vm1176_vm0, %v7492_v37 }
 0x153   : > { %v2921_v61 = vmin.f32 %v2665_v54, 1.0  ;;  %v3437_v12 = vmul.f32 %v2920_v60, %v2920_v60 }
 0x154   : > { %v3689_v62 = vadd.f32 %v3688_v57, %v3434_v53  ;;  %v3173_v63 = vadd.f32 %v3172_v56, %v2918_v58  ;;  %v3435_v0 = vmul.f32 %v2918_v58, %v2918_v58  ;;  %v2919_v1 = vmin.f32 %v2663_v59, 1.0  ;;  %v7493_v59 = vld [vmem:[%s7686_s11 + $0x380] sm:$0xff]  }
 0x155   : > { %v6251_v2 = vpack.c.bf16 %v2921_v61, %v2920_v60  ;;  %v3438_v17 = vmul.f32 %v2921_v61, %v2921_v61  ;;  %7277 = vmatprep.mubr.msk.bf16.mxu1 %vm1176_vm0, %v7493_v59 }
 0x156   : > { %v3690_v4 = vadd.f32 %v3689_v62, %v3435_v0  ;;  %v3174_v5 = vadd.f32 %v3173_v63, %v2919_v1  ;;  %v3436_v6 = vmul.f32 %v2919_v1, %v2919_v1  ;;  %v6246_v7 = vpack.c.bf16 %v2919_v1, %v2918_v58  ;;  %v7099_v8 = vpop.f32.mrb[44].mxu0  ;;  %v7494_v1 = vld [vmem:[%s7686_s11 + $0x388] sm:$0xff]  }
 0x157   : > { %6803 = vst [vmem:[%s7857_s26 + $0xa8] sm:$0xff] %v6251_v2   ;;  %v2668_v10 = vmax.f32 %v7099_v8, 0.0  ;;  %v1775_v11 = vpop.f32.mrb[45].mxu0 }
 0x158   : > { %v3175_v13 = vadd.f32 %v3174_v5, %v2920_v60  ;;  %v3691_v14 = vadd.f32 %v3690_v4, %v3436_v6  ;;  %6802 = vst [vmem:[%s7857_s26 + $0xa0] sm:$0xff] %v6246_v7   ;;  %v2666_v15 = vmax.f32 %v1775_v11, 0.0  ;;  %v7100_v16 = vpop.f32.mrb[46].mxu0 }
 0x159   : > { %v2669_v18 = vmax.f32 %v7100_v16, 0.0  ;;  %v1778_v19 = vpop.f32.mrb[47].mxu0  ;;  %v2924_v24 = vmin.f32 %v2668_v10, 1.0 }
 0x15a   : > { %v3176_v20 = vadd.f32 %v3175_v13, %v2921_v61  ;;  %v3692_v21 = vadd.f32 %v3691_v14, %v3437_v12  ;;  %v2922_v22 = vmin.f32 %v2666_v15, 1.0  ;;  %v2667_v23 = vmax.f32 %v1778_v19, 0.0  ;;  %7278 = vmatmul.mubr.msk.bf16.gmra.mrb[96].mxu1 %vm1176_vm0, %v7494_v1 }
 0x15b   : > { %v2925_v25 = vmin.f32 %v2669_v18, 1.0  ;;  %v3441_v40 = vmul.f32 %v2924_v24, %v2924_v24 }
 0x15c   : > { %v3693_v26 = vadd.f32 %v3692_v21, %v3438_v17  ;;  %v3177_v27 = vadd.f32 %v3176_v20, %v2922_v22  ;;  %v3439_v28 = vmul.f32 %v2922_v22, %v2922_v22  ;;  %v2923_v29 = vmin.f32 %v2667_v23, 1.0  ;;  %v7495_v23 = vld [vmem:[%s7686_s11 + $0x390] sm:$0xff]  }
 0x15d   : > { %v6261_v30 = vpack.c.bf16 %v2925_v25, %v2924_v24  ;;  %v3442_v45 = vmul.f32 %v2925_v25, %v2925_v25  ;;  %7281 = vmatprep.mubr.msk.bf16.mxu1 %vm1176_vm0, %v7495_v23 }
 0x15e   : > { %v3694_v32 = vadd.f32 %v3693_v26, %v3439_v28  ;;  %v3178_v33 = vadd.f32 %v3177_v27, %v2923_v29  ;;  %v3440_v34 = vmul.f32 %v2923_v29, %v2923_v29  ;;  %v6256_v35 = vpack.c.bf16 %v2923_v29, %v2922_v22  ;;  %v7103_v36 = vpop.f32.mrb[48].mxu0  ;;  %v7496_v29 = vld [vmem:[%s7686_s11 + $0x398] sm:$0xff]  }
 0x15f   : > { %6805 = vst [vmem:[%s7857_s26 + $0xb8] sm:$0xff] %v6261_v30   ;;  %v2672_v38 = vmax.f32 %v7103_v36, 0.0  ;;  %v1791_v39 = vpop.f32.mrb[49].mxu0 }
 0x160   : > { %v3179_v41 = vadd.f32 %v3178_v33, %v2924_v24  ;;  %v3695_v42 = vadd.f32 %v3694_v32, %v3440_v34  ;;  %6804 = vst [vmem:[%s7857_s26 + $0xb0] sm:$0xff] %v6256_v35   ;;  %v2670_v43 = vmax.f32 %v1791_v39, 0.0  ;;  %v7104_v44 = vpop.f32.mrb[50].mxu0 }
 0x161   : > { %v2673_v46 = vmax.f32 %v7104_v44, 0.0  ;;  %v1794_v47 = vpop.f32.mrb[51].mxu0  ;;  %v2928_v52 = vmin.f32 %v2672_v38, 1.0 }
 0x162   : > { %v3180_v48 = vadd.f32 %v3179_v41, %v2925_v25  ;;  %v3696_v49 = vadd.f32 %v3695_v42, %v3441_v40  ;;  %v2926_v50 = vmin.f32 %v2670_v43, 1.0  ;;  %v2671_v51 = vmax.f32 %v1794_v47, 0.0  ;;  %7282 = vmatmul.mubr.msk.bf16.gmra.mrb[100].mxu1 %vm1176_vm0, %v7496_v29 }
 0x163   : > { %v2929_v53 = vmin.f32 %v2673_v46, 1.0  ;;  %v3445_v4 = vmul.f32 %v2928_v52, %v2928_v52 }
 0x164   : > { %v3697_v54 = vadd.f32 %v3696_v49, %v3442_v45  ;;  %v3181_v55 = vadd.f32 %v3180_v48, %v2926_v50  ;;  %v3443_v56 = vmul.f32 %v2926_v50, %v2926_v50  ;;  %v2927_v57 = vmin.f32 %v2671_v51, 1.0  ;;  %v7497_v51 = vld [vmem:[%s7686_s11 + $0x3a0] sm:$0xff]  }
 0x165   : > { %v6271_v58 = vpack.c.bf16 %v2929_v53, %v2928_v52  ;;  %v3446_v9 = vmul.f32 %v2929_v53, %v2929_v53  ;;  %7285 = vmatprep.mubr.msk.bf16.mxu1 %vm1176_vm0, %v7497_v51 }
 0x166   : > { %v3698_v60 = vadd.f32 %v3697_v54, %v3443_v56  ;;  %v3182_v61 = vadd.f32 %v3181_v55, %v2927_v57  ;;  %v3444_v62 = vmul.f32 %v2927_v57, %v2927_v57  ;;  %v6266_v63 = vpack.c.bf16 %v2927_v57, %v2926_v50  ;;  %v7107_v0 = vpop.f32.mrb[52].mxu0  ;;  %v7498_v57 = vld [vmem:[%s7686_s11 + $0x3a8] sm:$0xff]  }
 0x167   : > { %6807 = vst [vmem:[%s7857_s26 + $0xc8] sm:$0xff] %v6271_v58   ;;  %v2676_v2 = vmax.f32 %v7107_v0, 0.0  ;;  %v1807_v3 = vpop.f32.mrb[53].mxu0 }
 0x168   : > { %v3183_v5 = vadd.f32 %v3182_v61, %v2928_v52  ;;  %v3699_v6 = vadd.f32 %v3698_v60, %v3444_v62  ;;  %6806 = vst [vmem:[%s7857_s26 + $0xc0] sm:$0xff] %v6266_v63   ;;  %v2674_v7 = vmax.f32 %v1807_v3, 0.0  ;;  %v7108_v8 = vpop.f32.mrb[54].mxu0 }
 0x169   : > { %v2677_v10 = vmax.f32 %v7108_v8, 0.0  ;;  %v1810_v11 = vpop.f32.mrb[55].mxu0  ;;  %v2932_v16 = vmin.f32 %v2676_v2, 1.0 }
 0x16a   : > { %v3184_v12 = vadd.f32 %v3183_v5, %v2929_v53  ;;  %v3700_v13 = vadd.f32 %v3699_v6, %v3445_v4  ;;  %v2930_v14 = vmin.f32 %v2674_v7, 1.0  ;;  %v2675_v15 = vmax.f32 %v1810_v11, 0.0  ;;  %7286 = vmatmul.mubr.msk.bf16.gmra.mrb[104].mxu1 %vm1176_vm0, %v7498_v57 }
 0x16b   : > { %v2933_v17 = vmin.f32 %v2677_v10, 1.0  ;;  %v3449_v32 = vmul.f32 %v2932_v16, %v2932_v16  ;;  %v7183_v10 = vpop.f32.mrb[0].mxu1 }
 0x16c   : > { %v3701_v18 = vadd.f32 %v3700_v13, %v3446_v9  ;;  %v3185_v19 = vadd.f32 %v3184_v12, %v2930_v14  ;;  %v3447_v20 = vmul.f32 %v2930_v14, %v2930_v14  ;;  %v2931_v21 = vmin.f32 %v2675_v15, 1.0  ;;  %v2111_v15 = vpop.f32.mrb[1].mxu1 }
 0x16d   : > { %v6281_v22 = vpack.c.bf16 %v2933_v17, %v2932_v16  ;;  %v3450_v37 = vmul.f32 %v2933_v17, %v2933_v17  ;;  %v2750_v29 = vmax.f32 %v2111_v15, 0.0 }
 0x16e   : > { %v3702_v24 = vadd.f32 %v3701_v18, %v3447_v20  ;;  %v3186_v25 = vadd.f32 %v3185_v19, %v2931_v21  ;;  %v3448_v26 = vmul.f32 %v2931_v21, %v2931_v21  ;;  %v6276_v27 = vpack.c.bf16 %v2931_v21, %v2930_v14  ;;  %v7111_v28 = vpop.f32.mrb[56].mxu0  ;;  %v7499_v18 = vld [vmem:[%s7686_s11 + $0x3b0] sm:$0xff]  }
 0x16f   : > { %6809 = vst [vmem:[%s7857_s26 + $0xd8] sm:$0xff] %v6281_v22   ;;  %v2680_v30 = vmax.f32 %v7111_v28, 0.0  ;;  %v1823_v31 = vpop.f32.mrb[57].mxu0  ;;  %v2752_v28 = vmax.f32 %v7183_v10, 0.0  ;;  %7289 = vmatprep.mubr.msk.bf16.mxu1 %vm1176_vm0, %v7499_v18 }
 0x170   : > { %v3187_v33 = vadd.f32 %v3186_v25, %v2932_v16  ;;  %v3703_v34 = vadd.f32 %v3702_v24, %v3448_v26  ;;  %6808 = vst [vmem:[%s7857_s26 + $0xd0] sm:$0xff] %v6276_v27   ;;  %v2678_v35 = vmax.f32 %v1823_v31, 0.0  ;;  %v7112_v36 = vpop.f32.mrb[58].mxu0  ;;  %v7500_v25 = vld [vmem:[%s7686_s11 + $0x3b8] sm:$0xff]  }
 0x171   : > { %v2681_v38 = vmax.f32 %v7112_v36, 0.0  ;;  %v1826_v39 = vpop.f32.mrb[59].mxu0  ;;  %v2936_v44 = vmin.f32 %v2680_v30, 1.0 }
 0x172   : > { %v3188_v40 = vadd.f32 %v3187_v33, %v2933_v17  ;;  %v3704_v41 = vadd.f32 %v3703_v34, %v3449_v32  ;;  %v2934_v42 = vmin.f32 %v2678_v35, 1.0  ;;  %v2679_v43 = vmax.f32 %v1826_v39, 0.0  ;;  %v7184_v17 = vpop.f32.mrb[2].mxu1  ;;  %7290 = vmatmul.mubr.msk.bf16.gmra.mrb[108].mxu1 %vm1176_vm0, %v7500_v25 }
 0x173   : > { %v2937_v45 = vmin.f32 %v2681_v38, 1.0  ;;  %v3453_v60 = vmul.f32 %v2936_v44, %v2936_v44  ;;  %v2114_v24 = vpop.f32.mrb[3].mxu1  ;;  %v2753_v38 = vmax.f32 %v7184_v17, 0.0 }
 0x174   : > { %v3705_v46 = vadd.f32 %v3704_v41, %v3450_v37  ;;  %v3189_v47 = vadd.f32 %v3188_v40, %v2934_v42  ;;  %v3451_v48 = vmul.f32 %v2934_v42, %v2934_v42  ;;  %v2935_v49 = vmin.f32 %v2679_v43, 1.0 }
 0x175   : > { %v6291_v50 = vpack.c.bf16 %v2937_v45, %v2936_v44  ;;  %v3454_v1 = vmul.f32 %v2937_v45, %v2937_v45  ;;  %v2751_v39 = vmax.f32 %v2114_v24, 0.0 }
 0x176   : > { %v3706_v52 = vadd.f32 %v3705_v46, %v3451_v48  ;;  %v3190_v53 = vadd.f32 %v3189_v47, %v2935_v49  ;;  %v3452_v54 = vmul.f32 %v2935_v49, %v2935_v49  ;;  %v6286_v55 = vpack.c.bf16 %v2935_v49, %v2934_v42  ;;  %v7115_v56 = vpop.f32.mrb[60].mxu0  ;;  %v7974_v48 = vpop.f32.mrb[4].mxu1 }
 0x177   : > { %6811 = vst [vmem:[%s7857_s26 + $0xe8] sm:$0xff] %v6291_v50   ;;  %v2684_v58 = vmax.f32 %v7115_v56, 0.0  ;;  %v1839_v59 = vpop.f32.mrb[61].mxu0  ;;  %v7970_v46 = vmin.f32 %v2752_v28, 1.0  ;;  %v7972_v47 = vmin.f32 %v2750_v29, 1.0  ;;  %v7980_v56 = vmin.f32 %v2751_v39, 1.0 }
 0x178   : > { %v3191_v61 = vadd.f32 %v3190_v53, %v2936_v44  ;;  %v3707_v62 = vadd.f32 %v3706_v52, %v3452_v54  ;;  %6810 = vst [vmem:[%s7857_s26 + $0xe0] sm:$0xff] %v6286_v55   ;;  %v2682_v63 = vmax.f32 %v1839_v59, 0.0  ;;  %v7116_v0 = vpop.f32.mrb[62].mxu0  ;;  %v7976_v53 = vpop.f32.mrb[5].mxu1  ;;  %v7978_v55 = vmin.f32 %v2753_v38, 1.0  ;;  %v7504_v38 = vld [vmem:[%s7686_s11 + $0x3d8] sm:$0xff]  }
 0x179   : > { %v2685_v2 = vmax.f32 %v7116_v0, 0.0  ;;  %v1842_v3 = vpop.f32.mrb[63].mxu0  ;;  %v2940_v8 = vmin.f32 %v2684_v58, 1.0  ;;  %v7982_v57 = vpop.f32.mrb[6].mxu1  ;;  %v7501_v58 = vld [vmem:[%s7686_s11 + $0x3c0] sm:$0xff]   ;;  %v6466_v10 = vpack.c.bf16 %v7980_v56, %v7972_v47 }
 0x17a   : > { %v3192_v4 = vadd.f32 %v3191_v61, %v2937_v45  ;;  %v3708_v5 = vadd.f32 %v3707_v62, %v3453_v60  ;;  %v2938_v6 = vmin.f32 %v2682_v63, 1.0  ;;  %v2683_v7 = vmax.f32 %v1842_v3, 0.0  ;;  %v7985_v0 = vpop.f32.mrb[7].mxu1  ;;  %7293 = vmatprep.mubr.msk.bf16.mxu1 %vm1176_vm0, %v7501_v58 }
 0x17b   : > { %v2941_v9 = vmin.f32 %v2685_v2, 1.0  ;;  %v3457_v30 = vmul.f32 %v2940_v8, %v2940_v8  ;;  %6846 = vst [vmem:[%s7857_s26 + $0x200] sm:$0xff] %v6466_v10  }
 0x17c   : > { %v3709_v11 = vadd.f32 %v3708_v5, %v3454_v1  ;;  %v3193_v12 = vadd.f32 %v3192_v4, %v2938_v6  ;;  %v3455_v13 = vmul.f32 %v2938_v6, %v2938_v6  ;;  %v2939_v14 = vmin.f32 %v2683_v7, 1.0  ;;  %v7502_v1 = vld [vmem:[%s7686_s11 + $0x3c8] sm:$0xff]  }
 0x17d   : > { %v6301_v16 = vpack.c.bf16 %v2941_v9, %v2940_v8  ;;  %v3458_v35 = vmul.f32 %v2941_v9, %v2941_v9  ;;  %v6471_v5 = vpack.c.bf16 %v7978_v55, %v7970_v46  ;;  %7294 = vmatmul.mubr.msk.bf16.gmra.mrb[112].mxu1 %vm1176_vm0, %v7502_v1 }
 0x17e   : > { %v3710_v19 = vadd.f32 %v3709_v11, %v3455_v13  ;;  %v3194_v20 = vadd.f32 %v3193_v12, %v2939_v14  ;;  %v3456_v21 = vmul.f32 %v2939_v14, %v2939_v14  ;;  %v6296_v22 = vpack.c.bf16 %v2939_v14, %v2938_v6  ;;  %v7119_v23 = vpop.f32.mrb[64].mxu0 }
 0x17f   : > { %6813 = vst [vmem:[%s7857_s26 + $0xf8] sm:$0xff] %v6301_v16   ;;  %v2688_v26 = vmax.f32 %v7119_v23, 0.0  ;;  %v1855_v27 = vpop.f32.mrb[65].mxu0  ;;  %6847 = vst [vmem:[%s7857_s26 + $0x208] sm:$0xff] %v6471_v5  }
 0x180   : > { %v3195_v31 = vadd.f32 %v3194_v20, %v2940_v8  ;;  %v3711_v32 = vadd.f32 %v3710_v19, %v3456_v21  ;;  %6812 = vst [vmem:[%s7857_s26 + $0xf0] sm:$0xff] %v6296_v22   ;;  %v2686_v33 = vmax.f32 %v1855_v27, 0.0  ;;  %v7120_v34 = vpop.f32.mrb[66].mxu0  ;;  %v2756_v20 = vmax.f32 %v7974_v48, 0.0  ;;  %v8000_v22 = vpop.f32.mrb[8].mxu1 }
 0x181   : > { %v2689_v36 = vmax.f32 %v7120_v34, 0.0  ;;  %v1858_v37 = vpop.f32.mrb[67].mxu0  ;;  %v2944_v44 = vmin.f32 %v2688_v26, 1.0  ;;  %v2754_v21 = vmax.f32 %v7976_v53, 0.0  ;;  %v8002_v27 = vpop.f32.mrb[9].mxu1 }
 0x182   : > { %v3196_v40 = vadd.f32 %v3195_v31, %v2941_v9  ;;  %v3712_v41 = vadd.f32 %v3711_v32, %v3457_v30  ;;  %v2942_v42 = vmin.f32 %v2686_v33, 1.0  ;;  %v2687_v43 = vmax.f32 %v1858_v37, 0.0  ;;  %v8004_v30 = vpop.f32.mrb[10].mxu1  ;;  %v7503_v31 = vld [vmem:[%s7686_s11 + $0x3d0] sm:$0xff]  }
 0x183   : > { %v2945_v45 = vmin.f32 %v2689_v36, 1.0  ;;  %v3461_v2 = vmul.f32 %v2944_v44, %v2944_v44  ;;  %v8007_v37 = vpop.f32.mrb[11].mxu1  ;;  %7297 = vmatprep.mubr.msk.bf16.mxu1 %vm1176_vm0, %v7503_v31  ;;  %v2758_v10 = vmax.f32 %v8002_v27, 0.0 }
 0x184   : > { %v3713_v49 = vadd.f32 %v3712_v41, %v3458_v35  ;;  %v3197_v50 = vadd.f32 %v3196_v40, %v2942_v42  ;;  %v3459_v51 = vmul.f32 %v2942_v42, %v2942_v42  ;;  %v2943_v52 = vmin.f32 %v2687_v43, 1.0  ;;  %v8026_v1 = vpop.f32.mrb[12].mxu1 }
 0x185   : > { %v6311_v54 = vpack.c.bf16 %v2945_v45, %v2944_v44  ;;  %v3462_v11 = vmul.f32 %v2945_v45, %v2945_v45  ;;  %v8011_v41 = vmin.f32 %v2756_v20, 1.0  ;;  %v2755_v43 = vmax.f32 %v7985_v0, 0.0  ;;  %7298 = vmatmul.mubr.msk.bf16.gmra.mrb[116].mxu1 %vm1176_vm0, %v7504_v38 }
 0x186   : > { %v3714_v59 = vadd.f32 %v3713_v49, %v3459_v51  ;;  %v3198_v60 = vadd.f32 %v3197_v50, %v2943_v52  ;;  %v3460_v61 = vmul.f32 %v2943_v52, %v2943_v52  ;;  %v6306_v62 = vpack.c.bf16 %v2943_v52, %v2942_v42  ;;  %v7123_v63 = vpop.f32.mrb[68].mxu0 }
 0x187   : > { %6815 = vst [vmem:[%s7857_s26 + $0x108] sm:$0xff] %v6311_v54   ;;  %v2692_v3 = vmax.f32 %v7123_v63, 0.0  ;;  %v1871_v4 = vpop.f32.mrb[69].mxu0  ;;  %v2757_v42 = vmax.f32 %v7982_v57, 0.0  ;;  %v8017_v50 = vmin.f32 %v2754_v21, 1.0  ;;  %v8022_v57 = vmin.f32 %v2755_v43, 1.0 }
 0x188   : > { %v3199_v6 = vadd.f32 %v3198_v60, %v2944_v44  ;;  %v3715_v7 = vadd.f32 %v3714_v59, %v3460_v61  ;;  %6814 = vst [vmem:[%s7857_s26 + $0x100] sm:$0xff] %v6306_v62   ;;  %v2690_v8 = vmax.f32 %v1871_v4, 0.0  ;;  %v7124_v9 = vpop.f32.mrb[70].mxu0 }
 0x189   : > { %v2948_v12 = vmin.f32 %v2692_v3, 1.0  ;;  %v2693_v13 = vmax.f32 %v7124_v9, 0.0  ;;  %v1874_v14 = vpop.f32.mrb[71].mxu0  ;;  %v8020_v54 = vmin.f32 %v2757_v42, 1.0  ;;  %v2760_v9 = vmax.f32 %v8000_v22, 0.0 }
 0x18a   : > { %v3200_v15 = vadd.f32 %v3199_v6, %v2945_v45  ;;  %v3716_v16 = vadd.f32 %v3715_v7, %v3461_v2  ;;  %v2946_v17 = vmin.f32 %v2690_v8, 1.0  ;;  %v2691_v18 = vmax.f32 %v1874_v14, 0.0  ;;  %v8028_v6 = vpop.f32.mrb[13].mxu1 }
 0x18b   : > { %v2949_v19 = vmin.f32 %v2693_v13, 1.0  ;;  %v3465_v28 = vmul.f32 %v2948_v12, %v2948_v12  ;;  %v6481_v0 = vpack.c.bf16 %v8020_v54, %v8011_v41  ;;  %v6476_v8 = vpack.c.bf16 %v8022_v57, %v8017_v50 }
 0x18c   : > { %v3717_v23 = vadd.f32 %v3716_v16, %v3462_v11  ;;  %v3201_v24 = vadd.f32 %v3200_v15, %v2946_v17  ;;  %v3463_v25 = vmul.f32 %v2946_v17, %v2946_v17  ;;  %v2947_v26 = vmin.f32 %v2691_v18, 1.0  ;;  %v8035_v11 = vpop.f32.mrb[14].mxu1 }
 0x18d   : > { %v6321_v29 = vpack.c.bf16 %v2949_v19, %v2948_v12  ;;  %v3466_v51 = vmul.f32 %v2949_v19, %v2949_v19  ;;  %6849 = vst [vmem:[%s7857_s26 + $0x218] sm:$0xff] %v6481_v0   ;;  %v8038_v18 = vpop.f32.mrb[15].mxu1  ;;  %6848 = vst [vmem:[%s7857_s26 + $0x210] sm:$0xff] %v6476_v8   ;;  %v2761_v22 = vmax.f32 %v8004_v30, 0.0  ;;  %v2764_v8 = vmax.f32 %v8026_v1, 0.0 }
 0x18e   : > { %v3718_v32 = vadd.f32 %v3717_v23, %v3463_v25  ;;  %v3202_v33 = vadd.f32 %v3201_v24, %v2947_v26  ;;  %v3464_v34 = vmul.f32 %v2947_v26, %v2947_v26  ;;  %v6316_v35 = vpack.c.bf16 %v2947_v26, %v2946_v17  ;;  %v7127_v36 = vpop.f32.mrb[72].mxu0 }
 0x18f   : > { %6817 = vst [vmem:[%s7857_s26 + $0x118] sm:$0xff] %v6321_v29   ;;  %v2696_v39 = vmax.f32 %v7127_v36, 0.0  ;;  %v1887_v40 = vpop.f32.mrb[73].mxu0  ;;  %v8052_v42 = vmin.f32 %v2761_v22, 1.0 }
 0x190   : > { %v3203_v44 = vadd.f32 %v3202_v33, %v2948_v12  ;;  %v3719_v45 = vadd.f32 %v3718_v32, %v3464_v34  ;;  %6816 = vst [vmem:[%s7857_s26 + $0x110] sm:$0xff] %v6316_v35   ;;  %v2694_v48 = vmax.f32 %v1887_v40, 0.0  ;;  %v7128_v49 = vpop.f32.mrb[74].mxu0  ;;  %v7505_v12 = vld [vmem:[%s7686_s11 + $0x3e0] sm:$0xff]   ;;  %v8048_v33 = vmin.f32 %v2760_v9, 1.0 }
 0x191   : > { %v2697_v52 = vmax.f32 %v7128_v49, 0.0  ;;  %v1890_v53 = vpop.f32.mrb[75].mxu0  ;;  %v2952_v62 = vmin.f32 %v2696_v39, 1.0  ;;  %7301 = vmatprep.mubr.msk.bf16.mxu1 %vm1176_vm0, %v7505_v12  ;;  %v8050_v34 = vmin.f32 %v2758_v10, 1.0 }
 0x192   : > { %v3720_v58 = vadd.f32 %v3719_v45, %v3465_v28  ;;  %v2950_v59 = vmin.f32 %v2694_v48, 1.0  ;;  %v3204_v60 = vadd.f32 %v3203_v44, %v2949_v19  ;;  %v2695_v61 = vmax.f32 %v1890_v53, 0.0  ;;  %v7506_v19 = vld [vmem:[%s7686_s11 + $0x3e8] sm:$0xff]  }
 0x193   : > { %v2953_v63 = vmin.f32 %v2697_v52, 1.0  ;;  %v3469_v20 = vmul.f32 %v2952_v62, %v2952_v62  ;;  %v2759_v28 = vmax.f32 %v8007_v37, 0.0  ;;  %7302 = vmatmul.mubr.msk.bf16.gmra.mrb[120].mxu1 %vm1176_vm0, %v7506_v19  ;;  %v8056_v37 = vpop.f32.mrb[16].mxu1  ;;  %v6491_v53 = vpack.c.bf16 %v8052_v42, %v8048_v33 }
 0x194   : > { %v3205_v2 = vadd.f32 %v3204_v60, %v2950_v59  ;;  %v3467_v3 = vmul.f32 %v2950_v59, %v2950_v59  ;;  %v3721_v4 = vadd.f32 %v3720_v58, %v3466_v51  ;;  %v2951_v5 = vmin.f32 %v2695_v61, 1.0  ;;  %v8058_v51 = vpop.f32.mrb[17].mxu1 }
 0x195   : > { %v6331_v7 = vpack.c.bf16 %v2953_v63, %v2952_v62  ;;  %v3470_v29 = vmul.f32 %v2953_v63, %v2953_v63  ;;  %v8054_v43 = vmin.f32 %v2759_v28, 1.0  ;;  %v8062_v58 = vpop.f32.mrb[18].mxu1  ;;  %6851 = vst [vmem:[%s7857_s26 + $0x228] sm:$0xff] %v6491_v53   ;;  %v2765_v19 = vmax.f32 %v8035_v11, 0.0 }
 0x196   : > { %v3722_v13 = vadd.f32 %v3721_v4, %v3467_v3  ;;  %v3206_v14 = vadd.f32 %v3205_v2, %v2951_v5  ;;  %v3468_v15 = vmul.f32 %v2951_v5, %v2951_v5  ;;  %v6326_v16 = vpack.c.bf16 %v2951_v5, %v2950_v59  ;;  %v7131_v17 = vpop.f32.mrb[76].mxu0  ;;  %v7507_v59 = vld [vmem:[%s7686_s11 + $0x3f0] sm:$0xff]   ;;  %v8065_v2 = vpop.f32.mrb[19].mxu1  ;;  %v7508_v3 = vld [vmem:[%s7686_s11 + $0x3f8] sm:$0xff]   ;;  %s7515_s11 = scalar_lea.vmem %s7514_s10, 256 }
 0x197   : > { %6819 = vst [vmem:[%s7857_s26 + $0x128] sm:$0xff] %v6331_v7   ;;  %v2700_v21 = vmax.f32 %v7131_v17, 0.0  ;;  %v1903_v23 = vpop.f32.mrb[77].mxu0  ;;  %v6486_v7 = vpack.c.bf16 %v8054_v43, %v8050_v34  ;;  %7305 = vmatprep.mubr.msk.bf16.mxu1 %vm1176_vm0, %v7507_v59  ;;  %v2763_v59 = vmax.f32 %v8038_v18, 0.0  ;;  %p7517_p2 = scmp.lt.s32.totalorder %s7515_s11, %s7509_s15 }
 0x198   : > { %v3207_v24 = vadd.f32 %v3206_v14, %v2952_v62  ;;  %v3723_v25 = vadd.f32 %v3722_v13, %v3468_v15  ;;  %6818 = vst [vmem:[%s7857_s26 + $0x120] sm:$0xff] %v6326_v16   ;;  %v2698_v26 = vmax.f32 %v1903_v23, 0.0  ;;  %v7132_v27 = vpop.f32.mrb[78].mxu0 }
 0x199   : > { %v2701_v31 = vmax.f32 %v7132_v27, 0.0  ;;  %v1906_v32 = vpop.f32.mrb[79].mxu0  ;;  %v2956_v39 = vmin.f32 %v2700_v21, 1.0  ;;  %6850 = vst [vmem:[%s7857_s26 + $0x220] sm:$0xff] %v6486_v7   ;;  %v8081_v27 = vpop.f32.mrb[20].mxu1  ;;  %v8099_v7 = vmin.f32 %v2763_v59, 1.0  ;;  %p7518_p3 = por %p7517_p2, %p7516_p1 }
 0x19a   : > { %v3724_v35 = vadd.f32 %v3723_v25, %v3469_v20  ;;  %v2954_v30 = vmin.f32 %v2698_v26, 1.0  ;;  %v3208_v36 = vadd.f32 %v3207_v24, %v2953_v63  ;;  %v2699_v38 = vmax.f32 %v1906_v32, 0.0 }
 0x19b   : > { %v2957_v40 = vmin.f32 %v2701_v31, 1.0  ;;  %v3473_v9 = vmul.f32 %v2956_v39, %v2956_v39  ;;  %7306 = vmatmul.mubr.msk.bf16.gmra.mrb[124].mxu1 %vm1176_vm0, %v7508_v3  ;;  %v8078_v25 = vmin.f32 %v2764_v8, 1.0  ;;  %v2762_v26 = vmax.f32 %v8028_v6, 0.0  ;;  %p7519_p5 = pnand %p7518_p3, %p7512_p0 }
 0x19c   : > { %v3209_v44 = vadd.f32 %v3208_v36, %v2954_v30  ;;  %v3471_v45 = vmul.f32 %v2954_v30, %v2954_v30  ;;  %v3725_v48 = vadd.f32 %v3724_v35, %v3470_v29  ;;  %v2955_v49 = vmin.f32 %v2699_v38, 1.0  ;;  %v8083_v35 = vpop.f32.mrb[21].mxu1 }
 0x19d   : > { %v6341_v52 = vpack.c.bf16 %v2957_v40, %v2956_v39  ;;  %v3474_v15 = vmul.f32 %v2957_v40, %v2957_v40  ;;  %v8087_v36 = vpop.f32.mrb[22].mxu1 }
 0x19e   : > { %v3726_v60 = vadd.f32 %v3725_v48, %v3471_v45  ;;  %v3210_v61 = vadd.f32 %v3209_v44, %v2955_v49  ;;  %v3472_v62 = vmul.f32 %v2955_v49, %v2955_v49  ;;  %v6336_v63 = vpack.c.bf16 %v2955_v49, %v2954_v30  ;;  %v7135_v0 = vpop.f32.mrb[80].mxu0  ;;  %v8089_v45 = vpop.f32.mrb[23].mxu1 }
 0x19f   : > { %6821 = vst [vmem:[%s7857_s26 + $0x138] sm:$0xff] %v6341_v52   ;;  %v2704_v4 = vmax.f32 %v7135_v0, 0.0  ;;  %v1919_v5 = vpop.f32.mrb[81].mxu0  ;;  %v8085_v30 = vmin.f32 %v2765_v19, 1.0  ;;  %v8092_v52 = vmin.f32 %v2762_v26, 1.0 }
 0x1a0   : > { %v3211_v10 = vadd.f32 %v3210_v61, %v2956_v39  ;;  %v3727_v12 = vadd.f32 %v3726_v60, %v3472_v62  ;;  %6820 = vst [vmem:[%s7857_s26 + $0x130] sm:$0xff] %v6336_v63   ;;  %v2702_v13 = vmax.f32 %v1919_v5, 0.0  ;;  %v7136_v14 = vpop.f32.mrb[82].mxu0 }
 0x1a1   : > { %v2705_v16 = vmax.f32 %v7136_v14, 0.0  ;;  %v1922_v17 = vpop.f32.mrb[83].mxu0  ;;  %v2960_v22 = vmin.f32 %v2704_v4, 1.0  ;;  %v6501_v53 = vpack.c.bf16 %v8085_v30, %v8078_v25  ;;  %v6496_v18 = vpack.c.bf16 %v8099_v7, %v8092_v52 }
 0x1a2   : > { %v3728_v20 = vadd.f32 %v3727_v12, %v3473_v9  ;;  %v2958_v21 = vmin.f32 %v2702_v13, 1.0  ;;  %v3212_v23 = vadd.f32 %v3211_v10, %v2957_v40  ;;  %v2703_v1 = vmax.f32 %v1922_v17, 0.0 }
 0x1a3   : > { %v2961_v24 = vmin.f32 %v2705_v16, 1.0  ;;  %v3477_v60 = vmul.f32 %v2960_v22, %v2960_v22  ;;  %6853 = vst [vmem:[%s7857_s26 + $0x238] sm:$0xff] %v6501_v53   ;;  %v8104_v16 = vpop.f32.mrb[24].mxu1  ;;  %6852 = vst [vmem:[%s7857_s26 + $0x230] sm:$0xff] %v6496_v18  }
 0x1a4   : > { %v3213_v28 = vadd.f32 %v3212_v23, %v2958_v21  ;;  %v3475_v29 = vmul.f32 %v2958_v21, %v2958_v21  ;;  %v3729_v31 = vadd.f32 %v3728_v20, %v3474_v15  ;;  %v2959_v32 = vmin.f32 %v2703_v1, 1.0  ;;  %v8106_v23 = vpop.f32.mrb[25].mxu1 }
 0x1a5   : > { %v6351_v11 = vpack.c.bf16 %v2961_v24, %v2960_v22  ;;  %v3478_v3 = vmul.f32 %v2961_v24, %v2961_v24  ;;  %v2768_v15 = vmax.f32 %v8056_v37, 0.0 }
 0x1a6   : > { %v3730_v38 = vadd.f32 %v3729_v31, %v3475_v29  ;;  %v3214_v39 = vadd.f32 %v3213_v28, %v2959_v32  ;;  %v3476_v40 = vmul.f32 %v2959_v32, %v2959_v32  ;;  %v6346_v44 = vpack.c.bf16 %v2959_v32, %v2958_v21  ;;  %v7139_v6 = vpop.f32.mrb[84].mxu0 }
 0x1a7   : > { %6823 = vst [vmem:[%s7857_s26 + $0x148] sm:$0xff] %v6351_v11   ;;  %v2708_v48 = vmax.f32 %v7139_v6, 0.0  ;;  %v1935_v49 = vpop.f32.mrb[85].mxu0 }
 0x1a8   : > { %v3215_v61 = vadd.f32 %v3214_v39, %v2960_v22  ;;  %v3731_v62 = vadd.f32 %v3730_v38, %v3476_v40  ;;  %6822 = vst [vmem:[%s7857_s26 + $0x140] sm:$0xff] %v6346_v44   ;;  %v2706_v63 = vmax.f32 %v1935_v49, 0.0  ;;  %v7140_v0 = vpop.f32.mrb[86].mxu0  ;;  %v8109_v22 = vpop.f32.mrb[26].mxu1  ;;  %v8114_v38 = vmin.f32 %v2768_v15, 1.0 }
 0x1a9   : > { %v2709_v4 = vmax.f32 %v7140_v0, 0.0  ;;  %v1938_v5 = vpop.f32.mrb[87].mxu0  ;;  %v2964_v13 = vmin.f32 %v2708_v48, 1.0  ;;  %v8111_v37 = vpop.f32.mrb[27].mxu1  ;;  %v2766_v39 = vmax.f32 %v8058_v51, 0.0  ;;  %v2769_v40 = vmax.f32 %v8062_v58, 0.0 }
 0x1aa   : > { %v3732_v8 = vadd.f32 %v3731_v62, %v3477_v60  ;;  %v2962_v9 = vmin.f32 %v2706_v63, 1.0  ;;  %v3216_v10 = vadd.f32 %v3215_v61, %v2961_v24  ;;  %v2707_v12 = vmax.f32 %v1938_v5, 0.0 }
 0x1ab   : > { %v2965_v14 = vmin.f32 %v2709_v4, 1.0  ;;  %v3481_v44 = vmul.f32 %v2964_v13, %v2964_v13  ;;  %v8119_v62 = vmin.f32 %v2769_v40, 1.0  ;;  %v2767_v63 = vmax.f32 %v8065_v2, 0.0 }
 0x1ac   : > { %v3217_v17 = vadd.f32 %v3216_v10, %v2962_v9  ;;  %v3479_v19 = vmul.f32 %v2962_v9, %v2962_v9  ;;  %v3733_v20 = vadd.f32 %v3732_v8, %v3478_v3  ;;  %v2963_v21 = vmin.f32 %v2707_v12, 1.0  ;;  %v8126_v10 = vpop.f32.mrb[28].mxu1 }
 0x1ad   : > { %v6361_v1 = vpack.c.bf16 %v2965_v14, %v2964_v13  ;;  %v3482_v59 = vmul.f32 %v2965_v14, %v2965_v14  ;;  %9232 = vst [vmem:[#allocation5_spill] sm:$0xff] %v8119_v62  ;;  %v8122_v8 = vmin.f32 %v2766_v39, 1.0  ;;  %v8128_v2 = vpop.f32.mrb[29].mxu1 }
 0x1ae   : > { %v3734_v24 = vadd.f32 %v3733_v20, %v3479_v19  ;;  %v3218_v26 = vadd.f32 %v3217_v17, %v2963_v21  ;;  %v3480_v28 = vmul.f32 %v2963_v21, %v2963_v21  ;;  %v6356_v29 = vpack.c.bf16 %v2963_v21, %v2962_v9  ;;  %v7143_v31 = vpop.f32.mrb[88].mxu0  ;;  %v8134_v20 = vpop.f32.mrb[30].mxu1 }
 0x1af   : > { %6825 = vst [vmem:[%s7857_s26 + $0x158] sm:$0xff] %v6361_v1   ;;  %v2712_v32 = vmax.f32 %v7143_v31, 0.0  ;;  %v1951_v11 = vpop.f32.mrb[89].mxu0  ;;  %v6511_v9 = vpack.c.bf16 %v8119_v62, %v8114_v38  ;;  %v2772_v19 = vmax.f32 %v8081_v27, 0.0 }
 0x1b0   : > { %v3219_v6 = vadd.f32 %v3218_v26, %v2964_v13  ;;  %v3735_v48 = vadd.f32 %v3734_v24, %v3480_v28  ;;  %6824 = vst [vmem:[%s7857_s26 + $0x150] sm:$0xff] %v6356_v29   ;;  %v2710_v49 = vmax.f32 %v1951_v11, 0.0  ;;  %v7144_v53 = vpop.f32.mrb[90].mxu0  ;;  %v8136_v29 = vpop.f32.mrb[31].mxu1 }
 0x1b1   : > { %v2713_v60 = vmax.f32 %v7144_v53, 0.0  ;;  %v1954_v61 = vpop.f32.mrb[91].mxu0  ;;  %v2968_v5 = vmin.f32 %v2712_v32, 1.0  ;;  %6855 = vst [vmem:[%s7857_s26 + $0x248] sm:$0xff] %v6511_v9  }
 0x1b2   : > { %v3736_v0 = vadd.f32 %v3735_v48, %v3481_v44  ;;  %v2966_v3 = vmin.f32 %v2710_v49, 1.0  ;;  %v3220_v4 = vadd.f32 %v3219_v6, %v2965_v14  ;;  %v2711_v51 = vmax.f32 %v1954_v61, 0.0 }
 0x1b3   : > { %v2969_v58 = vmin.f32 %v2713_v60, 1.0  ;;  %v8131_v14 = vmin.f32 %v2767_v63, 1.0  ;;  %v3485_v31 = vmul.f32 %v2968_v5, %v2968_v5  ;;  %v2770_v60 = vmax.f32 %v8083_v35, 0.0 }
 0x1b4   : > { %v3221_v12 = vadd.f32 %v3220_v4, %v2966_v3  ;;  %v3483_v13 = vmul.f32 %v2966_v3, %v2966_v3  ;;  %v3737_v18 = vadd.f32 %v3736_v0, %v3482_v59  ;;  %v2967_v15 = vmin.f32 %v2711_v51, 1.0 }
 0x1b5   : > { %v6371_v17 = vpack.c.bf16 %v2969_v58, %v2968_v5  ;;  %9233 = vst [vmem:[#allocation6_spill] sm:$0xff] %v8131_v14  ;;  %v6506_v39 = vpack.c.bf16 %v8131_v14, %v8122_v8  ;;  %v3486_v40 = vmul.f32 %v2969_v58, %v2969_v58  ;;  %v8143_v59 = vmin.f32 %v2772_v19, 1.0 }
 0x1b6   : > { %v3738_v21 = vadd.f32 %v3737_v18, %v3483_v13  ;;  %v3222_v1 = vadd.f32 %v3221_v12, %v2967_v15  ;;  %v3484_v24 = vmul.f32 %v2967_v15, %v2967_v15  ;;  %v6366_v26 = vpack.c.bf16 %v2967_v15, %v2966_v3  ;;  %v7147_v28 = vpop.f32.mrb[92].mxu0  ;;  %v8150_v13 = vpop.f32.mrb[32].mxu1 }
 0x1b7   : > { %6827 = vst [vmem:[%s7857_s26 + $0x168] sm:$0xff] %v6371_v17   ;;  %v2716_v32 = vmax.f32 %v7147_v28, 0.0  ;;  %v1967_v11 = vpop.f32.mrb[93].mxu0  ;;  %6854 = vst [vmem:[%s7857_s26 + $0x240] sm:$0xff] %v6506_v39   ;;  %v2773_v61 = vmax.f32 %v8087_v36, 0.0  ;;  %v2771_v12 = vmax.f32 %v8089_v45, 0.0 }
 0x1b8   : > { %v3223_v27 = vadd.f32 %v3222_v1, %v2968_v5  ;;  %v3739_v44 = vadd.f32 %v3738_v21, %v3484_v24  ;;  %6826 = vst [vmem:[%s7857_s26 + $0x160] sm:$0xff] %v6366_v26   ;;  %v2714_v6 = vmax.f32 %v1967_v11, 0.0  ;;  %v7148_v48 = vpop.f32.mrb[94].mxu0  ;;  %9234 = vst [vmem:[#allocation7_spill] sm:$0xff] %v8143_v59  ;;  %v8152_v35 = vpop.f32.mrb[33].mxu1  ;;  %v8154_v21 = vmin.f32 %v2770_v60, 1.0 }
 0x1b9   : > { %v2717_v49 = vmax.f32 %v7148_v48, 0.0  ;;  %v1970_v53 = vpop.f32.mrb[95].mxu0  ;;  %v2972_v51 = vmin.f32 %v2716_v32, 1.0  ;;  %v8147_v5 = vmin.f32 %v2773_v61, 1.0 }
 0x1ba   : > { %v3740_v63 = vadd.f32 %v3739_v44, %v3485_v31  ;;  %v2970_v0 = vmin.f32 %v2714_v6, 1.0  ;;  %v3224_v3 = vadd.f32 %v3223_v27, %v2969_v58  ;;  %v2715_v4 = vmax.f32 %v1970_v53, 0.0  ;;  %9236 = vst [vmem:[#allocation9_spill] sm:$0xff] %v8154_v21  ;;  %v8156_v58 = vpop.f32.mrb[34].mxu1 }
 0x1bb   : > { %v2973_v9 = vmin.f32 %v2717_v49, 1.0  ;;  %9235 = vst [vmem:[#allocation8_spill] sm:$0xff] %v8147_v5  ;;  %v8158_v31 = vpop.f32.mrb[35].mxu1  ;;  %v6521_v39 = vpack.c.bf16 %v8147_v5, %v8143_v59  ;;  %v3489_v27 = vmul.f32 %v2972_v51, %v2972_v51 }
 0x1bc   : > { %v3225_v18 = vadd.f32 %v3224_v3, %v2970_v0  ;;  %v3487_v15 = vmul.f32 %v2970_v0, %v2970_v0  ;;  %v3741_v17 = vadd.f32 %v3740_v63, %v3486_v40  ;;  %v2971_v19 = vmin.f32 %v2715_v4, 1.0 }
 0x1bd   : > { %v6381_v36 = vpack.c.bf16 %v2973_v9, %v2972_v51  ;;  %v8163_v40 = vmin.f32 %v2771_v12, 1.0  ;;  %v3490_v53 = vmul.f32 %v2973_v9, %v2973_v9  ;;  %6857 = vst [vmem:[%s7857_s26 + $0x258] sm:$0xff] %v6521_v39  }
 0x1be   : > { %v3742_v1 = vadd.f32 %v3741_v17, %v3487_v15  ;;  %v3226_v24 = vadd.f32 %v3225_v18, %v2971_v19  ;;  %v3488_v26 = vmul.f32 %v2971_v19, %v2971_v19  ;;  %v6376_v28 = vpack.c.bf16 %v2971_v19, %v2970_v0  ;;  %v7151_v45 = vpop.f32.mrb[96].mxu0  ;;  %v8172_v19 = vpop.f32.mrb[36].mxu1 }
 0x1bf   : > { %6829 = vst [vmem:[%s7857_s26 + $0x178] sm:$0xff] %v6381_v36   ;;  %v2720_v32 = vmax.f32 %v7151_v45, 0.0  ;;  %v1983_v11 = vpop.f32.mrb[97].mxu0  ;;  %9237 = vst [vmem:[#allocation10_spill] sm:$0xff] %v8163_v40  ;;  %v6516_v0 = vpack.c.bf16 %v8163_v40, %v8154_v21  ;;  %v2774_v17 = vmax.f32 %v8106_v23, 0.0 }
 0x1c0   : > { %v3227_v44 = vadd.f32 %v3226_v24, %v2972_v51  ;;  %v3743_v6 = vadd.f32 %v3742_v1, %v3488_v26  ;;  %6828 = vst [vmem:[%s7857_s26 + $0x170] sm:$0xff] %v6376_v28   ;;  %v2718_v48 = vmax.f32 %v1983_v11, 0.0  ;;  %v7152_v49 = vpop.f32.mrb[98].mxu0  ;;  %v2776_v51 = vmax.f32 %v8104_v16, 0.0  ;;  %v8174_v28 = vpop.f32.mrb[37].mxu1 }
 0x1c1   : > { %v2976_v60 = vmin.f32 %v2720_v32, 1.0  ;;  %v2721_v61 = vmax.f32 %v7152_v49, 0.0  ;;  %v1986_v63 = vpop.f32.mrb[99].mxu0  ;;  %6856 = vst [vmem:[%s7857_s26 + $0x250] sm:$0xff] %v6516_v0  }
 0x1c2   : > { %v3744_v3 = vadd.f32 %v3743_v6, %v3489_v27  ;;  %v2974_v4 = vmin.f32 %v2718_v48, 1.0  ;;  %v3228_v18 = vadd.f32 %v3227_v44, %v2973_v9  ;;  %v2719_v12 = vmax.f32 %v1986_v63, 0.0  ;;  %v8176_v9 = vpop.f32.mrb[38].mxu1 }
 0x1c3   : > { %v2977_v15 = vmin.f32 %v2721_v61, 1.0  ;;  %v3493_v45 = vmul.f32 %v2976_v60, %v2976_v60  ;;  %v8178_v23 = vpop.f32.mrb[39].mxu1  ;;  %v8181_v49 = vmin.f32 %v2776_v51, 1.0  ;;  %v2775_v61 = vmax.f32 %v8111_v37, 0.0 }
 0x1c4   : > { %v3229_v36 = vadd.f32 %v3228_v18, %v2974_v4  ;;  %v3491_v1 = vmul.f32 %v2974_v4, %v2974_v4  ;;  %v3745_v24 = vadd.f32 %v3744_v3, %v3490_v53  ;;  %v2975_v26 = vmin.f32 %v2719_v12, 1.0 }
 0x1c5   : > { %v6391_v32 = vpack.c.bf16 %v2977_v15, %v2976_v60  ;;  %9238 = vst [vmem:[#allocation11_spill] sm:$0xff] %v8181_v49  ;;  %v2777_v53 = vmax.f32 %v8109_v22, 0.0  ;;  %v8186_v12 = vmin.f32 %v2774_v17, 1.0 }
 0x1c6   : > { %v3746_v11 = vadd.f32 %v3745_v24, %v3491_v1  ;;  %v3230_v39 = vadd.f32 %v3229_v36, %v2975_v26  ;;  %v3492_v27 = vmul.f32 %v2975_v26, %v2975_v26  ;;  %v6386_v16 = vpack.c.bf16 %v2975_v26, %v2974_v4  ;;  %v7155_v44 = vpop.f32.mrb[100].mxu0 }
 0x1c7   : > { %6831 = vst [vmem:[%s7857_s26 + $0x188] sm:$0xff] %v6391_v32   ;;  %v2724_v6 = vmax.f32 %v7155_v44, 0.0  ;;  %v1999_v48 = vpop.f32.mrb[101].mxu0  ;;  %9239 = vst [vmem:[#allocation12_spill] sm:$0xff] %v8186_v12  ;;  %v3494_v4 = vmul.f32 %v2977_v15, %v2977_v15  ;;  %v8188_v24 = vmin.f32 %v2777_v53, 1.0  ;;  %v8190_v26 = vmin.f32 %v2775_v61, 1.0 }
 0x1c8   : > { %v3231_v63 = vadd.f32 %v3230_v39, %v2976_v60  ;;  %v3747_v0 = vadd.f32 %v3746_v11, %v3492_v27  ;;  %6830 = vst [vmem:[%s7857_s26 + $0x180] sm:$0xff] %v6386_v16   ;;  %v2722_v3 = vmax.f32 %v1999_v48, 0.0  ;;  %v7156_v18 = vpop.f32.mrb[102].mxu0  ;;  %v8194_v39 = vpop.f32.mrb[40].mxu1 }
 0x1c9   : > { %v2725_v36 = vmax.f32 %v7156_v18, 0.0  ;;  %v2002_v1 = vpop.f32.mrb[103].mxu0  ;;  %9240 = vst [vmem:[#allocation13_spill] sm:$0xff] %v8188_v24  ;;  %9241 = vst [vmem:[#allocation14_spill] sm:$0xff] %v8190_v26  ;;  %v2980_v37 = vmin.f32 %v2724_v6, 1.0  ;;  %v6531_v11 = vpack.c.bf16 %v8188_v24, %v8181_v49  ;;  %v8196_v53 = vpop.f32.mrb[41].mxu1 }
 0x1ca   : > { %v3748_v51 = vadd.f32 %v3747_v0, %v3493_v45  ;;  %v2978_v32 = vmin.f32 %v2722_v3, 1.0  ;;  %v3232_v22 = vadd.f32 %v3231_v63, %v2977_v15  ;;  %v2723_v44 = vmax.f32 %v2002_v1, 0.0  ;;  %v8203_v63 = vpop.f32.mrb[42].mxu1 }
 0x1cb   : > { %v2981_v60 = vmin.f32 %v2725_v36, 1.0  ;;  %6859 = vst [vmem:[%s7857_s26 + $0x268] sm:$0xff] %v6531_v11   ;;  %v6526_v15 = vpack.c.bf16 %v8190_v26, %v8186_v12  ;;  %v2780_v45 = vmax.f32 %v8126_v10, 0.0  ;;  %v2778_v6 = vmax.f32 %v8128_v2, 0.0  ;;  %v8205_v1 = vpop.f32.mrb[43].mxu1 }
 0x1cc   : > { %v3233_v17 = vadd.f32 %v3232_v22, %v2978_v32  ;;  %v3495_v27 = vmul.f32 %v2978_v32, %v2978_v32  ;;  %v3749_v16 = vadd.f32 %v3748_v51, %v3494_v4  ;;  %v2979_v48 = vmin.f32 %v2723_v44, 1.0 }
 0x1cd   : > { %v6401_v61 = vpack.c.bf16 %v2981_v60, %v2980_v37  ;;  %v3497_v51 = vmul.f32 %v2980_v37, %v2980_v37  ;;  %6858 = vst [vmem:[%s7857_s26 + $0x260] sm:$0xff] %v6526_v15   ;;  %v2781_v11 = vmax.f32 %v8134_v20, 0.0  ;;  %v8214_v26 = vmin.f32 %v2778_v6, 1.0 }
 0x1ce   : > { %v3750_v0 = vadd.f32 %v3749_v16, %v3495_v27  ;;  %v3234_v3 = vadd.f32 %v3233_v17, %v2979_v48  ;;  %v3496_v18 = vmul.f32 %v2979_v48, %v2979_v48  ;;  %v6396_v4 = vpack.c.bf16 %v2979_v48, %v2978_v32  ;;  %v7159_v36 = vpop.f32.mrb[104].mxu0 }
 0x1cf   : > { %6833 = vst [vmem:[%s7857_s26 + $0x198] sm:$0xff] %v6401_v61   ;;  %v2728_v22 = vmax.f32 %v7159_v36, 0.0  ;;  %v2015_v44 = vpop.f32.mrb[105].mxu0  ;;  %v2779_v27 = vmax.f32 %v8136_v29, 0.0  ;;  %v3498_v17 = vmul.f32 %v2981_v60, %v2981_v60  ;;  %v8212_v48 = vmin.f32 %v2780_v45, 1.0  ;;  %9243 = vst [vmem:[#allocation16_spill] sm:$0xff] %v8214_v26 }
 0x1d0   : > { %v3235_v10 = vadd.f32 %v3234_v3, %v2980_v37  ;;  %v3751_v24 = vadd.f32 %v3750_v0, %v3496_v18  ;;  %6832 = vst [vmem:[%s7857_s26 + $0x190] sm:$0xff] %v6396_v4   ;;  %v2726_v2 = vmax.f32 %v2015_v44, 0.0  ;;  %v7160_v49 = vpop.f32.mrb[106].mxu0  ;;  %v8216_v37 = vmin.f32 %v2781_v11, 1.0  ;;  %v8220_v3 = vpop.f32.mrb[44].mxu1 }
 0x1d1   : > { %v2729_v16 = vmax.f32 %v7160_v49, 0.0  ;;  %v2018_v32 = vpop.f32.mrb[107].mxu0  ;;  %9242 = vst [vmem:[#allocation15_spill] sm:$0xff] %v8212_v48  ;;  %v2984_v5 = vmin.f32 %v2728_v22, 1.0  ;;  %v8218_v0 = vmin.f32 %v2779_v27, 1.0  ;;  %v8222_v6 = vpop.f32.mrb[45].mxu1 }
 0x1d2   : > { %v3752_v61 = vadd.f32 %v3751_v24, %v3497_v51  ;;  %v2982_v36 = vmin.f32 %v2726_v2, 1.0  ;;  %v3236_v12 = vadd.f32 %v3235_v10, %v2981_v60  ;;  %v2727_v15 = vmax.f32 %v2018_v32, 0.0  ;;  %9244 = vst [vmem:[#allocation17_spill] sm:$0xff] %v8216_v37  ;;  %v8226_v4 = vpop.f32.mrb[46].mxu1 }
 0x1d3   : > { %v2985_v20 = vmin.f32 %v2729_v16, 1.0  ;;  %9245 = vst [vmem:[#allocation18_spill] sm:$0xff] %v8218_v0  ;;  %v6541_v60 = vpack.c.bf16 %v8216_v37, %v8212_v48  ;;  %v8228_v2 = vpop.f32.mrb[47].mxu1  ;;  %v2784_v16 = vmax.f32 %v8150_v13, 0.0  ;;  %v3501_v32 = vmul.f32 %v2984_v5, %v2984_v5 }
 0x1d4   : > { %v3237_v29 = vadd.f32 %v3236_v12, %v2982_v36  ;;  %v3499_v49 = vmul.f32 %v2982_v36, %v2982_v36  ;;  %v3753_v45 = vadd.f32 %v3752_v61, %v3498_v17  ;;  %v2983_v18 = vmin.f32 %v2727_v15, 1.0  ;;  %v8241_v13 = vpop.f32.mrb[48].mxu1 }
 0x1d5   : > { %v6411_v24 = vpack.c.bf16 %v2985_v20, %v2984_v5  ;;  %6861 = vst [vmem:[%s7857_s26 + $0x278] sm:$0xff] %v6541_v60   ;;  %v6536_v17 = vpack.c.bf16 %v8218_v0, %v8214_v26  ;;  %v8238_v26 = vmin.f32 %v2784_v16, 1.0 }
 0x1d6   : > { %v3754_v51 = vadd.f32 %v3753_v45, %v3499_v49  ;;  %v3238_v22 = vadd.f32 %v3237_v29, %v2983_v18  ;;  %v3500_v44 = vmul.f32 %v2983_v18, %v2983_v18  ;;  %v6406_v11 = vpack.c.bf16 %v2983_v18, %v2982_v36  ;;  %v7163_v10 = vpop.f32.mrb[108].mxu0 }
 0x1d7   : > { %6835 = vst [vmem:[%s7857_s26 + $0x1a8] sm:$0xff] %v6411_v24   ;;  %v2732_v12 = vmax.f32 %v7163_v10, 0.0  ;;  %v2031_v27 = vpop.f32.mrb[109].mxu0  ;;  %v3502_v36 = vmul.f32 %v2985_v20, %v2985_v20  ;;  %6860 = vst [vmem:[%s7857_s26 + $0x270] sm:$0xff] %v6536_v17   ;;  %v2785_v24 = vmax.f32 %v8156_v58, 0.0 }
 0x1d8   : > { %v3239_v61 = vadd.f32 %v3238_v22, %v2984_v5  ;;  %v3755_v15 = vadd.f32 %v3754_v51, %v3500_v44  ;;  %6834 = vst [vmem:[%s7857_s26 + $0x1a0] sm:$0xff] %v6406_v11   ;;  %v2730_v29 = vmax.f32 %v2031_v27, 0.0  ;;  %v7164_v49 = vpop.f32.mrb[110].mxu0  ;;  %9246 = vst [vmem:[#allocation19_spill] sm:$0xff] %v8238_v26  ;;  %v2782_v5 = vmax.f32 %v8152_v35, 0.0  ;;  %v8243_v27 = vpop.f32.mrb[49].mxu1 }
 0x1d9   : > { %v2733_v45 = vmax.f32 %v7164_v49, 0.0  ;;  %v2034_v18 = vpop.f32.mrb[111].mxu0  ;;  %v2988_v59 = vmin.f32 %v2732_v12, 1.0  ;;  %v8245_v17 = vmin.f32 %v2785_v24, 1.0 }
 0x1da   : > { %v3756_v10 = vadd.f32 %v3755_v15, %v3501_v32  ;;  %v2986_v37 = vmin.f32 %v2730_v29, 1.0  ;;  %v3240_v60 = vadd.f32 %v3239_v61, %v2985_v20  ;;  %v2731_v48 = vmax.f32 %v2034_v18, 0.0  ;;  %v8247_v20 = vpop.f32.mrb[50].mxu1 }
 0x1db   : > { %v2989_v0 = vmin.f32 %v2733_v45, 1.0  ;;  %9247 = vst [vmem:[#allocation20_spill] sm:$0xff] %v8245_v17  ;;  %v8249_v15 = vpop.f32.mrb[51].mxu1  ;;  %v2783_v45 = vmax.f32 %v8158_v31, 0.0  ;;  %v3505_v18 = vmul.f32 %v2988_v59, %v2988_v59  ;;  %v2788_v31 = vmax.f32 %v8172_v19, 0.0 }
 0x1dc   : > { %v3241_v51 = vadd.f32 %v3240_v60, %v2986_v37  ;;  %v3503_v22 = vmul.f32 %v2986_v37, %v2986_v37  ;;  %v3757_v44 = vadd.f32 %v3756_v10, %v3502_v36  ;;  %v2987_v11 = vmin.f32 %v2731_v48, 1.0 }
 0x1dd   : > { %v6421_v58 = vpack.c.bf16 %v2989_v0, %v2988_v59  ;;  %v8252_v48 = vmin.f32 %v2782_v5, 1.0  ;;  %v6551_v36 = vpack.c.bf16 %v8245_v17, %v8238_v26 }
 0x1de   : > { %v3758_v12 = vadd.f32 %v3757_v44, %v3503_v22  ;;  %v3242_v16 = vadd.f32 %v3241_v51, %v2987_v11  ;;  %v3504_v32 = vmul.f32 %v2987_v11, %v2987_v11  ;;  %v6416_v61 = vpack.c.bf16 %v2987_v11, %v2986_v37  ;;  %v7167_v35 = vpop.f32.mrb[112].mxu0 }
 0x1df   : > { %6837 = vst [vmem:[%s7857_s26 + $0x1b8] sm:$0xff] %v6421_v58   ;;  %v2736_v29 = vmax.f32 %v7167_v35, 0.0  ;;  %v2047_v49 = vpop.f32.mrb[113].mxu0  ;;  %9248 = vst [vmem:[#allocation21_spill] sm:$0xff] %v8252_v48  ;;  %v3506_v51 = vmul.f32 %v2989_v0, %v2989_v0  ;;  %v8259_v11 = vmin.f32 %v2783_v45, 1.0 }
 0x1e0   : > { %v3243_v24 = vadd.f32 %v3242_v16, %v2988_v59  ;;  %v3759_v10 = vadd.f32 %v3758_v12, %v3504_v32  ;;  %6836 = vst [vmem:[%s7857_s26 + $0x1b0] sm:$0xff] %v6416_v61   ;;  %v2734_v60 = vmax.f32 %v2047_v49, 0.0  ;;  %v7168_v37 = vpop.f32.mrb[114].mxu0  ;;  %6863 = vst [vmem:[%s7857_s26 + $0x288] sm:$0xff] %v6551_v36   ;;  %v8264_v12 = vpop.f32.mrb[52].mxu1 }
 0x1e1   : > { %v2737_v22 = vmax.f32 %v7168_v37, 0.0  ;;  %v2050_v44 = vpop.f32.mrb[115].mxu0  ;;  %9249 = vst [vmem:[#allocation22_spill] sm:$0xff] %v8259_v11  ;;  %v2992_v17 = vmin.f32 %v2736_v29, 1.0  ;;  %v6546_v59 = vpack.c.bf16 %v8259_v11, %v8252_v48  ;;  %v8266_v36 = vpop.f32.mrb[53].mxu1 }
 0x1e2   : > { %v3760_v5 = vadd.f32 %v3759_v10, %v3505_v18  ;;  %v2990_v58 = vmin.f32 %v2734_v60, 1.0  ;;  %v3244_v35 = vadd.f32 %v3243_v24, %v2989_v0  ;;  %v2735_v40 = vmax.f32 %v2050_v44, 0.0  ;;  %v8269_v0 = vpop.f32.mrb[54].mxu1 }
 0x1e3   : > { %v2993_v26 = vmin.f32 %v2737_v22, 1.0  ;;  %6862 = vst [vmem:[%s7857_s26 + $0x280] sm:$0xff] %v6546_v59   ;;  %v8271_v19 = vpop.f32.mrb[55].mxu1  ;;  %v8274_v44 = vmin.f32 %v2788_v31, 1.0 }
 0x1e4   : > { %v3245_v16 = vadd.f32 %v3244_v35, %v2990_v58  ;;  %v3507_v32 = vmul.f32 %v2990_v58, %v2990_v58  ;;  %v3761_v61 = vadd.f32 %v3760_v5, %v3506_v51  ;;  %v2991_v49 = vmin.f32 %v2735_v40, 1.0 }
 0x1e5   : > { %v6431_v45 = vpack.c.bf16 %v2993_v26, %v2992_v17  ;;  %9250 = vst [vmem:[#allocation23_spill] sm:$0xff] %v8274_v44  ;;  %v2786_v40 = vmax.f32 %v8174_v28, 0.0  ;;  %v2789_v51 = vmax.f32 %v8176_v9, 0.0  ;;  %v3509_v5 = vmul.f32 %v2992_v17, %v2992_v17 }
 0x1e6   : > { %v3762_v29 = vadd.f32 %v3761_v61, %v3507_v32  ;;  %v3246_v18 = vadd.f32 %v3245_v16, %v2991_v49  ;;  %v3508_v24 = vmul.f32 %v2991_v49, %v2991_v49  ;;  %v6426_v10 = vpack.c.bf16 %v2991_v49, %v2990_v58  ;;  %v7171_v60 = vpop.f32.mrb[116].mxu0 }
 0x1e7   : > { %6839 = vst [vmem:[%s7857_s26 + $0x1c8] sm:$0xff] %v6431_v45   ;;  %v2740_v37 = vmax.f32 %v7171_v60, 0.0  ;;  %v2063_v22 = vpop.f32.mrb[117].mxu0  ;;  %v3510_v61 = vmul.f32 %v2993_v26, %v2993_v26  ;;  %v8279_v11 = vmin.f32 %v2789_v51, 1.0  ;;  %v2787_v45 = vmax.f32 %v8178_v23, 0.0 }
 0x1e8   : > { %v3247_v35 = vadd.f32 %v3246_v18, %v2992_v17  ;;  %v3763_v59 = vadd.f32 %v3762_v29, %v3508_v24  ;;  %6838 = vst [vmem:[%s7857_s26 + $0x1c0] sm:$0xff] %v6426_v10   ;;  %v2738_v32 = vmax.f32 %v2063_v22, 0.0  ;;  %v7172_v16 = vpop.f32.mrb[118].mxu0  ;;  %v8282_v62 = vmin.f32 %v2786_v40, 1.0  ;;  %v8286_v29 = vpop.f32.mrb[56].mxu1 }
 0x1e9   : > { %v2741_v58 = vmax.f32 %v7172_v16, 0.0  ;;  %v2066_v49 = vpop.f32.mrb[119].mxu0  ;;  %9251 = vst [vmem:[#allocation24_spill] sm:$0xff] %v8279_v11  ;;  %v2996_v21 = vmin.f32 %v2740_v37, 1.0  ;;  %v6561_v17 = vpack.c.bf16 %v8279_v11, %v8274_v44  ;;  %v8288_v23 = vpop.f32.mrb[57].mxu1  ;;  %v2790_v11 = vmax.f32 %v8196_v53, 0.0 }
 0x1ea   : > { %v3764_v31 = vadd.f32 %v3763_v59, %v3509_v5  ;;  %v2994_v60 = vmin.f32 %v2738_v32, 1.0  ;;  %v3248_v48 = vadd.f32 %v3247_v35, %v2993_v26  ;;  %v2739_v28 = vmax.f32 %v2066_v49, 0.0  ;;  %9252 = vst [vmem:[#allocation25_spill] sm:$0xff] %v8282_v62  ;;  %v8293_v37 = vpop.f32.mrb[58].mxu1 }
 0x1eb   : > { %v2997_v9 = vmin.f32 %v2741_v58, 1.0  ;;  %6865 = vst [vmem:[%s7857_s26 + $0x298] sm:$0xff] %v6561_v17   ;;  %v8291_v26 = vmin.f32 %v2787_v45, 1.0  ;;  %v8295_v16 = vpop.f32.mrb[59].mxu1  ;;  %v2792_v45 = vmax.f32 %v8194_v39, 0.0 }
 0x1ec   : > { %v3249_v18 = vadd.f32 %v3248_v48, %v2994_v60  ;;  %v3511_v24 = vmul.f32 %v2994_v60, %v2994_v60  ;;  %v3765_v10 = vadd.f32 %v3764_v31, %v3510_v61  ;;  %v2995_v22 = vmin.f32 %v2739_v28, 1.0 }
 0x1ed   : > { %v6441_v51 = vpack.c.bf16 %v2997_v9, %v2996_v21  ;;  %9253 = vst [vmem:[#allocation26_spill] sm:$0xff] %v8291_v26  ;;  %v3513_v48 = vmul.f32 %v2996_v21, %v2996_v21  ;;  %v6556_v49 = vpack.c.bf16 %v8291_v26, %v8282_v62  ;;  %v3514_v31 = vmul.f32 %v2997_v9, %v2997_v9 }
 0x1ee   : > { %v3766_v40 = vadd.f32 %v3765_v10, %v3511_v24  ;;  %v3250_v5 = vadd.f32 %v3249_v18, %v2995_v22  ;;  %v3512_v35 = vmul.f32 %v2995_v22, %v2995_v22  ;;  %v6436_v59 = vpack.c.bf16 %v2995_v22, %v2994_v60  ;;  %v7175_v32 = vpop.f32.mrb[120].mxu0 }
 0x1ef   : > { %6841 = vst [vmem:[%s7857_s26 + $0x1d8] sm:$0xff] %v6441_v51   ;;  %v2744_v61 = vmax.f32 %v7175_v32, 0.0  ;;  %v2079_v58 = vpop.f32.mrb[121].mxu0  ;;  %6864 = vst [vmem:[%s7857_s26 + $0x290] sm:$0xff] %v6556_v49   ;;  %v2793_v51 = vmax.f32 %v8203_v63, 0.0  ;;  %v8305_v39 = vmin.f32 %v2792_v45, 1.0 }
 0x1f0   : > { %v3251_v28 = vadd.f32 %v3250_v5, %v2996_v21  ;;  %v3767_v17 = vadd.f32 %v3766_v40, %v3512_v35  ;;  %6840 = vst [vmem:[%s7857_s26 + $0x1d0] sm:$0xff] %v6436_v59   ;;  %v2742_v18 = vmax.f32 %v2079_v58, 0.0  ;;  %v7176_v24 = vpop.f32.mrb[122].mxu0  ;;  %v2791_v40 = vmax.f32 %v8205_v1, 0.0  ;;  %v8310_v5 = vpop.f32.mrb[60].mxu1 }
 0x1f1   : > { %v3000_v60 = vmin.f32 %v2744_v61, 1.0  ;;  %v2745_v10 = vmax.f32 %v7176_v24, 0.0  ;;  %v2082_v22 = vpop.f32.mrb[123].mxu0  ;;  %9254 = vst [vmem:[#allocation27_spill] sm:$0xff] %v8305_v39  ;;  %v8307_v21 = vmin.f32 %v2793_v51, 1.0  ;;  %v8312_v58 = vpop.f32.mrb[61].mxu1 }
 0x1f2   : > { %v3768_v32 = vadd.f32 %v3767_v17, %v3513_v48  ;;  %v2998_v44 = vmin.f32 %v2742_v18, 1.0  ;;  %v3252_v14 = vadd.f32 %v3251_v28, %v2997_v9  ;;  %v2743_v26 = vmax.f32 %v2082_v22, 0.0  ;;  %v8316_v49 = vpop.f32.mrb[62].mxu1 }
 0x1f3   : > { %v3001_v62 = vmin.f32 %v2745_v10, 1.0  ;;  %9255 = vst [vmem:[#allocation28_spill] sm:$0xff] %v8307_v21  ;;  %v3517_v63 = vmul.f32 %v3000_v60, %v3000_v60  ;;  %v8314_v9 = vmin.f32 %v2790_v11, 1.0  ;;  %v8318_v24 = vpop.f32.mrb[63].mxu1  ;;  %v6571_v10 = vpack.c.bf16 %v8307_v21, %v8305_v39 }
 0x1f4   : > { %v3253_v35 = vadd.f32 %v3252_v14, %v2998_v44  ;;  %v3515_v59 = vmul.f32 %v2998_v44, %v2998_v44  ;;  %v3769_v61 = vadd.f32 %v3768_v32, %v3514_v31  ;;  %v2999_v53 = vmin.f32 %v2743_v26, 1.0 }
 0x1f5   : > { %v6451_v48 = vpack.c.bf16 %v3001_v62, %v3000_v60  ;;  %9256 = vst [vmem:[#allocation29_spill] sm:$0xff] %v8314_v9  ;;  %v3518_v14 = vmul.f32 %v3001_v62, %v3001_v62  ;;  %v8323_v11 = vmin.f32 %v2791_v40, 1.0  ;;  %6867 = vst [vmem:[%s7857_s26 + $0x2a8] sm:$0xff] %v6571_v10  }
 0x1f6   : > { %v3770_v45 = vadd.f32 %v3769_v61, %v3515_v59  ;;  %v3254_v28 = vadd.f32 %v3253_v35, %v2999_v53  ;;  %v3516_v17 = vmul.f32 %v2999_v53, %v2999_v53  ;;  %v6446_v1 = vpack.c.bf16 %v2999_v53, %v2998_v44  ;;  %v7179_v18 = vpop.f32.mrb[124].mxu0 }
 0x1f7   : > { %6843 = vst [vmem:[%s7857_s26 + $0x1e8] sm:$0xff] %v6451_v48   ;;  %v2748_v26 = vmax.f32 %v7179_v18, 0.0  ;;  %v2095_v31 = vpop.f32.mrb[125].mxu0  ;;  %9257 = vst [vmem:[#allocation30_spill] sm:$0xff] %v8323_v11  ;;  %v2796_v44 = vmax.f32 %v8220_v3, 0.0  ;;  %v6566_v48 = vpack.c.bf16 %v8323_v11, %v8314_v9  ;;  %v2794_v18 = vmax.f32 %v8222_v6, 0.0 }
 0x1f8   : > { %v3255_v22 = vadd.f32 %v3254_v28, %v3000_v60  ;;  %v3771_v51 = vadd.f32 %v3770_v45, %v3516_v17  ;;  %6842 = vst [vmem:[%s7857_s26 + $0x1e0] sm:$0xff] %v6446_v1   ;;  %v2746_v32 = vmax.f32 %v2095_v31, 0.0  ;;  %v7180_v35 = vpop.f32.mrb[126].mxu0  ;;  %v3523_v17 = vmul.f32 %v7972_v47, %v7972_v47  ;;  %v8334_v3 = vpop.f32.mrb[64].mxu1 }
 0x1f9   : > { %v3004_v59 = vmin.f32 %v2748_v26, 1.0  ;;  %v2749_v61 = vmax.f32 %v7180_v35, 0.0  ;;  %v2098_v53 = vpop.f32.mrb[127].mxu0  ;;  %6866 = vst [vmem:[%s7857_s26 + $0x2a0] sm:$0xff] %v6566_v48   ;;  %v8336_v35 = vpop.f32.mrb[65].mxu1  ;;  %v2801_v9 = vmax.f32 %v8247_v20, 0.0 }
 0x1fa   : > { %v3772_v21 = vadd.f32 %v3771_v51, %v3517_v63  ;;  %v3002_v40 = vmin.f32 %v2746_v32, 1.0  ;;  %v3256_v39 = vadd.f32 %v3255_v22, %v3001_v62  ;;  %v2747_v60 = vmax.f32 %v2098_v53, 0.0  ;;  %v8342_v51 = vpop.f32.mrb[66].mxu1 }
 0x1fb   : > { %v3521_v45 = vmul.f32 %v3004_v59, %v3004_v59  ;;  %v3005_v28 = vmin.f32 %v2749_v61, 1.0  ;;  %v8338_v62 = vmin.f32 %v2796_v44, 1.0  ;;  %v8340_v22 = vmin.f32 %v2794_v18, 1.0  ;;  %v8344_v11 = vpop.f32.mrb[67].mxu1 }
 0x1fc   : > { %v3257_v1 = vadd.f32 %v3256_v39, %v3002_v40  ;;  %v3519_v26 = vmul.f32 %v3002_v40, %v3002_v40  ;;  %v3773_v31 = vadd.f32 %v3772_v21, %v3518_v14  ;;  %v3003_v10 = vmin.f32 %v2747_v60, 1.0 }
 0x1fd   : > { %v3522_v6 = vmul.f32 %v3005_v28, %v3005_v28  ;;  %v6461_v63 = vpack.c.bf16 %v3005_v28, %v3004_v59  ;;  %v2797_v39 = vmax.f32 %v8226_v4, 0.0  ;;  %v2795_v21 = vmax.f32 %v8228_v2, 0.0 }
 0x1fe   : > { %v3774_v32 = vadd.f32 %v3773_v31, %v3519_v26  ;;  %v3258_v61 = vadd.f32 %v3257_v1, %v3003_v10  ;;  %v3520_v53 = vmul.f32 %v3003_v10, %v3003_v10  ;;  %v6456_v48 = vpack.c.bf16 %v3003_v10, %v3002_v40  ;;  %v8370_v10 = vpop.f32.mrb[68].mxu1 }
 0x1ff   : > { %6845 = vst [vmem:[%s7857_s26 + $0x1f8] sm:$0xff] %v6461_v63   ;;  %v2800_v14 = vmax.f32 %v8241_v13, 0.0  ;;  %v2798_v44 = vmax.f32 %v8243_v27, 0.0  ;;  %v2799_v1 = vmax.f32 %v8249_v15, 0.0  ;;  %v8354_v26 = vmin.f32 %v2797_v39, 1.0 }
 0x200   : > { %v3259_v60 = vadd.f32 %v3258_v61, %v3004_v59  ;;  %v3775_v18 = vadd.f32 %v3774_v32, %v3520_v53  ;;  %6844 = vst [vmem:[%s7857_s26 + $0x1f0] sm:$0xff] %v6456_v48   ;;  %v8356_v40 = vmin.f32 %v2795_v21, 1.0  ;;  %v8362_v27 = vmin.f32 %v2801_v9, 1.0  ;;  %v8373_v61 = vpop.f32.mrb[69].mxu1 }
 0x201   : > { %v8358_v4 = vmin.f32 %v2800_v14, 1.0  ;;  %v8360_v2 = vmin.f32 %v2798_v44, 1.0  ;;  %v8364_v59 = vmin.f32 %v2799_v1, 1.0  ;;  %v6581_v20 = vpack.c.bf16 %v8354_v26, %v8338_v62 }
 0x202   : > { %v3260_v13 = vadd.f32 %v3259_v60, %v3005_v28  ;;  %v3776_v31 = vadd.f32 %v3775_v18, %v3521_v45  ;;  %v6576_v15 = vpack.c.bf16 %v8356_v40, %v8340_v22  ;;  %v3525_v9 = vmul.f32 %v7970_v46, %v7970_v46 }
 0x203   : > { %v3524_v45 = vmul.f32 %v7980_v56, %v7980_v56  ;;  %6869 = vst [vmem:[%s7857_s26 + $0x2b8] sm:$0xff] %v6581_v20   ;;  %v6591_v28 = vpack.c.bf16 %v8362_v27, %v8358_v4  ;;  %v6586_v53 = vpack.c.bf16 %v8364_v59, %v8360_v2  ;;  %v2804_v39 = vmax.f32 %v8264_v12, 0.0 }
 0x204   : > { %v3777_v63 = vadd.f32 %v3776_v31, %v3522_v6  ;;  %v3261_v32 = vadd.f32 %v3260_v13, %v7972_v47  ;;  %6868 = vst [vmem:[%s7857_s26 + $0x2b0] sm:$0xff] %v6576_v15   ;;  %v8385_v6 = vpop.f32.mrb[70].mxu1  ;;  %v2802_v21 = vmax.f32 %v8266_v36, 0.0  ;;  %v2805_v44 = vmax.f32 %v8269_v0, 0.0 }
 0x205   : > { %v8390_v14 = vpop.f32.mrb[71].mxu1  ;;  %6871 = vst [vmem:[%s7857_s26 + $0x2c8] sm:$0xff] %v6591_v28   ;;  %6870 = vst [vmem:[%s7857_s26 + $0x2c0] sm:$0xff] %v6586_v53   ;;  %v2803_v60 = vmax.f32 %v8271_v19, 0.0  ;;  %v2808_v18 = vmax.f32 %v8286_v29, 0.0  ;;  %v2806_v1 = vmax.f32 %v8288_v23, 0.0  ;;  %v3526_v0 = vmul.f32 %v7978_v55, %v7978_v55 }
 0x206   : > { %v3778_v48 = vadd.f32 %v3777_v63, %v3523_v17  ;;  %v3262_v47 = vadd.f32 %v3261_v32, %v7980_v56  ;;  %v8399_v56 = vmin.f32 %v2804_v39, 1.0  ;;  %v8401_v12 = vmin.f32 %v2802_v21, 1.0  ;;  %v8420_v32 = vpop.f32.mrb[72].mxu1 }
 0x207   : > { %v8403_v36 = vmin.f32 %v2805_v44, 1.0  ;;  %v8405_v31 = vmin.f32 %v2803_v60, 1.0  ;;  %v3529_v23 = vmul.f32 %v8011_v41, %v8011_v41  ;;  %v3528_v20 = vmul.f32 %v8022_v57, %v8022_v57  ;;  %v8427_v53 = vpop.f32.mrb[73].mxu1 }
 0x208   : > { %v3263_v17 = vadd.f32 %v3262_v47, %v7970_v46  ;;  %v3779_v13 = vadd.f32 %v3778_v48, %v3524_v45  ;;  %v3527_v46 = vmul.f32 %v8017_v50, %v8017_v50  ;;  %v8425_v28 = vmin.f32 %v2806_v1, 1.0  ;;  %v8435_v44 = vpop.f32.mrb[74].mxu1 }
 0x209   : > { %v6601_v15 = vpack.c.bf16 %v8403_v36, %v8399_v56  ;;  %v6596_v63 = vpack.c.bf16 %v8405_v31, %v8401_v12  ;;  %v2809_v48 = vmax.f32 %v8293_v37, 0.0  ;;  %v2807_v47 = vmax.f32 %v8295_v16, 0.0 }
 0x20a   : > { %v3264_v19 = vadd.f32 %v3263_v17, %v7978_v55  ;;  %v3780_v29 = vadd.f32 %v3779_v13, %v3525_v9  ;;  %v8423_v9 = vmin.f32 %v2808_v18, 1.0  ;;  %v2812_v39 = vmax.f32 %v8310_v5, 0.0  ;;  %v8440_v17 = vpop.f32.mrb[75].mxu1 }
 0x20b   : > { %6873 = vst [vmem:[%s7857_s26 + $0x2d8] sm:$0xff] %v6601_v15   ;;  %6872 = vst [vmem:[%s7857_s26 + $0x2d0] sm:$0xff] %v6596_v63   ;;  %v2810_v21 = vmax.f32 %v8312_v58, 0.0  ;;  %v2813_v18 = vmax.f32 %v8316_v49, 0.0  ;;  %v2811_v1 = vmax.f32 %v8318_v24, 0.0  ;;  %v8442_v13 = vmin.f32 %v2809_v48, 1.0 }
 0x20c   : > { %v3781_v45 = vadd.f32 %v3780_v29, %v3526_v0  ;;  %v3265_v55 = vadd.f32 %v3264_v19, %v8017_v50  ;;  %v8444_v37 = vmin.f32 %v2807_v47, 1.0  ;;  %v8446_v16 = vmin.f32 %v2812_v39, 1.0 }
 0x20d   : > { %v8448_v5 = vmin.f32 %v2810_v21, 1.0  ;;  %v8453_v49 = vmin.f32 %v2811_v1, 1.0  ;;  %v6611_v24 = vpack.c.bf16 %v8442_v13, %v8423_v9  ;;  %v3530_v29 = vmul.f32 %v8020_v54, %v8020_v54 }
 0x20e   : > { %v3782_v60 = vadd.f32 %v3781_v45, %v3527_v46  ;;  %v3266_v50 = vadd.f32 %v3265_v55, %v8022_v57  ;;  %v8451_v57 = vmin.f32 %v2813_v18, 1.0  ;;  %v6606_v19 = vpack.c.bf16 %v8444_v37, %v8425_v28  ;;  %v8472_v55 = vpop.f32.mrb[76].mxu1 }
 0x20f   : > { %6875 = vst [vmem:[%s7857_s26 + $0x2e8] sm:$0xff] %v6611_v24   ;;  %v6616_v45 = vpack.c.bf16 %v8453_v49, %v8448_v5  ;;  %v2814_v47 = vmax.f32 %v8336_v35, 0.0  ;;  %v8477_v39 = vpop.f32.mrb[77].mxu1  ;;  %v2817_v21 = vmax.f32 %v8342_v51, 0.0  ;;  %v2818_v18 = vmax.f32 %v8373_v61, 0.0 }
 0x210   : > { %v3267_v58 = vadd.f32 %v3266_v50, %v8011_v41  ;;  %v3783_v0 = vadd.f32 %v3782_v60, %v3528_v20  ;;  %v3531_v41 = vmul.f32 %v8050_v34, %v8050_v34  ;;  %v3532_v20 = vmul.f32 %v8054_v43, %v8054_v43  ;;  %6874 = vst [vmem:[%s7857_s26 + $0x2e0] sm:$0xff] %v6606_v19   ;;  %v8485_v1 = vpop.f32.mrb[78].mxu1 }
 0x211   : > { %v6621_v63 = vpack.c.bf16 %v8451_v57, %v8446_v16  ;;  %6876 = vst [vmem:[%s7857_s26 + $0x2f0] sm:$0xff] %v6616_v45   ;;  %v2815_v60 = vmax.f32 %v8344_v11, 0.0  ;;  %v2820_v50 = vmax.f32 %v8370_v10, 0.0  ;;  %v8490_v35 = vmin.f32 %v2814_v47, 1.0 }
 0x212   : > { %v3268_v46 = vadd.f32 %v3267_v58, %v8020_v54  ;;  %v3784_v15 = vadd.f32 %v3783_v0, %v3529_v23  ;;  %v2816_v23 = vmax.f32 %v8334_v3, 0.0  ;;  %v8492_v0 = vpop.f32.mrb[79].mxu1  ;;  %v8494_v51 = vmin.f32 %v2817_v21, 1.0 }
 0x213   : > { %6877 = vst [vmem:[%s7857_s26 + $0x2f8] sm:$0xff] %v6621_v63   ;;  %v8496_v11 = vmin.f32 %v2815_v60, 1.0  ;;  %v3533_v10 = vmul.f32 %v8048_v33, %v8048_v33  ;;  %v3534_v61 = vmul.f32 %v8052_v42, %v8052_v42  ;;  %v3535_v19 = vmul.f32 %v8092_v52, %v8092_v52  ;;  %v7263_v47 = vpop.f32.mrb[80].mxu1 }
 0x214   : > { %v3785_v48 = vadd.f32 %v3784_v15, %v3530_v29  ;;  %v3269_v54 = vadd.f32 %v3268_v46, %v8050_v34  ;;  %v8488_v3 = vmin.f32 %v2816_v23, 1.0  ;;  %v3536_v29 = vmul.f32 %v8099_v7, %v8099_v7 }
 0x215   : > { %v6626_v15 = vpack.c.bf16 %v8496_v11, %v8490_v35  ;;  %v8512_v45 = vmin.f32 %v2820_v50, 1.0  ;;  %v2822_v23 = vmax.f32 %v8427_v53, 0.0  ;;  %v2823_v50 = vmax.f32 %v8440_v17, 0.0 }
 0x216   : > { %v3786_v58 = vadd.f32 %v3785_v48, %v3531_v41  ;;  %v3270_v34 = vadd.f32 %v3269_v54, %v8054_v43  ;;  %v6631_v46 = vpack.c.bf16 %v8494_v51, %v8488_v3  ;;  %v8514_v48 = vmin.f32 %v2818_v18, 1.0  ;;  %v2431_v18 = vpop.f32.mrb[81].mxu1 }
 0x217   : > { %6878 = vst [vmem:[%s7857_s26 + $0x300] sm:$0xff] %v6626_v15   ;;  %v2824_v54 = vmax.f32 %v8420_v32, 0.0  ;;  %v7264_v32 = vpop.f32.mrb[82].mxu1  ;;  %v3539_v15 = vmul.f32 %v8122_v8, %v8122_v8 }
 0x218   : > { %v3271_v43 = vadd.f32 %v3270_v34, %v8048_v33  ;;  %v3787_v24 = vadd.f32 %v3786_v58, %v3532_v20  ;;  %6879 = vst [vmem:[%s7857_s26 + $0x308] sm:$0xff] %v6631_v46   ;;  %v2821_v33 = vmax.f32 %v8385_v6, 0.0  ;;  %v2819_v20 = vmax.f32 %v8390_v14, 0.0  ;;  %v2434_v17 = vpop.f32.mrb[83].mxu1 }
 0x219   : > { %v8529_v6 = vmin.f32 %v2824_v54, 1.0  ;;  %v8531_v14 = vmin.f32 %v2822_v23, 1.0  ;;  %v2829_v54 = vmax.f32 %v8485_v1, 0.0  ;;  %v2827_v23 = vmax.f32 %v8492_v0, 0.0 }
 0x21a   : > { %v3272_v41 = vadd.f32 %v3271_v43, %v8052_v42  ;;  %v3788_v63 = vadd.f32 %v3787_v24, %v3533_v10  ;;  %v2825_v42 = vmax.f32 %v8435_v44, 0.0  ;;  %v8525_v58 = vmin.f32 %v2821_v33, 1.0 }
 0x21b   : > { %v8527_v34 = vmin.f32 %v2819_v20, 1.0  ;;  %9258 = vst [vmem:[#allocation31_spill] sm:$0xff] %v8529_v6  ;;  %v8536_v44 = vmin.f32 %v2823_v50, 1.0  ;;  %v3537_v24 = vmul.f32 %v8078_v25, %v8078_v25  ;;  %v3541_v0 = vmul.f32 %v8114_v38, %v8114_v38 }
 0x21c   : > { %v3789_v21 = vadd.f32 %v3788_v63, %v3534_v61  ;;  %v3273_v60 = vadd.f32 %v3272_v41, %v8092_v52  ;;  %v8534_v52 = vmin.f32 %v2825_v42, 1.0  ;;  %v6641_v61 = vpack.c.bf16 %v8525_v58, %v8512_v45  ;;  %v7267_v42 = vpop.f32.mrb[84].mxu1 }
 0x21d   : > { %v6636_v43 = vpack.c.bf16 %v8527_v34, %v8514_v48  ;;  %v6646_v63 = vpack.c.bf16 %v8536_v44, %v8531_v14 }
 0x21e   : > { %v3790_v53 = vadd.f32 %v3789_v21, %v3535_v19  ;;  %v3274_v10 = vadd.f32 %v3273_v60, %v8099_v7  ;;  %9259 = vst [vmem:[#allocation32_spill] sm:$0xff] %v8534_v52  ;;  %v3538_v7 = vmul.f32 %v8085_v30, %v8085_v30  ;;  %6881 = vst [vmem:[%s7857_s26 + $0x318] sm:$0xff] %v6641_v61   ;;  %v2832_v21 = vmax.f32 %v7263_v47, 0.0  ;;  %v2447_v61 = vpop.f32.mrb[85].mxu1 }
 0x21f   : > { %6880 = vst [vmem:[%s7857_s26 + $0x310] sm:$0xff] %v6636_v43   ;;  %v6651_v41 = vpack.c.bf16 %v8534_v52, %v8529_v6  ;;  %6882 = vst [vmem:[%s7857_s26 + $0x320] sm:$0xff] %v6646_v63   ;;  %v2830_v60 = vmax.f32 %v2431_v18, 0.0  ;;  %v7268_v1 = vpop.f32.mrb[86].mxu1  ;;  %v9263_v18 = vld [vmem:[#allocation6_spill] sm:$0xff] }
 0x220   : > { %v3275_v19 = vadd.f32 %v3274_v10, %v8078_v25  ;;  %v3791_v46 = vadd.f32 %v3790_v53, %v3536_v29  ;;  %v2828_v25 = vmax.f32 %v8472_v55, 0.0  ;;  %v2826_v29 = vmax.f32 %v8477_v39, 0.0 }
 0x221   : > { %6883 = vst [vmem:[%s7857_s26 + $0x328] sm:$0xff] %v6651_v41   ;;  %v8567_v55 = vmin.f32 %v2829_v54, 1.0  ;;  %v8569_v39 = vmin.f32 %v2827_v23, 1.0  ;;  %v2833_v54 = vmax.f32 %v7264_v32, 0.0  ;;  %v2831_v23 = vmax.f32 %v2434_v17, 0.0 }
 0x222   : > { %v3276_v33 = vadd.f32 %v3275_v19, %v8085_v30  ;;  %v3792_v20 = vadd.f32 %v3791_v46, %v3537_v24  ;;  %v8563_v10 = vmin.f32 %v2828_v25, 1.0  ;;  %v8565_v30 = vmin.f32 %v2826_v29, 1.0  ;;  %v2450_v24 = vpop.f32.mrb[87].mxu1  ;;  %v9264_v19 = vld [vmem:[#allocation5_spill] sm:$0xff] }
 0x223   : > { %9261 = vst [vmem:[#allocation34_spill] sm:$0xff] %v8567_v55  ;;  %9262 = vst [vmem:[#allocation35_spill] sm:$0xff] %v8569_v39  ;;  %v3542_v46 = vmul.f32 %v9264_v19, %v9264_v19  ;;  %v8585_v25 = vmin.f32 %v2832_v21, 1.0  ;;  %v8587_v29 = vmin.f32 %v2830_v60, 1.0  ;;  %v8592_v6 = vmin.f32 %v2833_v54, 1.0  ;;  %v7271_v60 = vpop.f32.mrb[88].mxu1 }
 0x224   : > { %v3793_v50 = vadd.f32 %v3792_v20, %v3538_v7  ;;  %v3277_v53 = vadd.f32 %v3276_v33, %v8122_v8  ;;  %9260 = vst [vmem:[#allocation33_spill] sm:$0xff] %v8563_v10  ;;  %v3540_v8 = vmul.f32 %v9263_v18, %v9263_v18  ;;  %v9265_v7 = vld [vmem:[#allocation9_spill] sm:$0xff]  ;;  %v6661_v63 = vpack.c.bf16 %v8567_v55, %v8563_v10  ;;  %v9268_v54 = vld [vmem:[#allocation8_spill] sm:$0xff] }
 0x225   : > { %v3543_v41 = vmul.f32 %v9265_v7, %v9265_v7  ;;  %v6656_v33 = vpack.c.bf16 %v8569_v39, %v8565_v30  ;;  %v2837_v55 = vmax.f32 %v7268_v1, 0.0  ;;  %v2835_v10 = vmax.f32 %v2450_v24, 0.0  ;;  %v2463_v1 = vpop.f32.mrb[89].mxu1  ;;  %v9266_v24 = vld [vmem:[#allocation10_spill] sm:$0xff] }
 0x226   : > { %v3794_v47 = vadd.f32 %v3793_v50, %v3539_v15  ;;  %v3278_v43 = vadd.f32 %v3277_v53, %v9263_v18  ;;  %6885 = vst [vmem:[%s7857_s26 + $0x338] sm:$0xff] %v6661_v63   ;;  %v2836_v50 = vmax.f32 %v7267_v42, 0.0  ;;  %v2834_v53 = vmax.f32 %v2447_v61, 0.0 }
 0x227   : > { %6884 = vst [vmem:[%s7857_s26 + $0x330] sm:$0xff] %v6656_v33   ;;  %v8594_v39 = vmin.f32 %v2831_v23, 1.0  ;;  %v8601_v42 = vmin.f32 %v2837_v55, 1.0  ;;  %v8603_v61 = vmin.f32 %v2835_v10, 1.0  ;;  %v3546_v23 = vmul.f32 %v9268_v54, %v9268_v54 }
 0x228   : > { %v3279_v15 = vadd.f32 %v3278_v43, %v8114_v38  ;;  %v3795_v20 = vadd.f32 %v3794_v47, %v3540_v8  ;;  %v8596_v38 = vmin.f32 %v2836_v50, 1.0  ;;  %v8598_v21 = vmin.f32 %v2834_v53, 1.0  ;;  %v7272_v43 = vpop.f32.mrb[90].mxu1  ;;  %v9269_v50 = vld [vmem:[#allocation12_spill] sm:$0xff] }
 0x229   : > { %v6666_v47 = vpack.c.bf16 %v8594_v39, %v8587_v29  ;;  %v2466_v55 = vpop.f32.mrb[91].mxu1  ;;  %v3547_v53 = vmul.f32 %v9269_v50, %v9269_v50 }
 0x22a   : > { %v3280_v18 = vadd.f32 %v3279_v15, %v9264_v19  ;;  %v3796_v52 = vadd.f32 %v3795_v20, %v3541_v0  ;;  %v6671_v0 = vpack.c.bf16 %v8592_v6, %v8585_v25  ;;  %v6676_v63 = vpack.c.bf16 %v8603_v61, %v8598_v21 }
 0x22b   : > { %6886 = vst [vmem:[%s7857_s26 + $0x340] sm:$0xff] %v6666_v47   ;;  %v2840_v15 = vmax.f32 %v7271_v60, 0.0  ;;  %v2838_v20 = vmax.f32 %v2463_v1, 0.0 }
 0x22c   : > { %v3797_v32 = vadd.f32 %v3796_v52, %v3542_v46  ;;  %v3281_v17 = vadd.f32 %v3280_v18, %v9265_v7  ;;  %v3544_v52 = vmul.f32 %v9266_v24, %v9266_v24  ;;  %v9267_v46 = vld [vmem:[#allocation7_spill] sm:$0xff]  ;;  %6887 = vst [vmem:[%s7857_s26 + $0x348] sm:$0xff] %v6671_v0   ;;  %v6681_v7 = vpack.c.bf16 %v8601_v42, %v8596_v38 }
 0x22d   : > { %v3545_v10 = vmul.f32 %v9267_v46, %v9267_v46  ;;  %6888 = vst [vmem:[%s7857_s26 + $0x350] sm:$0xff] %v6676_v63   ;;  %v2841_v18 = vmax.f32 %v7272_v43, 0.0  ;;  %v8628_v47 = vmin.f32 %v2840_v15, 1.0  ;;  %v9271_v63 = vld [vmem:[#allocation14_spill] sm:$0xff] }
 0x22e   : > { %v3798_v8 = vadd.f32 %v3797_v32, %v3543_v41  ;;  %v3282_v19 = vadd.f32 %v3281_v17, %v9266_v24  ;;  %6889 = vst [vmem:[%s7857_s26 + $0x358] sm:$0xff] %v6681_v7   ;;  %v2839_v32 = vmax.f32 %v2466_v55, 0.0  ;;  %v7275_v24 = vpop.f32.mrb[92].mxu1 }
 0x22f   : > { %v8632_v60 = vmin.f32 %v2841_v18, 1.0  ;;  %v9272_v18 = vld [vmem:[#allocation11_spill] sm:$0xff] }
 0x230   : > { %v3283_v41 = vadd.f32 %v3282_v19, %v9267_v46  ;;  %v3799_v33 = vadd.f32 %v3798_v8, %v3544_v52  ;;  %v8630_v8 = vmin.f32 %v2838_v20, 1.0  ;;  %v8634_v1 = vmin.f32 %v2839_v32, 1.0  ;;  %v2479_v46 = vpop.f32.mrb[93].mxu1 }
 0x231   : > { %9270 = vst [vmem:[#allocation6_spill] sm:$0xff] %v8632_v60  ;;  %v6691_v43 = vpack.c.bf16 %v8632_v60, %v8628_v47  ;;  %v2844_v20 = vmax.f32 %v7275_v24, 0.0  ;;  %v3549_v32 = vmul.f32 %v9272_v18, %v9272_v18  ;;  %v9279_v60 = vld [vmem:[#allocation18_spill] sm:$0xff] }
 0x232   : > { %v3284_v17 = vadd.f32 %v3283_v41, %v9268_v54  ;;  %v3800_v0 = vadd.f32 %v3799_v33, %v3545_v10  ;;  %v6686_v55 = vpack.c.bf16 %v8634_v1, %v8630_v8  ;;  %v7276_v10 = vpop.f32.mrb[94].mxu1  ;;  %v3548_v33 = vmul.f32 %v9271_v63, %v9271_v63 }
 0x233   : > { %v2482_v15 = vpop.f32.mrb[95].mxu1  ;;  %6891 = vst [vmem:[%s7857_s26 + $0x368] sm:$0xff] %v6691_v43   ;;  %v2842_v54 = vmax.f32 %v2479_v46, 0.0  ;;  %v9277_v43 = vld [vmem:[#allocation13_spill] sm:$0xff] }
 0x234   : > { %v3801_v19 = vadd.f32 %v3800_v0, %v3546_v23  ;;  %v3285_v52 = vadd.f32 %v3284_v17, %v9269_v50  ;;  %6890 = vst [vmem:[%s7857_s26 + $0x360] sm:$0xff] %v6686_v55   ;;  %v2845_v23 = vmax.f32 %v7276_v10, 0.0  ;;  %v2843_v50 = vmax.f32 %v2482_v15, 0.0  ;;  %v9278_v10 = vld [vmem:[#allocation16_spill] sm:$0xff] }
 0x235   : > { %v3550_v24 = vmul.f32 %v9277_v43, %v9277_v43 }
 0x236   : > { %v3802_v7 = vadd.f32 %v3801_v19, %v3547_v53  ;;  %v3286_v41 = vadd.f32 %v3285_v52, %v9271_v63  ;;  %v8649_v53 = vmin.f32 %v2844_v20, 1.0  ;;  %v8651_v19 = vmin.f32 %v2842_v54, 1.0 }
 0x237   : > { %v8653_v52 = vmin.f32 %v2845_v23, 1.0  ;;  %v8655_v63 = vmin.f32 %v2843_v50, 1.0 }
 0x238   : > { %v3287_v17 = vadd.f32 %v3286_v41, %v9272_v18  ;;  %v3803_v0 = vadd.f32 %v3802_v7, %v3548_v33  ;;  %9273 = vst [vmem:[#allocation5_spill] sm:$0xff] %v8649_v53  ;;  %9274 = vst [vmem:[#allocation9_spill] sm:$0xff] %v8651_v19  ;;  %v3551_v41 = vmul.f32 %v9278_v10, %v9278_v10  ;;  %v7279_v33 = vpop.f32.mrb[96].mxu1 }
 0x239   : > { %9275 = vst [vmem:[#allocation10_spill] sm:$0xff] %v8653_v52  ;;  %9276 = vst [vmem:[#allocation7_spill] sm:$0xff] %v8655_v63  ;;  %v6701_v7 = vpack.c.bf16 %v8653_v52, %v8649_v53  ;;  %v6696_v54 = vpack.c.bf16 %v8655_v63, %v8651_v19  ;;  %v2495_v23 = vpop.f32.mrb[97].mxu1  ;;  %v9287_v19 = vld [vmem:[#allocation22_spill] sm:$0xff] }
 0x23a   : > { %v3288_v46 = vadd.f32 %v3287_v17, %v9277_v43  ;;  %v3804_v55 = vadd.f32 %v3803_v0, %v3549_v32  ;;  %v7280_v50 = vpop.f32.mrb[98].mxu1  ;;  %v3552_v32 = vmul.f32 %v9279_v60, %v9279_v60  ;;  %v2848_v43 = vmax.f32 %v7279_v33, 0.0 }
 0x23b   : > { %6893 = vst [vmem:[%s7857_s26 + $0x378] sm:$0xff] %v6701_v7   ;;  %6892 = vst [vmem:[%s7857_s26 + $0x370] sm:$0xff] %v6696_v54   ;;  %v2498_v0 = vpop.f32.mrb[99].mxu1  ;;  %v2846_v52 = vmax.f32 %v2495_v23, 0.0  ;;  %v2849_v53 = vmax.f32 %v7280_v50, 0.0  ;;  %v9286_v50 = vld [vmem:[#allocation21_spill] sm:$0xff] }
 0x23c   : > { %v3805_v15 = vadd.f32 %v3804_v55, %v3550_v24  ;;  %v3289_v20 = vadd.f32 %v3288_v46, %v9278_v10  ;;  %v2847_v24 = vmax.f32 %v2498_v0, 0.0  ;;  %v9280_v55 = vld [vmem:[#allocation15_spill] sm:$0xff]  ;;  %v8675_v63 = vmin.f32 %v2848_v43, 1.0 }
 0x23d   : > { %v3553_v46 = vmul.f32 %v9280_v55, %v9280_v55 }
 0x23e   : > { %v3806_v18 = vadd.f32 %v3805_v15, %v3551_v41  ;;  %v3290_v17 = vadd.f32 %v3289_v20, %v9279_v60  ;;  %9281 = vst [vmem:[#allocation8_spill] sm:$0xff] %v8675_v63  ;;  %v8677_v41 = vmin.f32 %v2846_v52, 1.0  ;;  %v8679_v15 = vmin.f32 %v2849_v53, 1.0  ;;  %v9285_v20 = vld [vmem:[#allocation17_spill] sm:$0xff] }
 0x23f   : > { %v8681_v60 = vmin.f32 %v2847_v24, 1.0  ;;  %v3554_v33 = vmul.f32 %v9285_v20, %v9285_v20 }
 0x240   : > { %v3291_v10 = vadd.f32 %v3290_v17, %v9280_v55  ;;  %v3807_v7 = vadd.f32 %v3806_v18, %v3552_v32  ;;  %9282 = vst [vmem:[#allocation12_spill] sm:$0xff] %v8677_v41  ;;  %9283 = vst [vmem:[#allocation14_spill] sm:$0xff] %v8679_v15  ;;  %v3555_v17 = vmul.f32 %v9286_v50, %v9286_v50  ;;  %v7283_v32 = vpop.f32.mrb[100].mxu1 }
 0x241   : > { %9284 = vst [vmem:[#allocation11_spill] sm:$0xff] %v8681_v60  ;;  %v6711_v18 = vpack.c.bf16 %v8679_v15, %v8675_v63  ;;  %v6706_v0 = vpack.c.bf16 %v8681_v60, %v8677_v41  ;;  %v2511_v43 = vpop.f32.mrb[101].mxu1  ;;  %v9295_v41 = vld [vmem:[#allocation26_spill] sm:$0xff] }
 0x242   : > { %v3292_v54 = vadd.f32 %v3291_v10, %v9285_v20  ;;  %v3808_v23 = vadd.f32 %v3807_v7, %v3553_v46  ;;  %v7284_v24 = vpop.f32.mrb[102].mxu1  ;;  %v3556_v46 = vmul.f32 %v9287_v19, %v9287_v19  ;;  %v2852_v20 = vmax.f32 %v7283_v32, 0.0 }
 0x243   : > { %6895 = vst [vmem:[%s7857_s26 + $0x388] sm:$0xff] %v6711_v18   ;;  %6894 = vst [vmem:[%s7857_s26 + $0x380] sm:$0xff] %v6706_v0   ;;  %v2514_v7 = vpop.f32.mrb[103].mxu1  ;;  %v2850_v15 = vmax.f32 %v2511_v43, 0.0  ;;  %v2853_v63 = vmax.f32 %v7284_v24, 0.0  ;;  %v9294_v24 = vld [vmem:[#allocation25_spill] sm:$0xff] }
 0x244   : > { %v3809_v52 = vadd.f32 %v3808_v23, %v3554_v33  ;;  %v3293_v53 = vadd.f32 %v3292_v54, %v9286_v50  ;;  %v2851_v33 = vmax.f32 %v2514_v7, 0.0  ;;  %v9288_v23 = vld [vmem:[#allocation19_spill] sm:$0xff]  ;;  %v8701_v60 = vmin.f32 %v2852_v20, 1.0 }
 0x245   : > { %v3557_v54 = vmul.f32 %v9288_v23, %v9288_v23 }
 0x246   : > { %v3810_v55 = vadd.f32 %v3809_v52, %v3555_v17  ;;  %v3294_v10 = vadd.f32 %v3293_v53, %v9287_v19  ;;  %9289 = vst [vmem:[#allocation13_spill] sm:$0xff] %v8701_v60  ;;  %v8703_v17 = vmin.f32 %v2850_v15, 1.0  ;;  %v8705_v52 = vmin.f32 %v2853_v63, 1.0  ;;  %v9293_v53 = vld [vmem:[#allocation20_spill] sm:$0xff] }
 0x247   : > { %v8707_v19 = vmin.f32 %v2851_v33, 1.0  ;;  %v3558_v32 = vmul.f32 %v9293_v53, %v9293_v53 }
 0x248   : > { %v3295_v50 = vadd.f32 %v3294_v10, %v9288_v23  ;;  %v3811_v18 = vadd.f32 %v3810_v55, %v3556_v46  ;;  %9290 = vst [vmem:[#allocation16_spill] sm:$0xff] %v8703_v17  ;;  %9291 = vst [vmem:[#allocation18_spill] sm:$0xff] %v8705_v52  ;;  %v3559_v10 = vmul.f32 %v9294_v24, %v9294_v24  ;;  %v7287_v46 = vpop.f32.mrb[104].mxu1 }
 0x249   : > { %9292 = vst [vmem:[#allocation15_spill] sm:$0xff] %v8707_v19  ;;  %v6721_v55 = vpack.c.bf16 %v8705_v52, %v8701_v60  ;;  %v6716_v7 = vpack.c.bf16 %v8707_v19, %v8703_v17  ;;  %v2527_v20 = vpop.f32.mrb[105].mxu1  ;;  %v9302_v17 = vld [vmem:[#allocation30_spill] sm:$0xff] }
 0x24a   : > { %v3296_v0 = vadd.f32 %v3295_v50, %v9293_v53  ;;  %v3812_v43 = vadd.f32 %v3811_v18, %v3557_v54  ;;  %v7288_v33 = vpop.f32.mrb[106].mxu1  ;;  %v3560_v54 = vmul.f32 %v9295_v41, %v9295_v41  ;;  %v2856_v53 = vmax.f32 %v7287_v46, 0.0 }
 0x24b   : > { %6897 = vst [vmem:[%s7857_s26 + $0x398] sm:$0xff] %v6721_v55   ;;  %6896 = vst [vmem:[%s7857_s26 + $0x390] sm:$0xff] %v6716_v7   ;;  %v2530_v18 = vpop.f32.mrb[107].mxu1  ;;  %v2854_v52 = vmax.f32 %v2527_v20, 0.0  ;;  %v2857_v60 = vmax.f32 %v7288_v33, 0.0  ;;  %v9301_v33 = vld [vmem:[#allocation29_spill] sm:$0xff] }
 0x24c   : > { %v3813_v15 = vadd.f32 %v3812_v43, %v3558_v32  ;;  %v3297_v63 = vadd.f32 %v3296_v0, %v9294_v24  ;;  %v2855_v32 = vmax.f32 %v2530_v18, 0.0  ;;  %v9296_v43 = vld [vmem:[#allocation23_spill] sm:$0xff]  ;;  %v8727_v19 = vmin.f32 %v2856_v53, 1.0 }
 0x24d   : > { %v3561_v0 = vmul.f32 %v9296_v43, %v9296_v43 }
 0x24e   : > { %v3814_v23 = vadd.f32 %v3813_v15, %v3559_v10  ;;  %v3298_v50 = vadd.f32 %v3297_v63, %v9295_v41  ;;  %9297 = vst [vmem:[#allocation17_spill] sm:$0xff] %v8727_v19  ;;  %v8729_v10 = vmin.f32 %v2854_v52, 1.0  ;;  %v8731_v15 = vmin.f32 %v2857_v60, 1.0  ;;  %v9300_v63 = vld [vmem:[#allocation24_spill] sm:$0xff] }
 0x24f   : > { %v8733_v41 = vmin.f32 %v2855_v32, 1.0  ;;  %v3562_v46 = vmul.f32 %v9300_v63, %v9300_v63 }
 0x250   : > { %v3299_v24 = vadd.f32 %v3298_v50, %v9296_v43  ;;  %v3815_v55 = vadd.f32 %v3814_v23, %v3560_v54  ;;  %9298 = vst [vmem:[#allocation21_spill] sm:$0xff] %v8731_v15  ;;  %v3563_v50 = vmul.f32 %v9301_v33, %v9301_v33  ;;  %v6731_v23 = vpack.c.bf16 %v8731_v15, %v8727_v19  ;;  %v7291_v54 = vpop.f32.mrb[108].mxu1 }
 0x251   : > { %9299 = vst [vmem:[#allocation22_spill] sm:$0xff] %v8733_v41  ;;  %v6726_v18 = vpack.c.bf16 %v8733_v41, %v8729_v10  ;;  %v2543_v53 = vpop.f32.mrb[109].mxu1 }
 0x252   : > { %v3300_v7 = vadd.f32 %v3299_v24, %v9300_v63  ;;  %v3816_v20 = vadd.f32 %v3815_v55, %v3561_v0  ;;  %6899 = vst [vmem:[%s7857_s26 + $0x3a8] sm:$0xff] %v6731_v23   ;;  %v7292_v32 = vpop.f32.mrb[110].mxu1  ;;  %v3564_v0 = vmul.f32 %v9302_v17, %v9302_v17  ;;  %v2860_v63 = vmax.f32 %v7291_v54, 0.0 }
 0x253   : > { %6898 = vst [vmem:[%s7857_s26 + $0x3a0] sm:$0xff] %v6726_v18   ;;  %v2546_v55 = vpop.f32.mrb[111].mxu1  ;;  %v2858_v15 = vmax.f32 %v2543_v53, 0.0  ;;  %v2861_v19 = vmax.f32 %v7292_v32, 0.0  ;;  %v3567_v32 = vmul.f32 %v8340_v22, %v8340_v22 }
 0x254   : > { %v3817_v52 = vadd.f32 %v3816_v20, %v3562_v46  ;;  %v3301_v60 = vadd.f32 %v3300_v7, %v9301_v33  ;;  %v2859_v46 = vmax.f32 %v2546_v55, 0.0  ;;  %v9303_v20 = vld [vmem:[#allocation27_spill] sm:$0xff]  ;;  %v8753_v41 = vmin.f32 %v2860_v63, 1.0 }
 0x255   : > { %v3565_v7 = vmul.f32 %v9303_v20, %v9303_v20 }
 0x256   : > { %v3818_v43 = vadd.f32 %v3817_v52, %v3563_v50  ;;  %v3302_v24 = vadd.f32 %v3301_v60, %v9302_v17  ;;  %v8755_v50 = vmin.f32 %v2858_v15, 1.0  ;;  %v8757_v52 = vmin.f32 %v2861_v19, 1.0  ;;  %v9305_v60 = vld [vmem:[#allocation28_spill] sm:$0xff] }
 0x257   : > { %v8759_v17 = vmin.f32 %v2859_v46, 1.0  ;;  %v3566_v54 = vmul.f32 %v9305_v60, %v9305_v60 }
 0x258   : > { %v3303_v33 = vadd.f32 %v3302_v24, %v9303_v20  ;;  %v3819_v23 = vadd.f32 %v3818_v43, %v3564_v0  ;;  %9304 = vst [vmem:[#allocation19_spill] sm:$0xff] %v8757_v52  ;;  %v6741_v43 = vpack.c.bf16 %v8757_v52, %v8753_v41  ;;  %v7295_v24 = vpop.f32.mrb[112].mxu1 }
 0x259   : > { %v6736_v0 = vpack.c.bf16 %v8759_v17, %v8755_v50  ;;  %v2559_v55 = vpop.f32.mrb[113].mxu1 }
 0x25a   : > { %v3304_v18 = vadd.f32 %v3303_v33, %v9305_v60  ;;  %v3820_v53 = vadd.f32 %v3819_v23, %v3565_v7  ;;  %6901 = vst [vmem:[%s7857_s26 + $0x3b8] sm:$0xff] %v6741_v43   ;;  %v7296_v63 = vpop.f32.mrb[114].mxu1  ;;  %v3568_v7 = vmul.f32 %v8356_v40, %v8356_v40  ;;  %v2864_v23 = vmax.f32 %v7295_v24, 0.0 }
 0x25b   : > { %6900 = vst [vmem:[%s7857_s26 + $0x3b0] sm:$0xff] %v6736_v0   ;;  %v2562_v33 = vpop.f32.mrb[115].mxu1  ;;  %v2862_v60 = vmax.f32 %v2559_v55, 0.0  ;;  %v2865_v52 = vmax.f32 %v7296_v63, 0.0  ;;  %v3570_v24 = vmul.f32 %v8354_v26, %v8354_v26 }
 0x25c   : > { %v3821_v15 = vadd.f32 %v3820_v53, %v3566_v54  ;;  %v3305_v19 = vadd.f32 %v3304_v18, %v8340_v22  ;;  %v2863_v54 = vmax.f32 %v2562_v33, 0.0  ;;  %v3569_v22 = vmul.f32 %v8338_v62, %v8338_v62  ;;  %v7299_v63 = vpop.f32.mrb[116].mxu1 }
 0x25d   : > { %v8779_v43 = vmin.f32 %v2864_v23, 1.0 }
 0x25e   : > { %v3822_v46 = vadd.f32 %v3821_v15, %v3567_v32  ;;  %v3306_v20 = vadd.f32 %v3305_v19, %v8356_v40  ;;  %v8781_v32 = vmin.f32 %v2862_v60, 1.0  ;;  %v8783_v15 = vmin.f32 %v2865_v52, 1.0 }
 0x25f   : > { %v8785_v40 = vmin.f32 %v2863_v54, 1.0  ;;  %v3572_v60 = vmul.f32 %v8364_v59, %v8364_v59 }
 0x260   : > { %v3307_v18 = vadd.f32 %v3306_v20, %v8338_v62  ;;  %v3823_v53 = vadd.f32 %v3822_v46, %v3568_v7  ;;  %v3571_v62 = vmul.f32 %v8360_v2, %v8360_v2  ;;  %v6751_v55 = vpack.c.bf16 %v8783_v15, %v8779_v43  ;;  %v2575_v7 = vpop.f32.mrb[117].mxu1 }
 0x261   : > { %v6746_v20 = vpack.c.bf16 %v8785_v40, %v8781_v32  ;;  %v7300_v33 = vpop.f32.mrb[118].mxu1 }
 0x262   : > { %v3308_v19 = vadd.f32 %v3307_v18, %v8354_v26  ;;  %v3824_v0 = vadd.f32 %v3823_v53, %v3569_v22  ;;  %6903 = vst [vmem:[%s7857_s26 + $0x3c8] sm:$0xff] %v6751_v55   ;;  %v2578_v54 = vpop.f32.mrb[119].mxu1  ;;  %v2868_v22 = vmax.f32 %v7299_v63, 0.0  ;;  %v2866_v18 = vmax.f32 %v2575_v7, 0.0 }
 0x263   : > { %6902 = vst [vmem:[%s7857_s26 + $0x3c0] sm:$0xff] %v6746_v20   ;;  %v2869_v53 = vmax.f32 %v7300_v33, 0.0  ;;  %v3574_v63 = vmul.f32 %v8362_v27, %v8362_v27 }
 0x264   : > { %v3825_v46 = vadd.f32 %v3824_v0, %v3570_v24  ;;  %v3309_v52 = vadd.f32 %v3308_v19, %v8360_v2  ;;  %v2867_v24 = vmax.f32 %v2578_v54, 0.0  ;;  %v3573_v2 = vmul.f32 %v8358_v4, %v8358_v4 }
 0x265   : > { %v8805_v55 = vmin.f32 %v2868_v22, 1.0 }
 0x266   : > { %v3826_v23 = vadd.f32 %v3825_v46, %v3571_v62  ;;  %v3310_v26 = vadd.f32 %v3309_v52, %v8364_v59  ;;  %v8807_v62 = vmin.f32 %v2866_v18, 1.0  ;;  %v8809_v46 = vmin.f32 %v2869_v53, 1.0  ;;  %v7303_v33 = vpop.f32.mrb[120].mxu1 }
 0x267   : > { %v8811_v59 = vmin.f32 %v2867_v24, 1.0  ;;  %v2591_v54 = vpop.f32.mrb[121].mxu1  ;;  %v3576_v53 = vmul.f32 %v8405_v31, %v8405_v31 }
 0x268   : > { %v3311_v19 = vadd.f32 %v3310_v26, %v8358_v4  ;;  %v3827_v0 = vadd.f32 %v3826_v23, %v3572_v60  ;;  %v3575_v4 = vmul.f32 %v8401_v12, %v8401_v12  ;;  %v6761_v7 = vpack.c.bf16 %v8809_v46, %v8805_v55  ;;  %v7304_v22 = vpop.f32.mrb[122].mxu1 }
 0x269   : > { %v6756_v60 = vpack.c.bf16 %v8811_v59, %v8807_v62  ;;  %v2594_v24 = vpop.f32.mrb[123].mxu1 }
 0x26a   : > { %v3312_v52 = vadd.f32 %v3311_v19, %v8362_v27  ;;  %v3828_v20 = vadd.f32 %v3827_v0, %v3573_v2  ;;  %6905 = vst [vmem:[%s7857_s26 + $0x3d8] sm:$0xff] %v6761_v7   ;;  %v2872_v2 = vmax.f32 %v7303_v33, 0.0  ;;  %v2870_v19 = vmax.f32 %v2591_v54, 0.0 }
 0x26b   : > { %6904 = vst [vmem:[%s7857_s26 + $0x3d0] sm:$0xff] %v6756_v60   ;;  %v2873_v0 = vmax.f32 %v7304_v22, 0.0  ;;  %v3578_v33 = vmul.f32 %v8403_v36, %v8403_v36 }
 0x26c   : > { %v3829_v23 = vadd.f32 %v3828_v20, %v3574_v63  ;;  %v3313_v26 = vadd.f32 %v3312_v52, %v8401_v12  ;;  %v2871_v63 = vmax.f32 %v2594_v24, 0.0  ;;  %v3577_v12 = vmul.f32 %v8399_v56, %v8399_v56 }
 0x26d   : > { %v8831_v7 = vmin.f32 %v2872_v2, 1.0 }
 0x26e   : > { %v3830_v18 = vadd.f32 %v3829_v23, %v3575_v4  ;;  %v3314_v27 = vadd.f32 %v3313_v26, %v8405_v31  ;;  %v8833_v4 = vmin.f32 %v2870_v19, 1.0  ;;  %v8835_v23 = vmin.f32 %v2873_v0, 1.0  ;;  %v7307_v22 = vpop.f32.mrb[124].mxu1 }
 0x26f   : > { %v8837_v31 = vmin.f32 %v2871_v63, 1.0  ;;  %v2607_v24 = vpop.f32.mrb[125].mxu1  ;;  %v3580_v0 = vmul.f32 %v8444_v37, %v8444_v37 }
 0x270   : > { %v3315_v52 = vadd.f32 %v3314_v27, %v8399_v56  ;;  %v3831_v20 = vadd.f32 %v3830_v18, %v3576_v53  ;;  %v3579_v56 = vmul.f32 %v8425_v28, %v8425_v28  ;;  %v6771_v54 = vpack.c.bf16 %v8835_v23, %v8831_v7  ;;  %v7308_v2 = vpop.f32.mrb[126].mxu1 }
 0x271   : > { %v6766_v53 = vpack.c.bf16 %v8837_v31, %v8833_v4  ;;  %v2610_v63 = vpop.f32.mrb[127].mxu1 }
 0x272   : > { %v3316_v26 = vadd.f32 %v3315_v52, %v8403_v36  ;;  %v3832_v60 = vadd.f32 %v3831_v20, %v3577_v12  ;;  %6907 = vst [vmem:[%s7857_s26 + $0x3e8] sm:$0xff] %v6771_v54   ;;  %v2876_v12 = vmax.f32 %v7307_v22, 0.0  ;;  %v2874_v52 = vmax.f32 %v2607_v24, 0.0 }
 0x273   : > { %6906 = vst [vmem:[%s7857_s26 + $0x3e0] sm:$0xff] %v6766_v53   ;;  %v2877_v20 = vmax.f32 %v7308_v2, 0.0  ;;  %v3582_v22 = vmul.f32 %v8442_v13, %v8442_v13  ;;  %v3583_v24 = vmul.f32 %v8448_v5, %v8448_v5 }
 0x274   : > { %v3833_v18 = vadd.f32 %v3832_v60, %v3578_v33  ;;  %v3317_v27 = vadd.f32 %v3316_v26, %v8425_v28  ;;  %v2875_v33 = vmax.f32 %v2610_v63, 0.0  ;;  %v3581_v28 = vmul.f32 %v8423_v9, %v8423_v9 }
 0x275   : > { %v8857_v54 = vmin.f32 %v2876_v12, 1.0  ;;  %v3585_v12 = vmul.f32 %v8446_v16, %v8446_v16 }
 0x276   : > { %v3834_v19 = vadd.f32 %v3833_v18, %v3579_v56  ;;  %v3318_v36 = vadd.f32 %v3317_v27, %v8444_v37  ;;  %v8859_v56 = vmin.f32 %v2874_v52, 1.0  ;;  %v8861_v18 = vmin.f32 %v2877_v20, 1.0 }
 0x277   : > { %v8863_v37 = vmin.f32 %v2875_v33, 1.0 }
 0x278   : > { %v3319_v26 = vadd.f32 %v3318_v36, %v8423_v9  ;;  %v3835_v60 = vadd.f32 %v3834_v19, %v3580_v0  ;;  %v6781_v9 = vpack.c.bf16 %v8861_v18, %v8857_v54 }
 0x279   : > { %v6776_v36 = vpack.c.bf16 %v8863_v37, %v8859_v56 }
 0x27a   : > { %v3320_v27 = vadd.f32 %v3319_v26, %v8442_v13  ;;  %v3836_v53 = vadd.f32 %v3835_v60, %v3581_v28  ;;  %6909 = vst [vmem:[%s7857_s26 + $0x3f8] sm:$0xff] %v6781_v9   ;;  %v3584_v13 = vmul.f32 %v8453_v49, %v8453_v49  ;;  %v3587_v26 = vmul.f32 %v8490_v35, %v8490_v35 }
 0x27b   : > { %6908 = vst [vmem:[%s7857_s26 + $0x3f0] sm:$0xff] %v6776_v36  }
 0x27c   : > { %v3837_v2 = vadd.f32 %v3836_v53, %v3582_v22  ;;  %v3321_v19 = vadd.f32 %v3320_v27, %v8448_v5  ;;  %v3586_v5 = vmul.f32 %v8451_v57, %v8451_v57  ;;  %v3588_v53 = vmul.f32 %v8496_v11, %v8496_v11 }
 0x27e   : > { %v3838_v0 = vadd.f32 %v3837_v2, %v3583_v24  ;;  %v3322_v63 = vadd.f32 %v3321_v19, %v8453_v49 }
 0x280   : > { %v3323_v52 = vadd.f32 %v3322_v63, %v8446_v16  ;;  %v3839_v20 = vadd.f32 %v3838_v0, %v3584_v13  ;;  %v3589_v16 = vmul.f32 %v8488_v3, %v8488_v3  ;;  %v3592_v13 = vmul.f32 %v8527_v34, %v8527_v34 }
 0x282   : > { %v3324_v33 = vadd.f32 %v3323_v52, %v8451_v57  ;;  %v3840_v28 = vadd.f32 %v3839_v20, %v3585_v12  ;;  %v3590_v57 = vmul.f32 %v8494_v51, %v8494_v51 }
 0x284   : > { %v3841_v60 = vadd.f32 %v3840_v28, %v3586_v5  ;;  %v3325_v22 = vadd.f32 %v3324_v33, %v8490_v35  ;;  %v3591_v35 = vmul.f32 %v8514_v48, %v8514_v48 }
 0x286   : > { %v3842_v49 = vadd.f32 %v3841_v60, %v3587_v26  ;;  %v3326_v27 = vadd.f32 %v3325_v22, %v8496_v11  ;;  %v3596_v60 = vmul.f32 %v8536_v44, %v8536_v44 }
 0x288   : > { %v3327_v24 = vadd.f32 %v3326_v27, %v8488_v3  ;;  %v3843_v9 = vadd.f32 %v3842_v49, %v3588_v53  ;;  %v3593_v3 = vmul.f32 %v8512_v45, %v8512_v45  ;;  %v9307_v53 = vld [vmem:[#allocation32_spill] sm:$0xff] }
 0x28a   : > { %v3844_v2 = vadd.f32 %v3843_v9, %v3589_v16  ;;  %v3328_v19 = vadd.f32 %v3327_v24, %v8494_v51  ;;  %v3594_v51 = vmul.f32 %v8525_v58, %v8525_v58 }
 0x28c   : > { %v3329_v36 = vadd.f32 %v3328_v19, %v8514_v48  ;;  %v3845_v0 = vadd.f32 %v3844_v2, %v3590_v57  ;;  %v3595_v48 = vmul.f32 %v8531_v14, %v8531_v14 }
 0x28e   : > { %v3846_v63 = vadd.f32 %v3845_v0, %v3591_v35  ;;  %v3330_v11 = vadd.f32 %v3329_v36, %v8527_v34  ;;  %v9309_v36 = vld [vmem:[#allocation33_spill] sm:$0xff] }
 0x28f   : > { %v3601_v0 = vmul.f32 %v9309_v36, %v9309_v36 }
 0x290   : > { %v3331_v12 = vadd.f32 %v3330_v11, %v8512_v45  ;;  %v3847_v52 = vadd.f32 %v3846_v63, %v3592_v13  ;;  %v9306_v45 = vld [vmem:[#allocation31_spill] sm:$0xff]  ;;  %v9310_v13 = vld [vmem:[#allocation34_spill] sm:$0xff] }
 0x291   : > { %v3597_v22 = vmul.f32 %v9306_v45, %v9306_v45 }
 0x292   : > { %v3848_v20 = vadd.f32 %v3847_v52, %v3593_v3  ;;  %v3332_v5 = vadd.f32 %v3331_v12, %v8525_v58  ;;  %v3598_v58 = vmul.f32 %v9307_v53, %v9307_v53  ;;  %v3602_v3 = vmul.f32 %v9310_v13, %v9310_v13 }
 0x294   : > { %v3333_v33 = vadd.f32 %v3332_v5, %v8531_v14  ;;  %v3849_v28 = vadd.f32 %v3848_v20, %v3594_v51  ;;  %v3599_v14 = vmul.f32 %v8565_v30, %v8565_v30 }
 0x296   : > { %v3850_v26 = vadd.f32 %v3849_v28, %v3595_v48  ;;  %v3334_v34 = vadd.f32 %v3333_v33, %v8536_v44  ;;  %v9308_v44 = vld [vmem:[#allocation35_spill] sm:$0xff]  ;;  %v3604_v33 = vmul.f32 %v8594_v39, %v8594_v39  ;;  %v3605_v28 = vmul.f32 %v8585_v25, %v8585_v25 }
 0x297   : > { %v3600_v35 = vmul.f32 %v9308_v44, %v9308_v44 }
 0x298   : > { %v3335_v49 = vadd.f32 %v3334_v34, %v9306_v45  ;;  %v3851_v27 = vadd.f32 %v3850_v26, %v3596_v60  ;;  %v3606_v60 = vmul.f32 %v8592_v6, %v8592_v6 }
 0x29a   : > { %v3852_v16 = vadd.f32 %v3851_v27, %v3597_v22  ;;  %v3336_v24 = vadd.f32 %v3335_v49, %v9307_v53 }
 0x29c   : > { %v3337_v9 = vadd.f32 %v3336_v24, %v8565_v30  ;;  %v3853_v57 = vadd.f32 %v3852_v16, %v3598_v58  ;;  %v3603_v30 = vmul.f32 %v8587_v29, %v8587_v29  ;;  %v3608_v58 = vmul.f32 %v8603_v61, %v8603_v61 }
 0x29e   : > { %v3854_v2 = vadd.f32 %v3853_v57, %v3599_v14  ;;  %v3338_v19 = vadd.f32 %v3337_v9, %v9308_v44 }
 0x2a0   : > { %v3339_v63 = vadd.f32 %v3338_v19, %v9309_v36  ;;  %v3855_v11 = vadd.f32 %v3854_v2, %v3600_v35  ;;  %v3612_v19 = vmul.f32 %v8634_v1, %v8634_v1 }
 0x2a2   : > { %v3856_v12 = vadd.f32 %v3855_v11, %v3601_v0  ;;  %v3340_v52 = vadd.f32 %v3339_v63, %v9310_v13  ;;  %v9311_v0 = vld [vmem:[#allocation6_spill] sm:$0xff] }
 0x2a4   : > { %v3341_v51 = vadd.f32 %v3340_v52, %v8587_v29  ;;  %v3857_v20 = vadd.f32 %v3856_v12, %v3602_v3  ;;  %v3607_v29 = vmul.f32 %v8598_v21, %v8598_v21 }
 0x2a6   : > { %v3858_v5 = vadd.f32 %v3857_v20, %v3603_v30  ;;  %v3342_v48 = vadd.f32 %v3341_v51, %v8594_v39 }
 0x2a8   : > { %v3343_v26 = vadd.f32 %v3342_v48, %v8585_v25  ;;  %v3859_v34 = vadd.f32 %v3858_v5, %v3604_v33  ;;  %v3609_v25 = vmul.f32 %v8596_v38, %v8596_v38  ;;  %v9315_v33 = vld [vmem:[#allocation10_spill] sm:$0xff] }
 0x2aa   : > { %v3860_v45 = vadd.f32 %v3859_v34, %v3605_v28  ;;  %v3344_v22 = vadd.f32 %v3343_v26, %v8592_v6  ;;  %v3610_v6 = vmul.f32 %v8601_v42, %v8601_v42  ;;  %v3618_v28 = vmul.f32 %v9315_v33, %v9315_v33 }
 0x2ac   : > { %v3345_v49 = vadd.f32 %v3344_v22, %v8598_v21  ;;  %v3861_v27 = vadd.f32 %v3860_v45, %v3606_v60  ;;  %v3611_v21 = vmul.f32 %v8630_v8, %v8630_v8  ;;  %v9316_v60 = vld [vmem:[#allocation12_spill] sm:$0xff] }
 0x2ad   : > { %v3619_v45 = vmul.f32 %v9316_v60, %v9316_v60 }
 0x2ae   : > { %v3862_v53 = vadd.f32 %v3861_v27, %v3607_v29  ;;  %v3346_v39 = vadd.f32 %v3345_v49, %v8603_v61  ;;  %v9317_v27 = vld [vmem:[#allocation11_spill] sm:$0xff] }
 0x2b0   : > { %v3347_v16 = vadd.f32 %v3346_v39, %v8596_v38  ;;  %v3863_v24 = vadd.f32 %v3862_v53, %v3608_v58  ;;  %v3613_v38 = vmul.f32 %v8628_v47, %v8628_v47  ;;  %v3620_v39 = vmul.f32 %v9317_v27, %v9317_v27  ;;  %v9318_v58 = vld [vmem:[#allocation8_spill] sm:$0xff] }
 0x2b2   : > { %v3864_v14 = vadd.f32 %v3863_v24, %v3609_v25  ;;  %v3348_v9 = vadd.f32 %v3347_v16, %v8601_v42  ;;  %v3614_v42 = vmul.f32 %v9311_v0, %v9311_v0  ;;  %v3621_v25 = vmul.f32 %v9318_v58, %v9318_v58 }
 0x2b4   : > { %v3349_v57 = vadd.f32 %v3348_v9, %v8630_v8  ;;  %v3865_v2 = vadd.f32 %v3864_v14, %v3610_v6  ;;  %v9312_v8 = vld [vmem:[#allocation9_spill] sm:$0xff]  ;;  %v9319_v6 = vld [vmem:[#allocation14_spill] sm:$0xff] }
 0x2b5   : > { %v3615_v13 = vmul.f32 %v9312_v8, %v9312_v8  ;;  %v3622_v14 = vmul.f32 %v9319_v6, %v9319_v6 }
 0x2b6   : > { %v3866_v44 = vadd.f32 %v3865_v2, %v3611_v21  ;;  %v3350_v61 = vadd.f32 %v3349_v57, %v8634_v1  ;;  %v9313_v1 = vld [vmem:[#allocation7_spill] sm:$0xff]  ;;  %v9320_v57 = vld [vmem:[#allocation16_spill] sm:$0xff] }
 0x2b7   : > { %v3616_v51 = vmul.f32 %v9313_v1, %v9313_v1  ;;  %v3623_v2 = vmul.f32 %v9320_v57, %v9320_v57 }
 0x2b8   : > { %v3351_v35 = vadd.f32 %v3350_v61, %v8628_v47  ;;  %v3867_v36 = vadd.f32 %v3866_v44, %v3612_v19  ;;  %v9314_v47 = vld [vmem:[#allocation5_spill] sm:$0xff] }
 0x2b9   : > { %v3617_v20 = vmul.f32 %v9314_v47, %v9314_v47 }
 0x2ba   : > { %v3868_v63 = vadd.f32 %v3867_v36, %v3613_v38  ;;  %v3352_v11 = vadd.f32 %v3351_v35, %v9311_v0  ;;  %v9321_v38 = vld [vmem:[#allocation15_spill] sm:$0xff]  ;;  %v9322_v0 = vld [vmem:[#allocation13_spill] sm:$0xff] }
 0x2bb   : > { %v3624_v36 = vmul.f32 %v9321_v38, %v9321_v38 }
 0x2bc   : > { %v3353_v3 = vadd.f32 %v3352_v11, %v9312_v8  ;;  %v3869_v12 = vadd.f32 %v3868_v63, %v3614_v42  ;;  %v3625_v42 = vmul.f32 %v9322_v0, %v9322_v0  ;;  %v9323_v8 = vld [vmem:[#allocation18_spill] sm:$0xff] }
 0x2be   : > { %v3870_v52 = vadd.f32 %v3869_v12, %v3615_v13  ;;  %v3354_v30 = vadd.f32 %v3353_v3, %v9313_v1  ;;  %v3626_v13 = vmul.f32 %v9323_v8, %v9323_v8 }
 0x2c0   : > { %v3355_v5 = vadd.f32 %v3354_v30, %v9314_v47  ;;  %v3871_v48 = vadd.f32 %v3870_v52, %v3616_v51  ;;  %v3627_v52 = vmul.f32 %v8729_v10, %v8729_v10  ;;  %v9324_v47 = vld [vmem:[#allocation22_spill] sm:$0xff] }
 0x2c2   : > { %v3872_v26 = vadd.f32 %v3871_v48, %v3617_v20  ;;  %v3356_v34 = vadd.f32 %v3355_v5, %v9315_v33  ;;  %v3628_v5 = vmul.f32 %v9324_v47, %v9324_v47  ;;  %v9325_v48 = vld [vmem:[#allocation17_spill] sm:$0xff] }
 0x2c3   : > { %v3629_v33 = vmul.f32 %v9325_v48, %v9325_v48 }
 0x2c4   : > { %v3357_v22 = vadd.f32 %v3356_v34, %v9316_v60  ;;  %v3873_v29 = vadd.f32 %v3872_v26, %v3618_v28  ;;  %v9326_v34 = vld [vmem:[#allocation21_spill] sm:$0xff] }
 0x2c5   : > { %v3630_v60 = vmul.f32 %v9326_v34, %v9326_v34 }
 0x2c6   : > { %v3874_v49 = vadd.f32 %v3873_v29, %v3619_v45  ;;  %v3358_v53 = vadd.f32 %v3357_v22, %v9317_v27 }
 0x2c8   : > { %v3359_v16 = vadd.f32 %v3358_v53, %v9318_v58  ;;  %v3875_v24 = vadd.f32 %v3874_v49, %v3620_v39  ;;  %v3632_v39 = vmul.f32 %v8759_v17, %v8759_v17  ;;  %v3633_v58 = vmul.f32 %v8753_v41, %v8753_v41 }
 0x2ca   : > { %v3876_v9 = vadd.f32 %v3875_v24, %v3621_v25  ;;  %v3360_v21 = vadd.f32 %v3359_v16, %v9319_v6  ;;  %v9327_v24 = vld [vmem:[#allocation19_spill] sm:$0xff] }
 0x2cb   : > { %v3634_v6 = vmul.f32 %v9327_v24, %v9327_v24 }
 0x2cc   : > { %v3361_v44 = vadd.f32 %v3360_v21, %v9320_v57  ;;  %v3877_v61 = vadd.f32 %v3876_v9, %v3622_v14 }
 0x2ce   : > { %v3878_v19 = vadd.f32 %v3877_v61, %v3623_v2  ;;  %v3362_v35 = vadd.f32 %v3361_v44, %v9321_v38  ;;  %v3636_v44 = vmul.f32 %v8785_v40, %v8785_v40  ;;  %v3638_v38 = vmul.f32 %v8783_v15, %v8783_v15 }
 0x2d0   : > { %v3363_v63 = vadd.f32 %v3362_v35, %v9322_v0  ;;  %v3879_v11 = vadd.f32 %v3878_v19, %v3624_v36 }
 0x2d2   : > { %v3880_v3 = vadd.f32 %v3879_v11, %v3625_v42  ;;  %v3364_v12 = vadd.f32 %v3363_v63, %v9323_v8  ;;  %v3640_v11 = vmul.f32 %v8811_v59, %v8811_v59 }
 0x2d4   : > { %v3365_v1 = vadd.f32 %v3364_v12, %v8729_v10  ;;  %v3881_v30 = vadd.f32 %v3880_v3, %v3626_v13  ;;  %v3631_v10 = vmul.f32 %v8755_v50, %v8755_v50 }
 0x2d6   : > { %v3882_v51 = vadd.f32 %v3881_v30, %v3627_v52  ;;  %v3366_v20 = vadd.f32 %v3365_v1, %v9324_v47 }
 0x2d8   : > { %v3367_v28 = vadd.f32 %v3366_v20, %v9325_v48  ;;  %v3883_v26 = vadd.f32 %v3882_v51, %v3628_v5  ;;  %v3644_v51 = vmul.f32 %v8837_v31, %v8837_v31 }
 0x2da   : > { %v3884_v45 = vadd.f32 %v3883_v26, %v3629_v33  ;;  %v3368_v22 = vadd.f32 %v3367_v28, %v9326_v34  ;;  %v3649_v34 = vmul.f32 %v8857_v54, %v8857_v54 }
 0x2dc   : > { %v3369_v29 = vadd.f32 %v3368_v22, %v8755_v50  ;;  %v3885_v49 = vadd.f32 %v3884_v45, %v3630_v60  ;;  %v3635_v50 = vmul.f32 %v8781_v32, %v8781_v32 }
 0x2de   : > { %v3886_v27 = vadd.f32 %v3885_v49, %v3631_v10  ;;  %v3370_v53 = vadd.f32 %v3369_v29, %v8759_v17 }
 0x2e0   : > { %v3371_v25 = vadd.f32 %v3370_v53, %v8753_v41  ;;  %v3887_v16 = vadd.f32 %v3886_v27, %v3632_v39  ;;  %v3637_v41 = vmul.f32 %v8779_v43, %v8779_v43  ;;  %v3912_v53 = vlaneseq }
 0x2e2   : > { %v3888_v14 = vadd.f32 %v3887_v16, %v3633_v58  ;;  %v3372_v9 = vadd.f32 %v3371_v25, %v9327_v24 }
 0x2e4   : > { %v3373_v21 = vadd.f32 %v3372_v9, %v8781_v32  ;;  %v3889_v57 = vadd.f32 %v3888_v14, %v3634_v6  ;;  %v3639_v32 = vmul.f32 %v8807_v62, %v8807_v62 }
 0x2e6   : > { %v3890_v2 = vadd.f32 %v3889_v57, %v3635_v50  ;;  %v3374_v17 = vadd.f32 %v3373_v21, %v8785_v40 }
 0x2e8   : > { %v3375_v61 = vadd.f32 %v3374_v17, %v8779_v43  ;;  %v3891_v19 = vadd.f32 %v3890_v2, %v3636_v44  ;;  %v3641_v43 = vmul.f32 %v8805_v55, %v8805_v55 }
 0x2ea   : > { %v3892_v35 = vadd.f32 %v3891_v19, %v3637_v41  ;;  %v3376_v36 = vadd.f32 %v3375_v61, %v8783_v15  ;;  %v3642_v15 = vmul.f32 %v8809_v46, %v8809_v46 }
 0x2ec   : > { %v3377_v0 = vadd.f32 %v3376_v36, %v8807_v62  ;;  %v3893_v42 = vadd.f32 %v3892_v35, %v3638_v38  ;;  %v3643_v62 = vmul.f32 %v8833_v4, %v8833_v4 }
 0x2ee   : > { %v3894_v63 = vadd.f32 %v3893_v42, %v3639_v32  ;;  %v3378_v40 = vadd.f32 %v3377_v0, %v8811_v59 }
 0x2f0   : > { %v3379_v8 = vadd.f32 %v3378_v40, %v8805_v55  ;;  %v3895_v13 = vadd.f32 %v3894_v63, %v3640_v11  ;;  %v3645_v55 = vmul.f32 %v8831_v7, %v8831_v7 }
 0x2f2   : > { %v3896_v3 = vadd.f32 %v3895_v13, %v3641_v43  ;;  %v3380_v12 = vadd.f32 %v3379_v8, %v8809_v46  ;;  %v3646_v46 = vmul.f32 %v8835_v23, %v8835_v23 }
 0x2f4   : > { %v3381_v52 = vadd.f32 %v3380_v12, %v8833_v4  ;;  %v3897_v1 = vadd.f32 %v3896_v3, %v3642_v15  ;;  %v3647_v4 = vmul.f32 %v8859_v56, %v8859_v56 }
 0x2f6   : > { %v3898_v30 = vadd.f32 %v3897_v1, %v3643_v62  ;;  %v3382_v59 = vadd.f32 %v3381_v52, %v8837_v31 }
 0x2f8   : > { %v3383_v47 = vadd.f32 %v3382_v59, %v8831_v7  ;;  %v3899_v20 = vadd.f32 %v3898_v30, %v3644_v51  ;;  %v3648_v7 = vmul.f32 %v8863_v37, %v8863_v37 }
 0x2fa   : > { %v3900_v5 = vadd.f32 %v3899_v20, %v3645_v55  ;;  %v3384_v48 = vadd.f32 %v3383_v47, %v8835_v23  ;;  %v3650_v23 = vmul.f32 %v8861_v18, %v8861_v18 }
 0x2fc   : > { %v3385_v33 = vadd.f32 %v3384_v48, %v8859_v56  ;;  %v3901_v28 = vadd.f32 %v3900_v5, %v3646_v46 }
 0x2fe   : > { %v3902_v31 = vadd.f32 %v3901_v28, %v3647_v4  ;;  %v3386_v26 = vadd.f32 %v3385_v33, %v8863_v37 }
 0x300   : > { %v3387_v60 = vadd.f32 %v3386_v26, %v8857_v54  ;;  %v3903_v45 = vadd.f32 %v3902_v31, %v3648_v7  ;;  %v3913_v54 = vshrl.u32 %v3912_v53, 7 }
 0x302   : > { %v3388_v22 = vadd.f32 %v3387_v60, %v8861_v18  ;;  %v3904_v10 = vadd.f32 %v3903_v45, %v3649_v34  ;;  %vm3915_vm2 = vcmp.eq.s32.totalorder %v3913_v54, 1  ;;  %vm3914_vm3 = vcmp.eq.s32.totalorder %v3913_v54, 0 }
 0x304   : > { %v3389_v56 = vrot.slane %v3388_v22, 4  ;;  %v3905_v29 = vadd.f32 %v3904_v10, %v3650_v23 }
 0x306   : > { %v3390_v49 = vadd.f32 %v3389_v56, %v3388_v22  ;;  %v3906_v27 = vrot.slane %v3905_v29, 4 }
 0x308   : > { %v3391_v37 = vrot.slane %v3390_v49, 2  ;;  %v3907_v39 = vadd.f32 %v3906_v27, %v3905_v29 }
 0x30a   : > { %v3392_v58 = vadd.f32 %v3391_v37, %v3390_v49  ;;  %v3908_v25 = vrot.slane %v3907_v39, 2 }
 0x30c   : > { %v3909_v16 = vadd.f32 %v3908_v25, %v3907_v39  ;;  %v3393_v24 = vrot.slane %v3392_v58, 1 }
 0x30e   : > { %v3910_v6 = vrot.slane %v3909_v16, 1  ;;  %v3394_v14 = vadd.f32 %v3393_v24, %v3392_v58 }
 0x310   : > { %v3911_v18 = vadd.f32 %v3910_v6, %v3909_v16 }
 0x312   : > { %v3916_v9 = vsel %vm3915_vm2, %v3911_v18, 0.0 }
 0x313   : > { %v3917_v50 = vsel %vm3914_vm3, %v3394_v14, %v3916_v9 }
 0x314   : > { %3918 = vst [vmem:[%s217_s30] sm:$0xff] %v3917_v50 }
 0x315   : > { %7522 = shalt.err (!%p7519_p5)
}
 0x316   : > { %s7523_s18 = scalar_lea.hbm %s9083_s7, 128  ;;  %s7527_s23 = scalar_lea.hbm %s9133_s3, 512 }
 0x317   : > { %p7524_p6 = scmp.ne.s32.totalorder %s9083_s7, %s7523_s18  ;;  %p7528_p10 = scmp.lt.u32.totalorder %s9083_s7, %s9133_s3 }
 0x318   : > { %p7529_p11 = scmp.lt.u32.totalorder %s7527_s23, %s7523_s18  ;;  %p7531_p13 = scmp.lt.u32.totalorder %s7523_s18, %s9083_s7 }
 0x319   : > { %p7525_p7 = pnand %p7524_p6, %p7650_p4 }
 0x31a   : > { %p7530_p12 = por %p7529_p11, %p7528_p10 }
 0x31b   : > { %p7526_p9 = pneg %p7525_p7 }
 0x31c   : > { %p7532_p0 = por %p7531_p13, %p7530_p12 }
 0x31e   : > { %p7533_p1 = pnand %p7532_p0, %p7526_p9 }
 0x320   : > { %7536 = shalt.err (!%p7533_p1)
}
 0x321   : > { %7321 = dma.vmem_to_hbm [thread:$0]  (%p7650_p4), %s9085_s4, 128, %s9083_s7, %s5209_s8  }
 0x322 PF: > { %p7327_p2 = scmp.ge.s32.totalorder %s7587_s17, 2  ;;  %s5252_s28 = sand.u32 1, %s7567_s12  }
 0x323   : > { %s5253_s29 = scalar_lea.sflag [#allocation3], %s5252_s28 }
 0x324   : > { %p7324_p3 = pnand %p7327_p2, %p7657_p8 }
 0x326   : > { %7562 = dma.done.wait (!%p7324_p3), %s5253_s29, 128  }
 0x327   : > { %7564 = vsyncadd (!%p7324_p3), %s5253_s29, 4294967168  ;;  %s17_s17 = sadd.s32 1, %s7587_s17   ;;  %s9328_s12 = smov %s7571_s13 }
 0x328   : > { %p14_p5 = scmp.ge.s32.totalorder %s17_s17, 6   ;;  %s9329_s13 = smov %s7575_s14 }
 0x329   : > { %s9330_s14 = smov %s7663_s25  ;;  %s9331_s15 = smov %s7583_s16 }
 0x32a   : > { %s9332_s16 = smov %s9334_s20  ;;  %16 = sbr.rel (!%p14_p5) target bundleno = 4 (0x4), region = 78 }
 0x331   :  { %5258 = vsyncpa [#allocation3], 1 }
 0x332   :  { %5260 = vsyncpa [#allocation3 + $0x1], 1 }

</bundles_post_ra>
